<compile_context>
chip_gen: v5e
topology: v5e:2x2
jax: 0.10.0
libtpu: 0.0.40
codegen_flags: <defaults>
</compile_context>

<pallas_src>
import functools
import math

import jax
import jax.numpy as jnp
from jax import lax
from jax.experimental import pallas as pl
from jax.experimental.pallas import tpu as pltpu

MXU_DTYPE = jnp.bfloat16          # MXU-native on v5e/v6e/v7x; accumulation stays f32
BN_EPS = 1e-5
VMEM_LIMIT = 48 * 1024 * 1024     # safe on v7x's 64 MiB; comfortable on v5e/v6e


def _pick_tile(dim, candidates):
    for c in candidates:
        if c <= dim and dim % c == 0:
            return c
    return dim


def _pick_rows(m):
    # BN-stats row tile: largest divisor of m <= 8192 (decoupled from H*W).
    for cand in (8192, 4096, 2048, 1024, 512, 256, 128, 64, 32, 16, 8):
        if cand <= m and m % cand == 0:
            return cand
    return m


# --------------------------- BN statistics kernel ----------------------------

def _bn_stats_kernel(x_ref, g_ref, b_ref, scale_ref, shift_ref, s_acc, ss_acc,
                     *, total_rows):
    i = pl.program_id(0)

    @pl.when(i == 0)
    def _():
        s_acc[...] = jnp.zeros_like(s_acc)
        ss_acc[...] = jnp.zeros_like(ss_acc)

    x = x_ref[...].astype(jnp.float32)          # inputs may be bf16; accumulate in f32
    s_acc[...] += jnp.sum(x, axis=0, keepdims=True)
    ss_acc[...] += jnp.sum(x * x, axis=0, keepdims=True)

    @pl.when(i == pl.num_programs(0) - 1)
    def _():
        inv_n = 1.0 / float(total_rows)
        mean = s_acc[...] * inv_n
        var = ss_acc[...] * inv_n - mean * mean          # biased variance (training BN)
        inv = lax.rsqrt(var + BN_EPS)
        scale = g_ref[...] * inv
        scale_ref[...] = scale
        shift_ref[...] = b_ref[...] - mean * scale


def bn_scale_shift(x_flat, gamma, beta):
    """Per-channel (scale, shift) so training-mode BN is y = x*scale + shift."""
    m, c = x_flat.shape
    rows = _pick_rows(m)
    kern = functools.partial(_bn_stats_kernel, total_rows=m)
    scale, shift = pl.pallas_call(
        kern,
        out_shape=(jax.ShapeDtypeStruct((1, c), jnp.float32),
                   jax.ShapeDtypeStruct((1, c), jnp.float32)),
        grid_spec=pltpu.PrefetchScalarGridSpec(
            num_scalar_prefetch=0,
            grid=(m // rows,),
            in_specs=[pl.BlockSpec((rows, c), lambda i: (i, 0)),
                      pl.BlockSpec((1, c), lambda i: (0, 0)),
                      pl.BlockSpec((1, c), lambda i: (0, 0))],
            out_specs=[pl.BlockSpec((1, c), lambda i: (0, 0)),
                       pl.BlockSpec((1, c), lambda i: (0, 0))],
            scratch_shapes=[pltpu.VMEM((1, c), jnp.float32),
                            pltpu.VMEM((1, c), jnp.float32)]),
        compiler_params=pltpu.CompilerParams(
            dimension_semantics=("arbitrary",),
            vmem_limit_bytes=VMEM_LIMIT),
    )(x_flat, gamma.reshape(1, c), beta.reshape(1, c))
    return scale, shift


# ------------- fused BN+ReLU -> stride-1 KhxKw conv (+residual) kernel -------

def _bnrelu_conv_kernel(x_ref, scale_ref, shift_ref, w_ref, *rest,
                        kh, kw, pad_top, pad_left, ho, wo, has_residual):
    if has_residual:
        res_ref, o_ref, col_buf, acc_ref = rest
    else:
        o_ref, col_buf, acc_ref = rest

    k = pl.program_id(2)

    @pl.when(k == 0)
    def _():
        acc_ref[...] = jnp.zeros_like(acc_ref)

    hin, win = x_ref.shape[1], x_ref.shape[2]
    hp = ho + kh - 1
    ck = col_buf.shape[-1]

    # Folded BN + ReLU prologue (f32 math), stored bf16 for the MXU.
    a = jnp.maximum(x_ref[0].astype(jnp.float32) * scale_ref[...] + shift_ref[...], 0.0)
    a = a.astype(col_buf.dtype)

    # Build kw column-shifted, zero-padded copies of the activation (one per
    # horizontal tap).  Only the thin border strips are zeroed; the interior is
    # written directly from `a` with the appropriate column shift.  Afterwards
    # every tap is a contiguous dim-1 slice -> its reshape is a view.
    for tx in range(kw):
        d = tx - pad_left
        src_lo = max(0, d)
        src_hi = min(win, wo + d)
        dst_lo = src_lo - d
        dst_hi = src_hi - d
        if pad_top > 0:
            col_buf[tx, 0:pad_top, :, :] = jnp.zeros((pad_top, wo, ck), col_buf.dtype)
        if pad_top + hin < hp:
            col_buf[tx, pad_top + hin:hp, :, :] = jnp.zeros(
                (hp - pad_top - hin, wo, ck), col_buf.dtype)
        if dst_lo > 0:
            col_buf[tx, pad_top:pad_top + hin, 0:dst_lo, :] = jnp.zeros(
                (hin, dst_lo, ck), col_buf.dtype)
        if dst_hi < wo:
            col_buf[tx, pad_top:pad_top + hin, dst_hi:wo, :] = jnp.zeros(
                (hin, wo - dst_hi, ck), col_buf.dtype)
        col_buf[tx, pad_top:pad_top + hin, dst_lo:dst_hi, :] = a[:, src_lo:src_hi, :]

    # Shift-and-accumulate over the kh*kw taps (unrolled, all on the MXU).
    for t in range(kh * kw):
        ty, tx = divmod(t, kw)
        a_tap = col_buf[tx, ty:ty + ho, :, :].reshape(ho * wo, ck)
        acc_ref[...] += jnp.dot(a_tap, w_ref[t], preferred_element_type=jnp.float32)

    @pl.when(k == pl.num_programs(2) - 1)
    def _():
        out = acc_ref[...]
        if has_residual:
            out = out + res_ref[0].astype(jnp.float32)
        o_ref[0] = out.astype(o_ref.dtype)


def bnrelu_conv(x_eff, scale_eff, shift_eff, w_taps, *, kh, kw, pad_top, pad_left,
                ho, wo, residual=None, out_dtype=jnp.float32):
    """y = stride-1 conv_{kh x kw}( relu(x_eff*scale + shift) )  [+ residual].

    x_eff:    (N, Hin, Win, Ceff)   raw activations (f32 or bf16)
    w_taps:   (kh*kw, Ceff, Cout)   tap-major weights
    residual: (N, ho*wo, Cout) f32 or None (added in the last-K epilogue)
    returns   (N, ho*wo, Cout) out_dtype
    """
    n, hin, win, ceff = x_eff.shape
    cout = w_taps.shape[-1]
    hp = ho + kh - 1
    assert pad_top + hin <= hp

    # Keep tn a multiple of 128 whenever cout allows (lane-dense writeback).
    tn = _pick_tile(cout, (256, 128))
    tk = _pick_tile(ceff, (512, 256, 128))
    grid = (n, cout // tn, ceff // tk)

    kern = functools.partial(_bnrelu_conv_kernel, kh=kh, kw=kw,
                             pad_top=pad_top, pad_left=pad_left, ho=ho, wo=wo,
                             has_residual=residual is not None)

    in_specs = [
        pl.BlockSpec((1, hin, win, tk), lambda i, j, k: (i, 0, 0, k)),
        pl.BlockSpec((1, tk), lambda i, j, k: (0, k)),
        pl.BlockSpec((1, tk), lambda i, j, k: (0, k)),
        pl.BlockSpec((kh * kw, tk, tn), lambda i, j, k: (0, k, j)),
    ]
    args = [x_eff, scale_eff, shift_eff, w_taps.astype(MXU_DTYPE)]
    if residual is not None:
        in_specs.append(pl.BlockSpec((1, ho * wo, tn), lambda i, j, k: (i, 0, j)))
        args.append(residual)

    return pl.pallas_call(
        kern,
        out_shape=jax.ShapeDtypeStruct((n, ho * wo, cout), out_dtype),
        grid_spec=pltpu.PrefetchScalarGridSpec(
            num_scalar_prefetch=0,
            grid=grid,
            in_specs=in_specs,
            out_specs=pl.BlockSpec((1, ho * wo, tn), lambda i, j, k: (i, 0, j)),
            scratch_shapes=[pltpu.VMEM((kw, hp, wo, tk), MXU_DTYPE),
                            pltpu.VMEM((ho * wo, tn), jnp.float32)]),
        compiler_params=pltpu.CompilerParams(
            dimension_semantics=("parallel", "parallel", "arbitrary"),
            vmem_limit_bytes=VMEM_LIMIT),
    )(*args)


# ------------------- tiled matmul (1x1 shortcut convolution) -----------------

def _matmul_kernel(a_ref, b_ref, o_ref, acc_ref):
    k = pl.program_id(2)

    @pl.when(k == 0)
    def _():
        acc_ref[...] = jnp.zeros_like(acc_ref)

    acc_ref[...] += jnp.dot(a_ref[...], b_ref[...],
                            preferred_element_type=jnp.float32)

    @pl.when(k == pl.num_programs(2) - 1)
    def _():
        o_ref[...] = acc_ref[...].astype(o_ref.dtype)


def pallas_matmul(a, b):
    a = a.astype(MXU_DTYPE)
    b = b.astype(MXU_DTYPE)
    m, kdim = a.shape
    _, nd = b.shape
    tm = _pick_tile(m, (256, 128, 64, 32, 16, 8))
    tn = _pick_tile(nd, (256, 128))
    tk = _pick_tile(kdim, (512, 256, 128))
    return pl.pallas_call(
        _matmul_kernel,
        out_shape=jax.ShapeDtypeStruct((m, nd), jnp.float32),
        grid_spec=pltpu.PrefetchScalarGridSpec(
            num_scalar_prefetch=0,
            grid=(m // tm, nd // tn, kdim // tk),
            in_specs=[pl.BlockSpec((tm, tk), lambda i, j, k: (i, k)),
                      pl.BlockSpec((tk, tn), lambda i, j, k: (k, j))],
            out_specs=pl.BlockSpec((tm, tn), lambda i, j, k: (i, j)),
            scratch_shapes=[pltpu.VMEM((tm, tn), jnp.float32)]),
        compiler_params=pltpu.CompilerParams(
            dimension_semantics=("parallel", "parallel", "arbitrary"),
            vmem_limit_bytes=VMEM_LIMIT),
    )(a, b)


# ------------------------- conv weight / input transforms --------------------

def _taps_stride1(w_hwio):
    kh, kw, cin, cout = w_hwio.shape
    return w_hwio.reshape(kh * kw, cin, cout)


def _taps_stride2(w_hwio):
    # Rewrite 3x3 stride-2 as a stride-1 2x2 conv over the space-to-depth input:
    #   W2[ty,tx,(py,px,c),co] = W[2ty+py-1, 2tx+px-1, c, co]  (0 if out of range).
    kh, kw, cin, cout = w_hwio.shape
    assert kh == 3 and kw == 3
    w2 = jnp.zeros((2, 2, 2, 2, cin, cout), jnp.float32)
    for ty in range(2):
        for tx in range(2):
            for py in range(2):
                for px in range(2):
                    dy, dx = 2 * ty + py - 1, 2 * tx + px - 1
                    if 0 <= dy < 3 and 0 <= dx < 3:
                        w2 = w2.at[ty, tx, py, px].set(w_hwio[dy, dx])
    return w2.reshape(4, 4 * cin, cout)


def _space_to_depth2(x_nhwc):
    n, h, w, c = x_nhwc.shape
    assert h % 2 == 0 and w % 2 == 0
    z = x_nhwc.reshape(n, h // 2, 2, w // 2, 2, c)
    z = jnp.transpose(z, (0, 1, 3, 2, 4, 5))          # (n, i, j, py, px, c)
    return z.reshape(n, h // 2, w // 2, 4 * c)


# ------------------------------ block: params / fwd --------------------------

def init_preact_basic_block(key, in_planes, planes, stride=1):
    k1, k2, k3 = jax.random.split(key, 3)

    def conv_init(k, kh, kw, cin, cout):
        # PyTorch nn.Conv2d default init: U(-1/sqrt(fan_in), 1/sqrt(fan_in))
        bound = 1.0 / math.sqrt(cin * kh * kw)
        return jax.random.uniform(k, (kh, kw, cin, cout), jnp.float32, -bound, bound)

    p = {
        "stride": stride, "in_planes": in_planes, "planes": planes,
        "bn1_g": jnp.ones((in_planes,), jnp.float32),
        "bn1_b": jnp.zeros((in_planes,), jnp.float32),
        "conv1_w": conv_init(k1, 3, 3, in_planes, planes),
        "bn2_g": jnp.ones((planes,), jnp.float32),
        "bn2_b": jnp.zeros((planes,), jnp.float32),
        "conv2_w": conv_init(k2, 3, 3, planes, planes),
        "has_shortcut": (stride != 1 or in_planes != planes),
    }
    if p["has_shortcut"]:
        p["shortcut_w"] = conv_init(k3, 1, 1, in_planes, planes)
    return p


def preact_basic_block_forward(p, x_nchw):
    x = jnp.transpose(x_nchw, (0, 2, 3, 1)).astype(jnp.float32)     # NCHW -> NHWC
    n, h, w, c = x.shape
    s = p["stride"]
    planes = p["planes"]
    ho, wo = h // s, w // s

    x_s2d = _space_to_depth2(x) if s == 2 else None

    # Shortcut is taken from the RAW input x (per the reference module).  For
    # stride 2, the 1x1/stride-2 input equals the phase-(0,0) channel slice of
    # the space-to-depth tensor already needed for conv1.
    if p["has_shortcut"]:
        xs = x_s2d[..., :c] if s == 2 else x
        sc = pallas_matmul(xs.reshape(n * ho * wo, c),
                           p["shortcut_w"].reshape(c, planes))
        sc = sc.reshape(n, ho * wo, planes)
    else:
        sc = x.reshape(n, ho * wo, planes)

    # conv1( relu(bn1(x)) ), stride s -- BN+ReLU fused into the conv prologue.
    scale1, shift1 = bn_scale_shift(x.reshape(n * h * w, c), p["bn1_g"], p["bn1_b"])
    if s == 1:
        y1 = bnrelu_conv(x, scale1, shift1, _taps_stride1(p["conv1_w"]),
                         kh=3, kw=3, pad_top=1, pad_left=1, ho=ho, wo=wo,
                         out_dtype=MXU_DTYPE)
    else:
        y1 = bnrelu_conv(x_s2d, jnp.tile(scale1, (1, 4)), jnp.tile(shift1, (1, 4)),
                         _taps_stride2(p["conv1_w"]),
                         kh=2, kw=2, pad_top=1, pad_left=1, ho=ho, wo=wo,
                         out_dtype=MXU_DTYPE)
    y1 = y1.reshape(n, ho, wo, planes)                               # bf16 intermediate

    # conv2( relu(bn2(y1)) ) + shortcut -- residual add fused into the epilogue.
    scale2, shift2 = bn_scale_shift(y1.reshape(n * ho * wo, planes),
                                    p["bn2_g"], p["bn2_b"])
    y2 = bnrelu_conv(y1, scale2, shift2, _taps_stride1(p["conv2_w"]),
                     kh=3, kw=3, pad_top=1, pad_left=1, ho=ho, wo=wo,
                     residual=sc, out_dtype=jnp.float32)
    y2 = y2.reshape(n, ho, wo, planes)

    return jnp.transpose(y2, (0, 3, 1, 2))                           # NHWC -> NCHW


# ------------------------------- pure-JAX reference --------------------------

def _reference_block(p, x_nchw):
    x = jnp.transpose(x_nchw, (0, 2, 3, 1)).astype(jnp.float32)

    def bn_relu(v, g, b):
        mean = jnp.mean(v, axis=(0, 1, 2))
        var = jnp.mean((v - mean) ** 2, axis=(0, 1, 2))
        return jnp.maximum((v - mean) * lax.rsqrt(var + BN_EPS) * g + b, 0.0)

    def conv(v, w_hwio, stride, pad):
        return lax.conv_general_dilated(
            v, w_hwio, window_strides=(stride, stride),
            padding=((pad, pad), (pad, pad)),
            dimension_numbers=("NHWC", "HWIO", "NHWC"),
            precision=lax.Precision.HIGHEST)

    s = p["stride"]
    out = bn_relu(x, p["bn1_g"], p["bn1_b"])
    sc = conv(x, p["shortcut_w"], s, 0) if p["has_shortcut"] else x
    out = conv(out, p["conv1_w"], s, 1)
    out = conv(bn_relu(out, p["bn2_g"], p["bn2_b"]), p["conv2_w"], 1, 1) + sc
    return jnp.transpose(out, (0, 3, 1, 2))


# ------------------------------------- main ----------------------------------

if __name__ == "__main__":
    key = jax.random.PRNGKey(0)
    kx, kb1, kb2 = jax.random.split(key, 3)
    x = jax.random.normal(kx, (2, 64, 16, 16), jnp.float32)          # NCHW, like PyTorch

    configs = [
        dict(in_planes=64, planes=64, stride=1),     # identity shortcut
        dict(in_planes=64, planes=128, stride=2),    # downsample: 1x1 conv shortcut
    ]
    for kk, cfg in zip((kb1, kb2), configs):
        params = init_preact_basic_block(kk, **cfg)
        fwd = jax.jit(functools.partial(preact_basic_block_forward, params))
        out = jax.block_until_ready(fwd(x))

        n, _, h, w = x.shape
        s = cfg["stride"]
        assert out.shape == (n, cfg["planes"], h // s, w // s), out.shape
        assert out.dtype == jnp.float32
        assert bool(jnp.all(jnp.isfinite(out)))

        ref = _reference_block(params, x)
        err = float(jnp.max(jnp.abs(out - ref)))
        ref_scale = float(jnp.max(jnp.abs(ref)))
        # bf16 MXU operands / bf16 y1 round-trip => relative tolerance vs f32 reference.
        assert err <= 3e-2 * ref_scale + 1e-3, \
            f"max abs err {err} (ref max {ref_scale}) vs pure-JAX reference"

    print("KERNEL_OK")
</pallas_src>

<mosaic_0001>
module attributes {stable_mosaic.version = 11 : i64} {
  func.func @_bn_stats_kernel(%arg0: i32, %arg1: memref<512x64xbf16, #tpu.memory_space<vmem>>, %arg2: memref<1x64xf32, #tpu.memory_space<vmem>>, %arg3: memref<1x64xf32, #tpu.memory_space<vmem>>, %arg4: memref<1x64xf32, #tpu.memory_space<vmem>>, %arg5: memref<1x64xf32, #tpu.memory_space<vmem>>, %arg6: memref<1x64xf32, #tpu.memory_space<vmem>>, %arg7: memref<1x64xf32, #tpu.memory_space<vmem>>) attributes {dimension_semantics = [#tpu.dimension_semantics<arbitrary>], iteration_bounds = array<i64: 1>, scalar_prefetch = 0 : i64, scratch_operands = 2 : i64, tpu.core_type = #tpu.core_type<tc>, window_params = [{transform_indices = @transform_0, window_bounds = array<i64: 512, 64>}, {pipeline_mode = #tpu.pipeline_mode<synchronous>, transform_indices = @transform_1, window_bounds = array<i64: 1, 64>}, {pipeline_mode = #tpu.pipeline_mode<synchronous>, transform_indices = @transform_2, window_bounds = array<i64: 1, 64>}, {pipeline_mode = #tpu.pipeline_mode<synchronous>, transform_indices = @transform_3, window_bounds = array<i64: 1, 64>}, {pipeline_mode = #tpu.pipeline_mode<synchronous>, transform_indices = @transform_4, window_bounds = array<i64: 1, 64>}]} {
    %c0_i32 = arith.constant 0 : i32
    %0 = arith.cmpi eq, %arg0, %c0_i32 : i32
    %1 = arith.extui %0 : i1 to i32
    %c0_i32_0 = arith.constant 0 : i32
    %2 = arith.cmpi ne, %1, %c0_i32_0 : i32
    scf.if %2 {
      %cst_13 = arith.constant 0.000000e+00 : f32
      %19 = vector.broadcast %cst_13 : f32 to vector<1x64xf32>
      %c0_14 = arith.constant 0 : index
      %c0_15 = arith.constant 0 : index
      %20 = vector.load %arg6[%c0_14, %c0_15] : memref<1x64xf32, #tpu.memory_space<vmem>>, vector<1x64xf32>
      tpu.vector_store %arg6[%c0_14, %c0_15], %19 {strides = array<i32>} : memref<1x64xf32, #tpu.memory_space<vmem>>, vector<1x64xf32>,
      %cst_16 = arith.constant 0.000000e+00 : f32
      %21 = vector.broadcast %cst_16 : f32 to vector<1x64xf32>
      %c0_17 = arith.constant 0 : index
      %c0_18 = arith.constant 0 : index
      %22 = vector.load %arg7[%c0_17, %c0_18] : memref<1x64xf32, #tpu.memory_space<vmem>>, vector<1x64xf32>
      tpu.vector_store %arg7[%c0_17, %c0_18], %21 {strides = array<i32>} : memref<1x64xf32, #tpu.memory_space<vmem>>, vector<1x64xf32>,
    } else {
    }
    %c0 = arith.constant 0 : index
    %c0_1 = arith.constant 0 : index
    %3 = vector.load %arg1[%c0, %c0_1] : memref<512x64xbf16, #tpu.memory_space<vmem>>, vector<512x64xbf16>
    %4 = arith.extf %3 : vector<512x64xbf16> to vector<512x64xf32>
    %c0_2 = arith.constant 0 : index
    %c0_3 = arith.constant 0 : index
    %5 = vector.load %arg6[%c0_2, %c0_3] : memref<1x64xf32, #tpu.memory_space<vmem>>, vector<1x64xf32>
    %cst = arith.constant dense<0.000000e+00> : vector<64xf32>
    %6 = vector.multi_reduction <add>, %4, %cst [0] : vector<512x64xf32> to vector<64xf32>
    %7 = vector.shape_cast %6 : vector<64xf32> to vector<1x64xf32>
    %8 = arith.addf %5, %7 : vector<1x64xf32>
    %c0_4 = arith.constant 0 : index
    %c0_5 = arith.constant 0 : index
    %9 = vector.load %arg6[%c0_4, %c0_5] : memref<1x64xf32, #tpu.memory_space<vmem>>, vector<1x64xf32>
    tpu.vector_store %arg6[%c0_4, %c0_5], %8 {strides = array<i32>} : memref<1x64xf32, #tpu.memory_space<vmem>>, vector<1x64xf32>,
    %c0_6 = arith.constant 0 : index
    %c0_7 = arith.constant 0 : index
    %10 = vector.load %arg7[%c0_6, %c0_7] : memref<1x64xf32, #tpu.memory_space<vmem>>, vector<1x64xf32>
    %11 = arith.mulf %4, %4 : vector<512x64xf32>
    %cst_8 = arith.constant dense<0.000000e+00> : vector<64xf32>
    %12 = vector.multi_reduction <add>, %11, %cst_8 [0] : vector<512x64xf32> to vector<64xf32>
    %13 = vector.shape_cast %12 : vector<64xf32> to vector<1x64xf32>
    %14 = arith.addf %10, %13 : vector<1x64xf32>
    %c0_9 = arith.constant 0 : index
    %c0_10 = arith.constant 0 : index
    %15 = vector.load %arg7[%c0_9, %c0_10] : memref<1x64xf32, #tpu.memory_space<vmem>>, vector<1x64xf32>
    tpu.vector_store %arg7[%c0_9, %c0_10], %14 {strides = array<i32>} : memref<1x64xf32, #tpu.memory_space<vmem>>, vector<1x64xf32>,
    %c0_i32_11 = arith.constant 0 : i32
    %16 = arith.cmpi eq, %arg0, %c0_i32_11 : i32
    %17 = arith.extui %16 : i1 to i32
    %c0_i32_12 = arith.constant 0 : i32
    %18 = arith.cmpi ne, %17, %c0_i32_12 : i32
    scf.if %18 {
      %c0_13 = arith.constant 0 : index
      %c0_14 = arith.constant 0 : index
      %19 = vector.load %arg6[%c0_13, %c0_14] : memref<1x64xf32, #tpu.memory_space<vmem>>, vector<1x64xf32>
      %cst_15 = arith.constant 0.001953125 : f32
      %20 = vector.broadcast %cst_15 : f32 to vector<1x64xf32>
      %21 = arith.mulf %19, %20 : vector<1x64xf32>
      %c0_16 = arith.constant 0 : index
      %c0_17 = arith.constant 0 : index
      %22 = vector.load %arg7[%c0_16, %c0_17] : memref<1x64xf32, #tpu.memory_space<vmem>>, vector<1x64xf32>
      %cst_18 = arith.constant 0.001953125 : f32
      %23 = vector.broadcast %cst_18 : f32 to vector<1x64xf32>
      %24 = arith.mulf %22, %23 : vector<1x64xf32>
      %25 = arith.mulf %21, %21 : vector<1x64xf32>
      %26 = arith.subf %24, %25 : vector<1x64xf32>
      %cst_19 = arith.constant 9.99999974E-6 : f32
      %27 = vector.broadcast %cst_19 : f32 to vector<1x64xf32>
      %28 = arith.addf %26, %27 : vector<1x64xf32>
      %29 = math.rsqrt %28 : vector<1x64xf32>
      %c0_20 = arith.constant 0 : index
      %c0_21 = arith.constant 0 : index
      %30 = vector.load %arg2[%c0_20, %c0_21] : memref<1x64xf32, #tpu.memory_space<vmem>>, vector<1x64xf32>
      %31 = arith.mulf %30, %29 : vector<1x64xf32>
      %c0_22 = arith.constant 0 : index
      %c0_23 = arith.constant 0 : index
      %32 = vector.load %arg4[%c0_22, %c0_23] : memref<1x64xf32, #tpu.memory_space<vmem>>, vector<1x64xf32>
      tpu.vector_store %arg4[%c0_22, %c0_23], %31 {strides = array<i32>} : memref<1x64xf32, #tpu.memory_space<vmem>>, vector<1x64xf32>,
      %c0_24 = arith.constant 0 : index
      %c0_25 = arith.constant 0 : index
      %33 = vector.load %arg3[%c0_24, %c0_25] : memref<1x64xf32, #tpu.memory_space<vmem>>, vector<1x64xf32>
      %34 = arith.mulf %21, %31 : vector<1x64xf32>
      %35 = arith.subf %33, %34 : vector<1x64xf32>
      %c0_26 = arith.constant 0 : index
      %c0_27 = arith.constant 0 : index
      %36 = vector.load %arg5[%c0_26, %c0_27] : memref<1x64xf32, #tpu.memory_space<vmem>>, vector<1x64xf32>
      tpu.vector_store %arg5[%c0_26, %c0_27], %35 {strides = array<i32>} : memref<1x64xf32, #tpu.memory_space<vmem>>, vector<1x64xf32>,
    } else {
    }
    return
  }
  func.func @transform_0(%arg0: i32) -> (i32, i32) {
    %c0_i32 = arith.constant 0 : i32
    %c0_i32_0 = arith.constant 0 : i32
    return %arg0, %c0_i32 : i32, i32
  }
  func.func @transform_1(%arg0: i32) -> (i32, i32) {
    %c0_i32 = arith.constant 0 : i32
    %c0_i32_0 = arith.constant 0 : i32
    %c0_i32_1 = arith.constant 0 : i32
    return %c0_i32, %c0_i32_0 : i32, i32
  }
  func.func @transform_2(%arg0: i32) -> (i32, i32) {
    %c0_i32 = arith.constant 0 : i32
    %c0_i32_0 = arith.constant 0 : i32
    %c0_i32_1 = arith.constant 0 : i32
    return %c0_i32, %c0_i32_0 : i32, i32
  }
  func.func @transform_3(%arg0: i32) -> (i32, i32) {
    %c0_i32 = arith.constant 0 : i32
    %c0_i32_0 = arith.constant 0 : i32
    %c0_i32_1 = arith.constant 0 : i32
    return %c0_i32, %c0_i32_0 : i32, i32
  }
  func.func @transform_4(%arg0: i32) -> (i32, i32) {
    %c0_i32 = arith.constant 0 : i32
    %c0_i32_0 = arith.constant 0 : i32
    %c0_i32_1 = arith.constant 0 : i32
    return %c0_i32, %c0_i32_0 : i32, i32
  }
}

module attributes {stable_mosaic.version = 11 : i64} {
  func.func @_bn_stats_kernel(%arg0: i32, %arg1: memref<512x64xf32, #tpu.memory_space<vmem>>, %arg2: memref<1x64xf32, #tpu.memory_space<vmem>>, %arg3: memref<1x64xf32, #tpu.memory_space<vmem>>, %arg4: memref<1x64xf32, #tpu.memory_space<vmem>>, %arg5: memref<1x64xf32, #tpu.memory_space<vmem>>, %arg6: memref<1x64xf32, #tpu.memory_space<vmem>>, %arg7: memref<1x64xf32, #tpu.memory_space<vmem>>) attributes {dimension_semantics = [#tpu.dimension_semantics<arbitrary>], iteration_bounds = array<i64: 1>, scalar_prefetch = 0 : i64, scratch_operands = 2 : i64, tpu.core_type = #tpu.core_type<tc>, window_params = [{transform_indices = @transform_0, window_bounds = array<i64: 512, 64>}, {pipeline_mode = #tpu.pipeline_mode<synchronous>, transform_indices = @transform_1, window_bounds = array<i64: 1, 64>}, {pipeline_mode = #tpu.pipeline_mode<synchronous>, transform_indices = @transform_2, window_bounds = array<i64: 1, 64>}, {pipeline_mode = #tpu.pipeline_mode<synchronous>, transform_indices = @transform_3, window_bounds = array<i64: 1, 64>}, {pipeline_mode = #tpu.pipeline_mode<synchronous>, transform_indices = @transform_4, window_bounds = array<i64: 1, 64>}]} {
    %c0_i32 = arith.constant 0 : i32
    %0 = arith.cmpi eq, %arg0, %c0_i32 : i32
    %1 = arith.extui %0 : i1 to i32
    %c0_i32_0 = arith.constant 0 : i32
    %2 = arith.cmpi ne, %1, %c0_i32_0 : i32
    scf.if %2 {
      %cst_13 = arith.constant 0.000000e+00 : f32
      %18 = vector.broadcast %cst_13 : f32 to vector<1x64xf32>
      %c0_14 = arith.constant 0 : index
      %c0_15 = arith.constant 0 : index
      %19 = vector.load %arg6[%c0_14, %c0_15] : memref<1x64xf32, #tpu.memory_space<vmem>>, vector<1x64xf32>
      tpu.vector_store %arg6[%c0_14, %c0_15], %18 {strides = array<i32>} : memref<1x64xf32, #tpu.memory_space<vmem>>, vector<1x64xf32>,
      %cst_16 = arith.constant 0.000000e+00 : f32
      %20 = vector.broadcast %cst_16 : f32 to vector<1x64xf32>
      %c0_17 = arith.constant 0 : index
      %c0_18 = arith.constant 0 : index
      %21 = vector.load %arg7[%c0_17, %c0_18] : memref<1x64xf32, #tpu.memory_space<vmem>>, vector<1x64xf32>
      tpu.vector_store %arg7[%c0_17, %c0_18], %20 {strides = array<i32>} : memref<1x64xf32, #tpu.memory_space<vmem>>, vector<1x64xf32>,
    } else {
    }
    %c0 = arith.constant 0 : index
    %c0_1 = arith.constant 0 : index
    %3 = vector.load %arg1[%c0, %c0_1] : memref<512x64xf32, #tpu.memory_space<vmem>>, vector<512x64xf32>
    %c0_2 = arith.constant 0 : index
    %c0_3 = arith.constant 0 : index
    %4 = vector.load %arg6[%c0_2, %c0_3] : memref<1x64xf32, #tpu.memory_space<vmem>>, vector<1x64xf32>
    %cst = arith.constant dense<0.000000e+00> : vector<64xf32>
    %5 = vector.multi_reduction <add>, %3, %cst [0] : vector<512x64xf32> to vector<64xf32>
    %6 = vector.shape_cast %5 : vector<64xf32> to vector<1x64xf32>
    %7 = arith.addf %4, %6 : vector<1x64xf32>
    %c0_4 = arith.constant 0 : index
    %c0_5 = arith.constant 0 : index
    %8 = vector.load %arg6[%c0_4, %c0_5] : memref<1x64xf32, #tpu.memory_space<vmem>>, vector<1x64xf32>
    tpu.vector_store %arg6[%c0_4, %c0_5], %7 {strides = array<i32>} : memref<1x64xf32, #tpu.memory_space<vmem>>, vector<1x64xf32>,
    %c0_6 = arith.constant 0 : index
    %c0_7 = arith.constant 0 : index
    %9 = vector.load %arg7[%c0_6, %c0_7] : memref<1x64xf32, #tpu.memory_space<vmem>>, vector<1x64xf32>
    %10 = arith.mulf %3, %3 : vector<512x64xf32>
    %cst_8 = arith.constant dense<0.000000e+00> : vector<64xf32>
    %11 = vector.multi_reduction <add>, %10, %cst_8 [0] : vector<512x64xf32> to vector<64xf32>
    %12 = vector.shape_cast %11 : vector<64xf32> to vector<1x64xf32>
    %13 = arith.addf %9, %12 : vector<1x64xf32>
    %c0_9 = arith.constant 0 : index
    %c0_10 = arith.constant 0 : index
    %14 = vector.load %arg7[%c0_9, %c0_10] : memref<1x64xf32, #tpu.memory_space<vmem>>, vector<1x64xf32>
    tpu.vector_store %arg7[%c0_9, %c0_10], %13 {strides = array<i32>} : memref<1x64xf32, #tpu.memory_space<vmem>>, vector<1x64xf32>,
    %c0_i32_11 = arith.constant 0 : i32
    %15 = arith.cmpi eq, %arg0, %c0_i32_11 : i32
    %16 = arith.extui %15 : i1 to i32
    %c0_i32_12 = arith.constant 0 : i32
    %17 = arith.cmpi ne, %16, %c0_i32_12 : i32
    scf.if %17 {
      %c0_13 = arith.constant 0 : index
      %c0_14 = arith.constant 0 : index
      %18 = vector.load %arg6[%c0_13, %c0_14] : memref<1x64xf32, #tpu.memory_space<vmem>>, vector<1x64xf32>
      %cst_15 = arith.constant 0.001953125 : f32
      %19 = vector.broadcast %cst_15 : f32 to vector<1x64xf32>
      %20 = arith.mulf %18, %19 : vector<1x64xf32>
      %c0_16 = arith.constant 0 : index
      %c0_17 = arith.constant 0 : index
      %21 = vector.load %arg7[%c0_16, %c0_17] : memref<1x64xf32, #tpu.memory_space<vmem>>, vector<1x64xf32>
      %cst_18 = arith.constant 0.001953125 : f32
      %22 = vector.broadcast %cst_18 : f32 to vector<1x64xf32>
      %23 = arith.mulf %21, %22 : vector<1x64xf32>
      %24 = arith.mulf %20, %20 : vector<1x64xf32>
      %25 = arith.subf %23, %24 : vector<1x64xf32>
      %cst_19 = arith.constant 9.99999974E-6 : f32
      %26 = vector.broadcast %cst_19 : f32 to vector<1x64xf32>
      %27 = arith.addf %25, %26 : vector<1x64xf32>
      %28 = math.rsqrt %27 : vector<1x64xf32>
      %c0_20 = arith.constant 0 : index
      %c0_21 = arith.constant 0 : index
      %29 = vector.load %arg2[%c0_20, %c0_21] : memref<1x64xf32, #tpu.memory_space<vmem>>, vector<1x64xf32>
      %30 = arith.mulf %29, %28 : vector<1x64xf32>
      %c0_22 = arith.constant 0 : index
      %c0_23 = arith.constant 0 : index
      %31 = vector.load %arg4[%c0_22, %c0_23] : memref<1x64xf32, #tpu.memory_space<vmem>>, vector<1x64xf32>
      tpu.vector_store %arg4[%c0_22, %c0_23], %30 {strides = array<i32>} : memref<1x64xf32, #tpu.memory_space<vmem>>, vector<1x64xf32>,
      %c0_24 = arith.constant 0 : index
      %c0_25 = arith.constant 0 : index
      %32 = vector.load %arg3[%c0_24, %c0_25] : memref<1x64xf32, #tpu.memory_space<vmem>>, vector<1x64xf32>
      %33 = arith.mulf %20, %30 : vector<1x64xf32>
      %34 = arith.subf %32, %33 : vector<1x64xf32>
      %c0_26 = arith.constant 0 : index
      %c0_27 = arith.constant 0 : index
      %35 = vector.load %arg5[%c0_26, %c0_27] : memref<1x64xf32, #tpu.memory_space<vmem>>, vector<1x64xf32>
      tpu.vector_store %arg5[%c0_26, %c0_27], %34 {strides = array<i32>} : memref<1x64xf32, #tpu.memory_space<vmem>>, vector<1x64xf32>,
    } else {
    }
    return
  }
  func.func @transform_0(%arg0: i32) -> (i32, i32) {
    %c0_i32 = arith.constant 0 : i32
    %c0_i32_0 = arith.constant 0 : i32
    return %arg0, %c0_i32 : i32, i32
  }
  func.func @transform_1(%arg0: i32) -> (i32, i32) {
    %c0_i32 = arith.constant 0 : i32
    %c0_i32_0 = arith.constant 0 : i32
    %c0_i32_1 = arith.constant 0 : i32
    return %c0_i32, %c0_i32_0 : i32, i32
  }
  func.func @transform_2(%arg0: i32) -> (i32, i32) {
    %c0_i32 = arith.constant 0 : i32
    %c0_i32_0 = arith.constant 0 : i32
    %c0_i32_1 = arith.constant 0 : i32
    return %c0_i32, %c0_i32_0 : i32, i32
  }
  func.func @transform_3(%arg0: i32) -> (i32, i32) {
    %c0_i32 = arith.constant 0 : i32
    %c0_i32_0 = arith.constant 0 : i32
    %c0_i32_1 = arith.constant 0 : i32
    return %c0_i32, %c0_i32_0 : i32, i32
  }
  func.func @transform_4(%arg0: i32) -> (i32, i32) {
    %c0_i32 = arith.constant 0 : i32
    %c0_i32_0 = arith.constant 0 : i32
    %c0_i32_1 = arith.constant 0 : i32
    return %c0_i32, %c0_i32_0 : i32, i32
  }
}

module attributes {stable_mosaic.version = 11 : i64} {
  func.func @_bnrelu_conv_kernel(%arg0: i32, %arg1: i32, %arg2: i32, %arg3: memref<1x16x16x64xf32, #tpu.memory_space<vmem>>, %arg4: memref<1x64xf32, #tpu.memory_space<vmem>>, %arg5: memref<1x64xf32, #tpu.memory_space<vmem>>, %arg6: memref<9x64x64xbf16, #tpu.memory_space<vmem>>, %arg7: memref<1x256x64xbf16, #tpu.memory_space<vmem>>, %arg8: memref<3x18x16x64xbf16, #tpu.memory_space<vmem>>, %arg9: memref<256x64xf32, #tpu.memory_space<vmem>>) attributes {dimension_semantics = [#tpu.dimension_semantics<parallel>, #tpu.dimension_semantics<parallel>, #tpu.dimension_semantics<arbitrary>], iteration_bounds = array<i64: 2, 1, 1>, scalar_prefetch = 0 : i64, scratch_operands = 2 : i64, tpu.core_type = #tpu.core_type<tc>, window_params = [{transform_indices = @transform_0, window_bounds = array<i64: 1, 16, 16, 64>}, {transform_indices = @transform_1, window_bounds = array<i64: 1, 64>}, {transform_indices = @transform_2, window_bounds = array<i64: 1, 64>}, {transform_indices = @transform_3, window_bounds = array<i64: 9, 64, 64>}, {transform_indices = @transform_4, window_bounds = array<i64: 1, 256, 64>}]} {
    %c0_i32 = arith.constant 0 : i32
    %0 = arith.cmpi eq, %arg2, %c0_i32 : i32
    %1 = arith.extui %0 : i1 to i32
    %c0_i32_0 = arith.constant 0 : i32
    %2 = arith.cmpi ne, %1, %c0_i32_0 : i32
    scf.if %2 {
      %cst_160 = arith.constant 0.000000e+00 : f32
      %143 = vector.broadcast %cst_160 : f32 to vector<256x64xf32>
      %c0_161 = arith.constant 0 : index
      %c0_162 = arith.constant 0 : index
      %144 = vector.load %arg9[%c0_161, %c0_162] : memref<256x64xf32, #tpu.memory_space<vmem>>, vector<256x64xf32>
      tpu.vector_store %arg9[%c0_161, %c0_162], %143 {strides = array<i32>} : memref<256x64xf32, #tpu.memory_space<vmem>>, vector<256x64xf32>,
    } else {
    }
    %c0 = arith.constant 0 : index
    %c0_1 = arith.constant 0 : index
    %c0_2 = arith.constant 0 : index
    %c0_3 = arith.constant 0 : index
    %3 = vector.load %arg3[%c0, %c0_1, %c0_2, %c0_3] : memref<1x16x16x64xf32, #tpu.memory_space<vmem>>, vector<1x16x16x64xf32>
    %4 = vector.shape_cast %3 : vector<1x16x16x64xf32> to vector<16x16x64xf32>
    %c0_4 = arith.constant 0 : index
    %c0_5 = arith.constant 0 : index
    %5 = vector.load %arg4[%c0_4, %c0_5] : memref<1x64xf32, #tpu.memory_space<vmem>>, vector<1x64xf32>
    %6 = vector.shape_cast %5 : vector<1x64xf32> to vector<1x1x64xf32>
    %7 = vector.broadcast %6 : vector<1x1x64xf32> to vector<16x16x64xf32>
    %8 = arith.mulf %4, %7 : vector<16x16x64xf32>
    %c0_6 = arith.constant 0 : index
    %c0_7 = arith.constant 0 : index
    %9 = vector.load %arg5[%c0_6, %c0_7] : memref<1x64xf32, #tpu.memory_space<vmem>>, vector<1x64xf32>
    %10 = vector.shape_cast %9 : vector<1x64xf32> to vector<1x1x64xf32>
    %11 = vector.broadcast %10 : vector<1x1x64xf32> to vector<16x16x64xf32>
    %12 = arith.addf %8, %11 : vector<16x16x64xf32>
    %cst = arith.constant 0.000000e+00 : f32
    %13 = vector.broadcast %cst : f32 to vector<16x16x64xf32>
    %14 = arith.maximumf %12, %13 : vector<16x16x64xf32>
    %15 = arith.truncf %14 : vector<16x16x64xf32> to vector<16x16x64xbf16>
    %cst_8 = arith.constant 0.000000e+00 : bf16
    %16 = vector.broadcast %cst_8 : bf16 to vector<1x16x64xbf16>
    %c0_9 = arith.constant 0 : index
    %c0_10 = arith.constant 0 : index
    %c0_11 = arith.constant 0 : index
    %c0_12 = arith.constant 0 : index
    %17 = vector.load %arg8[%c0_9, %c0_10, %c0_11, %c0_12] : memref<3x18x16x64xbf16, #tpu.memory_space<vmem>>, vector<1x1x16x64xbf16>
    %18 = vector.shape_cast %17 : vector<1x1x16x64xbf16> to vector<1x16x64xbf16>
    %19 = vector.shape_cast %16 : vector<1x16x64xbf16> to vector<1x1x16x64xbf16>
    tpu.vector_store %arg8[%c0_9, %c0_10, %c0_11, %c0_12], %19 {strides = array<i32>} : memref<3x18x16x64xbf16, #tpu.memory_space<vmem>>, vector<1x1x16x64xbf16>,
    %cst_13 = arith.constant 0.000000e+00 : bf16
    %20 = vector.broadcast %cst_13 : bf16 to vector<1x16x64xbf16>
    %c0_14 = arith.constant 0 : index
    %c17 = arith.constant 17 : index
    %c0_15 = arith.constant 0 : index
    %c0_16 = arith.constant 0 : index
    %21 = vector.load %arg8[%c0_14, %c17, %c0_15, %c0_16] : memref<3x18x16x64xbf16, #tpu.memory_space<vmem>>, vector<1x1x16x64xbf16>
    %22 = vector.shape_cast %21 : vector<1x1x16x64xbf16> to vector<1x16x64xbf16>
    %23 = vector.shape_cast %20 : vector<1x16x64xbf16> to vector<1x1x16x64xbf16>
    tpu.vector_store %arg8[%c0_14, %c17, %c0_15, %c0_16], %23 {strides = array<i32>} : memref<3x18x16x64xbf16, #tpu.memory_space<vmem>>, vector<1x1x16x64xbf16>,
    %cst_17 = arith.constant 0.000000e+00 : bf16
    %24 = vector.broadcast %cst_17 : bf16 to vector<16x1x64xbf16>
    %c0_18 = arith.constant 0 : index
    %c1 = arith.constant 1 : index
    %c0_19 = arith.constant 0 : index
    %c0_20 = arith.constant 0 : index
    %25 = vector.load %arg8[%c0_18, %c1, %c0_19, %c0_20] : memref<3x18x16x64xbf16, #tpu.memory_space<vmem>>, vector<1x16x1x64xbf16>
    %26 = vector.shape_cast %25 : vector<1x16x1x64xbf16> to vector<16x1x64xbf16>
    %27 = vector.shape_cast %24 : vector<16x1x64xbf16> to vector<1x16x1x64xbf16>
    tpu.vector_store %arg8[%c0_18, %c1, %c0_19, %c0_20], %27 {strides = array<i32>} : memref<3x18x16x64xbf16, #tpu.memory_space<vmem>>, vector<1x16x1x64xbf16>,
    %28 = vector.extract_strided_slice %15 {offsets = [0, 0, 0], sizes = [16, 15, 64], strides = [1, 1, 1]} : vector<16x16x64xbf16> to vector<16x15x64xbf16>
    %c0_21 = arith.constant 0 : index
    %c1_22 = arith.constant 1 : index
    %c1_23 = arith.constant 1 : index
    %c0_24 = arith.constant 0 : index
    %29 = vector.load %arg8[%c0_21, %c1_22, %c1_23, %c0_24] : memref<3x18x16x64xbf16, #tpu.memory_space<vmem>>, vector<1x16x15x64xbf16>
    %30 = vector.shape_cast %29 : vector<1x16x15x64xbf16> to vector<16x15x64xbf16>
    %31 = vector.shape_cast %28 : vector<16x15x64xbf16> to vector<1x16x15x64xbf16>
    tpu.vector_store %arg8[%c0_21, %c1_22, %c1_23, %c0_24], %31 {strides = array<i32>} : memref<3x18x16x64xbf16, #tpu.memory_space<vmem>>, vector<1x16x15x64xbf16>,
    %cst_25 = arith.constant 0.000000e+00 : bf16
    %32 = vector.broadcast %cst_25 : bf16 to vector<1x16x64xbf16>
    %c1_26 = arith.constant 1 : index
    %c0_27 = arith.constant 0 : index
    %c0_28 = arith.constant 0 : index
    %c0_29 = arith.constant 0 : index
    %33 = vector.load %arg8[%c1_26, %c0_27, %c0_28, %c0_29] : memref<3x18x16x64xbf16, #tpu.memory_space<vmem>>, vector<1x1x16x64xbf16>
    %34 = vector.shape_cast %33 : vector<1x1x16x64xbf16> to vector<1x16x64xbf16>
    %35 = vector.shape_cast %32 : vector<1x16x64xbf16> to vector<1x1x16x64xbf16>
    tpu.vector_store %arg8[%c1_26, %c0_27, %c0_28, %c0_29], %35 {strides = array<i32>} : memref<3x18x16x64xbf16, #tpu.memory_space<vmem>>, vector<1x1x16x64xbf16>,
    %cst_30 = arith.constant 0.000000e+00 : bf16
    %36 = vector.broadcast %cst_30 : bf16 to vector<1x16x64xbf16>
    %c1_31 = arith.constant 1 : index
    %c17_32 = arith.constant 17 : index
    %c0_33 = arith.constant 0 : index
    %c0_34 = arith.constant 0 : index
    %37 = vector.load %arg8[%c1_31, %c17_32, %c0_33, %c0_34] : memref<3x18x16x64xbf16, #tpu.memory_space<vmem>>, vector<1x1x16x64xbf16>
    %38 = vector.shape_cast %37 : vector<1x1x16x64xbf16> to vector<1x16x64xbf16>
    %39 = vector.shape_cast %36 : vector<1x16x64xbf16> to vector<1x1x16x64xbf16>
    tpu.vector_store %arg8[%c1_31, %c17_32, %c0_33, %c0_34], %39 {strides = array<i32>} : memref<3x18x16x64xbf16, #tpu.memory_space<vmem>>, vector<1x1x16x64xbf16>,
    %c1_35 = arith.constant 1 : index
    %c1_36 = arith.constant 1 : index
    %c0_37 = arith.constant 0 : index
    %c0_38 = arith.constant 0 : index
    %40 = vector.load %arg8[%c1_35, %c1_36, %c0_37, %c0_38] : memref<3x18x16x64xbf16, #tpu.memory_space<vmem>>, vector<1x16x16x64xbf16>
    %41 = vector.shape_cast %40 : vector<1x16x16x64xbf16> to vector<16x16x64xbf16>
    %42 = vector.shape_cast %15 : vector<16x16x64xbf16> to vector<1x16x16x64xbf16>
    tpu.vector_store %arg8[%c1_35, %c1_36, %c0_37, %c0_38], %42 {strides = array<i32>} : memref<3x18x16x64xbf16, #tpu.memory_space<vmem>>, vector<1x16x16x64xbf16>,
    %cst_39 = arith.constant 0.000000e+00 : bf16
    %43 = vector.broadcast %cst_39 : bf16 to vector<1x16x64xbf16>
    %c2 = arith.constant 2 : index
    %c0_40 = arith.constant 0 : index
    %c0_41 = arith.constant 0 : index
    %c0_42 = arith.constant 0 : index
    %44 = vector.load %arg8[%c2, %c0_40, %c0_41, %c0_42] : memref<3x18x16x64xbf16, #tpu.memory_space<vmem>>, vector<1x1x16x64xbf16>
    %45 = vector.shape_cast %44 : vector<1x1x16x64xbf16> to vector<1x16x64xbf16>
    %46 = vector.shape_cast %43 : vector<1x16x64xbf16> to vector<1x1x16x64xbf16>
    tpu.vector_store %arg8[%c2, %c0_40, %c0_41, %c0_42], %46 {strides = array<i32>} : memref<3x18x16x64xbf16, #tpu.memory_space<vmem>>, vector<1x1x16x64xbf16>,
    %cst_43 = arith.constant 0.000000e+00 : bf16
    %47 = vector.broadcast %cst_43 : bf16 to vector<1x16x64xbf16>
    %c2_44 = arith.constant 2 : index
    %c17_45 = arith.constant 17 : index
    %c0_46 = arith.constant 0 : index
    %c0_47 = arith.constant 0 : index
    %48 = vector.load %arg8[%c2_44, %c17_45, %c0_46, %c0_47] : memref<3x18x16x64xbf16, #tpu.memory_space<vmem>>, vector<1x1x16x64xbf16>
    %49 = vector.shape_cast %48 : vector<1x1x16x64xbf16> to vector<1x16x64xbf16>
    %50 = vector.shape_cast %47 : vector<1x16x64xbf16> to vector<1x1x16x64xbf16>
    tpu.vector_store %arg8[%c2_44, %c17_45, %c0_46, %c0_47], %50 {strides = array<i32>} : memref<3x18x16x64xbf16, #tpu.memory_space<vmem>>, vector<1x1x16x64xbf16>,
    %cst_48 = arith.constant 0.000000e+00 : bf16
    %51 = vector.broadcast %cst_48 : bf16 to vector<16x1x64xbf16>
    %c2_49 = arith.constant 2 : index
    %c1_50 = arith.constant 1 : index
    %c15 = arith.constant 15 : index
    %c0_51 = arith.constant 0 : index
    %52 = vector.load %arg8[%c2_49, %c1_50, %c15, %c0_51] : memref<3x18x16x64xbf16, #tpu.memory_space<vmem>>, vector<1x16x1x64xbf16>
    %53 = vector.shape_cast %52 : vector<1x16x1x64xbf16> to vector<16x1x64xbf16>
    %54 = vector.shape_cast %51 : vector<16x1x64xbf16> to vector<1x16x1x64xbf16>
    tpu.vector_store %arg8[%c2_49, %c1_50, %c15, %c0_51], %54 {strides = array<i32>} : memref<3x18x16x64xbf16, #tpu.memory_space<vmem>>, vector<1x16x1x64xbf16>,
    %55 = vector.extract_strided_slice %15 {offsets = [0, 1, 0], sizes = [16, 15, 64], strides = [1, 1, 1]} : vector<16x16x64xbf16> to vector<16x15x64xbf16>
    %c2_52 = arith.constant 2 : index
    %c1_53 = arith.constant 1 : index
    %c0_54 = arith.constant 0 : index
    %c0_55 = arith.constant 0 : index
    %56 = vector.load %arg8[%c2_52, %c1_53, %c0_54, %c0_55] : memref<3x18x16x64xbf16, #tpu.memory_space<vmem>>, vector<1x16x15x64xbf16>
    %57 = vector.shape_cast %56 : vector<1x16x15x64xbf16> to vector<16x15x64xbf16>
    %58 = vector.shape_cast %55 : vector<16x15x64xbf16> to vector<1x16x15x64xbf16>
    tpu.vector_store %arg8[%c2_52, %c1_53, %c0_54, %c0_55], %58 {strides = array<i32>} : memref<3x18x16x64xbf16, #tpu.memory_space<vmem>>, vector<1x16x15x64xbf16>,
    %c0_56 = arith.constant 0 : index
    %c0_57 = arith.constant 0 : index
    %c0_58 = arith.constant 0 : index
    %c0_59 = arith.constant 0 : index
    %59 = vector.load %arg8[%c0_56, %c0_57, %c0_58, %c0_59] : memref<3x18x16x64xbf16, #tpu.memory_space<vmem>>, vector<1x16x16x64xbf16>
    %60 = vector.shape_cast %59 : vector<1x16x16x64xbf16> to vector<16x16x64xbf16>
    %61 = vector.shape_cast %60 : vector<16x16x64xbf16> to vector<256x64xbf16>
    %c0_60 = arith.constant 0 : index
    %c0_61 = arith.constant 0 : index
    %62 = vector.load %arg9[%c0_60, %c0_61] : memref<256x64xf32, #tpu.memory_space<vmem>>, vector<256x64xf32>
    %c0_62 = arith.constant 0 : index
    %c0_63 = arith.constant 0 : index
    %c0_64 = arith.constant 0 : index
    %63 = vector.load %arg6[%c0_62, %c0_63, %c0_64] : memref<9x64x64xbf16, #tpu.memory_space<vmem>>, vector<1x64x64xbf16>
    %64 = vector.shape_cast %63 : vector<1x64x64xbf16> to vector<64x64xbf16>
    %cst_65 = arith.constant dense<0.000000e+00> : vector<256x64xf32>
    %65 = tpu.matmul %61, %64, %cst_65 {dimension_numbers = #tpu.dot_dimension_numbers<[1], [0], [0], [1], [0, 0, 1, 1], [], []>} : vector<256x64xbf16>, vector<64x64xbf16>, vector<256x64xf32> -> vector<256x64xf32>
    %66 = arith.addf %62, %65 : vector<256x64xf32>
    %c0_66 = arith.constant 0 : index
    %c0_67 = arith.constant 0 : index
    %67 = vector.load %arg9[%c0_66, %c0_67] : memref<256x64xf32, #tpu.memory_space<vmem>>, vector<256x64xf32>
    tpu.vector_store %arg9[%c0_66, %c0_67], %66 {strides = array<i32>} : memref<256x64xf32, #tpu.memory_space<vmem>>, vector<256x64xf32>,
    %c1_68 = arith.constant 1 : index
    %c0_69 = arith.constant 0 : index
    %c0_70 = arith.constant 0 : index
    %c0_71 = arith.constant 0 : index
    %68 = vector.load %arg8[%c1_68, %c0_69, %c0_70, %c0_71] : memref<3x18x16x64xbf16, #tpu.memory_space<vmem>>, vector<1x16x16x64xbf16>
    %69 = vector.shape_cast %68 : vector<1x16x16x64xbf16> to vector<16x16x64xbf16>
    %70 = vector.shape_cast %69 : vector<16x16x64xbf16> to vector<256x64xbf16>
    %c0_72 = arith.constant 0 : index
    %c0_73 = arith.constant 0 : index
    %71 = vector.load %arg9[%c0_72, %c0_73] : memref<256x64xf32, #tpu.memory_space<vmem>>, vector<256x64xf32>
    %c1_74 = arith.constant 1 : index
    %c0_75 = arith.constant 0 : index
    %c0_76 = arith.constant 0 : index
    %72 = vector.load %arg6[%c1_74, %c0_75, %c0_76] : memref<9x64x64xbf16, #tpu.memory_space<vmem>>, vector<1x64x64xbf16>
    %73 = vector.shape_cast %72 : vector<1x64x64xbf16> to vector<64x64xbf16>
    %cst_77 = arith.constant dense<0.000000e+00> : vector<256x64xf32>
    %74 = tpu.matmul %70, %73, %cst_77 {dimension_numbers = #tpu.dot_dimension_numbers<[1], [0], [0], [1], [0, 0, 1, 1], [], []>} : vector<256x64xbf16>, vector<64x64xbf16>, vector<256x64xf32> -> vector<256x64xf32>
    %75 = arith.addf %71, %74 : vector<256x64xf32>
    %c0_78 = arith.constant 0 : index
    %c0_79 = arith.constant 0 : index
    %76 = vector.load %arg9[%c0_78, %c0_79] : memref<256x64xf32, #tpu.memory_space<vmem>>, vector<256x64xf32>
    tpu.vector_store %arg9[%c0_78, %c0_79], %75 {strides = array<i32>} : memref<256x64xf32, #tpu.memory_space<vmem>>, vector<256x64xf32>,
    %c2_80 = arith.constant 2 : index
    %c0_81 = arith.constant 0 : index
    %c0_82 = arith.constant 0 : index
    %c0_83 = arith.constant 0 : index
    %77 = vector.load %arg8[%c2_80, %c0_81, %c0_82, %c0_83] : memref<3x18x16x64xbf16, #tpu.memory_space<vmem>>, vector<1x16x16x64xbf16>
    %78 = vector.shape_cast %77 : vector<1x16x16x64xbf16> to vector<16x16x64xbf16>
    %79 = vector.shape_cast %78 : vector<16x16x64xbf16> to vector<256x64xbf16>
    %c0_84 = arith.constant 0 : index
    %c0_85 = arith.constant 0 : index
    %80 = vector.load %arg9[%c0_84, %c0_85] : memref<256x64xf32, #tpu.memory_space<vmem>>, vector<256x64xf32>
    %c2_86 = arith.constant 2 : index
    %c0_87 = arith.constant 0 : index
    %c0_88 = arith.constant 0 : index
    %81 = vector.load %arg6[%c2_86, %c0_87, %c0_88] : memref<9x64x64xbf16, #tpu.memory_space<vmem>>, vector<1x64x64xbf16>
    %82 = vector.shape_cast %81 : vector<1x64x64xbf16> to vector<64x64xbf16>
    %cst_89 = arith.constant dense<0.000000e+00> : vector<256x64xf32>
    %83 = tpu.matmul %79, %82, %cst_89 {dimension_numbers = #tpu.dot_dimension_numbers<[1], [0], [0], [1], [0, 0, 1, 1], [], []>} : vector<256x64xbf16>, vector<64x64xbf16>, vector<256x64xf32> -> vector<256x64xf32>
    %84 = arith.addf %80, %83 : vector<256x64xf32>
    %c0_90 = arith.constant 0 : index
    %c0_91 = arith.constant 0 : index
    %85 = vector.load %arg9[%c0_90, %c0_91] : memref<256x64xf32, #tpu.memory_space<vmem>>, vector<256x64xf32>
    tpu.vector_store %arg9[%c0_90, %c0_91], %84 {strides = array<i32>} : memref<256x64xf32, #tpu.memory_space<vmem>>, vector<256x64xf32>,
    %c0_92 = arith.constant 0 : index
    %c1_93 = arith.constant 1 : index
    %c0_94 = arith.constant 0 : index
    %c0_95 = arith.constant 0 : index
    %86 = vector.load %arg8[%c0_92, %c1_93, %c0_94, %c0_95] : memref<3x18x16x64xbf16, #tpu.memory_space<vmem>>, vector<1x16x16x64xbf16>
    %87 = vector.shape_cast %86 : vector<1x16x16x64xbf16> to vector<16x16x64xbf16>
    %88 = vector.shape_cast %87 : vector<16x16x64xbf16> to vector<256x64xbf16>
    %c0_96 = arith.constant 0 : index
    %c0_97 = arith.constant 0 : index
    %89 = vector.load %arg9[%c0_96, %c0_97] : memref<256x64xf32, #tpu.memory_space<vmem>>, vector<256x64xf32>
    %c3 = arith.constant 3 : index
    %c0_98 = arith.constant 0 : index
    %c0_99 = arith.constant 0 : index
    %90 = vector.load %arg6[%c3, %c0_98, %c0_99] : memref<9x64x64xbf16, #tpu.memory_space<vmem>>, vector<1x64x64xbf16>
    %91 = vector.shape_cast %90 : vector<1x64x64xbf16> to vector<64x64xbf16>
    %cst_100 = arith.constant dense<0.000000e+00> : vector<256x64xf32>
    %92 = tpu.matmul %88, %91, %cst_100 {dimension_numbers = #tpu.dot_dimension_numbers<[1], [0], [0], [1], [0, 0, 1, 1], [], []>} : vector<256x64xbf16>, vector<64x64xbf16>, vector<256x64xf32> -> vector<256x64xf32>
    %93 = arith.addf %89, %92 : vector<256x64xf32>
    %c0_101 = arith.constant 0 : index
    %c0_102 = arith.constant 0 : index
    %94 = vector.load %arg9[%c0_101, %c0_102] : memref<256x64xf32, #tpu.memory_space<vmem>>, vector<256x64xf32>
    tpu.vector_store %arg9[%c0_101, %c0_102], %93 {strides = array<i32>} : memref<256x64xf32, #tpu.memory_space<vmem>>, vector<256x64xf32>,
    %c1_103 = arith.constant 1 : index
    %c1_104 = arith.constant 1 : index
    %c0_105 = arith.constant 0 : index
    %c0_106 = arith.constant 0 : index
    %95 = vector.load %arg8[%c1_103, %c1_104, %c0_105, %c0_106] : memref<3x18x16x64xbf16, #tpu.memory_space<vmem>>, vector<1x16x16x64xbf16>
    %96 = vector.shape_cast %95 : vector<1x16x16x64xbf16> to vector<16x16x64xbf16>
    %97 = vector.shape_cast %96 : vector<16x16x64xbf16> to vector<256x64xbf16>
    %c0_107 = arith.constant 0 : index
    %c0_108 = arith.constant 0 : index
    %98 = vector.load %arg9[%c0_107, %c0_108] : memref<256x64xf32, #tpu.memory_space<vmem>>, vector<256x64xf32>
    %c4 = arith.constant 4 : index
    %c0_109 = arith.constant 0 : index
    %c0_110 = arith.constant 0 : index
    %99 = vector.load %arg6[%c4, %c0_109, %c0_110] : memref<9x64x64xbf16, #tpu.memory_space<vmem>>, vector<1x64x64xbf16>
    %100 = vector.shape_cast %99 : vector<1x64x64xbf16> to vector<64x64xbf16>
    %cst_111 = arith.constant dense<0.000000e+00> : vector<256x64xf32>
    %101 = tpu.matmul %97, %100, %cst_111 {dimension_numbers = #tpu.dot_dimension_numbers<[1], [0], [0], [1], [0, 0, 1, 1], [], []>} : vector<256x64xbf16>, vector<64x64xbf16>, vector<256x64xf32> -> vector<256x64xf32>
    %102 = arith.addf %98, %101 : vector<256x64xf32>
    %c0_112 = arith.constant 0 : index
    %c0_113 = arith.constant 0 : index
    %103 = vector.load %arg9[%c0_112, %c0_113] : memref<256x64xf32, #tpu.memory_space<vmem>>, vector<256x64xf32>
    tpu.vector_store %arg9[%c0_112, %c0_113], %102 {strides = array<i32>} : memref<256x64xf32, #tpu.memory_space<vmem>>, vector<256x64xf32>,
    %c2_114 = arith.constant 2 : index
    %c1_115 = arith.constant 1 : index
    %c0_116 = arith.constant 0 : index
    %c0_117 = arith.constant 0 : index
    %104 = vector.load %arg8[%c2_114, %c1_115, %c0_116, %c0_117] : memref<3x18x16x64xbf16, #tpu.memory_space<vmem>>, vector<1x16x16x64xbf16>
    %105 = vector.shape_cast %104 : vector<1x16x16x64xbf16> to vector<16x16x64xbf16>
    %106 = vector.shape_cast %105 : vector<16x16x64xbf16> to vector<256x64xbf16>
    %c0_118 = arith.constant 0 : index
    %c0_119 = arith.constant 0 : index
    %107 = vector.load %arg9[%c0_118, %c0_119] : memref<256x64xf32, #tpu.memory_space<vmem>>, vector<256x64xf32>
    %c5 = arith.constant 5 : index
    %c0_120 = arith.constant 0 : index
    %c0_121 = arith.constant 0 : index
    %108 = vector.load %arg6[%c5, %c0_120, %c0_121] : memref<9x64x64xbf16, #tpu.memory_space<vmem>>, vector<1x64x64xbf16>
    %109 = vector.shape_cast %108 : vector<1x64x64xbf16> to vector<64x64xbf16>
    %cst_122 = arith.constant dense<0.000000e+00> : vector<256x64xf32>
    %110 = tpu.matmul %106, %109, %cst_122 {dimension_numbers = #tpu.dot_dimension_numbers<[1], [0], [0], [1], [0, 0, 1, 1], [], []>} : vector<256x64xbf16>, vector<64x64xbf16>, vector<256x64xf32> -> vector<256x64xf32>
    %111 = arith.addf %107, %110 : vector<256x64xf32>
    %c0_123 = arith.constant 0 : index
    %c0_124 = arith.constant 0 : index
    %112 = vector.load %arg9[%c0_123, %c0_124] : memref<256x64xf32, #tpu.memory_space<vmem>>, vector<256x64xf32>
    tpu.vector_store %arg9[%c0_123, %c0_124], %111 {strides = array<i32>} : memref<256x64xf32, #tpu.memory_space<vmem>>, vector<256x64xf32>,
    %c0_125 = arith.constant 0 : index
    %c2_126 = arith.constant 2 : index
    %c0_127 = arith.constant 0 : index
    %c0_128 = arith.constant 0 : index
    %113 = vector.load %arg8[%c0_125, %c2_126, %c0_127, %c0_128] : memref<3x18x16x64xbf16, #tpu.memory_space<vmem>>, vector<1x16x16x64xbf16>
    %114 = vector.shape_cast %113 : vector<1x16x16x64xbf16> to vector<16x16x64xbf16>
    %115 = vector.shape_cast %114 : vector<16x16x64xbf16> to vector<256x64xbf16>
    %c0_129 = arith.constant 0 : index
    %c0_130 = arith.constant 0 : index
    %116 = vector.load %arg9[%c0_129, %c0_130] : memref<256x64xf32, #tpu.memory_space<vmem>>, vector<256x64xf32>
    %c6 = arith.constant 6 : index
    %c0_131 = arith.constant 0 : index
    %c0_132 = arith.constant 0 : index
    %117 = vector.load %arg6[%c6, %c0_131, %c0_132] : memref<9x64x64xbf16, #tpu.memory_space<vmem>>, vector<1x64x64xbf16>
    %118 = vector.shape_cast %117 : vector<1x64x64xbf16> to vector<64x64xbf16>
    %cst_133 = arith.constant dense<0.000000e+00> : vector<256x64xf32>
    %119 = tpu.matmul %115, %118, %cst_133 {dimension_numbers = #tpu.dot_dimension_numbers<[1], [0], [0], [1], [0, 0, 1, 1], [], []>} : vector<256x64xbf16>, vector<64x64xbf16>, vector<256x64xf32> -> vector<256x64xf32>
    %120 = arith.addf %116, %119 : vector<256x64xf32>
    %c0_134 = arith.constant 0 : index
    %c0_135 = arith.constant 0 : index
    %121 = vector.load %arg9[%c0_134, %c0_135] : memref<256x64xf32, #tpu.memory_space<vmem>>, vector<256x64xf32>
    tpu.vector_store %arg9[%c0_134, %c0_135], %120 {strides = array<i32>} : memref<256x64xf32, #tpu.memory_space<vmem>>, vector<256x64xf32>,
    %c1_136 = arith.constant 1 : index
    %c2_137 = arith.constant 2 : index
    %c0_138 = arith.constant 0 : index
    %c0_139 = arith.constant 0 : index
    %122 = vector.load %arg8[%c1_136, %c2_137, %c0_138, %c0_139] : memref<3x18x16x64xbf16, #tpu.memory_space<vmem>>, vector<1x16x16x64xbf16>
    %123 = vector.shape_cast %122 : vector<1x16x16x64xbf16> to vector<16x16x64xbf16>
    %124 = vector.shape_cast %123 : vector<16x16x64xbf16> to vector<256x64xbf16>
    %c0_140 = arith.constant 0 : index
    %c0_141 = arith.constant 0 : index
    %125 = vector.load %arg9[%c0_140, %c0_141] : memref<256x64xf32, #tpu.memory_space<vmem>>, vector<256x64xf32>
    %c7 = arith.constant 7 : index
    %c0_142 = arith.constant 0 : index
    %c0_143 = arith.constant 0 : index
    %126 = vector.load %arg6[%c7, %c0_142, %c0_143] : memref<9x64x64xbf16, #tpu.memory_space<vmem>>, vector<1x64x64xbf16>
    %127 = vector.shape_cast %126 : vector<1x64x64xbf16> to vector<64x64xbf16>
    %cst_144 = arith.constant dense<0.000000e+00> : vector<256x64xf32>
    %128 = tpu.matmul %124, %127, %cst_144 {dimension_numbers = #tpu.dot_dimension_numbers<[1], [0], [0], [1], [0, 0, 1, 1], [], []>} : vector<256x64xbf16>, vector<64x64xbf16>, vector<256x64xf32> -> vector<256x64xf32>
    %129 = arith.addf %125, %128 : vector<256x64xf32>
    %c0_145 = arith.constant 0 : index
    %c0_146 = arith.constant 0 : index
    %130 = vector.load %arg9[%c0_145, %c0_146] : memref<256x64xf32, #tpu.memory_space<vmem>>, vector<256x64xf32>
    tpu.vector_store %arg9[%c0_145, %c0_146], %129 {strides = array<i32>} : memref<256x64xf32, #tpu.memory_space<vmem>>, vector<256x64xf32>,
    %c2_147 = arith.constant 2 : index
    %c2_148 = arith.constant 2 : index
    %c0_149 = arith.constant 0 : index
    %c0_150 = arith.constant 0 : index
    %131 = vector.load %arg8[%c2_147, %c2_148, %c0_149, %c0_150] : memref<3x18x16x64xbf16, #tpu.memory_space<vmem>>, vector<1x16x16x64xbf16>
    %132 = vector.shape_cast %131 : vector<1x16x16x64xbf16> to vector<16x16x64xbf16>
    %133 = vector.shape_cast %132 : vector<16x16x64xbf16> to vector<256x64xbf16>
    %c0_151 = arith.constant 0 : index
    %c0_152 = arith.constant 0 : index
    %134 = vector.load %arg9[%c0_151, %c0_152] : memref<256x64xf32, #tpu.memory_space<vmem>>, vector<256x64xf32>
    %c8 = arith.constant 8 : index
    %c0_153 = arith.constant 0 : index
    %c0_154 = arith.constant 0 : index
    %135 = vector.load %arg6[%c8, %c0_153, %c0_154] : memref<9x64x64xbf16, #tpu.memory_space<vmem>>, vector<1x64x64xbf16>
    %136 = vector.shape_cast %135 : vector<1x64x64xbf16> to vector<64x64xbf16>
    %cst_155 = arith.constant dense<0.000000e+00> : vector<256x64xf32>
    %137 = tpu.matmul %133, %136, %cst_155 {dimension_numbers = #tpu.dot_dimension_numbers<[1], [0], [0], [1], [0, 0, 1, 1], [], []>} : vector<256x64xbf16>, vector<64x64xbf16>, vector<256x64xf32> -> vector<256x64xf32>
    %138 = arith.addf %134, %137 : vector<256x64xf32>
    %c0_156 = arith.constant 0 : index
    %c0_157 = arith.constant 0 : index
    %139 = vector.load %arg9[%c0_156, %c0_157] : memref<256x64xf32, #tpu.memory_space<vmem>>, vector<256x64xf32>
    tpu.vector_store %arg9[%c0_156, %c0_157], %138 {strides = array<i32>} : memref<256x64xf32, #tpu.memory_space<vmem>>, vector<256x64xf32>,
    %c0_i32_158 = arith.constant 0 : i32
    %140 = arith.cmpi eq, %arg2, %c0_i32_158 : i32
    %141 = arith.extui %140 : i1 to i32
    %c0_i32_159 = arith.constant 0 : i32
    %142 = arith.cmpi ne, %141, %c0_i32_159 : i32
    scf.if %142 {
      %c0_160 = arith.constant 0 : index
      %c0_161 = arith.constant 0 : index
      %143 = vector.load %arg9[%c0_160, %c0_161] : memref<256x64xf32, #tpu.memory_space<vmem>>, vector<256x64xf32>
      %144 = arith.truncf %143 : vector<256x64xf32> to vector<256x64xbf16>
      %c0_162 = arith.constant 0 : index
      %c0_163 = arith.constant 0 : index
      %c0_164 = arith.constant 0 : index
      %145 = vector.load %arg7[%c0_162, %c0_163, %c0_164] : memref<1x256x64xbf16, #tpu.memory_space<vmem>>, vector<1x256x64xbf16>
      %146 = vector.shape_cast %145 : vector<1x256x64xbf16> to vector<256x64xbf16>
      %147 = vector.shape_cast %144 : vector<256x64xbf16> to vector<1x256x64xbf16>
      tpu.vector_store %arg7[%c0_162, %c0_163, %c0_164], %147 {strides = array<i32>} : memref<1x256x64xbf16, #tpu.memory_space<vmem>>, vector<1x256x64xbf16>,
    } else {
    }
    return
  }
  func.func @transform_0(%arg0: i32, %arg1: i32, %arg2: i32) -> (i32, i32, i32, i32) {
    %c0_i32 = arith.constant 0 : i32
    %c0_i32_0 = arith.constant 0 : i32
    %c0_i32_1 = arith.constant 0 : i32
    return %arg0, %c0_i32, %c0_i32_0, %arg2 : i32, i32, i32, i32
  }
  func.func @transform_1(%arg0: i32, %arg1: i32, %arg2: i32) -> (i32, i32) {
    %c0_i32 = arith.constant 0 : i32
    %c0_i32_0 = arith.constant 0 : i32
    return %c0_i32, %arg2 : i32, i32
  }
  func.func @transform_2(%arg0: i32, %arg1: i32, %arg2: i32) -> (i32, i32) {
    %c0_i32 = arith.constant 0 : i32
    %c0_i32_0 = arith.constant 0 : i32
    return %c0_i32, %arg2 : i32, i32
  }
  func.func @transform_3(%arg0: i32, %arg1: i32, %arg2: i32) -> (i32, i32, i32) {
    %c0_i32 = arith.constant 0 : i32
    %c0_i32_0 = arith.constant 0 : i32
    return %c0_i32, %arg2, %arg1 : i32, i32, i32
  }
  func.func @transform_4(%arg0: i32, %arg1: i32, %arg2: i32) -> (i32, i32, i32) {
    %c0_i32 = arith.constant 0 : i32
    %c0_i32_0 = arith.constant 0 : i32
    return %arg0, %c0_i32, %arg1 : i32, i32, i32
  }
}

module attributes {stable_mosaic.version = 11 : i64} {
  func.func @_bnrelu_conv_kernel(%arg0: i32, %arg1: i32, %arg2: i32, %arg3: memref<1x16x16x64xbf16, #tpu.memory_space<vmem>>, %arg4: memref<1x64xf32, #tpu.memory_space<vmem>>, %arg5: memref<1x64xf32, #tpu.memory_space<vmem>>, %arg6: memref<9x64x64xbf16, #tpu.memory_space<vmem>>, %arg7: memref<1x256x64xf32, #tpu.memory_space<vmem>>, %arg8: memref<1x256x64xf32, #tpu.memory_space<vmem>>, %arg9: memref<3x18x16x64xbf16, #tpu.memory_space<vmem>>, %arg10: memref<256x64xf32, #tpu.memory_space<vmem>>) attributes {dimension_semantics = [#tpu.dimension_semantics<parallel>, #tpu.dimension_semantics<parallel>, #tpu.dimension_semantics<arbitrary>], iteration_bounds = array<i64: 2, 1, 1>, scalar_prefetch = 0 : i64, scratch_operands = 2 : i64, tpu.core_type = #tpu.core_type<tc>, window_params = [{transform_indices = @transform_0, window_bounds = array<i64: 1, 16, 16, 64>}, {transform_indices = @transform_1, window_bounds = array<i64: 1, 64>}, {transform_indices = @transform_2, window_bounds = array<i64: 1, 64>}, {transform_indices = @transform_3, window_bounds = array<i64: 9, 64, 64>}, {transform_indices = @transform_4, window_bounds = array<i64: 1, 256, 64>}, {transform_indices = @transform_5, window_bounds = array<i64: 1, 256, 64>}]} {
    %c0_i32 = arith.constant 0 : i32
    %0 = arith.cmpi eq, %arg2, %c0_i32 : i32
    %1 = arith.extui %0 : i1 to i32
    %c0_i32_0 = arith.constant 0 : i32
    %2 = arith.cmpi ne, %1, %c0_i32_0 : i32
    scf.if %2 {
      %cst_160 = arith.constant 0.000000e+00 : f32
      %144 = vector.broadcast %cst_160 : f32 to vector<256x64xf32>
      %c0_161 = arith.constant 0 : index
      %c0_162 = arith.constant 0 : index
      %145 = vector.load %arg10[%c0_161, %c0_162] : memref<256x64xf32, #tpu.memory_space<vmem>>, vector<256x64xf32>
      tpu.vector_store %arg10[%c0_161, %c0_162], %144 {strides = array<i32>} : memref<256x64xf32, #tpu.memory_space<vmem>>, vector<256x64xf32>,
    } else {
    }
    %c0 = arith.constant 0 : index
    %c0_1 = arith.constant 0 : index
    %c0_2 = arith.constant 0 : index
    %c0_3 = arith.constant 0 : index
    %3 = vector.load %arg3[%c0, %c0_1, %c0_2, %c0_3] : memref<1x16x16x64xbf16, #tpu.memory_space<vmem>>, vector<1x16x16x64xbf16>
    %4 = vector.shape_cast %3 : vector<1x16x16x64xbf16> to vector<16x16x64xbf16>
    %5 = arith.extf %4 : vector<16x16x64xbf16> to vector<16x16x64xf32>
    %c0_4 = arith.constant 0 : index
    %c0_5 = arith.constant 0 : index
    %6 = vector.load %arg4[%c0_4, %c0_5] : memref<1x64xf32, #tpu.memory_space<vmem>>, vector<1x64xf32>
    %7 = vector.shape_cast %6 : vector<1x64xf32> to vector<1x1x64xf32>
    %8 = vector.broadcast %7 : vector<1x1x64xf32> to vector<16x16x64xf32>
    %9 = arith.mulf %5, %8 : vector<16x16x64xf32>
    %c0_6 = arith.constant 0 : index
    %c0_7 = arith.constant 0 : index
    %10 = vector.load %arg5[%c0_6, %c0_7] : memref<1x64xf32, #tpu.memory_space<vmem>>, vector<1x64xf32>
    %11 = vector.shape_cast %10 : vector<1x64xf32> to vector<1x1x64xf32>
    %12 = vector.broadcast %11 : vector<1x1x64xf32> to vector<16x16x64xf32>
    %13 = arith.addf %9, %12 : vector<16x16x64xf32>
    %cst = arith.constant 0.000000e+00 : f32
    %14 = vector.broadcast %cst : f32 to vector<16x16x64xf32>
    %15 = arith.maximumf %13, %14 : vector<16x16x64xf32>
    %16 = arith.truncf %15 : vector<16x16x64xf32> to vector<16x16x64xbf16>
    %cst_8 = arith.constant 0.000000e+00 : bf16
    %17 = vector.broadcast %cst_8 : bf16 to vector<1x16x64xbf16>
    %c0_9 = arith.constant 0 : index
    %c0_10 = arith.constant 0 : index
    %c0_11 = arith.constant 0 : index
    %c0_12 = arith.constant 0 : index
    %18 = vector.load %arg9[%c0_9, %c0_10, %c0_11, %c0_12] : memref<3x18x16x64xbf16, #tpu.memory_space<vmem>>, vector<1x1x16x64xbf16>
    %19 = vector.shape_cast %18 : vector<1x1x16x64xbf16> to vector<1x16x64xbf16>
    %20 = vector.shape_cast %17 : vector<1x16x64xbf16> to vector<1x1x16x64xbf16>
    tpu.vector_store %arg9[%c0_9, %c0_10, %c0_11, %c0_12], %20 {strides = array<i32>} : memref<3x18x16x64xbf16, #tpu.memory_space<vmem>>, vector<1x1x16x64xbf16>,
    %cst_13 = arith.constant 0.000000e+00 : bf16
    %21 = vector.broadcast %cst_13 : bf16 to vector<1x16x64xbf16>
    %c0_14 = arith.constant 0 : index
    %c17 = arith.constant 17 : index
    %c0_15 = arith.constant 0 : index
    %c0_16 = arith.constant 0 : index
    %22 = vector.load %arg9[%c0_14, %c17, %c0_15, %c0_16] : memref<3x18x16x64xbf16, #tpu.memory_space<vmem>>, vector<1x1x16x64xbf16>
    %23 = vector.shape_cast %22 : vector<1x1x16x64xbf16> to vector<1x16x64xbf16>
    %24 = vector.shape_cast %21 : vector<1x16x64xbf16> to vector<1x1x16x64xbf16>
    tpu.vector_store %arg9[%c0_14, %c17, %c0_15, %c0_16], %24 {strides = array<i32>} : memref<3x18x16x64xbf16, #tpu.memory_space<vmem>>, vector<1x1x16x64xbf16>,
    %cst_17 = arith.constant 0.000000e+00 : bf16
    %25 = vector.broadcast %cst_17 : bf16 to vector<16x1x64xbf16>
    %c0_18 = arith.constant 0 : index
    %c1 = arith.constant 1 : index
    %c0_19 = arith.constant 0 : index
    %c0_20 = arith.constant 0 : index
    %26 = vector.load %arg9[%c0_18, %c1, %c0_19, %c0_20] : memref<3x18x16x64xbf16, #tpu.memory_space<vmem>>, vector<1x16x1x64xbf16>
    %27 = vector.shape_cast %26 : vector<1x16x1x64xbf16> to vector<16x1x64xbf16>
    %28 = vector.shape_cast %25 : vector<16x1x64xbf16> to vector<1x16x1x64xbf16>
    tpu.vector_store %arg9[%c0_18, %c1, %c0_19, %c0_20], %28 {strides = array<i32>} : memref<3x18x16x64xbf16, #tpu.memory_space<vmem>>, vector<1x16x1x64xbf16>,
    %29 = vector.extract_strided_slice %16 {offsets = [0, 0, 0], sizes = [16, 15, 64], strides = [1, 1, 1]} : vector<16x16x64xbf16> to vector<16x15x64xbf16>
    %c0_21 = arith.constant 0 : index
    %c1_22 = arith.constant 1 : index
    %c1_23 = arith.constant 1 : index
    %c0_24 = arith.constant 0 : index
    %30 = vector.load %arg9[%c0_21, %c1_22, %c1_23, %c0_24] : memref<3x18x16x64xbf16, #tpu.memory_space<vmem>>, vector<1x16x15x64xbf16>
    %31 = vector.shape_cast %30 : vector<1x16x15x64xbf16> to vector<16x15x64xbf16>
    %32 = vector.shape_cast %29 : vector<16x15x64xbf16> to vector<1x16x15x64xbf16>
    tpu.vector_store %arg9[%c0_21, %c1_22, %c1_23, %c0_24], %32 {strides = array<i32>} : memref<3x18x16x64xbf16, #tpu.memory_space<vmem>>, vector<1x16x15x64xbf16>,
    %cst_25 = arith.constant 0.000000e+00 : bf16
    %33 = vector.broadcast %cst_25 : bf16 to vector<1x16x64xbf16>
    %c1_26 = arith.constant 1 : index
    %c0_27 = arith.constant 0 : index
    %c0_28 = arith.constant 0 : index
    %c0_29 = arith.constant 0 : index
    %34 = vector.load %arg9[%c1_26, %c0_27, %c0_28, %c0_29] : memref<3x18x16x64xbf16, #tpu.memory_space<vmem>>, vector<1x1x16x64xbf16>
    %35 = vector.shape_cast %34 : vector<1x1x16x64xbf16> to vector<1x16x64xbf16>
    %36 = vector.shape_cast %33 : vector<1x16x64xbf16> to vector<1x1x16x64xbf16>
    tpu.vector_store %arg9[%c1_26, %c0_27, %c0_28, %c0_29], %36 {strides = array<i32>} : memref<3x18x16x64xbf16, #tpu.memory_space<vmem>>, vector<1x1x16x64xbf16>,
    %cst_30 = arith.constant 0.000000e+00 : bf16
    %37 = vector.broadcast %cst_30 : bf16 to vector<1x16x64xbf16>
    %c1_31 = arith.constant 1 : index
    %c17_32 = arith.constant 17 : index
    %c0_33 = arith.constant 0 : index
    %c0_34 = arith.constant 0 : index
    %38 = vector.load %arg9[%c1_31, %c17_32, %c0_33, %c0_34] : memref<3x18x16x64xbf16, #tpu.memory_space<vmem>>, vector<1x1x16x64xbf16>
    %39 = vector.shape_cast %38 : vector<1x1x16x64xbf16> to vector<1x16x64xbf16>
    %40 = vector.shape_cast %37 : vector<1x16x64xbf16> to vector<1x1x16x64xbf16>
    tpu.vector_store %arg9[%c1_31, %c17_32, %c0_33, %c0_34], %40 {strides = array<i32>} : memref<3x18x16x64xbf16, #tpu.memory_space<vmem>>, vector<1x1x16x64xbf16>,
    %c1_35 = arith.constant 1 : index
    %c1_36 = arith.constant 1 : index
    %c0_37 = arith.constant 0 : index
    %c0_38 = arith.constant 0 : index
    %41 = vector.load %arg9[%c1_35, %c1_36, %c0_37, %c0_38] : memref<3x18x16x64xbf16, #tpu.memory_space<vmem>>, vector<1x16x16x64xbf16>
    %42 = vector.shape_cast %41 : vector<1x16x16x64xbf16> to vector<16x16x64xbf16>
    %43 = vector.shape_cast %16 : vector<16x16x64xbf16> to vector<1x16x16x64xbf16>
    tpu.vector_store %arg9[%c1_35, %c1_36, %c0_37, %c0_38], %43 {strides = array<i32>} : memref<3x18x16x64xbf16, #tpu.memory_space<vmem>>, vector<1x16x16x64xbf16>,
    %cst_39 = arith.constant 0.000000e+00 : bf16
    %44 = vector.broadcast %cst_39 : bf16 to vector<1x16x64xbf16>
    %c2 = arith.constant 2 : index
    %c0_40 = arith.constant 0 : index
    %c0_41 = arith.constant 0 : index
    %c0_42 = arith.constant 0 : index
    %45 = vector.load %arg9[%c2, %c0_40, %c0_41, %c0_42] : memref<3x18x16x64xbf16, #tpu.memory_space<vmem>>, vector<1x1x16x64xbf16>
    %46 = vector.shape_cast %45 : vector<1x1x16x64xbf16> to vector<1x16x64xbf16>
    %47 = vector.shape_cast %44 : vector<1x16x64xbf16> to vector<1x1x16x64xbf16>
    tpu.vector_store %arg9[%c2, %c0_40, %c0_41, %c0_42], %47 {strides = array<i32>} : memref<3x18x16x64xbf16, #tpu.memory_space<vmem>>, vector<1x1x16x64xbf16>,
    %cst_43 = arith.constant 0.000000e+00 : bf16
    %48 = vector.broadcast %cst_43 : bf16 to vector<1x16x64xbf16>
    %c2_44 = arith.constant 2 : index
    %c17_45 = arith.constant 17 : index
    %c0_46 = arith.constant 0 : index
    %c0_47 = arith.constant 0 : index
    %49 = vector.load %arg9[%c2_44, %c17_45, %c0_46, %c0_47] : memref<3x18x16x64xbf16, #tpu.memory_space<vmem>>, vector<1x1x16x64xbf16>
    %50 = vector.shape_cast %49 : vector<1x1x16x64xbf16> to vector<1x16x64xbf16>
    %51 = vector.shape_cast %48 : vector<1x16x64xbf16> to vector<1x1x16x64xbf16>
    tpu.vector_store %arg9[%c2_44, %c17_45, %c0_46, %c0_47], %51 {strides = array<i32>} : memref<3x18x16x64xbf16, #tpu.memory_space<vmem>>, vector<1x1x16x64xbf16>,
    %cst_48 = arith.constant 0.000000e+00 : bf16
    %52 = vector.broadcast %cst_48 : bf16 to vector<16x1x64xbf16>
    %c2_49 = arith.constant 2 : index
    %c1_50 = arith.constant 1 : index
    %c15 = arith.constant 15 : index
    %c0_51 = arith.constant 0 : index
    %53 = vector.load %arg9[%c2_49, %c1_50, %c15, %c0_51] : memref<3x18x16x64xbf16, #tpu.memory_space<vmem>>, vector<1x16x1x64xbf16>
    %54 = vector.shape_cast %53 : vector<1x16x1x64xbf16> to vector<16x1x64xbf16>
    %55 = vector.shape_cast %52 : vector<16x1x64xbf16> to vector<1x16x1x64xbf16>
    tpu.vector_store %arg9[%c2_49, %c1_50, %c15, %c0_51], %55 {strides = array<i32>} : memref<3x18x16x64xbf16, #tpu.memory_space<vmem>>, vector<1x16x1x64xbf16>,
    %56 = vector.extract_strided_slice %16 {offsets = [0, 1, 0], sizes = [16, 15, 64], strides = [1, 1, 1]} : vector<16x16x64xbf16> to vector<16x15x64xbf16>
    %c2_52 = arith.constant 2 : index
    %c1_53 = arith.constant 1 : index
    %c0_54 = arith.constant 0 : index
    %c0_55 = arith.constant 0 : index
    %57 = vector.load %arg9[%c2_52, %c1_53, %c0_54, %c0_55] : memref<3x18x16x64xbf16, #tpu.memory_space<vmem>>, vector<1x16x15x64xbf16>
    %58 = vector.shape_cast %57 : vector<1x16x15x64xbf16> to vector<16x15x64xbf16>
    %59 = vector.shape_cast %56 : vector<16x15x64xbf16> to vector<1x16x15x64xbf16>
    tpu.vector_store %arg9[%c2_52, %c1_53, %c0_54, %c0_55], %59 {strides = array<i32>} : memref<3x18x16x64xbf16, #tpu.memory_space<vmem>>, vector<1x16x15x64xbf16>,
    %c0_56 = arith.constant 0 : index
    %c0_57 = arith.constant 0 : index
    %c0_58 = arith.constant 0 : index
    %c0_59 = arith.constant 0 : index
    %60 = vector.load %arg9[%c0_56, %c0_57, %c0_58, %c0_59] : memref<3x18x16x64xbf16, #tpu.memory_space<vmem>>, vector<1x16x16x64xbf16>
    %61 = vector.shape_cast %60 : vector<1x16x16x64xbf16> to vector<16x16x64xbf16>
    %62 = vector.shape_cast %61 : vector<16x16x64xbf16> to vector<256x64xbf16>
    %c0_60 = arith.constant 0 : index
    %c0_61 = arith.constant 0 : index
    %63 = vector.load %arg10[%c0_60, %c0_61] : memref<256x64xf32, #tpu.memory_space<vmem>>, vector<256x64xf32>
    %c0_62 = arith.constant 0 : index
    %c0_63 = arith.constant 0 : index
    %c0_64 = arith.constant 0 : index
    %64 = vector.load %arg6[%c0_62, %c0_63, %c0_64] : memref<9x64x64xbf16, #tpu.memory_space<vmem>>, vector<1x64x64xbf16>
    %65 = vector.shape_cast %64 : vector<1x64x64xbf16> to vector<64x64xbf16>
    %cst_65 = arith.constant dense<0.000000e+00> : vector<256x64xf32>
    %66 = tpu.matmul %62, %65, %cst_65 {dimension_numbers = #tpu.dot_dimension_numbers<[1], [0], [0], [1], [0, 0, 1, 1], [], []>} : vector<256x64xbf16>, vector<64x64xbf16>, vector<256x64xf32> -> vector<256x64xf32>
    %67 = arith.addf %63, %66 : vector<256x64xf32>
    %c0_66 = arith.constant 0 : index
    %c0_67 = arith.constant 0 : index
    %68 = vector.load %arg10[%c0_66, %c0_67] : memref<256x64xf32, #tpu.memory_space<vmem>>, vector<256x64xf32>
    tpu.vector_store %arg10[%c0_66, %c0_67], %67 {strides = array<i32>} : memref<256x64xf32, #tpu.memory_space<vmem>>, vector<256x64xf32>,
    %c1_68 = arith.constant 1 : index
    %c0_69 = arith.constant 0 : index
    %c0_70 = arith.constant 0 : index
    %c0_71 = arith.constant 0 : index
    %69 = vector.load %arg9[%c1_68, %c0_69, %c0_70, %c0_71] : memref<3x18x16x64xbf16, #tpu.memory_space<vmem>>, vector<1x16x16x64xbf16>
    %70 = vector.shape_cast %69 : vector<1x16x16x64xbf16> to vector<16x16x64xbf16>
    %71 = vector.shape_cast %70 : vector<16x16x64xbf16> to vector<256x64xbf16>
    %c0_72 = arith.constant 0 : index
    %c0_73 = arith.constant 0 : index
    %72 = vector.load %arg10[%c0_72, %c0_73] : memref<256x64xf32, #tpu.memory_space<vmem>>, vector<256x64xf32>
    %c1_74 = arith.constant 1 : index
    %c0_75 = arith.constant 0 : index
    %c0_76 = arith.constant 0 : index
    %73 = vector.load %arg6[%c1_74, %c0_75, %c0_76] : memref<9x64x64xbf16, #tpu.memory_space<vmem>>, vector<1x64x64xbf16>
    %74 = vector.shape_cast %73 : vector<1x64x64xbf16> to vector<64x64xbf16>
    %cst_77 = arith.constant dense<0.000000e+00> : vector<256x64xf32>
    %75 = tpu.matmul %71, %74, %cst_77 {dimension_numbers = #tpu.dot_dimension_numbers<[1], [0], [0], [1], [0, 0, 1, 1], [], []>} : vector<256x64xbf16>, vector<64x64xbf16>, vector<256x64xf32> -> vector<256x64xf32>
    %76 = arith.addf %72, %75 : vector<256x64xf32>
    %c0_78 = arith.constant 0 : index
    %c0_79 = arith.constant 0 : index
    %77 = vector.load %arg10[%c0_78, %c0_79] : memref<256x64xf32, #tpu.memory_space<vmem>>, vector<256x64xf32>
    tpu.vector_store %arg10[%c0_78, %c0_79], %76 {strides = array<i32>} : memref<256x64xf32, #tpu.memory_space<vmem>>, vector<256x64xf32>,
    %c2_80 = arith.constant 2 : index
    %c0_81 = arith.constant 0 : index
    %c0_82 = arith.constant 0 : index
    %c0_83 = arith.constant 0 : index
    %78 = vector.load %arg9[%c2_80, %c0_81, %c0_82, %c0_83] : memref<3x18x16x64xbf16, #tpu.memory_space<vmem>>, vector<1x16x16x64xbf16>
    %79 = vector.shape_cast %78 : vector<1x16x16x64xbf16> to vector<16x16x64xbf16>
    %80 = vector.shape_cast %79 : vector<16x16x64xbf16> to vector<256x64xbf16>
    %c0_84 = arith.constant 0 : index
    %c0_85 = arith.constant 0 : index
    %81 = vector.load %arg10[%c0_84, %c0_85] : memref<256x64xf32, #tpu.memory_space<vmem>>, vector<256x64xf32>
    %c2_86 = arith.constant 2 : index
    %c0_87 = arith.constant 0 : index
    %c0_88 = arith.constant 0 : index
    %82 = vector.load %arg6[%c2_86, %c0_87, %c0_88] : memref<9x64x64xbf16, #tpu.memory_space<vmem>>, vector<1x64x64xbf16>
    %83 = vector.shape_cast %82 : vector<1x64x64xbf16> to vector<64x64xbf16>
    %cst_89 = arith.constant dense<0.000000e+00> : vector<256x64xf32>
    %84 = tpu.matmul %80, %83, %cst_89 {dimension_numbers = #tpu.dot_dimension_numbers<[1], [0], [0], [1], [0, 0, 1, 1], [], []>} : vector<256x64xbf16>, vector<64x64xbf16>, vector<256x64xf32> -> vector<256x64xf32>
    %85 = arith.addf %81, %84 : vector<256x64xf32>
    %c0_90 = arith.constant 0 : index
    %c0_91 = arith.constant 0 : index
    %86 = vector.load %arg10[%c0_90, %c0_91] : memref<256x64xf32, #tpu.memory_space<vmem>>, vector<256x64xf32>
    tpu.vector_store %arg10[%c0_90, %c0_91], %85 {strides = array<i32>} : memref<256x64xf32, #tpu.memory_space<vmem>>, vector<256x64xf32>,
    %c0_92 = arith.constant 0 : index
    %c1_93 = arith.constant 1 : index
    %c0_94 = arith.constant 0 : index
    %c0_95 = arith.constant 0 : index
    %87 = vector.load %arg9[%c0_92, %c1_93, %c0_94, %c0_95] : memref<3x18x16x64xbf16, #tpu.memory_space<vmem>>, vector<1x16x16x64xbf16>
    %88 = vector.shape_cast %87 : vector<1x16x16x64xbf16> to vector<16x16x64xbf16>
    %89 = vector.shape_cast %88 : vector<16x16x64xbf16> to vector<256x64xbf16>
    %c0_96 = arith.constant 0 : index
    %c0_97 = arith.constant 0 : index
    %90 = vector.load %arg10[%c0_96, %c0_97] : memref<256x64xf32, #tpu.memory_space<vmem>>, vector<256x64xf32>
    %c3 = arith.constant 3 : index
    %c0_98 = arith.constant 0 : index
    %c0_99 = arith.constant 0 : index
    %91 = vector.load %arg6[%c3, %c0_98, %c0_99] : memref<9x64x64xbf16, #tpu.memory_space<vmem>>, vector<1x64x64xbf16>
    %92 = vector.shape_cast %91 : vector<1x64x64xbf16> to vector<64x64xbf16>
    %cst_100 = arith.constant dense<0.000000e+00> : vector<256x64xf32>
    %93 = tpu.matmul %89, %92, %cst_100 {dimension_numbers = #tpu.dot_dimension_numbers<[1], [0], [0], [1], [0, 0, 1, 1], [], []>} : vector<256x64xbf16>, vector<64x64xbf16>, vector<256x64xf32> -> vector<256x64xf32>
    %94 = arith.addf %90, %93 : vector<256x64xf32>
    %c0_101 = arith.constant 0 : index
    %c0_102 = arith.constant 0 : index
    %95 = vector.load %arg10[%c0_101, %c0_102] : memref<256x64xf32, #tpu.memory_space<vmem>>, vector<256x64xf32>
    tpu.vector_store %arg10[%c0_101, %c0_102], %94 {strides = array<i32>} : memref<256x64xf32, #tpu.memory_space<vmem>>, vector<256x64xf32>,
    %c1_103 = arith.constant 1 : index
    %c1_104 = arith.constant 1 : index
    %c0_105 = arith.constant 0 : index
    %c0_106 = arith.constant 0 : index
    %96 = vector.load %arg9[%c1_103, %c1_104, %c0_105, %c0_106] : memref<3x18x16x64xbf16, #tpu.memory_space<vmem>>, vector<1x16x16x64xbf16>
    %97 = vector.shape_cast %96 : vector<1x16x16x64xbf16> to vector<16x16x64xbf16>
    %98 = vector.shape_cast %97 : vector<16x16x64xbf16> to vector<256x64xbf16>
    %c0_107 = arith.constant 0 : index
    %c0_108 = arith.constant 0 : index
    %99 = vector.load %arg10[%c0_107, %c0_108] : memref<256x64xf32, #tpu.memory_space<vmem>>, vector<256x64xf32>
    %c4 = arith.constant 4 : index
    %c0_109 = arith.constant 0 : index
    %c0_110 = arith.constant 0 : index
    %100 = vector.load %arg6[%c4, %c0_109, %c0_110] : memref<9x64x64xbf16, #tpu.memory_space<vmem>>, vector<1x64x64xbf16>
    %101 = vector.shape_cast %100 : vector<1x64x64xbf16> to vector<64x64xbf16>
    %cst_111 = arith.constant dense<0.000000e+00> : vector<256x64xf32>
    %102 = tpu.matmul %98, %101, %cst_111 {dimension_numbers = #tpu.dot_dimension_numbers<[1], [0], [0], [1], [0, 0, 1, 1], [], []>} : vector<256x64xbf16>, vector<64x64xbf16>, vector<256x64xf32> -> vector<256x64xf32>
    %103 = arith.addf %99, %102 : vector<256x64xf32>
    %c0_112 = arith.constant 0 : index
    %c0_113 = arith.constant 0 : index
    %104 = vector.load %arg10[%c0_112, %c0_113] : memref<256x64xf32, #tpu.memory_space<vmem>>, vector<256x64xf32>
    tpu.vector_store %arg10[%c0_112, %c0_113], %103 {strides = array<i32>} : memref<256x64xf32, #tpu.memory_space<vmem>>, vector<256x64xf32>,
    %c2_114 = arith.constant 2 : index
    %c1_115 = arith.constant 1 : index
    %c0_116 = arith.constant 0 : index
    %c0_117 = arith.constant 0 : index
    %105 = vector.load %arg9[%c2_114, %c1_115, %c0_116, %c0_117] : memref<3x18x16x64xbf16, #tpu.memory_space<vmem>>, vector<1x16x16x64xbf16>
    %106 = vector.shape_cast %105 : vector<1x16x16x64xbf16> to vector<16x16x64xbf16>
    %107 = vector.shape_cast %106 : vector<16x16x64xbf16> to vector<256x64xbf16>
    %c0_118 = arith.constant 0 : index
    %c0_119 = arith.constant 0 : index
    %108 = vector.load %arg10[%c0_118, %c0_119] : memref<256x64xf32, #tpu.memory_space<vmem>>, vector<256x64xf32>
    %c5 = arith.constant 5 : index
    %c0_120 = arith.constant 0 : index
    %c0_121 = arith.constant 0 : index
    %109 = vector.load %arg6[%c5, %c0_120, %c0_121] : memref<9x64x64xbf16, #tpu.memory_space<vmem>>, vector<1x64x64xbf16>
    %110 = vector.shape_cast %109 : vector<1x64x64xbf16> to vector<64x64xbf16>
    %cst_122 = arith.constant dense<0.000000e+00> : vector<256x64xf32>
    %111 = tpu.matmul %107, %110, %cst_122 {dimension_numbers = #tpu.dot_dimension_numbers<[1], [0], [0], [1], [0, 0, 1, 1], [], []>} : vector<256x64xbf16>, vector<64x64xbf16>, vector<256x64xf32> -> vector<256x64xf32>
    %112 = arith.addf %108, %111 : vector<256x64xf32>
    %c0_123 = arith.constant 0 : index
    %c0_124 = arith.constant 0 : index
    %113 = vector.load %arg10[%c0_123, %c0_124] : memref<256x64xf32, #tpu.memory_space<vmem>>, vector<256x64xf32>
    tpu.vector_store %arg10[%c0_123, %c0_124], %112 {strides = array<i32>} : memref<256x64xf32, #tpu.memory_space<vmem>>, vector<256x64xf32>,
    %c0_125 = arith.constant 0 : index
    %c2_126 = arith.constant 2 : index
    %c0_127 = arith.constant 0 : index
    %c0_128 = arith.constant 0 : index
    %114 = vector.load %arg9[%c0_125, %c2_126, %c0_127, %c0_128] : memref<3x18x16x64xbf16, #tpu.memory_space<vmem>>, vector<1x16x16x64xbf16>
    %115 = vector.shape_cast %114 : vector<1x16x16x64xbf16> to vector<16x16x64xbf16>
    %116 = vector.shape_cast %115 : vector<16x16x64xbf16> to vector<256x64xbf16>
    %c0_129 = arith.constant 0 : index
    %c0_130 = arith.constant 0 : index
    %117 = vector.load %arg10[%c0_129, %c0_130] : memref<256x64xf32, #tpu.memory_space<vmem>>, vector<256x64xf32>
    %c6 = arith.constant 6 : index
    %c0_131 = arith.constant 0 : index
    %c0_132 = arith.constant 0 : index
    %118 = vector.load %arg6[%c6, %c0_131, %c0_132] : memref<9x64x64xbf16, #tpu.memory_space<vmem>>, vector<1x64x64xbf16>
    %119 = vector.shape_cast %118 : vector<1x64x64xbf16> to vector<64x64xbf16>
    %cst_133 = arith.constant dense<0.000000e+00> : vector<256x64xf32>
    %120 = tpu.matmul %116, %119, %cst_133 {dimension_numbers = #tpu.dot_dimension_numbers<[1], [0], [0], [1], [0, 0, 1, 1], [], []>} : vector<256x64xbf16>, vector<64x64xbf16>, vector<256x64xf32> -> vector<256x64xf32>
    %121 = arith.addf %117, %120 : vector<256x64xf32>
    %c0_134 = arith.constant 0 : index
    %c0_135 = arith.constant 0 : index
    %122 = vector.load %arg10[%c0_134, %c0_135] : memref<256x64xf32, #tpu.memory_space<vmem>>, vector<256x64xf32>
    tpu.vector_store %arg10[%c0_134, %c0_135], %121 {strides = array<i32>} : memref<256x64xf32, #tpu.memory_space<vmem>>, vector<256x64xf32>,
    %c1_136 = arith.constant 1 : index
    %c2_137 = arith.constant 2 : index
    %c0_138 = arith.constant 0 : index
    %c0_139 = arith.constant 0 : index
    %123 = vector.load %arg9[%c1_136, %c2_137, %c0_138, %c0_139] : memref<3x18x16x64xbf16, #tpu.memory_space<vmem>>, vector<1x16x16x64xbf16>
    %124 = vector.shape_cast %123 : vector<1x16x16x64xbf16> to vector<16x16x64xbf16>
    %125 = vector.shape_cast %124 : vector<16x16x64xbf16> to vector<256x64xbf16>
    %c0_140 = arith.constant 0 : index
    %c0_141 = arith.constant 0 : index
    %126 = vector.load %arg10[%c0_140, %c0_141] : memref<256x64xf32, #tpu.memory_space<vmem>>, vector<256x64xf32>
    %c7 = arith.constant 7 : index
    %c0_142 = arith.constant 0 : index
    %c0_143 = arith.constant 0 : index
    %127 = vector.load %arg6[%c7, %c0_142, %c0_143] : memref<9x64x64xbf16, #tpu.memory_space<vmem>>, vector<1x64x64xbf16>
    %128 = vector.shape_cast %127 : vector<1x64x64xbf16> to vector<64x64xbf16>
    %cst_144 = arith.constant dense<0.000000e+00> : vector<256x64xf32>
    %129 = tpu.matmul %125, %128, %cst_144 {dimension_numbers = #tpu.dot_dimension_numbers<[1], [0], [0], [1], [0, 0, 1, 1], [], []>} : vector<256x64xbf16>, vector<64x64xbf16>, vector<256x64xf32> -> vector<256x64xf32>
    %130 = arith.addf %126, %129 : vector<256x64xf32>
    %c0_145 = arith.constant 0 : index
    %c0_146 = arith.constant 0 : index
    %131 = vector.load %arg10[%c0_145, %c0_146] : memref<256x64xf32, #tpu.memory_space<vmem>>, vector<256x64xf32>
    tpu.vector_store %arg10[%c0_145, %c0_146], %130 {strides = array<i32>} : memref<256x64xf32, #tpu.memory_space<vmem>>, vector<256x64xf32>,
    %c2_147 = arith.constant 2 : index
    %c2_148 = arith.constant 2 : index
    %c0_149 = arith.constant 0 : index
    %c0_150 = arith.constant 0 : index
    %132 = vector.load %arg9[%c2_147, %c2_148, %c0_149, %c0_150] : memref<3x18x16x64xbf16, #tpu.memory_space<vmem>>, vector<1x16x16x64xbf16>
    %133 = vector.shape_cast %132 : vector<1x16x16x64xbf16> to vector<16x16x64xbf16>
    %134 = vector.shape_cast %133 : vector<16x16x64xbf16> to vector<256x64xbf16>
    %c0_151 = arith.constant 0 : index
    %c0_152 = arith.constant 0 : index
    %135 = vector.load %arg10[%c0_151, %c0_152] : memref<256x64xf32, #tpu.memory_space<vmem>>, vector<256x64xf32>
    %c8 = arith.constant 8 : index
    %c0_153 = arith.constant 0 : index
    %c0_154 = arith.constant 0 : index
    %136 = vector.load %arg6[%c8, %c0_153, %c0_154] : memref<9x64x64xbf16, #tpu.memory_space<vmem>>, vector<1x64x64xbf16>
    %137 = vector.shape_cast %136 : vector<1x64x64xbf16> to vector<64x64xbf16>
    %cst_155 = arith.constant dense<0.000000e+00> : vector<256x64xf32>
    %138 = tpu.matmul %134, %137, %cst_155 {dimension_numbers = #tpu.dot_dimension_numbers<[1], [0], [0], [1], [0, 0, 1, 1], [], []>} : vector<256x64xbf16>, vector<64x64xbf16>, vector<256x64xf32> -> vector<256x64xf32>
    %139 = arith.addf %135, %138 : vector<256x64xf32>
    %c0_156 = arith.constant 0 : index
    %c0_157 = arith.constant 0 : index
    %140 = vector.load %arg10[%c0_156, %c0_157] : memref<256x64xf32, #tpu.memory_space<vmem>>, vector<256x64xf32>
    tpu.vector_store %arg10[%c0_156, %c0_157], %139 {strides = array<i32>} : memref<256x64xf32, #tpu.memory_space<vmem>>, vector<256x64xf32>,
    %c0_i32_158 = arith.constant 0 : i32
    %141 = arith.cmpi eq, %arg2, %c0_i32_158 : i32
    %142 = arith.extui %141 : i1 to i32
    %c0_i32_159 = arith.constant 0 : i32
    %143 = arith.cmpi ne, %142, %c0_i32_159 : i32
    scf.if %143 {
      %c0_160 = arith.constant 0 : index
      %c0_161 = arith.constant 0 : index
      %144 = vector.load %arg10[%c0_160, %c0_161] : memref<256x64xf32, #tpu.memory_space<vmem>>, vector<256x64xf32>
      %c0_162 = arith.constant 0 : index
      %c0_163 = arith.constant 0 : index
      %c0_164 = arith.constant 0 : index
      %145 = vector.load %arg7[%c0_162, %c0_163, %c0_164] : memref<1x256x64xf32, #tpu.memory_space<vmem>>, vector<1x256x64xf32>
      %146 = vector.shape_cast %145 : vector<1x256x64xf32> to vector<256x64xf32>
      %147 = arith.addf %144, %146 : vector<256x64xf32>
      %c0_165 = arith.constant 0 : index
      %c0_166 = arith.constant 0 : index
      %c0_167 = arith.constant 0 : index
      %148 = vector.load %arg8[%c0_165, %c0_166, %c0_167] : memref<1x256x64xf32, #tpu.memory_space<vmem>>, vector<1x256x64xf32>
      %149 = vector.shape_cast %148 : vector<1x256x64xf32> to vector<256x64xf32>
      %150 = vector.shape_cast %147 : vector<256x64xf32> to vector<1x256x64xf32>
      tpu.vector_store %arg8[%c0_165, %c0_166, %c0_167], %150 {strides = array<i32>} : memref<1x256x64xf32, #tpu.memory_space<vmem>>, vector<1x256x64xf32>,
    } else {
    }
    return
  }
  func.func @transform_0(%arg0: i32, %arg1: i32, %arg2: i32) -> (i32, i32, i32, i32) {
    %c0_i32 = arith.constant 0 : i32
    %c0_i32_0 = arith.constant 0 : i32
    %c0_i32_1 = arith.constant 0 : i32
    return %arg0, %c0_i32, %c0_i32_0, %arg2 : i32, i32, i32, i32
  }
  func.func @transform_1(%arg0: i32, %arg1: i32, %arg2: i32) -> (i32, i32) {
    %c0_i32 = arith.constant 0 : i32
    %c0_i32_0 = arith.constant 0 : i32
    return %c0_i32, %arg2 : i32, i32
  }
  func.func @transform_2(%arg0: i32, %arg1: i32, %arg2: i32) -> (i32, i32) {
    %c0_i32 = arith.constant 0 : i32
    %c0_i32_0 = arith.constant 0 : i32
    return %c0_i32, %arg2 : i32, i32
  }
  func.func @transform_3(%arg0: i32, %arg1: i32, %arg2: i32) -> (i32, i32, i32) {
    %c0_i32 = arith.constant 0 : i32
    %c0_i32_0 = arith.constant 0 : i32
    return %c0_i32, %arg2, %arg1 : i32, i32, i32
  }
  func.func @transform_4(%arg0: i32, %arg1: i32, %arg2: i32) -> (i32, i32, i32) {
    %c0_i32 = arith.constant 0 : i32
    %c0_i32_0 = arith.constant 0 : i32
    return %arg0, %c0_i32, %arg1 : i32, i32, i32
  }
  func.func @transform_5(%arg0: i32, %arg1: i32, %arg2: i32) -> (i32, i32, i32) {
    %c0_i32 = arith.constant 0 : i32
    %c0_i32_0 = arith.constant 0 : i32
    return %arg0, %c0_i32, %arg1 : i32, i32, i32
  }
}

</mosaic_0001>

<bundles_post_ra>
// kernel: preact_basic_block_forward.6
= control target key start
LH: loop header
LB: loop body
LE: loop exit
PB: predicated region body
PF: predicated region fallthrough
CT: control target
= control target key end

     0   :  { %vm20_vm0 = vcmask 516096   ;;  %v686_v0 = vmov 0.0   ;;  %vm152_vm1 = vcmask 523264   ;;  %s954_s0 = inlined_call_operand.vmem [shape: bf16[512,64], index: 0, kind: input, shape index: {}]   ;;  %s955_s1 = inlined_call_operand.vmem [shape: f32[1,64], index: 1, kind: input, shape index: {}]   ;;  %s956_s2 = inlined_call_operand.vmem [shape: f32[1,64], index: 2, kind: input, shape index: {}]   ;;  %s957_s3 = inlined_call_operand.vmem [shape: f32[1,64], index: 3, kind: output, shape index: {0}]   ;;  %s958_s4 = inlined_call_operand.vmem [shape: f32[1,64], index: 4, kind: output, shape index: {1}]  }
   0x1   :  { %21 = vst.msk [vmem:[#allocation2] sm:$0x1] %vm20_vm0, %v686_v0  ;;  %v525_v1 = vld [vmem:[%s954_s0] sm:$0xff]   ;;  %v652_v2 = vld [vmem:[%s954_s0 + $0x8] sm:$0xff]   ;;  %v653_v6 = vld [vmem:[%s954_s0 + $0x10] sm:$0xff]  }
   0x2   :  { %22 = vst.msk [vmem:[#allocation3] sm:$0x1] %vm20_vm0, %v686_v0  ;;  %v526_v3 = vunpack.c.l.bf16 %v525_v1  ;;  %v527_v4 = vunpack.c.h.bf16 %v525_v1  ;;  %v530_v5 = vunpack.c.l.bf16 %v652_v2  ;;  %v531_v7 = vunpack.c.h.bf16 %v652_v2  ;;  %v654_v12 = vld [vmem:[%s954_s0 + $0x18] sm:$0xff]   ;;  %v655_v19 = vld [vmem:[%s954_s0 + $0x20] sm:$0xff]   ;;  %v656_v27 = vld [vmem:[%s954_s0 + $0x28] sm:$0xff]  }
   0x3   :  { %v534_v8 = vunpack.c.l.bf16 %v653_v6  ;;  %v535_v14 = vunpack.c.h.bf16 %v653_v6  ;;  %v538_v17 = vunpack.c.l.bf16 %v654_v12  ;;  %v539_v21 = vunpack.c.h.bf16 %v654_v12  ;;  %v657_v38 = vld [vmem:[%s954_s0 + $0x30] sm:$0xff]   ;;  %v658_v52 = vld [vmem:[%s954_s0 + $0x38] sm:$0xff]   ;;  %v659_v1 = vld [vmem:[%s954_s0 + $0x40] sm:$0xff]  }
   0x4   :  { %v153_v9 = vsel %vm152_vm1, %v526_v3, 0.0  ;;  %v154_v10 = vsel %vm152_vm1, %v527_v4, 0.0  ;;  %v156_v11 = vsel %vm152_vm1, %v530_v5, 0.0  ;;  %v158_v15 = vsel %vm152_vm1, %v531_v7, 0.0 }
   0x5   :  { %v155_v13 = vadd.f32 %v154_v10, %v153_v9  ;;  %v160_v18 = vsel %vm152_vm1, %v534_v8, 0.0  ;;  %v162_v22 = vsel %vm152_vm1, %v535_v14, 0.0  ;;  %v542_v24 = vunpack.c.l.bf16 %v655_v19 }
   0x6   :  { %v164_v25 = vsel %vm152_vm1, %v538_v17, 0.0  ;;  %v290_v26 = vmul.f32 %v526_v3, %v526_v3  ;;  %v291_v29 = vmul.f32 %v527_v4, %v527_v4  ;;  %v292_v30 = vmul.f32 %v530_v5, %v530_v5 }
   0x7   :  { %v157_v16 = vadd.f32 %v156_v11, %v155_v13  ;;  %v543_v31 = vunpack.c.h.bf16 %v655_v19  ;;  %v166_v32 = vsel %vm152_vm1, %v539_v21, 0.0  ;;  %v293_v34 = vmul.f32 %v531_v7, %v531_v7 }
   0x8   :  { %v546_v35 = vunpack.c.l.bf16 %v656_v27  ;;  %v168_v36 = vsel %vm152_vm1, %v542_v24, 0.0  ;;  %v354_v37 = vsel %vm152_vm1, %v290_v26, 0.0  ;;  %v294_v40 = vmul.f32 %v534_v8, %v534_v8 }
   0x9   :  { %v159_v20 = vadd.f32 %v158_v15, %v157_v16  ;;  %v355_v41 = vsel %vm152_vm1, %v291_v29, 0.0  ;;  %v357_v42 = vsel %vm152_vm1, %v292_v30, 0.0  ;;  %v547_v43 = vunpack.c.h.bf16 %v656_v27  ;;  %v661_v27 = vld [vmem:[%s954_s0 + $0x50] sm:$0xff]  }
   0xa   :  { %v170_v44 = vsel %vm152_vm1, %v543_v31, 0.0  ;;  %v356_v45 = vadd.f32 %v355_v41, %v354_v37  ;;  %v295_v47 = vmul.f32 %v535_v14, %v535_v14  ;;  %v359_v48 = vsel %vm152_vm1, %v293_v34, 0.0  ;;  %v660_v14 = vld [vmem:[%s954_s0 + $0x48] sm:$0xff]  }
   0xb   :  { %v161_v23 = vadd.f32 %v160_v18, %v159_v20  ;;  %v550_v49 = vunpack.c.l.bf16 %v657_v38  ;;  %v172_v50 = vsel %vm152_vm1, %v546_v35, 0.0  ;;  %v296_v54 = vmul.f32 %v538_v17, %v538_v17 }
   0xc   :  { %v358_v51 = vadd.f32 %v357_v42, %v356_v45  ;;  %v361_v55 = vsel %vm152_vm1, %v294_v40, 0.0  ;;  %v551_v56 = vunpack.c.h.bf16 %v657_v38  ;;  %v174_v57 = vsel %vm152_vm1, %v547_v43, 0.0  ;;  %v662_v40 = vld [vmem:[%s954_s0 + $0x58] sm:$0xff]  }
   0xd   :  { %v163_v28 = vadd.f32 %v162_v22, %v161_v23  ;;  %v297_v60 = vmul.f32 %v539_v21, %v539_v21  ;;  %v363_v61 = vsel %vm152_vm1, %v295_v47, 0.0  ;;  %v554_v62 = vunpack.c.l.bf16 %v658_v52 }
   0xe   :  { %v360_v58 = vadd.f32 %v359_v48, %v358_v51  ;;  %v176_v63 = vsel %vm152_vm1, %v550_v49, 0.0  ;;  %v298_v3 = vmul.f32 %v542_v24, %v542_v24  ;;  %v365_v4 = vsel %vm152_vm1, %v296_v54, 0.0 }
   0xf   :  { %v165_v33 = vadd.f32 %v164_v25, %v163_v28  ;;  %v555_v5 = vunpack.c.h.bf16 %v658_v52  ;;  %v178_v6 = vsel %vm152_vm1, %v551_v56, 0.0  ;;  %v299_v9 = vmul.f32 %v543_v31, %v543_v31 }
  0x10   :  { %v362_v0 = vadd.f32 %v361_v55, %v360_v58  ;;  %v367_v10 = vsel %vm152_vm1, %v297_v60, 0.0  ;;  %v558_v11 = vunpack.c.l.bf16 %v659_v1  ;;  %v180_v12 = vsel %vm152_vm1, %v554_v62, 0.0 }
  0x11   :  { %v167_v39 = vadd.f32 %v166_v32, %v165_v33  ;;  %v300_v16 = vmul.f32 %v546_v35, %v546_v35  ;;  %v369_v17 = vsel %vm152_vm1, %v298_v3, 0.0  ;;  %v559_v18 = vunpack.c.h.bf16 %v659_v1 }
  0x12   :  { %v364_v7 = vadd.f32 %v363_v61, %v362_v0  ;;  %v182_v19 = vsel %vm152_vm1, %v555_v5, 0.0  ;;  %v301_v22 = vmul.f32 %v547_v43, %v547_v43  ;;  %v371_v23 = vsel %vm152_vm1, %v299_v9, 0.0 }
  0x13   :  { %v169_v46 = vadd.f32 %v168_v36, %v167_v39  ;;  %v562_v24 = vunpack.c.l.bf16 %v660_v14  ;;  %v184_v25 = vsel %vm152_vm1, %v558_v11, 0.0  ;;  %v302_v29 = vmul.f32 %v550_v49, %v550_v49 }
  0x14   :  { %v366_v13 = vadd.f32 %v365_v4, %v364_v7  ;;  %v373_v30 = vsel %vm152_vm1, %v300_v16, 0.0  ;;  %v563_v31 = vunpack.c.h.bf16 %v660_v14  ;;  %v186_v32 = vsel %vm152_vm1, %v559_v18, 0.0 }
  0x15   :  { %v171_v53 = vadd.f32 %v170_v44, %v169_v46  ;;  %v303_v35 = vmul.f32 %v551_v56, %v551_v56  ;;  %v375_v36 = vsel %vm152_vm1, %v301_v22, 0.0  ;;  %v566_v37 = vunpack.c.l.bf16 %v661_v27 }
  0x16   :  { %v368_v20 = vadd.f32 %v367_v10, %v366_v13  ;;  %v188_v38 = vsel %vm152_vm1, %v562_v24, 0.0  ;;  %v304_v42 = vmul.f32 %v554_v62, %v554_v62  ;;  %v377_v43 = vsel %vm152_vm1, %v302_v29, 0.0 }
  0x17   :  { %v173_v59 = vadd.f32 %v172_v50, %v171_v53  ;;  %v567_v44 = vunpack.c.h.bf16 %v661_v27  ;;  %v190_v45 = vsel %vm152_vm1, %v563_v31, 0.0  ;;  %v305_v48 = vmul.f32 %v555_v5, %v555_v5  ;;  %v663_v53 = vld [vmem:[%s954_s0 + $0x60] sm:$0xff]  }
  0x18   :  { %v370_v26 = vadd.f32 %v369_v17, %v368_v20  ;;  %v379_v49 = vsel %vm152_vm1, %v303_v35, 0.0  ;;  %v570_v50 = vunpack.c.l.bf16 %v662_v40  ;;  %v192_v51 = vsel %vm152_vm1, %v566_v37, 0.0 }
  0x19   :  { %v175_v2 = vadd.f32 %v174_v57, %v173_v59  ;;  %v306_v55 = vmul.f32 %v558_v11, %v558_v11  ;;  %v381_v56 = vsel %vm152_vm1, %v304_v42, 0.0  ;;  %v571_v57 = vunpack.c.h.bf16 %v662_v40 }
  0x1a   :  { %v372_v33 = vadd.f32 %v371_v23, %v370_v26  ;;  %v194_v58 = vsel %vm152_vm1, %v567_v44, 0.0  ;;  %v307_v61 = vmul.f32 %v559_v18, %v559_v18  ;;  %v383_v62 = vsel %vm152_vm1, %v305_v48, 0.0 }
  0x1b   :  { %v177_v8 = vadd.f32 %v176_v63, %v175_v2  ;;  %v574_v63 = vunpack.c.l.bf16 %v663_v53  ;;  %v196_v0 = vsel %vm152_vm1, %v570_v50, 0.0  ;;  %v664_v2 = vld [vmem:[%s954_s0 + $0x68] sm:$0xff]   ;;  %v308_v4 = vmul.f32 %v562_v24, %v562_v24 }
  0x1c   :  { %v374_v39 = vadd.f32 %v373_v30, %v372_v33  ;;  %v385_v5 = vsel %vm152_vm1, %v306_v55, 0.0  ;;  %v198_v7 = vsel %vm152_vm1, %v571_v57, 0.0  ;;  %v309_v10 = vmul.f32 %v563_v31, %v563_v31 }
  0x1d   :  { %v179_v15 = vadd.f32 %v178_v6, %v177_v8  ;;  %v575_v6 = vunpack.c.h.bf16 %v663_v53  ;;  %v387_v11 = vsel %vm152_vm1, %v307_v61, 0.0  ;;  %v200_v13 = vsel %vm152_vm1, %v574_v63, 0.0 }
  0x1e   :  { %v376_v46 = vadd.f32 %v375_v36, %v374_v39  ;;  %v310_v17 = vmul.f32 %v566_v37, %v566_v37  ;;  %v389_v18 = vsel %vm152_vm1, %v308_v4, 0.0  ;;  %v311_v23 = vmul.f32 %v567_v44, %v567_v44 }
  0x1f   :  { %v181_v21 = vadd.f32 %v180_v12, %v179_v15  ;;  %v578_v12 = vunpack.c.l.bf16 %v664_v2  ;;  %v665_v15 = vld [vmem:[%s954_s0 + $0x70] sm:$0xff]   ;;  %v202_v20 = vsel %vm152_vm1, %v575_v6, 0.0  ;;  %v391_v24 = vsel %vm152_vm1, %v309_v10, 0.0 }
  0x20   :  { %v378_v52 = vadd.f32 %v377_v43, %v376_v46  ;;  %v312_v30 = vmul.f32 %v570_v50, %v570_v50  ;;  %v393_v31 = vsel %vm152_vm1, %v310_v17, 0.0  ;;  %v313_v36 = vmul.f32 %v571_v57, %v571_v57 }
  0x21   :  { %v183_v28 = vadd.f32 %v182_v19, %v181_v21  ;;  %v579_v19 = vunpack.c.h.bf16 %v664_v2  ;;  %v204_v26 = vsel %vm152_vm1, %v578_v12, 0.0  ;;  %v395_v37 = vsel %vm152_vm1, %v311_v23, 0.0 }
  0x22   :  { %v380_v59 = vadd.f32 %v379_v49, %v378_v52  ;;  %v314_v43 = vmul.f32 %v574_v63, %v574_v63  ;;  %v397_v44 = vsel %vm152_vm1, %v312_v30, 0.0  ;;  %v315_v49 = vmul.f32 %v575_v6, %v575_v6 }
  0x23   :  { %v185_v34 = vadd.f32 %v184_v25, %v183_v28  ;;  %v582_v25 = vunpack.c.l.bf16 %v665_v15  ;;  %v666_v28 = vld [vmem:[%s954_s0 + $0x78] sm:$0xff]   ;;  %v206_v33 = vsel %vm152_vm1, %v579_v19, 0.0  ;;  %v399_v50 = vsel %vm152_vm1, %v313_v36, 0.0 }
  0x24   :  { %v382_v1 = vadd.f32 %v381_v56, %v380_v59  ;;  %v316_v56 = vmul.f32 %v578_v12, %v578_v12  ;;  %v401_v57 = vsel %vm152_vm1, %v314_v43, 0.0  ;;  %v403_v63 = vsel %vm152_vm1, %v315_v49, 0.0 }
  0x25   :  { %v187_v41 = vadd.f32 %v186_v32, %v185_v34  ;;  %v583_v32 = vunpack.c.h.bf16 %v665_v15  ;;  %v208_v39 = vsel %vm152_vm1, %v582_v25, 0.0 }
  0x26   :  { %v384_v8 = vadd.f32 %v383_v62, %v382_v1  ;;  %v317_v62 = vmul.f32 %v579_v19, %v579_v19  ;;  %v405_v6 = vsel %vm152_vm1, %v316_v56, 0.0 }
  0x27   :  { %v189_v47 = vadd.f32 %v188_v38, %v187_v41  ;;  %v586_v38 = vunpack.c.l.bf16 %v666_v28  ;;  %v667_v41 = vld [vmem:[%s954_s0 + $0x80] sm:$0xff]   ;;  %v210_v46 = vsel %vm152_vm1, %v583_v32, 0.0 }
  0x28   :  { %v386_v14 = vadd.f32 %v385_v5, %v384_v8  ;;  %v318_v5 = vmul.f32 %v582_v25, %v582_v25  ;;  %v407_v12 = vsel %vm152_vm1, %v317_v62, 0.0 }
  0x29   :  { %v191_v54 = vadd.f32 %v190_v45, %v189_v47  ;;  %v587_v45 = vunpack.c.h.bf16 %v666_v28  ;;  %v212_v52 = vsel %vm152_vm1, %v586_v38, 0.0 }
  0x2a   :  { %v388_v21 = vadd.f32 %v387_v11, %v386_v14  ;;  %v319_v11 = vmul.f32 %v583_v32, %v583_v32  ;;  %v409_v19 = vsel %vm152_vm1, %v318_v5, 0.0 }
  0x2b   :  { %v193_v60 = vadd.f32 %v192_v51, %v191_v54  ;;  %v590_v51 = vunpack.c.l.bf16 %v667_v41  ;;  %v668_v54 = vld [vmem:[%s954_s0 + $0x88] sm:$0xff]   ;;  %v214_v59 = vsel %vm152_vm1, %v587_v45, 0.0 }
  0x2c   :  { %v390_v27 = vadd.f32 %v389_v18, %v388_v21  ;;  %v320_v18 = vmul.f32 %v586_v38, %v586_v38  ;;  %v411_v25 = vsel %vm152_vm1, %v319_v11, 0.0 }
  0x2d   :  { %v195_v3 = vadd.f32 %v194_v58, %v193_v60  ;;  %v591_v58 = vunpack.c.h.bf16 %v667_v41  ;;  %v216_v1 = vsel %vm152_vm1, %v590_v51, 0.0 }
  0x2e   :  { %v392_v34 = vadd.f32 %v391_v24, %v390_v27  ;;  %v321_v24 = vmul.f32 %v587_v45, %v587_v45  ;;  %v413_v32 = vsel %vm152_vm1, %v320_v18, 0.0 }
  0x2f   :  { %v197_v9 = vadd.f32 %v196_v0, %v195_v3  ;;  %v594_v0 = vunpack.c.l.bf16 %v668_v54  ;;  %v669_v3 = vld [vmem:[%s954_s0 + $0x90] sm:$0xff]   ;;  %v218_v8 = vsel %vm152_vm1, %v591_v58, 0.0 }
  0x30   :  { %v394_v40 = vadd.f32 %v393_v31, %v392_v34  ;;  %v322_v31 = vmul.f32 %v590_v51, %v590_v51  ;;  %v415_v38 = vsel %vm152_vm1, %v321_v24, 0.0 }
  0x31   :  { %v199_v16 = vadd.f32 %v198_v7, %v197_v9  ;;  %v595_v7 = vunpack.c.h.bf16 %v668_v54  ;;  %v220_v14 = vsel %vm152_vm1, %v594_v0, 0.0 }
  0x32   :  { %v396_v47 = vadd.f32 %v395_v37, %v394_v40  ;;  %v323_v37 = vmul.f32 %v591_v58, %v591_v58  ;;  %v417_v45 = vsel %vm152_vm1, %v322_v31, 0.0 }
  0x33   :  { %v201_v22 = vadd.f32 %v200_v13, %v199_v16  ;;  %v598_v13 = vunpack.c.l.bf16 %v669_v3  ;;  %v670_v16 = vld [vmem:[%s954_s0 + $0x98] sm:$0xff]   ;;  %v222_v21 = vsel %vm152_vm1, %v595_v7, 0.0 }
  0x34   :  { %v398_v53 = vadd.f32 %v397_v44, %v396_v47  ;;  %v324_v44 = vmul.f32 %v594_v0, %v594_v0  ;;  %v419_v51 = vsel %vm152_vm1, %v323_v37, 0.0 }
  0x35   :  { %v203_v29 = vadd.f32 %v202_v20, %v201_v22  ;;  %v599_v20 = vunpack.c.h.bf16 %v669_v3  ;;  %v224_v27 = vsel %vm152_vm1, %v598_v13, 0.0 }
  0x36   :  { %v400_v60 = vadd.f32 %v399_v50, %v398_v53  ;;  %v325_v50 = vmul.f32 %v595_v7, %v595_v7  ;;  %v421_v58 = vsel %vm152_vm1, %v324_v44, 0.0 }
  0x37   :  { %v205_v35 = vadd.f32 %v204_v26, %v203_v29  ;;  %v602_v26 = vunpack.c.l.bf16 %v670_v16  ;;  %v671_v29 = vld [vmem:[%s954_s0 + $0xa0] sm:$0xff]   ;;  %v226_v34 = vsel %vm152_vm1, %v599_v20, 0.0 }
  0x38   :  { %v402_v2 = vadd.f32 %v401_v57, %v400_v60  ;;  %v326_v57 = vmul.f32 %v598_v13, %v598_v13  ;;  %v423_v0 = vsel %vm152_vm1, %v325_v50, 0.0 }
  0x39   :  { %v207_v42 = vadd.f32 %v206_v33, %v205_v35  ;;  %v603_v33 = vunpack.c.h.bf16 %v670_v16  ;;  %v228_v40 = vsel %vm152_vm1, %v602_v26, 0.0 }
  0x3a   :  { %v404_v9 = vadd.f32 %v403_v63, %v402_v2  ;;  %v327_v63 = vmul.f32 %v599_v20, %v599_v20  ;;  %v425_v7 = vsel %vm152_vm1, %v326_v57, 0.0 }
  0x3b   :  { %v209_v48 = vadd.f32 %v208_v39, %v207_v42  ;;  %v606_v39 = vunpack.c.l.bf16 %v671_v29  ;;  %v672_v42 = vld [vmem:[%s954_s0 + $0xa8] sm:$0xff]   ;;  %v230_v47 = vsel %vm152_vm1, %v603_v33, 0.0 }
  0x3c   :  { %v406_v15 = vadd.f32 %v405_v6, %v404_v9  ;;  %v328_v6 = vmul.f32 %v602_v26, %v602_v26  ;;  %v427_v13 = vsel %vm152_vm1, %v327_v63, 0.0 }
  0x3d   :  { %v211_v55 = vadd.f32 %v210_v46, %v209_v48  ;;  %v607_v46 = vunpack.c.h.bf16 %v671_v29  ;;  %v232_v53 = vsel %vm152_vm1, %v606_v39, 0.0 }
  0x3e   :  { %v408_v22 = vadd.f32 %v407_v12, %v406_v15  ;;  %v329_v12 = vmul.f32 %v603_v33, %v603_v33  ;;  %v429_v20 = vsel %vm152_vm1, %v328_v6, 0.0 }
  0x3f   :  { %v213_v61 = vadd.f32 %v212_v52, %v211_v55  ;;  %v610_v52 = vunpack.c.l.bf16 %v672_v42  ;;  %v673_v55 = vld [vmem:[%s954_s0 + $0xb0] sm:$0xff]   ;;  %v234_v60 = vsel %vm152_vm1, %v607_v46, 0.0 }
  0x40   :  { %v410_v28 = vadd.f32 %v409_v19, %v408_v22  ;;  %v330_v19 = vmul.f32 %v606_v39, %v606_v39  ;;  %v431_v26 = vsel %vm152_vm1, %v329_v12, 0.0 }
  0x41   :  { %v215_v4 = vadd.f32 %v214_v59, %v213_v61  ;;  %v611_v59 = vunpack.c.h.bf16 %v672_v42  ;;  %v236_v2 = vsel %vm152_vm1, %v610_v52, 0.0 }
  0x42   :  { %v412_v35 = vadd.f32 %v411_v25, %v410_v28  ;;  %v331_v25 = vmul.f32 %v607_v46, %v607_v46  ;;  %v433_v33 = vsel %vm152_vm1, %v330_v19, 0.0 }
  0x43   :  { %v217_v10 = vadd.f32 %v216_v1, %v215_v4  ;;  %v614_v1 = vunpack.c.l.bf16 %v673_v55  ;;  %v674_v4 = vld [vmem:[%s954_s0 + $0xb8] sm:$0xff]   ;;  %v238_v9 = vsel %vm152_vm1, %v611_v59, 0.0 }
  0x44   :  { %v414_v41 = vadd.f32 %v413_v32, %v412_v35  ;;  %v332_v32 = vmul.f32 %v610_v52, %v610_v52  ;;  %v435_v39 = vsel %vm152_vm1, %v331_v25, 0.0 }
  0x45   :  { %v219_v17 = vadd.f32 %v218_v8, %v217_v10  ;;  %v615_v8 = vunpack.c.h.bf16 %v673_v55  ;;  %v240_v15 = vsel %vm152_vm1, %v614_v1, 0.0 }
  0x46   :  { %v416_v48 = vadd.f32 %v415_v38, %v414_v41  ;;  %v333_v38 = vmul.f32 %v611_v59, %v611_v59  ;;  %v437_v46 = vsel %vm152_vm1, %v332_v32, 0.0 }
  0x47   :  { %v221_v23 = vadd.f32 %v220_v14, %v219_v17  ;;  %v618_v14 = vunpack.c.l.bf16 %v674_v4  ;;  %v675_v17 = vld [vmem:[%s954_s0 + $0xc0] sm:$0xff]   ;;  %v242_v22 = vsel %vm152_vm1, %v615_v8, 0.0 }
  0x48   :  { %v418_v54 = vadd.f32 %v417_v45, %v416_v48  ;;  %v334_v45 = vmul.f32 %v614_v1, %v614_v1  ;;  %v439_v52 = vsel %vm152_vm1, %v333_v38, 0.0 }
  0x49   :  { %v223_v30 = vadd.f32 %v222_v21, %v221_v23  ;;  %v619_v21 = vunpack.c.h.bf16 %v674_v4  ;;  %v244_v28 = vsel %vm152_vm1, %v618_v14, 0.0 }
  0x4a   :  { %v420_v61 = vadd.f32 %v419_v51, %v418_v54  ;;  %v335_v51 = vmul.f32 %v615_v8, %v615_v8  ;;  %v441_v59 = vsel %vm152_vm1, %v334_v45, 0.0 }
  0x4b   :  { %v225_v36 = vadd.f32 %v224_v27, %v223_v30  ;;  %v622_v27 = vunpack.c.l.bf16 %v675_v17  ;;  %v676_v30 = vld [vmem:[%s954_s0 + $0xc8] sm:$0xff]   ;;  %v246_v35 = vsel %vm152_vm1, %v619_v21, 0.0 }
  0x4c   :  { %v422_v3 = vadd.f32 %v421_v58, %v420_v61  ;;  %v336_v58 = vmul.f32 %v618_v14, %v618_v14  ;;  %v443_v1 = vsel %vm152_vm1, %v335_v51, 0.0 }
  0x4d   :  { %v227_v43 = vadd.f32 %v226_v34, %v225_v36  ;;  %v623_v34 = vunpack.c.h.bf16 %v675_v17  ;;  %v248_v41 = vsel %vm152_vm1, %v622_v27, 0.0 }
  0x4e   :  { %v424_v10 = vadd.f32 %v423_v0, %v422_v3  ;;  %v337_v0 = vmul.f32 %v619_v21, %v619_v21  ;;  %v445_v8 = vsel %vm152_vm1, %v336_v58, 0.0 }
  0x4f   :  { %v229_v49 = vadd.f32 %v228_v40, %v227_v43  ;;  %v626_v40 = vunpack.c.l.bf16 %v676_v30  ;;  %v677_v43 = vld [vmem:[%s954_s0 + $0xd0] sm:$0xff]   ;;  %v250_v48 = vsel %vm152_vm1, %v623_v34, 0.0 }
  0x50   :  { %v426_v16 = vadd.f32 %v425_v7, %v424_v10  ;;  %v338_v7 = vmul.f32 %v622_v27, %v622_v27  ;;  %v447_v14 = vsel %vm152_vm1, %v337_v0, 0.0 }
  0x51   :  { %v231_v56 = vadd.f32 %v230_v47, %v229_v49  ;;  %v627_v47 = vunpack.c.h.bf16 %v676_v30  ;;  %v252_v54 = vsel %vm152_vm1, %v626_v40, 0.0 }
  0x52   :  { %v428_v23 = vadd.f32 %v427_v13, %v426_v16  ;;  %v339_v13 = vmul.f32 %v623_v34, %v623_v34  ;;  %v449_v21 = vsel %vm152_vm1, %v338_v7, 0.0 }
  0x53   :  { %v233_v62 = vadd.f32 %v232_v53, %v231_v56  ;;  %v630_v53 = vunpack.c.l.bf16 %v677_v43  ;;  %v678_v56 = vld [vmem:[%s954_s0 + $0xd8] sm:$0xff]   ;;  %v254_v61 = vsel %vm152_vm1, %v627_v47, 0.0 }
  0x54   :  { %v430_v29 = vadd.f32 %v429_v20, %v428_v23  ;;  %v340_v20 = vmul.f32 %v626_v40, %v626_v40  ;;  %v451_v27 = vsel %vm152_vm1, %v339_v13, 0.0 }
  0x55   :  { %v235_v5 = vadd.f32 %v234_v60, %v233_v62  ;;  %v631_v60 = vunpack.c.h.bf16 %v677_v43  ;;  %v256_v3 = vsel %vm152_vm1, %v630_v53, 0.0 }
  0x56   :  { %v432_v36 = vadd.f32 %v431_v26, %v430_v29  ;;  %v341_v26 = vmul.f32 %v627_v47, %v627_v47  ;;  %v453_v34 = vsel %vm152_vm1, %v340_v20, 0.0 }
  0x57   :  { %v237_v11 = vadd.f32 %v236_v2, %v235_v5  ;;  %v634_v2 = vunpack.c.l.bf16 %v678_v56  ;;  %v679_v5 = vld [vmem:[%s954_s0 + $0xe0] sm:$0xff]   ;;  %v258_v10 = vsel %vm152_vm1, %v631_v60, 0.0 }
  0x58   :  { %v434_v42 = vadd.f32 %v433_v33, %v432_v36  ;;  %v342_v33 = vmul.f32 %v630_v53, %v630_v53  ;;  %v455_v40 = vsel %vm152_vm1, %v341_v26, 0.0 }
  0x59   :  { %v239_v18 = vadd.f32 %v238_v9, %v237_v11  ;;  %v635_v9 = vunpack.c.h.bf16 %v678_v56  ;;  %v260_v16 = vsel %vm152_vm1, %v634_v2, 0.0 }
  0x5a   :  { %v436_v49 = vadd.f32 %v435_v39, %v434_v42  ;;  %v343_v39 = vmul.f32 %v631_v60, %v631_v60  ;;  %v457_v47 = vsel %vm152_vm1, %v342_v33, 0.0 }
  0x5b   :  { %v241_v24 = vadd.f32 %v240_v15, %v239_v18  ;;  %v638_v15 = vunpack.c.l.bf16 %v679_v5  ;;  %v680_v18 = vld [vmem:[%s954_s0 + $0xe8] sm:$0xff]   ;;  %v262_v23 = vsel %vm152_vm1, %v635_v9, 0.0 }
  0x5c   :  { %v438_v55 = vadd.f32 %v437_v46, %v436_v49  ;;  %v344_v46 = vmul.f32 %v634_v2, %v634_v2  ;;  %v459_v53 = vsel %vm152_vm1, %v343_v39, 0.0 }
  0x5d   :  { %v243_v31 = vadd.f32 %v242_v22, %v241_v24  ;;  %v639_v22 = vunpack.c.h.bf16 %v679_v5  ;;  %v264_v29 = vsel %vm152_vm1, %v638_v15, 0.0  ;;  %v346_v58 = vmul.f32 %v638_v15, %v638_v15 }
  0x5e   :  { %v440_v62 = vadd.f32 %v439_v52, %v438_v55  ;;  %v345_v52 = vmul.f32 %v635_v9, %v635_v9 }
  0x5f   :  { %v245_v37 = vadd.f32 %v244_v28, %v243_v31  ;;  %v642_v28 = vunpack.c.l.bf16 %v680_v18  ;;  %v681_v31 = vld [vmem:[%s954_s0 + $0xf0] sm:$0xff]   ;;  %v266_v36 = vsel %vm152_vm1, %v639_v22, 0.0  ;;  %v347_v0 = vmul.f32 %v639_v22, %v639_v22 }
  0x60   :  { %v442_v4 = vadd.f32 %v441_v59, %v440_v62  ;;  %v461_v59 = vsel %vm152_vm1, %v344_v46, 0.0 }
  0x61   :  { %v247_v44 = vadd.f32 %v246_v35, %v245_v37  ;;  %v643_v35 = vunpack.c.h.bf16 %v680_v18  ;;  %v268_v42 = vsel %vm152_vm1, %v642_v28, 0.0  ;;  %v348_v5 = vmul.f32 %v642_v28, %v642_v28 }
  0x62   :  { %v444_v11 = vadd.f32 %v443_v1, %v442_v4  ;;  %v463_v1 = vsel %vm152_vm1, %v345_v52, 0.0 }
  0x63   :  { %v249_v50 = vadd.f32 %v248_v41, %v247_v44  ;;  %v646_v41 = vunpack.c.l.bf16 %v681_v31  ;;  %v682_v44 = vld [vmem:[%s954_s0 + $0xf8] sm:$0xff]   ;;  %v270_v49 = vsel %vm152_vm1, %v643_v35, 0.0  ;;  %v469_v15 = vsel %vm152_vm1, %v348_v5, 0.0 }
  0x64   :  { %v446_v17 = vadd.f32 %v445_v8, %v444_v11  ;;  %v651_v60 = vunpack.c.h.bf16 %v682_v44  ;;  %v467_v11 = vsel %vm152_vm1, %v347_v0, 0.0 }
  0x65   :  { %v251_v57 = vadd.f32 %v250_v48, %v249_v50  ;;  %v647_v48 = vunpack.c.h.bf16 %v681_v31  ;;  %v272_v55 = vsel %vm152_vm1, %v646_v41, 0.0 }
  0x66   :  { %v448_v24 = vadd.f32 %v447_v14, %v446_v17  ;;  %v278_v7 = vsel %vm152_vm1, %v651_v60, 0.0  ;;  %v350_v14 = vmul.f32 %v646_v41, %v646_v41  ;;  %v353_v26 = vmul.f32 %v651_v60, %v651_v60  ;;  %v509_v60 = vld [vmem:[%s955_s1] sm:$0x1] }
  0x67   :  { %v253_v63 = vadd.f32 %v252_v54, %v251_v57  ;;  %v650_v54 = vunpack.c.l.bf16 %v682_v44  ;;  %v351_v18 = vmul.f32 %v647_v48, %v647_v48  ;;  %v289_v44 = vld [vmem:[#allocation3] sm:$0x1] }
  0x68   :  { %v450_v30 = vadd.f32 %v449_v21, %v448_v24  ;;  %v479_v33 = vsel %vm152_vm1, %v353_v26, 0.0 }
  0x69   :  { %v255_v6 = vadd.f32 %v254_v61, %v253_v63  ;;  %v274_v61 = vsel %vm152_vm1, %v647_v48, 0.0  ;;  %v276_v2 = vsel %vm152_vm1, %v650_v54, 0.0  ;;  %v352_v22 = vmul.f32 %v650_v54, %v650_v54 }
  0x6a   :  { %v452_v37 = vadd.f32 %v451_v27, %v450_v30  ;;  %v475_v27 = vsel %vm152_vm1, %v351_v18, 0.0 }
  0x6b   :  { %v257_v12 = vadd.f32 %v256_v3, %v255_v6  ;;  %v465_v6 = vsel %vm152_vm1, %v346_v58, 0.0  ;;  %v477_v30 = vsel %vm152_vm1, %v352_v22, 0.0 }
  0x6c   :  { %v454_v43 = vadd.f32 %v453_v34, %v452_v37  ;;  %v151_v34 = vld [vmem:[#allocation2] sm:$0x1] }
  0x6d   :  { %v259_v19 = vadd.f32 %v258_v10, %v257_v12  ;;  %v349_v10 = vmul.f32 %v643_v35, %v643_v35 }
  0x6e   :  { %v456_v50 = vadd.f32 %v455_v40, %v454_v43 }
  0x6f   :  { %v261_v25 = vadd.f32 %v260_v16, %v259_v19  ;;  %v471_v19 = vsel %vm152_vm1, %v349_v10, 0.0 }
  0x70   :  { %v458_v56 = vadd.f32 %v457_v47, %v456_v50 }
  0x71   :  { %v263_v32 = vadd.f32 %v262_v23, %v261_v25  ;;  %v473_v23 = vsel %vm152_vm1, %v350_v14, 0.0 }
  0x72   :  { %v460_v62 = vadd.f32 %v459_v53, %v458_v56 }
  0x73   :  { %v265_v38 = vadd.f32 %v264_v29, %v263_v32 }
  0x74   :  { %v462_v3 = vadd.f32 %v461_v59, %v460_v62 }
  0x75   :  { %v267_v45 = vadd.f32 %v266_v36, %v265_v38 }
  0x76   :  { %v464_v8 = vadd.f32 %v463_v1, %v462_v3 }
  0x77   :  { %v269_v51 = vadd.f32 %v268_v42, %v267_v45 }
  0x78   :  { %v466_v12 = vadd.f32 %v465_v6, %v464_v8 }
  0x79   :  { %v271_v57 = vadd.f32 %v270_v49, %v269_v51 }
  0x7a   :  { %v468_v16 = vadd.f32 %v467_v11, %v466_v12 }
  0x7b   :  { %v273_v63 = vadd.f32 %v272_v55, %v271_v57 }
  0x7c   :  { %v470_v20 = vadd.f32 %v469_v15, %v468_v16 }
  0x7d   :  { %v275_v4 = vadd.f32 %v274_v61, %v273_v63  ;;  %v512_v63 = vld [vmem:[%s956_s2] sm:$0x1] }
  0x7e   :  { %v472_v24 = vadd.f32 %v471_v19, %v470_v20 }
  0x7f   :  { %v277_v9 = vadd.f32 %v276_v2, %v275_v4 }
  0x80   :  { %v474_v28 = vadd.f32 %v473_v23, %v472_v24 }
  0x81   :  { %v279_v13 = vadd.f32 %v278_v7, %v277_v9 }
  0x82   :  { %v476_v31 = vadd.f32 %v475_v27, %v474_v28 }
  0x83   :  { %v280_v17 = vrot.slane %v279_v13, 4 }
  0x84   :  { %v478_v35 = vadd.f32 %v477_v30, %v476_v31 }
  0x85   :  { %v281_v21 = vadd.f32 %v280_v17, %v279_v13 }
  0x86   :  { %v480_v37 = vadd.f32 %v479_v33, %v478_v35 }
  0x87   :  { %v282_v25 = vrot.slane %v281_v21, 2 }
  0x88   :  { %v481_v39 = vrot.slane %v480_v37, 4 }
  0x89   :  { %v283_v29 = vadd.f32 %v282_v25, %v281_v21 }
  0x8a   :  { %v482_v40 = vadd.f32 %v481_v39, %v480_v37 }
  0x8b   :  { %v284_v32 = vrot.slane %v283_v29, 1 }
  0x8c   :  { %v483_v41 = vrot.slane %v482_v40, 2 }
  0x8d   :  { %v285_v36 = vadd.f32 %v284_v32, %v283_v29 }
  0x8e   :  { %v484_v42 = vadd.f32 %v483_v41, %v482_v40 }
  0x8f   :  { %v286_v38 = vadd.f32 %v285_v36, %v151_v34 }
  0x90   :  { %v485_v43 = vrot.slane %v484_v42, 1 }
  0x91   :  { %288 = vst.msk [vmem:[#allocation2] sm:$0x1] %vm20_vm0, %v286_v38 }
  0x92   :  { %v486_v45 = vadd.f32 %v485_v43, %v484_v42 }
  0x94   :  { %v487_v46 = vadd.f32 %v486_v45, %v289_v44 }
  0x96   :  { %488 = vst.msk [vmem:[#allocation3] sm:$0x1] %vm20_vm0, %v487_v46 }
  0x98   :  { %v492_v47 = vld [vmem:[#allocation2] sm:$0x1] }
  0x99   :  { %v493_v48 = vmul.f32 0.001953125, %v492_v47 }
  0x9b   :  { %v496_v49 = vmul.f32 %v493_v48, %v493_v48 }
  0x9d   :  { %v494_v50 = vld [vmem:[#allocation3] sm:$0x1] }
  0x9e   :  { %v495_v51 = vmul.f32 0.001953125, %v494_v50 }
  0xa0   :  { %v497_v52 = vsub.f32 %v495_v51, %v496_v49 }
  0xa2   :  { %v498_v53 = vadd.f32 1e-05, %v497_v52 }
  0xa4   :  { %684 = vrsqrt.f32 %v498_v53  ;;  %vm505_vm3 = vweird.f32 %v498_v53 }
  0xaa   :  { %v685_v54 = vpop.eup %684 }
  0xab   :  { %v500_v55 = vmul.f32 %v685_v54, %v498_v53  ;;  %vm506_vm2 = vweird.f32 %v685_v54 }
  0xac   :  { %vm507_vm4 = vmor %vm505_vm3, %vm506_vm2 }
  0xad   :  { %v501_v56 = vmul.f32 %v685_v54, %v500_v55 }
  0xaf   :  { %v502_v57 = vmul.f32 0.5, %v501_v56 }
  0xb1   :  { %v503_v58 = vsub.f32 1.5, %v502_v57 }
  0xb3   :  { %v504_v59 = vmul.f32 %v685_v54, %v503_v58 }
  0xb5   :  { %v508_v61 = vsel %vm507_vm4, %v685_v54, %v504_v59 }
  0xb6   :  { %v510_v62 = vmul.f32 %v509_v60, %v508_v61 }
  0xb8   :  { %511 = vst.msk [vmem:[%s957_s3] sm:$0x1] %vm20_vm0, %v510_v62  ;;  %v513_v0 = vmul.f32 %v510_v62, %v493_v48 }
  0xba   :  { %v514_v1 = vsub.f32 %v512_v63, %v513_v0 }
  0xbc   :  { %515 = vst.msk [vmem:[%s958_s4] sm:$0x1] %vm20_vm0, %v514_v1 }

// kernel: preact_basic_block_forward.4
= control target key start
LH: loop header
LB: loop body
LE: loop exit
PB: predicated region body
PF: predicated region fallthrough
CT: control target
= control target key end

     0   :  { %10 = vsyncpa [#allocation5], 0  ;;  %s509_s18 = smov [#allocation4]   ;;  %s510_s20 = smov 128   ;;  %s687_s0 = inlined_call_operand.hbm [shape: f32[512,64], index: 0, kind: input, shape index: {}]   ;;  %s688_s1 = inlined_call_operand.vmem [shape: f32[1,64], index: 1, kind: input, shape index: {}]   ;;  %s689_s2 = inlined_call_operand.vmem [shape: f32[1,64], index: 2, kind: input, shape index: {}]   ;;  %s690_s3 = inlined_call_operand.vmem [shape: f32[1,64], index: 3, kind: output, shape index: {0}]   ;;  %s691_s4 = inlined_call_operand.vmem [shape: f32[1,64], index: 4, kind: output, shape index: {1}]  }
   0x1   :  { %s15_s17 = sshll.u32 %s687_s0, 4  ;;  %s17_s19 = sshll.u32 %s509_s18, 4  ;;  %s16_s17 = int_to_ptr.hbm [resolvable:$true] %s15_s17  ;;  %s18_s19 = int_to_ptr.vmem [resolvable:$true] %s17_s19 }
   0x2   :  { %s511_s21 = smov 8  }
   0x3   :  { %23 = dma.hbm_to_vmem [thread:$0]  %s16_s17, 8192, %s18_s19, [#allocation5], %s510_s20, %s510_s20, %s511_s21  }
   0x4   :  { %507 = dma.done.wait [#allocation5], 8192  }
   0x5   :  { %508 = vsyncadd [#allocation5], 4294959104  ;;  %vm36_vm0 = vcmask 516096   ;;  %v512_v0 = vmov 0.0   ;;  %vm104_vm1 = vcmask 523264   ;;  %v39_v1 = vld [vmem:[#allocation4] sm:$0xff] }
   0x6   :  { %37 = vst.msk [vmem:[#allocation2] sm:$0x1] %vm36_vm0, %v512_v0  ;;  %v40_v2 = vld [vmem:[#allocation4 + $0x8] sm:$0xff]  ;;  %v41_v3 = vld [vmem:[#allocation4 + $0x10] sm:$0xff]  ;;  %v42_v4 = vld [vmem:[#allocation4 + $0x18] sm:$0xff]  ;;  %v105_v5 = vsel %vm104_vm1, %v39_v1, 0.0  ;;  %v242_v22 = vmul.f32 %v39_v1, %v39_v1 }
   0x7   :  { %38 = vst.msk [vmem:[#allocation3] sm:$0x1] %vm36_vm0, %v512_v0  ;;  %v106_v6 = vsel %vm104_vm1, %v40_v2, 0.0  ;;  %v108_v7 = vsel %vm104_vm1, %v41_v3, 0.0  ;;  %v43_v8 = vld [vmem:[#allocation4 + $0x20] sm:$0xff]  ;;  %v110_v10 = vsel %vm104_vm1, %v42_v4, 0.0  ;;  %v243_v24 = vmul.f32 %v40_v2, %v40_v2 }
   0x8   :  { %v107_v9 = vadd.f32 %v106_v6, %v105_v5  ;;  %v44_v11 = vld [vmem:[#allocation4 + $0x28] sm:$0xff]  ;;  %v112_v13 = vsel %vm104_vm1, %v43_v8, 0.0  ;;  %v45_v14 = vld [vmem:[#allocation4 + $0x30] sm:$0xff]  ;;  %v46_v17 = vld [vmem:[#allocation4 + $0x38] sm:$0xff]  ;;  %v244_v25 = vmul.f32 %v41_v3, %v41_v3  ;;  %v245_v29 = vmul.f32 %v42_v4, %v42_v4 }
   0x9   :  { %v114_v16 = vsel %vm104_vm1, %v44_v11, 0.0  ;;  %v116_v19 = vsel %vm104_vm1, %v45_v14, 0.0  ;;  %v47_v20 = vld [vmem:[#allocation4 + $0x40] sm:$0xff]  ;;  %v118_v23 = vsel %vm104_vm1, %v46_v17, 0.0  ;;  %v48_v26 = vld [vmem:[#allocation4 + $0x48] sm:$0xff]  ;;  %v49_v30 = vld [vmem:[#allocation4 + $0x50] sm:$0xff]  ;;  %v246_v34 = vmul.f32 %v43_v8, %v43_v8 }
   0xa   :  { %v109_v12 = vadd.f32 %v108_v7, %v107_v9  ;;  %v120_v28 = vsel %vm104_vm1, %v47_v20, 0.0  ;;  %v306_v32 = vsel %vm104_vm1, %v242_v22, 0.0  ;;  %v122_v33 = vsel %vm104_vm1, %v48_v26, 0.0  ;;  %v50_v37 = vld [vmem:[#allocation4 + $0x58] sm:$0xff]  ;;  %v51_v43 = vld [vmem:[#allocation4 + $0x60] sm:$0xff]  ;;  %v52_v49 = vld [vmem:[#allocation4 + $0x68] sm:$0xff] }
   0xb   :  { %v307_v35 = vsel %vm104_vm1, %v243_v24, 0.0  ;;  %v309_v36 = vsel %vm104_vm1, %v244_v25, 0.0  ;;  %v124_v40 = vsel %vm104_vm1, %v49_v30, 0.0  ;;  %v247_v41 = vmul.f32 %v44_v11, %v44_v11  ;;  %v53_v55 = vld [vmem:[#allocation4 + $0x70] sm:$0xff]  ;;  %v54_v61 = vld [vmem:[#allocation4 + $0x78] sm:$0xff]  ;;  %v55_v3 = vld [vmem:[#allocation4 + $0x80] sm:$0xff] }
   0xc   :  { %v111_v15 = vadd.f32 %v110_v10, %v109_v12  ;;  %v308_v39 = vadd.f32 %v307_v35, %v306_v32  ;;  %v311_v42 = vsel %vm104_vm1, %v245_v29, 0.0  ;;  %v126_v46 = vsel %vm104_vm1, %v50_v37, 0.0  ;;  %v56_v9 = vld [vmem:[#allocation4 + $0x88] sm:$0xff] }
   0xd   :  { %v248_v47 = vmul.f32 %v45_v14, %v45_v14  ;;  %v313_v48 = vsel %vm104_vm1, %v246_v34, 0.0  ;;  %v128_v52 = vsel %vm104_vm1, %v51_v43, 0.0  ;;  %v249_v53 = vmul.f32 %v46_v17, %v46_v17 }
   0xe   :  { %v113_v18 = vadd.f32 %v112_v13, %v111_v15  ;;  %v310_v45 = vadd.f32 %v309_v36, %v308_v39  ;;  %v315_v54 = vsel %vm104_vm1, %v247_v41, 0.0  ;;  %v130_v58 = vsel %vm104_vm1, %v52_v49, 0.0  ;;  %v57_v15 = vld [vmem:[#allocation4 + $0x90] sm:$0xff] }
   0xf   :  { %v250_v59 = vmul.f32 %v47_v20, %v47_v20  ;;  %v317_v60 = vsel %vm104_vm1, %v248_v47, 0.0  ;;  %v132_v0 = vsel %vm104_vm1, %v53_v55, 0.0  ;;  %v251_v1 = vmul.f32 %v48_v26, %v48_v26  ;;  %v61_v39 = vld [vmem:[#allocation4 + $0xb0] sm:$0xff] }
  0x10   :  { %v115_v21 = vadd.f32 %v114_v16, %v113_v18  ;;  %v312_v51 = vadd.f32 %v311_v42, %v310_v45  ;;  %v319_v2 = vsel %vm104_vm1, %v249_v53, 0.0  ;;  %v134_v6 = vsel %vm104_vm1, %v54_v61, 0.0  ;;  %v62_v45 = vld [vmem:[#allocation4 + $0xb8] sm:$0xff] }
  0x11   :  { %v252_v7 = vmul.f32 %v49_v30, %v49_v30  ;;  %v321_v8 = vsel %vm104_vm1, %v250_v59, 0.0  ;;  %v136_v12 = vsel %vm104_vm1, %v55_v3, 0.0  ;;  %v253_v13 = vmul.f32 %v50_v37, %v50_v37 }
  0x12   :  { %v117_v27 = vadd.f32 %v116_v19, %v115_v21  ;;  %v314_v57 = vadd.f32 %v313_v48, %v312_v51  ;;  %v323_v14 = vsel %vm104_vm1, %v251_v1, 0.0  ;;  %v138_v18 = vsel %vm104_vm1, %v56_v9, 0.0  ;;  %v58_v21 = vld [vmem:[#allocation4 + $0x98] sm:$0xff]  ;;  %v63_v51 = vld [vmem:[#allocation4 + $0xc0] sm:$0xff] }
  0x13   :  { %v254_v19 = vmul.f32 %v51_v43, %v51_v43  ;;  %v325_v20 = vsel %vm104_vm1, %v252_v7, 0.0  ;;  %v140_v24 = vsel %vm104_vm1, %v57_v15, 0.0  ;;  %v255_v25 = vmul.f32 %v52_v49, %v52_v49 }
  0x14   :  { %v119_v31 = vadd.f32 %v118_v23, %v117_v27  ;;  %v316_v63 = vadd.f32 %v315_v54, %v314_v57  ;;  %v327_v26 = vsel %vm104_vm1, %v253_v13, 0.0  ;;  %v59_v27 = vld [vmem:[#allocation4 + $0xa0] sm:$0xff]  ;;  %v142_v30 = vsel %vm104_vm1, %v58_v21, 0.0  ;;  %v64_v57 = vld [vmem:[#allocation4 + $0xc8] sm:$0xff] }
  0x15   :  { %v329_v32 = vsel %vm104_vm1, %v254_v19, 0.0  ;;  %v144_v36 = vsel %vm104_vm1, %v59_v27, 0.0  ;;  %v257_v37 = vmul.f32 %v54_v61, %v54_v61  ;;  %v258_v43 = vmul.f32 %v55_v3, %v55_v3 }
  0x16   :  { %v121_v38 = vadd.f32 %v120_v28, %v119_v31  ;;  %v318_v5 = vadd.f32 %v317_v60, %v316_v63  ;;  %v256_v31 = vmul.f32 %v53_v55, %v53_v55  ;;  %v148_v48 = vsel %vm104_vm1, %v61_v39, 0.0  ;;  %v65_v63 = vld [vmem:[#allocation4 + $0xd0] sm:$0xff] }
  0x17   :  { %v259_v49 = vmul.f32 %v56_v9, %v56_v9  ;;  %v150_v54 = vsel %vm104_vm1, %v62_v45, 0.0  ;;  %v260_v55 = vmul.f32 %v57_v15, %v57_v15  ;;  %v152_v60 = vsel %vm104_vm1, %v63_v51, 0.0 }
  0x18   :  { %v123_v44 = vadd.f32 %v122_v33, %v121_v38  ;;  %v320_v11 = vadd.f32 %v319_v2, %v318_v5  ;;  %v60_v33 = vld [vmem:[#allocation4 + $0xa8] sm:$0xff]  ;;  %v331_v38 = vsel %vm104_vm1, %v255_v25, 0.0  ;;  %v261_v61 = vmul.f32 %v58_v21, %v58_v21  ;;  %v66_v5 = vld [vmem:[#allocation4 + $0xd8] sm:$0xff] }
  0x19   :  { %v146_v42 = vsel %vm104_vm1, %v60_v33, 0.0  ;;  %v154_v2 = vsel %vm104_vm1, %v64_v57, 0.0  ;;  %v262_v3 = vmul.f32 %v59_v27, %v59_v27  ;;  %v263_v9 = vmul.f32 %v60_v33, %v60_v33 }
  0x1a   :  { %v125_v50 = vadd.f32 %v124_v40, %v123_v44  ;;  %v322_v17 = vadd.f32 %v321_v8, %v320_v11  ;;  %v333_v44 = vsel %vm104_vm1, %v256_v31, 0.0  ;;  %v156_v8 = vsel %vm104_vm1, %v65_v63, 0.0  ;;  %v67_v11 = vld [vmem:[#allocation4 + $0xe0] sm:$0xff] }
  0x1b   :  { %v264_v15 = vmul.f32 %v61_v39, %v61_v39  ;;  %v265_v21 = vmul.f32 %v62_v45, %v62_v45  ;;  %v266_v27 = vmul.f32 %v63_v51, %v63_v51  ;;  %v267_v33 = vmul.f32 %v64_v57, %v64_v57 }
  0x1c   :  { %v127_v56 = vadd.f32 %v126_v46, %v125_v50  ;;  %v324_v23 = vadd.f32 %v323_v14, %v322_v17  ;;  %v335_v50 = vsel %vm104_vm1, %v257_v37, 0.0  ;;  %v158_v14 = vsel %vm104_vm1, %v66_v5, 0.0  ;;  %v68_v17 = vld [vmem:[#allocation4 + $0xe8] sm:$0xff] }
  0x1d   :  { %v268_v39 = vmul.f32 %v65_v63, %v65_v63  ;;  %v269_v45 = vmul.f32 %v66_v5, %v66_v5  ;;  %v270_v51 = vmul.f32 %v67_v11, %v67_v11  ;;  %v271_v57 = vmul.f32 %v68_v17, %v68_v17 }
  0x1e   :  { %v129_v62 = vadd.f32 %v128_v52, %v127_v56  ;;  %v326_v29 = vadd.f32 %v325_v20, %v324_v23  ;;  %v337_v56 = vsel %vm104_vm1, %v258_v43, 0.0  ;;  %v160_v20 = vsel %vm104_vm1, %v67_v11, 0.0  ;;  %v69_v23 = vld [vmem:[#allocation4 + $0xf0] sm:$0xff] }
  0x1f   :  { %v272_v63 = vmul.f32 %v69_v23, %v69_v23 }
  0x20   :  { %v131_v4 = vadd.f32 %v130_v58, %v129_v62  ;;  %v328_v35 = vadd.f32 %v327_v26, %v326_v29  ;;  %v339_v62 = vsel %vm104_vm1, %v259_v49, 0.0  ;;  %v162_v26 = vsel %vm104_vm1, %v68_v17, 0.0  ;;  %v70_v29 = vld [vmem:[#allocation4 + $0xf8] sm:$0xff] }
  0x21   :  { %v273_v5 = vmul.f32 %v70_v29, %v70_v29 }
  0x22   :  { %v133_v10 = vadd.f32 %v132_v0, %v131_v4  ;;  %v330_v41 = vadd.f32 %v329_v32, %v328_v35  ;;  %v341_v4 = vsel %vm104_vm1, %v260_v55, 0.0  ;;  %v164_v32 = vsel %vm104_vm1, %v69_v23, 0.0  ;;  %v71_v35 = vld [vmem:[#allocation4 + $0x100] sm:$0xff] }
  0x23   :  { %v274_v11 = vmul.f32 %v71_v35, %v71_v35 }
  0x24   :  { %v135_v16 = vadd.f32 %v134_v6, %v133_v10  ;;  %v332_v47 = vadd.f32 %v331_v38, %v330_v41  ;;  %v343_v10 = vsel %vm104_vm1, %v261_v61, 0.0  ;;  %v166_v38 = vsel %vm104_vm1, %v70_v29, 0.0  ;;  %v72_v41 = vld [vmem:[#allocation4 + $0x108] sm:$0xff] }
  0x25   :  { %v275_v17 = vmul.f32 %v72_v41, %v72_v41 }
  0x26   :  { %v137_v22 = vadd.f32 %v136_v12, %v135_v16  ;;  %v334_v53 = vadd.f32 %v333_v44, %v332_v47  ;;  %v345_v16 = vsel %vm104_vm1, %v262_v3, 0.0  ;;  %v168_v44 = vsel %vm104_vm1, %v71_v35, 0.0  ;;  %v73_v47 = vld [vmem:[#allocation4 + $0x110] sm:$0xff] }
  0x27   :  { %v276_v23 = vmul.f32 %v73_v47, %v73_v47 }
  0x28   :  { %v139_v28 = vadd.f32 %v138_v18, %v137_v22  ;;  %v336_v59 = vadd.f32 %v335_v50, %v334_v53  ;;  %v347_v22 = vsel %vm104_vm1, %v263_v9, 0.0  ;;  %v170_v50 = vsel %vm104_vm1, %v72_v41, 0.0  ;;  %v74_v53 = vld [vmem:[#allocation4 + $0x118] sm:$0xff] }
  0x29   :  { %v277_v29 = vmul.f32 %v74_v53, %v74_v53 }
  0x2a   :  { %v141_v34 = vadd.f32 %v140_v24, %v139_v28  ;;  %v338_v1 = vadd.f32 %v337_v56, %v336_v59  ;;  %v349_v28 = vsel %vm104_vm1, %v264_v15, 0.0  ;;  %v172_v56 = vsel %vm104_vm1, %v73_v47, 0.0  ;;  %v75_v59 = vld [vmem:[#allocation4 + $0x120] sm:$0xff] }
  0x2b   :  { %v278_v35 = vmul.f32 %v75_v59, %v75_v59 }
  0x2c   :  { %v143_v40 = vadd.f32 %v142_v30, %v141_v34  ;;  %v340_v7 = vadd.f32 %v339_v62, %v338_v1  ;;  %v351_v34 = vsel %vm104_vm1, %v265_v21, 0.0  ;;  %v174_v62 = vsel %vm104_vm1, %v74_v53, 0.0  ;;  %v76_v1 = vld [vmem:[#allocation4 + $0x128] sm:$0xff] }
  0x2d   :  { %v279_v41 = vmul.f32 %v76_v1, %v76_v1 }
  0x2e   :  { %v145_v46 = vadd.f32 %v144_v36, %v143_v40  ;;  %v342_v13 = vadd.f32 %v341_v4, %v340_v7  ;;  %v353_v40 = vsel %vm104_vm1, %v266_v27, 0.0  ;;  %v176_v4 = vsel %vm104_vm1, %v75_v59, 0.0  ;;  %v77_v7 = vld [vmem:[#allocation4 + $0x130] sm:$0xff] }
  0x2f   :  { %v280_v47 = vmul.f32 %v77_v7, %v77_v7 }
  0x30   :  { %v147_v52 = vadd.f32 %v146_v42, %v145_v46  ;;  %v344_v19 = vadd.f32 %v343_v10, %v342_v13  ;;  %v355_v46 = vsel %vm104_vm1, %v267_v33, 0.0  ;;  %v178_v10 = vsel %vm104_vm1, %v76_v1, 0.0  ;;  %v78_v13 = vld [vmem:[#allocation4 + $0x138] sm:$0xff] }
  0x31   :  { %v281_v53 = vmul.f32 %v78_v13, %v78_v13 }
  0x32   :  { %v149_v58 = vadd.f32 %v148_v48, %v147_v52  ;;  %v346_v25 = vadd.f32 %v345_v16, %v344_v19  ;;  %v357_v52 = vsel %vm104_vm1, %v268_v39, 0.0  ;;  %v180_v16 = vsel %vm104_vm1, %v77_v7, 0.0  ;;  %v79_v19 = vld [vmem:[#allocation4 + $0x140] sm:$0xff] }
  0x33   :  { %v282_v59 = vmul.f32 %v79_v19, %v79_v19 }
  0x34   :  { %v151_v0 = vadd.f32 %v150_v54, %v149_v58  ;;  %v348_v31 = vadd.f32 %v347_v22, %v346_v25  ;;  %v359_v58 = vsel %vm104_vm1, %v269_v45, 0.0  ;;  %v182_v22 = vsel %vm104_vm1, %v78_v13, 0.0  ;;  %v80_v25 = vld [vmem:[#allocation4 + $0x148] sm:$0xff] }
  0x35   :  { %v283_v1 = vmul.f32 %v80_v25, %v80_v25 }
  0x36   :  { %v153_v6 = vadd.f32 %v152_v60, %v151_v0  ;;  %v350_v37 = vadd.f32 %v349_v28, %v348_v31  ;;  %v361_v0 = vsel %vm104_vm1, %v270_v51, 0.0  ;;  %v184_v28 = vsel %vm104_vm1, %v79_v19, 0.0  ;;  %v81_v31 = vld [vmem:[#allocation4 + $0x150] sm:$0xff] }
  0x37   :  { %v284_v7 = vmul.f32 %v81_v31, %v81_v31 }
  0x38   :  { %v155_v12 = vadd.f32 %v154_v2, %v153_v6  ;;  %v352_v43 = vadd.f32 %v351_v34, %v350_v37  ;;  %v363_v6 = vsel %vm104_vm1, %v271_v57, 0.0  ;;  %v186_v34 = vsel %vm104_vm1, %v80_v25, 0.0  ;;  %v82_v37 = vld [vmem:[#allocation4 + $0x158] sm:$0xff] }
  0x39   :  { %v285_v13 = vmul.f32 %v82_v37, %v82_v37 }
  0x3a   :  { %v157_v18 = vadd.f32 %v156_v8, %v155_v12  ;;  %v354_v49 = vadd.f32 %v353_v40, %v352_v43  ;;  %v365_v12 = vsel %vm104_vm1, %v272_v63, 0.0  ;;  %v188_v40 = vsel %vm104_vm1, %v81_v31, 0.0  ;;  %v83_v43 = vld [vmem:[#allocation4 + $0x160] sm:$0xff] }
  0x3b   :  { %v286_v19 = vmul.f32 %v83_v43, %v83_v43 }
  0x3c   :  { %v159_v24 = vadd.f32 %v158_v14, %v157_v18  ;;  %v356_v55 = vadd.f32 %v355_v46, %v354_v49  ;;  %v367_v18 = vsel %vm104_vm1, %v273_v5, 0.0  ;;  %v190_v46 = vsel %vm104_vm1, %v82_v37, 0.0  ;;  %v84_v49 = vld [vmem:[#allocation4 + $0x168] sm:$0xff] }
  0x3d   :  { %v287_v25 = vmul.f32 %v84_v49, %v84_v49 }
  0x3e   :  { %v161_v30 = vadd.f32 %v160_v20, %v159_v24  ;;  %v358_v61 = vadd.f32 %v357_v52, %v356_v55  ;;  %v369_v24 = vsel %vm104_vm1, %v274_v11, 0.0  ;;  %v192_v52 = vsel %vm104_vm1, %v83_v43, 0.0  ;;  %v85_v55 = vld [vmem:[#allocation4 + $0x170] sm:$0xff] }
  0x3f   :  { %v288_v31 = vmul.f32 %v85_v55, %v85_v55 }
  0x40   :  { %v163_v36 = vadd.f32 %v162_v26, %v161_v30  ;;  %v360_v3 = vadd.f32 %v359_v58, %v358_v61  ;;  %v371_v30 = vsel %vm104_vm1, %v275_v17, 0.0  ;;  %v194_v58 = vsel %vm104_vm1, %v84_v49, 0.0  ;;  %v86_v61 = vld [vmem:[#allocation4 + $0x178] sm:$0xff] }
  0x41   :  { %v289_v37 = vmul.f32 %v86_v61, %v86_v61 }
  0x42   :  { %v165_v42 = vadd.f32 %v164_v32, %v163_v36  ;;  %v362_v9 = vadd.f32 %v361_v0, %v360_v3  ;;  %v373_v36 = vsel %vm104_vm1, %v276_v23, 0.0  ;;  %v196_v0 = vsel %vm104_vm1, %v85_v55, 0.0  ;;  %v87_v3 = vld [vmem:[#allocation4 + $0x180] sm:$0xff] }
  0x43   :  { %v290_v43 = vmul.f32 %v87_v3, %v87_v3 }
  0x44   :  { %v167_v48 = vadd.f32 %v166_v38, %v165_v42  ;;  %v364_v15 = vadd.f32 %v363_v6, %v362_v9  ;;  %v375_v42 = vsel %vm104_vm1, %v277_v29, 0.0  ;;  %v198_v6 = vsel %vm104_vm1, %v86_v61, 0.0  ;;  %v88_v9 = vld [vmem:[#allocation4 + $0x188] sm:$0xff] }
  0x45   :  { %v291_v49 = vmul.f32 %v88_v9, %v88_v9 }
  0x46   :  { %v169_v54 = vadd.f32 %v168_v44, %v167_v48  ;;  %v366_v21 = vadd.f32 %v365_v12, %v364_v15  ;;  %v377_v48 = vsel %vm104_vm1, %v278_v35, 0.0  ;;  %v200_v12 = vsel %vm104_vm1, %v87_v3, 0.0  ;;  %v89_v15 = vld [vmem:[#allocation4 + $0x190] sm:$0xff] }
  0x47   :  { %v292_v55 = vmul.f32 %v89_v15, %v89_v15 }
  0x48   :  { %v171_v60 = vadd.f32 %v170_v50, %v169_v54  ;;  %v368_v27 = vadd.f32 %v367_v18, %v366_v21  ;;  %v379_v54 = vsel %vm104_vm1, %v279_v41, 0.0  ;;  %v202_v18 = vsel %vm104_vm1, %v88_v9, 0.0  ;;  %v90_v21 = vld [vmem:[#allocation4 + $0x198] sm:$0xff] }
  0x49   :  { %v293_v61 = vmul.f32 %v90_v21, %v90_v21 }
  0x4a   :  { %v173_v2 = vadd.f32 %v172_v56, %v171_v60  ;;  %v370_v33 = vadd.f32 %v369_v24, %v368_v27  ;;  %v381_v60 = vsel %vm104_vm1, %v280_v47, 0.0  ;;  %v204_v24 = vsel %vm104_vm1, %v89_v15, 0.0  ;;  %v91_v27 = vld [vmem:[#allocation4 + $0x1a0] sm:$0xff] }
  0x4b   :  { %v294_v3 = vmul.f32 %v91_v27, %v91_v27 }
  0x4c   :  { %v175_v8 = vadd.f32 %v174_v62, %v173_v2  ;;  %v372_v39 = vadd.f32 %v371_v30, %v370_v33  ;;  %v383_v2 = vsel %vm104_vm1, %v281_v53, 0.0  ;;  %v206_v30 = vsel %vm104_vm1, %v90_v21, 0.0  ;;  %v92_v33 = vld [vmem:[#allocation4 + $0x1a8] sm:$0xff] }
  0x4d   :  { %v295_v9 = vmul.f32 %v92_v33, %v92_v33 }
  0x4e   :  { %v177_v14 = vadd.f32 %v176_v4, %v175_v8  ;;  %v374_v45 = vadd.f32 %v373_v36, %v372_v39  ;;  %v385_v8 = vsel %vm104_vm1, %v282_v59, 0.0  ;;  %v208_v36 = vsel %vm104_vm1, %v91_v27, 0.0  ;;  %v93_v39 = vld [vmem:[#allocation4 + $0x1b0] sm:$0xff] }
  0x4f   :  { %v296_v15 = vmul.f32 %v93_v39, %v93_v39 }
  0x50   :  { %v179_v20 = vadd.f32 %v178_v10, %v177_v14  ;;  %v376_v51 = vadd.f32 %v375_v42, %v374_v45  ;;  %v387_v14 = vsel %vm104_vm1, %v283_v1, 0.0  ;;  %v210_v42 = vsel %vm104_vm1, %v92_v33, 0.0  ;;  %v94_v45 = vld [vmem:[#allocation4 + $0x1b8] sm:$0xff] }
  0x51   :  { %v297_v21 = vmul.f32 %v94_v45, %v94_v45 }
  0x52   :  { %v181_v26 = vadd.f32 %v180_v16, %v179_v20  ;;  %v378_v57 = vadd.f32 %v377_v48, %v376_v51  ;;  %v389_v20 = vsel %vm104_vm1, %v284_v7, 0.0  ;;  %v212_v48 = vsel %vm104_vm1, %v93_v39, 0.0  ;;  %v95_v51 = vld [vmem:[#allocation4 + $0x1c0] sm:$0xff] }
  0x53   :  { %v298_v27 = vmul.f32 %v95_v51, %v95_v51 }
  0x54   :  { %v183_v32 = vadd.f32 %v182_v22, %v181_v26  ;;  %v380_v63 = vadd.f32 %v379_v54, %v378_v57  ;;  %v391_v26 = vsel %vm104_vm1, %v285_v13, 0.0  ;;  %v214_v54 = vsel %vm104_vm1, %v94_v45, 0.0  ;;  %v96_v57 = vld [vmem:[#allocation4 + $0x1c8] sm:$0xff] }
  0x55   :  { %v299_v33 = vmul.f32 %v96_v57, %v96_v57  ;;  %v417_v39 = vsel %vm104_vm1, %v298_v27, 0.0 }
  0x56   :  { %v185_v38 = vadd.f32 %v184_v28, %v183_v32  ;;  %v382_v5 = vadd.f32 %v381_v60, %v380_v63  ;;  %v393_v32 = vsel %vm104_vm1, %v286_v19, 0.0  ;;  %v216_v60 = vsel %vm104_vm1, %v95_v51, 0.0  ;;  %v97_v63 = vld [vmem:[#allocation4 + $0x1d0] sm:$0xff] }
  0x58   :  { %v187_v44 = vadd.f32 %v186_v34, %v185_v38  ;;  %v384_v11 = vadd.f32 %v383_v2, %v382_v5  ;;  %v395_v38 = vsel %vm104_vm1, %v287_v25, 0.0  ;;  %v218_v2 = vsel %vm104_vm1, %v96_v57, 0.0  ;;  %v98_v5 = vld [vmem:[#allocation4 + $0x1d8] sm:$0xff] }
  0x5a   :  { %v189_v50 = vadd.f32 %v188_v40, %v187_v44  ;;  %v386_v17 = vadd.f32 %v385_v8, %v384_v11  ;;  %v397_v44 = vsel %vm104_vm1, %v288_v31, 0.0  ;;  %v220_v8 = vsel %vm104_vm1, %v97_v63, 0.0  ;;  %v99_v11 = vld [vmem:[#allocation4 + $0x1e0] sm:$0xff] }
  0x5c   :  { %v191_v56 = vadd.f32 %v190_v46, %v189_v50  ;;  %v388_v23 = vadd.f32 %v387_v14, %v386_v17  ;;  %v399_v50 = vsel %vm104_vm1, %v289_v37, 0.0  ;;  %v222_v14 = vsel %vm104_vm1, %v98_v5, 0.0  ;;  %v100_v17 = vld [vmem:[#allocation4 + $0x1e8] sm:$0xff] }
  0x5e   :  { %v193_v62 = vadd.f32 %v192_v52, %v191_v56  ;;  %v390_v29 = vadd.f32 %v389_v20, %v388_v23  ;;  %v401_v56 = vsel %vm104_vm1, %v290_v43, 0.0  ;;  %v224_v20 = vsel %vm104_vm1, %v99_v11, 0.0  ;;  %v101_v23 = vld [vmem:[#allocation4 + $0x1f0] sm:$0xff] }
  0x5f   :  { %v419_v43 = vsel %vm104_vm1, %v299_v33, 0.0 }
  0x60   :  { %v195_v4 = vadd.f32 %v194_v58, %v193_v62  ;;  %v392_v35 = vadd.f32 %v391_v26, %v390_v29  ;;  %v403_v62 = vsel %vm104_vm1, %v291_v49, 0.0  ;;  %v226_v26 = vsel %vm104_vm1, %v100_v17, 0.0  ;;  %v102_v29 = vld [vmem:[#allocation4 + $0x1f8] sm:$0xff] }
  0x61   :  { %v230_v37 = vsel %vm104_vm1, %v102_v29, 0.0 }
  0x62   :  { %v197_v10 = vadd.f32 %v196_v0, %v195_v4  ;;  %v394_v41 = vadd.f32 %v393_v32, %v392_v35  ;;  %v405_v4 = vsel %vm104_vm1, %v292_v55, 0.0  ;;  %v228_v32 = vsel %vm104_vm1, %v101_v23, 0.0 }
  0x64   :  { %v199_v16 = vadd.f32 %v198_v6, %v197_v10  ;;  %v396_v47 = vadd.f32 %v395_v38, %v394_v41  ;;  %v407_v10 = vsel %vm104_vm1, %v293_v61, 0.0  ;;  %v300_v38 = vmul.f32 %v97_v63, %v97_v63 }
  0x66   :  { %v201_v22 = vadd.f32 %v200_v12, %v199_v16  ;;  %v398_v53 = vadd.f32 %v397_v44, %v396_v47  ;;  %v409_v16 = vsel %vm104_vm1, %v294_v3, 0.0  ;;  %v421_v47 = vsel %vm104_vm1, %v300_v38, 0.0 }
  0x68   :  { %v203_v28 = vadd.f32 %v202_v18, %v201_v22  ;;  %v400_v59 = vadd.f32 %v399_v50, %v398_v53  ;;  %v411_v22 = vsel %vm104_vm1, %v295_v9, 0.0  ;;  %v303_v50 = vmul.f32 %v100_v17, %v100_v17 }
  0x6a   :  { %v205_v34 = vadd.f32 %v204_v24, %v203_v28  ;;  %v402_v1 = vadd.f32 %v401_v56, %v400_v59  ;;  %v413_v28 = vsel %vm104_vm1, %v296_v15, 0.0  ;;  %v427_v59 = vsel %vm104_vm1, %v303_v50, 0.0 }
  0x6c   :  { %v207_v40 = vadd.f32 %v206_v30, %v205_v34  ;;  %v404_v7 = vadd.f32 %v403_v62, %v402_v1  ;;  %v415_v34 = vsel %vm104_vm1, %v297_v21, 0.0  ;;  %v103_v1 = vld [vmem:[#allocation2] sm:$0x1] }
  0x6e   :  { %v209_v46 = vadd.f32 %v208_v36, %v207_v40  ;;  %v406_v13 = vadd.f32 %v405_v4, %v404_v7 }
  0x70   :  { %v211_v52 = vadd.f32 %v210_v42, %v209_v46  ;;  %v408_v19 = vadd.f32 %v407_v10, %v406_v13  ;;  %v301_v42 = vmul.f32 %v98_v5, %v98_v5  ;;  %v302_v46 = vmul.f32 %v99_v11, %v99_v11 }
  0x72   :  { %v213_v58 = vadd.f32 %v212_v48, %v211_v52  ;;  %v410_v25 = vadd.f32 %v409_v16, %v408_v19  ;;  %v423_v51 = vsel %vm104_vm1, %v301_v42, 0.0  ;;  %v425_v55 = vsel %vm104_vm1, %v302_v46, 0.0 }
  0x74   :  { %v215_v0 = vadd.f32 %v214_v54, %v213_v58  ;;  %v412_v31 = vadd.f32 %v411_v22, %v410_v25  ;;  %v304_v54 = vmul.f32 %v101_v23, %v101_v23  ;;  %v305_v58 = vmul.f32 %v102_v29, %v102_v29 }
  0x76   :  { %v217_v6 = vadd.f32 %v216_v60, %v215_v0  ;;  %v414_v36 = vadd.f32 %v413_v28, %v412_v31  ;;  %v429_v62 = vsel %vm104_vm1, %v304_v54, 0.0  ;;  %v461_v28 = vld [vmem:[%s688_s1] sm:$0x1] }
  0x77   :  { %v464_v31 = vld [vmem:[%s689_s2] sm:$0x1] }
  0x78   :  { %v219_v12 = vadd.f32 %v218_v2, %v217_v6  ;;  %v416_v41 = vadd.f32 %v415_v34, %v414_v36  ;;  %v431_v2 = vsel %vm104_vm1, %v305_v58, 0.0 }
  0x7a   :  { %v221_v18 = vadd.f32 %v220_v8, %v219_v12  ;;  %v418_v45 = vadd.f32 %v417_v39, %v416_v41  ;;  %v241_v12 = vld [vmem:[#allocation3] sm:$0x1] }
  0x7c   :  { %v223_v24 = vadd.f32 %v222_v14, %v221_v18  ;;  %v420_v49 = vadd.f32 %v419_v43, %v418_v45 }
  0x7e   :  { %v225_v30 = vadd.f32 %v224_v20, %v223_v24  ;;  %v422_v53 = vadd.f32 %v421_v47, %v420_v49 }
  0x80   :  { %v227_v35 = vadd.f32 %v226_v26, %v225_v30  ;;  %v424_v57 = vadd.f32 %v423_v51, %v422_v53 }
  0x82   :  { %v229_v40 = vadd.f32 %v228_v32, %v227_v35  ;;  %v426_v61 = vadd.f32 %v425_v55, %v424_v57 }
  0x84   :  { %v231_v44 = vadd.f32 %v230_v37, %v229_v40  ;;  %v428_v0 = vadd.f32 %v427_v59, %v426_v61 }
  0x86   :  { %v232_v48 = vrot.slane %v231_v44, 4  ;;  %v430_v4 = vadd.f32 %v429_v62, %v428_v0 }
  0x88   :  { %v233_v52 = vadd.f32 %v232_v48, %v231_v44  ;;  %v432_v6 = vadd.f32 %v431_v2, %v430_v4 }
  0x8a   :  { %v234_v56 = vrot.slane %v233_v52, 2  ;;  %v433_v7 = vrot.slane %v432_v6, 4 }
  0x8c   :  { %v235_v60 = vadd.f32 %v234_v56, %v233_v52  ;;  %v434_v8 = vadd.f32 %v433_v7, %v432_v6 }
  0x8e   :  { %v236_v63 = vrot.slane %v235_v60, 1  ;;  %v435_v9 = vrot.slane %v434_v8, 2 }
  0x90   :  { %v237_v3 = vadd.f32 %v236_v63, %v235_v60  ;;  %v436_v10 = vadd.f32 %v435_v9, %v434_v8 }
  0x92   :  { %v238_v5 = vadd.f32 %v237_v3, %v103_v1  ;;  %v437_v11 = vrot.slane %v436_v10, 1 }
  0x94   :  { %240 = vst.msk [vmem:[#allocation2] sm:$0x1] %vm36_vm0, %v238_v5  ;;  %v438_v13 = vadd.f32 %v437_v11, %v436_v10 }
  0x96   :  { %v439_v14 = vadd.f32 %v438_v13, %v241_v12 }
  0x98   :  { %440 = vst.msk [vmem:[#allocation3] sm:$0x1] %vm36_vm0, %v439_v14 }
  0x9b   :  { %v444_v15 = vld [vmem:[#allocation2] sm:$0x1] }
  0x9c   :  { %v445_v16 = vmul.f32 0.001953125, %v444_v15 }
  0x9e   :  { %v448_v17 = vmul.f32 %v445_v16, %v445_v16 }
  0x9f   :  { %v446_v18 = vld [vmem:[#allocation3] sm:$0x1] }
  0xa0   :  { %v447_v19 = vmul.f32 0.001953125, %v446_v18 }
  0xa2   :  { %v449_v20 = vsub.f32 %v447_v19, %v448_v17 }
  0xa4   :  { %v450_v21 = vadd.f32 1e-05, %v449_v20 }
  0xa6   :  { %481 = vrsqrt.f32 %v450_v21  ;;  %vm457_vm3 = vweird.f32 %v450_v21 }
  0xac   :  { %v482_v22 = vpop.eup %481 }
  0xad   :  { %v452_v23 = vmul.f32 %v482_v22, %v450_v21  ;;  %vm458_vm2 = vweird.f32 %v482_v22 }
  0xae   :  { %vm459_vm4 = vmor %vm457_vm3, %vm458_vm2 }
  0xaf   :  { %v453_v24 = vmul.f32 %v482_v22, %v452_v23 }
  0xb1   :  { %v454_v25 = vmul.f32 0.5, %v453_v24 }
  0xb3   :  { %v455_v26 = vsub.f32 1.5, %v454_v25 }
  0xb5   :  { %v456_v27 = vmul.f32 %v482_v22, %v455_v26 }
  0xb7   :  { %v460_v29 = vsel %vm459_vm4, %v482_v22, %v456_v27 }
  0xb8   :  { %v462_v30 = vmul.f32 %v461_v28, %v460_v29 }
  0xba   :  { %463 = vst.msk [vmem:[%s690_s3] sm:$0x1] %vm36_vm0, %v462_v30  ;;  %v465_v32 = vmul.f32 %v462_v30, %v445_v16 }
  0xbc   :  { %v466_v33 = vsub.f32 %v464_v31, %v465_v32 }
  0xbe   :  { %467 = vst.msk [vmem:[%s691_s4] sm:$0x1] %vm36_vm0, %v466_v33 }
  0xbf   :  { %476 = vsyncpa [#allocation5], 1 }

// kernel: preact_basic_block_forward.5
= control target key start
LH: loop header
LB: loop body
LE: loop exit
PB: predicated region body
PF: predicated region fallthrough
CT: control target
= control target key end

     0   :  { %9 = vsyncpa [#allocation5], 0  ;;  %s7756_s0 = inlined_call_operand.hbm [shape: f32[2,16,16,64], index: 0, kind: input, shape index: {}]   ;;  %s7757_s1 = inlined_call_operand.vmem [shape: f32[1,64], index: 1, kind: input, shape index: {}]   ;;  %s7758_s2 = inlined_call_operand.vmem [shape: f32[1,64], index: 2, kind: input, shape index: {}]   ;;  %s7759_s3 = inlined_call_operand.hbm [shape: bf16[9,64,64], index: 3, kind: input, shape index: {}]   ;;  %s7760_s4 = inlined_call_operand.vmem [shape: bf16[2,256,64], index: 4, kind: output, shape index: {}]  }
   0x1   :  { %11 = vsyncpa [#allocation5 + $0x1], 0 }
   0x2   :  { %12 = vsyncpa [#allocation7], 0  ;;  %s6204_s15 = smov 0   ;;  %s6206_s16 = smov 0  }
   0x3   :  { %s6208_s17 = smov 0   ;;  %s6210_s18 = smov 0  }
   0x4   :  { %s6212_s19 = smov 0   ;;  %s6214_s20 = smov 0  }
   0x5 LB: > { %s4905_s21 = sadd.s32 4294967295, %s6170_s20   ;;  %p59_p0 = scmp.ne.s32.totalorder %s6154_s16, %s6150_s15  ;;  %s6170_s20 = sphi %s6214_s20, %s18_s20   ;;  %s6166_s19 = sphi %s6212_s19, %s7869_s19   ;;  %s6162_s18 = sphi %s6210_s18, %s7868_s18   ;;  %s6158_s17 = sphi %s6208_s17, %s7867_s17   ;;  %s6154_s16 = sphi %s6206_s16, %s7866_s16   ;;  %s6150_s15 = sphi %s6204_s15, %s7865_s15  }
   0x6   : > { %p6234_p1 = scmp.eq.s32.totalorder %s4905_s21, 0  ;;  %p4907_p2 = scmp.ge.s32.totalorder %s6170_s20, 1 }
   0x7   : > { %p178_p3 = scmp.lt.s32.totalorder %s6170_s20, 3  ;;  %s205_s26 = sshll.u32 %s7759_s3, 4  ;;  %s206_s26 = int_to_ptr.hbm [resolvable:$true] %s205_s26 }
   0x8   : > { %p6242_p4 = por %p6234_p1, %p59_p0  ;;  %s6172_s28 = smov [#allocation6]  }
   0x9   : > { %p6249_p5 = pnand %p4907_p2, %p178_p3  ;;  %s207_s29 = sshll.u32 %s6172_s28, 4  ;;  %s208_s29 = int_to_ptr.vmem [resolvable:$true] %s207_s29 }
   0xa   : > { %s6173_s30 = smov 64   ;;  %s6174_s5 = smov 4  }
   0xb   : > { %p5986_p6 = pneg %p6249_p5  ;;  %s37_s6 = sadd.s32 1, %s6166_s19 }
   0xc   : > { %p39_p8 = scmp.ge.s32.totalorder %s37_s6, 2  ;;  %s46_s7 = sadd.s32 1, %s6158_s17 }
   0xd   : > { %p5987_p7 = pnand %p5986_p6, %p6234_p1  ;;  %p53_p9 = scmp.ne.s32.totalorder %s6158_s17, %s6154_s16 }
   0xe   : > { %p54_p10 = scmp.eq.s32.totalorder %s6170_s20, 0  ;;  %s7871_s6 = smov (%p39_p8, %s37_s6), 0 }
   0xf   : > { %5989 = dma.hbm_to_vmem [thread:$0]  (!%p5987_p7), %s206_s26, 4608, %s208_s29, [#allocation7], %s6173_s30, %s6173_s30, %s6174_s5  }
  0x10   : > { %p6264_p11 = por %p54_p10, %p53_p9  ;;  %p5995_p12 = scmp.lt.s32.totalorder %s6170_s20, 2 }
  0x11   : > { %s41_s9 = ssub.s32 %s6166_s19, %s7871_s6  ;;  %s221_s10 = sand.u32 1, %s6158_s17  }
  0x12   : > { %p44_p13 = scmp.eq.s32.totalorder %s41_s9, 0  ;;  %s4912_s11 = sshll.u32 %s221_s10, 8 }
  0x13   : > { %s5786_s12 = sshll.u32 %s6166_s19, 8  ;;  %s225_s25 = scalar_lea.vmem [#allocation4], %s4912_s11 }
  0x14   : > { %s6274_s13 = scalar_select %p44_p13, %s6158_s17, %s46_s7  }
  0x15   : > { %s231_s21 = scalar_lea.hbm %s7756_s0, %s5786_s12  ;;  %s234_s26 = sshll.u32 %s225_s25, 4  ;;  %s235_s26 = int_to_ptr.vmem [resolvable:$true] %s234_s26 }
  0x16   : > { %s232_s24 = sshll.u32 %s231_s21, 4  ;;  %p5991_p0 = pnand %p5995_p12, %p6264_p11  ;;  %s233_s24 = int_to_ptr.hbm [resolvable:$true] %s232_s24 }
  0x17   : > { %s222_s28 = scalar_lea.sflag [#allocation5], %s221_s10  ;;  %s6175_s29 = smov 128  }
  0x18   : > { %s6176_s30 = smov 8   ;;  %246 = sbr.rel (%p6249_p5) target bundleno = 810 (0x32a), region = 36 }
  0x19   : > { %5993 = dma.hbm_to_vmem [thread:$0]  (!%p5991_p0), %s233_s24, 4096, %s235_s26, %s222_s28, %s6175_s29, %s6175_s29, %s6176_s30  }
  0x1a   : > { %s248_s5 = sand.u32 (!%p6249_p5), 1, %s6154_s16  }
  0x1b   : > { %s4916_s7 = sshll.u32 (!%p6249_p5), %s248_s5, 8  ;;  %s249_s9 = scalar_lea.sflag (!%p6249_p5), [#allocation5], %s248_s5 }
  0x1c   : > { %s6286_s12 = scalar_lea.vmem (!%p6249_p5), [#allocation4], %s4916_s7 }
  0x1d   : > { %6141 = dma.done.wait (%p6242_p4), %s249_s9, 4096  }
  0x1e   : > { %6143 = vsyncadd (%p6242_p4), %s249_s9, 4294963200 }
  0x1f   : > { %6145 = dma.done.wait (%p6234_p1), [#allocation7], 4608  }
  0x20   : > { %6147 = vsyncadd (%p6234_p1), [#allocation7], 4294962688  ;;  %vm520_vm0 = vcmask 516096   ;;  %vm521_vm1 = vsmask.f32 256  ;;  %v5807_v0 = vld [vmem:[#allocation6 + $0x18] sm:$0xff] }
  0x21   : > { %vm6297_vm2 = vmand %vm520_vm0, %vm521_vm1  ;;  %v5806_v2 = vld [vmem:[#allocation6 + $0x10] sm:$0xff]  ;;  %v352_v4 = vld [vmem:[%s6286_s12 + $0x38] sm:$0xff]  ;;  %5968 = vmatpush.bf16.msra.mxu1 %v5807_v0  ;;  %5969 = vmatpush.bf16.msra.mxu2 %v5807_v0  ;;  %vm571_vm3 = vsmask.f32 4368  ;;  %vm862_vm4 = vsmask.f32 7938 }
  0x22   : > { %v351_v3 = vld [vmem:[%s6286_s12 + $0x30] sm:$0xff]  ;;  %5970 = vmatpush.bf16.msra.mxu3 %v5807_v0  ;;  %1498 = vmatpush.bf16.msra.mxu0 %v5807_v0  ;;  %v360_v12 = vld [vmem:[%s6286_s12 + $0x78] sm:$0xff]  ;;  %vm513_vm5 = vcmask 519168   ;;  %v5805_v19 = vld [vmem:[#allocation6 + $0x8] sm:$0xff]  ;;  %vm312_vm8 = vcmask 523264   ;;  %vm974_vm11 = vcmask 519171  }
  0x23   : > { %v6306_v5 = vld [vmem:[%s7757_s1] ss:$0 sm:$0xff]  ;;  %v368_v18 = vld [vmem:[%s6286_s12 + $0xb8] sm:$0xff]  ;;  %v353_v24 = vld [vmem:[%s6286_s12 + $0x40] sm:$0xff]  ;;  %vm975_vm9 = vsmask.f32 7950 }
  0x24   : > { %v6311_v6 = vld [vmem:[%s7758_s2] ss:$0 sm:$0xff]  ;;  %v387_v9 = vmul.f32 %v6306_v5, %v351_v3  ;;  %v388_v10 = vmul.f32 %v6306_v5, %v352_v4  ;;  %v396_v15 = vmul.f32 %v6306_v5, %v360_v12  ;;  %v404_v27 = vmul.f32 %v6306_v5, %v368_v18  ;;  %v535_v29 = vld [vmem:[#allocation2 + $0x28] sm:$0x1]  ;;  %v354_v33 = vld [vmem:[%s6286_s12 + $0x48] sm:$0xff]  ;;  %p299_p1 = scmp.lt.s32.totalorder %s6162_s18, 1 }
  0x25   : > { %v532_v7 = vld [vmem:[#allocation2 + $0x20] sm:$0x1]  ;;  %5971 = vmatpush.bf16.msra.mxu1 %v5806_v2  ;;  %5972 = vmatpush.bf16.msra.mxu2 %v5806_v2  ;;  %v389_v37 = vmul.f32 %v6306_v5, %v353_v24  ;;  %v5804_v38 = vld [vmem:[#allocation6] sm:$0xff]  ;;  %v536_v42 = vsel %vm6297_vm2, 0, %v535_v29  ;;  %v5827_v44 = vld [vmem:[#allocation6 + $0x38] sm:$0xff]  ;;  %v390_v47 = vmul.f32 %v6306_v5, %v354_v33 }
  0x26   : > { %v359_v8 = vld [vmem:[%s6286_s12 + $0x70] sm:$0xff]  ;;  %v533_v11 = vsel %vm6297_vm2, 0, %v532_v7  ;;  %v423_v20 = vadd.f32 %v6311_v6, %v387_v9  ;;  %v424_v21 = vadd.f32 %v6311_v6, %v388_v10  ;;  %5973 = vmatpush.bf16.msra.mxu3 %v5806_v2  ;;  %v432_v25 = vadd.f32 %v6311_v6, %v396_v15  ;;  %1499 = vmatpush.bf16.msra.mxu0 %v5806_v2  ;;  %v5847_v52 = vld [vmem:[#allocation6 + $0x58] sm:$0xff]  ;;  %vm6361_vm6 = vmor %vm521_vm1, %vm571_vm3  ;;  %s7873_s18 = smov (!%p299_p1, %s6162_s18), 1 }
  0x27   : > { %v395_v13 = vmul.f32 %v6306_v5, %v359_v8  ;;  %v544_v14 = vld [vmem:[#allocation2 + $0x40] sm:$0x1]  ;;  %534 = vst [vmem:[#allocation2 + $0x20] sm:$0x1] %v533_v11  ;;  %v440_v36 = vadd.f32 %v6311_v6, %v404_v27  ;;  %v5867_v53 = vld [vmem:[#allocation6 + $0x78] sm:$0xff]  ;;  %vm6377_vm7 = vmand %vm513_vm5, %vm862_vm4  ;;  %v425_v4 = vadd.f32 %v6311_v6, %v389_v37  ;;  %v426_v7 = vadd.f32 %v6311_v6, %v390_v47  ;;  %s5787_s21 = sshll.u32 %s7873_s18, 7 }
  0x28   : > { %v545_v16 = vsel %vm6297_vm2, 0, %v544_v14  ;;  %v367_v17 = vld [vmem:[%s6286_s12 + $0xb0] sm:$0xff]  ;;  %v455_v30 = vmax.f32 %v423_v20, 0.0  ;;  %v456_v31 = vmax.f32 %v424_v21, 0.0  ;;  %v464_v34 = vmax.f32 %v432_v25, 0.0  ;;  %v361_v14 = vld [vmem:[%s6286_s12 + $0x80] sm:$0xff]  ;;  %vm6888_vm13 = vmand %vm974_vm11, %vm975_vm9  ;;  %s7521_s26 = scalar_lea.vmem %s7760_s4, %s5787_s21 }
  0x29   : > { %v431_v22 = vadd.f32 %v6311_v6, %v395_v13  ;;  %546 = vst [vmem:[#allocation2 + $0x40] sm:$0x1] %v545_v16  ;;  %v556_v23 = vld [vmem:[#allocation2 + $0x60] sm:$0x1]  ;;  %v403_v26 = vmul.f32 %v6306_v5, %v367_v17  ;;  %5974 = vmatpush.bf16.msra.mxu1 %v5805_v19  ;;  %5975 = vmatpush.bf16.msra.mxu2 %v5805_v19  ;;  %v472_v46 = vmax.f32 %v440_v36, 0.0 }
  0x2a   : > { %v557_v28 = vsel %vm6297_vm2, 0, %v556_v23  ;;  %v6338_v39 = vpack.c.bf16 %v455_v30, %v455_v30  ;;  %v6340_v40 = vpack.c.bf16 %v456_v31, %v456_v31  ;;  %5976 = vmatpush.bf16.msra.mxu3 %v5805_v19  ;;  %v6346_v43 = vpack.c.bf16 %v464_v34, %v464_v34  ;;  %1500 = vmatpush.bf16.msra.mxu0 %v5805_v19  ;;  %v5826_v8 = vld [vmem:[#allocation6 + $0x30] sm:$0xff]  ;;  %v362_v19 = vld [vmem:[%s6286_s12 + $0x88] sm:$0xff]  ;;  %v547_v25 = vld [vmem:[#allocation2 + $0x48] sm:$0x1] }
  0x2b   : > { %v463_v32 = vmax.f32 %v431_v22, 0.0  ;;  %558 = vst [vmem:[#allocation2 + $0x60] sm:$0x1] %v557_v28  ;;  %v439_v35 = vadd.f32 %v6311_v6, %v403_v26  ;;  %v6373_v63 = vpack.c.bf16 %v472_v46, %v472_v46  ;;  %v5846_v20 = vld [vmem:[#allocation6 + $0x50] sm:$0xff]  ;;  %v457_v30 = vmax.f32 %v425_v4, 0.0 }
  0x2c   : > { %537 = vst [vmem:[#allocation2 + $0x28] sm:$0x1] %v536_v42  ;;  %v622_v48 = vshrl.u32 %v6338_v39, 16  ;;  %v625_v49 = vshll.u32 %v6338_v39, 16  ;;  %v7799_v50 = vshrl.u32 %v6340_v40, 16  ;;  %v633_v51 = vshll.u32 %v6340_v40, 16 }
  0x2d   : > { %v6342_v41 = vpack.c.bf16 %v463_v32, %v463_v32  ;;  %v471_v45 = vmax.f32 %v439_v35, 0.0  ;;  %941 = vst.msk [vmem:[#allocation2 + $0xb0] sm:$0xf] %vm513_vm5, %v6338_v39  ;;  %v7779_v56 = vshrl.u32 %v6346_v43, 16  ;;  %v7775_v57 = vshll.u32 %v6346_v43, 16  ;;  %5977 = vmatpush.bf16.msra.mxu1 %v5804_v38  ;;  %5978 = vmatpush.bf16.msra.mxu2 %v5804_v38  ;;  %v370_v42 = vld [vmem:[%s6286_s12 + $0xc8] sm:$0xff] }
  0x2e   : > { %v624_v59 = vrot.slane %v622_v48, 7  ;;  %v632_v60 = vrot.slane %v7799_v50, 7  ;;  %v876_v61 = vld [vmem:[#allocation2 + $0x20] sm:$0xf]  ;;  %942 = vst.msk [vmem:[#allocation2 + $0xb4] sm:$0xf] %vm513_vm5, %v6340_v40  ;;  %5979 = vmatpush.bf16.msra.mxu3 %v5804_v38  ;;  %1501 = vmatpush.bf16.msra.mxu0 %v5804_v38  ;;  %v6424_v35 = vpack.c.bf16 %v457_v30, %v457_v30  ;;  %v397_v36 = vmul.f32 %v6306_v5, %v361_v14 }
  0x2f   : > { %v7778_v54 = vshrl.u32 %v6342_v41, 16  ;;  %v7777_v55 = vshll.u32 %v6342_v41, 16  ;;  %v6371_v62 = vpack.c.bf16 %v471_v45, %v471_v45  ;;  %v696_v3 = vrot.slane %v7779_v56, 7  ;;  %949 = vst.msk [vmem:[#allocation2 + $0xd0] sm:$0xf] %vm513_vm5, %v6342_v41  ;;  %v369_v38 = vld [vmem:[%s6286_s12 + $0xc0] sm:$0xff] }
  0x30   : > { %v627_v9 = vor.u32 %v625_v49, %v624_v59  ;;  %v628_v10 = vrot.slane %v624_v59, 4  ;;  %v635_v11 = vor.u32 %v633_v51, %v632_v60  ;;  %v892_v12 = vld [vmem:[#allocation2 + $0x40] sm:$0xf]  ;;  %950 = vst.msk [vmem:[#allocation2 + $0xd4] sm:$0xf] %vm513_vm5, %v6346_v43  ;;  %v7768_v24 = vshrl.u32 %v6373_v63, 16 }
  0x31   : > { %v688_v2 = vrot.slane %v7778_v54, 7  ;;  %1876 = vmatpush.bf16.msrb.mxu1 %v5827_v44  ;;  %2254 = vmatpush.bf16.msrb.mxu2 %v5847_v52  ;;  %v7767_v13 = vshrl.u32 %v6371_v62, 16  ;;  %v699_v17 = vor.u32 %v7775_v57, %v696_v3  ;;  %v7766_v18 = vshll.u32 %v6371_v62, 16  ;;  %957 = vst.msk [vmem:[#allocation2 + $0xf0] sm:$0xf] %vm513_vm5, %v6371_v62  ;;  %v355_v4 = vld [vmem:[%s6286_s12 + $0x50] sm:$0xff] }
  0x32   : > { %2632 = vmatpush.bf16.msrb.mxu3 %v5867_v53  ;;  %v636_v21 = vsel %vm6361_vm6, %v628_v10, %v635_v11  ;;  %v877_v22 = vsel %vm6377_vm7, %v627_v9, %v876_v61  ;;  %958 = vst.msk [vmem:[#allocation2 + $0xf4] sm:$0xf] %vm513_vm5, %v6373_v63  ;;  %v7765_v28 = vshll.u32 %v6373_v63, 16  ;;  %v908_v29 = vld [vmem:[#allocation2 + $0x60] sm:$0xf]  ;;  %v760_v33 = vrot.slane %v7768_v24, 7 }
  0x33   : > { %v691_v15 = vor.u32 %v7777_v55, %v688_v2  ;;  %v692_v16 = vrot.slane %v688_v2, 4  ;;  %v752_v23 = vrot.slane %v7767_v13, 7  ;;  %878 = vst [vmem:[#allocation2 + $0x20] sm:$0xf] %v877_v22  ;;  %v458_v34 = vmax.f32 %v426_v7, 0.0  ;;  %v357_v24 = vld [vmem:[%s6286_s12 + $0x60] sm:$0xff] }
  0x34   : > { %879 = vst.msk [vmem:[#allocation2 + $0x24] sm:$0xf] %vm513_vm5, %v636_v21  ;;  %v398_v37 = vmul.f32 %v6306_v5, %v362_v19  ;;  %v763_v44 = vor.u32 %v7765_v28, %v760_v33  ;;  %v548_v46 = vsel %vm6297_vm2, 0, %v547_v25  ;;  %v7798_v52 = vshrl.u32 %v6424_v35, 16  ;;  %v880_v11 = vld [vmem:[#allocation2 + $0x28] sm:$0xf] }
  0x35   : > { %v700_v26 = vsel %vm6361_vm6, %v692_v16, %v699_v17  ;;  %v893_v27 = vsel %vm6377_vm7, %v691_v15, %v892_v12  ;;  %1877 = vmatpush.bf16.msrb.mxu1 %v5826_v8  ;;  %v755_v31 = vor.u32 %v7766_v18, %v752_v23  ;;  %v756_v32 = vrot.slane %v752_v23, 4  ;;  %2255 = vmatpush.bf16.msrb.mxu2 %v5846_v20  ;;  %v6578_v18 = vld [vmem:[#allocation2 + $0x50] sm:$0x1] }
  0x36   : > { %894 = vst [vmem:[#allocation2 + $0x40] sm:$0xf] %v893_v27  ;;  %v6437_v47 = vpack.c.bf16 %v458_v34, %v458_v34  ;;  %v7796_v53 = vshll.u32 %v6424_v35, 16  ;;  %v433_v59 = vadd.f32 %v6311_v6, %v397_v36  ;;  %v434_v61 = vadd.f32 %v6311_v6, %v398_v37  ;;  %v356_v27 = vld [vmem:[%s6286_s12 + $0x58] sm:$0xff]  ;;  %v365_v57 = vld [vmem:[%s6286_s12 + $0xa0] sm:$0xff] }
  0x37   : > { %895 = vst.msk [vmem:[#allocation2 + $0x44] sm:$0xf] %vm513_vm5, %v700_v26  ;;  %v909_v45 = vsel %vm6377_vm7, %v755_v31, %v908_v29  ;;  %v764_v60 = vsel %vm6361_vm6, %v756_v32, %v763_v44  ;;  %v405_v2 = vmul.f32 %v6306_v5, %v369_v38  ;;  %v406_v3 = vmul.f32 %v6306_v5, %v370_v42  ;;  %v6655_v56 = vld [vmem:[#allocation2 + $0x70] sm:$0x1] }
  0x38   : > { %910 = vst [vmem:[#allocation2 + $0x60] sm:$0xf] %v909_v45  ;;  %v640_v7 = vrot.slane %v7798_v52, 7  ;;  %v7787_v8 = vshrl.u32 %v6437_v47, 16  ;;  %v7789_v9 = vshll.u32 %v6437_v47, 16  ;;  %v465_v10 = vmax.f32 %v433_v59, 0.0 }
  0x39   : > { %943 = vst.msk [vmem:[#allocation2 + $0xb8] sm:$0xf] %vm513_vm5, %v6424_v35  ;;  %v466_v12 = vmax.f32 %v434_v61, 0.0  ;;  %v441_v14 = vadd.f32 %v6311_v6, %v405_v2  ;;  %v442_v15 = vadd.f32 %v6311_v6, %v406_v3  ;;  %v6177_v23 = vmov 0  }
  0x3a   : > { %911 = vst.msk [vmem:[#allocation2 + $0x64] sm:$0xf] %vm513_vm5, %v764_v60  ;;  %v643_v17 = vor.u32 %v7796_v53, %v640_v7  ;;  %v644_v19 = vrot.slane %v640_v7, 4  ;;  %v648_v20 = vrot.slane %v7787_v8, 7  ;;  %v6463_v21 = vpack.c.bf16 %v465_v10, %v465_v10  ;;  %v363_v60 = vld [vmem:[%s6286_s12 + $0x90] sm:$0xff] }
  0x3b   : > { %944 = vst.msk [vmem:[#allocation2 + $0xbc] sm:$0xf] %vm513_vm5, %v6437_v47  ;;  %v5792_v16 = vld [vmem:[#allocation2 + $0x20] sm:$0xff]  ;;  %v6465_v22 = vpack.c.bf16 %v466_v12, %v466_v12  ;;  %v473_v25 = vmax.f32 %v441_v14, 0.0  ;;  %v474_v26 = vmax.f32 %v442_v15, 0.0  ;;  %v391_v29 = vmul.f32 %v6306_v5, %v355_v4  ;;  %v364_v12 = vld [vmem:[%s6286_s12 + $0x98] sm:$0xff] }
  0x3c   : > { %549 = vst [vmem:[#allocation2 + $0x48] sm:$0x1] %v548_v46  ;;  %5004 = vmatmul.msk.bf16.vlgmr.msra.gmra.mxu1 %vm312_vm8, %v5792_v16  ;;  %v651_v31 = vor.u32 %v7789_v9, %v648_v20  ;;  %v881_v32 = vsel %vm6377_vm7, %v643_v17, %v880_v11  ;;  %v7773_v33 = vshrl.u32 %v6463_v21, 16  ;;  %v7772_v34 = vshll.u32 %v6463_v21, 16  ;;  %v5866_v11 = vld [vmem:[#allocation6 + $0x70] sm:$0xff]  ;;  %v345_v20 = vld [vmem:[%s6286_s12] sm:$0xff] }
  0x3d   : > { %514 = vst.msk [vmem:[#allocation2] sm:$0xf] %vm513_vm5, %v6177_v23  ;;  %v7774_v36 = vshrl.u32 %v6465_v22, 16  ;;  %v7769_v37 = vshll.u32 %v6465_v22, 16  ;;  %v6482_v38 = vpack.c.bf16 %v473_v25, %v473_v25  ;;  %v6484_v42 = vpack.c.bf16 %v474_v26, %v474_v26  ;;  %2633 = vmatpush.bf16.msrb.mxu3 %v5866_v11  ;;  %v374_v9 = vld [vmem:[%s6286_s12 + $0xe8] sm:$0xff] }
  0x3e   : > { %v5796_v30 = vld [vmem:[#allocation2 + $0x40] sm:$0xff]  ;;  %951 = vst.msk [vmem:[#allocation2 + $0xd8] sm:$0xf] %vm513_vm5, %v6463_v21  ;;  %v652_v44 = vsel %vm6361_vm6, %v644_v19, %v651_v31  ;;  %v704_v45 = vrot.slane %v7773_v33, 7  ;;  %v392_v46 = vmul.f32 %v6306_v5, %v356_v27  ;;  %v427_v59 = vadd.f32 %v6311_v6, %v391_v29  ;;  %v5887_v29 = vld [vmem:[#allocation6 + $0x98] sm:$0xff] }
  0x3f   : > { %882 = vst [vmem:[#allocation2 + $0x28] sm:$0xf] %v881_v32  ;;  %5008 = vmatmul.msk.bf16.vlgmr.msra.gmra.mxu2 %vm312_vm8, %v5796_v30  ;;  %v712_v2 = vrot.slane %v7774_v36, 7  ;;  %v7762_v3 = vshrl.u32 %v6482_v38, 16  ;;  %v7764_v10 = vshrl.u32 %v6484_v42, 16  ;;  %v399_v19 = vmul.f32 %v6306_v5, %v363_v60  ;;  %3010 = vmatpush.bf16.msrb.mxu0 %v5887_v29  ;;  %v346_v60 = vld [vmem:[%s6286_s12 + $0x8] sm:$0xff] }
  0x40   : > { %952 = vst.msk [vmem:[#allocation2 + $0xdc] sm:$0xf] %vm513_vm5, %v6465_v22  ;;  %v707_v4 = vor.u32 %v7772_v34, %v704_v45  ;;  %v708_v7 = vrot.slane %v704_v45, 4  ;;  %v428_v17 = vadd.f32 %v6311_v6, %v392_v46  ;;  %v7761_v27 = vshll.u32 %v6484_v42, 16  ;;  %v526_v53 = vld [vmem:[#allocation2 + $0x10] sm:$0x1] }
  0x41   : > { %v5800_v61 = vld [vmem:[#allocation2 + $0x60] sm:$0xff]  ;;  %883 = vst.msk [vmem:[#allocation2 + $0x2c] sm:$0xf] %vm513_vm5, %v652_v44  ;;  %v715_v14 = vor.u32 %v7769_v37, %v712_v2  ;;  %v768_v16 = vrot.slane %v7762_v3, 7  ;;  %v776_v26 = vrot.slane %v7764_v10, 7  ;;  %v459_v30 = vmax.f32 %v427_v59, 0.0 }
  0x42   : > { %515 = vst.msk [vmem:[#allocation2 + $0x4] sm:$0xf] %vm513_vm5, %v6177_v23  ;;  %5012 = vmatmul.msk.bf16.vlgmr.msra.gmra.mxu3 %vm312_vm8, %v5800_v61  ;;  %v460_v32 = vmax.f32 %v428_v17, 0.0  ;;  %v7763_v44 = vshll.u32 %v6482_v38, 16  ;;  %v400_v46 = vmul.f32 %v6306_v5, %v364_v12  ;;  %v559_v59 = vld [vmem:[#allocation2 + $0x68] sm:$0x1]  ;;  %v435_v2 = vadd.f32 %v6311_v6, %v399_v19 }
  0x43   : > { %v896_v15 = vld [vmem:[#allocation2 + $0x48] sm:$0xf]  ;;  %517 = vst.msk [vmem:[#allocation2 + $0x88] sm:$0xf] %vm513_vm5, %v6177_v23  ;;  %v716_v31 = vsel %vm6361_vm6, %v708_v7, %v715_v14  ;;  %v6527_v45 = vpack.c.bf16 %v459_v30, %v459_v30  ;;  %v772_v11 = vrot.slane %v768_v16, 4  ;;  %v779_v14 = vor.u32 %v7761_v27, %v776_v26  ;;  %v371_v17 = vld [vmem:[%s6286_s12 + $0xd0] sm:$0xff] }
  0x44   : > { %v897_v25 = vsel %vm6377_vm7, %v707_v4, %v896_v15  ;;  %518 = vst.msk [vmem:[#allocation2 + $0x8c] sm:$0xf] %vm513_vm5, %v6177_v23  ;;  %v6533_v61 = vpack.c.bf16 %v460_v32, %v460_v32  ;;  %v381_v4 = vmul.f32 %v6306_v5, %v345_v20  ;;  %v436_v15 = vadd.f32 %v6311_v6, %v400_v46  ;;  %v5825_v46 = vld [vmem:[#allocation6 + $0x28] sm:$0xff]  ;;  %v372_v10 = vld [vmem:[%s6286_s12 + $0xd8] sm:$0xff] }
  0x45   : > { %898 = vst [vmem:[#allocation2 + $0x48] sm:$0xf] %v897_v25  ;;  %v7795_v12 = vshrl.u32 %v6527_v45, 16  ;;  %v467_v29 = vmax.f32 %v435_v2, 0.0  ;;  %v382_v30 = vmul.f32 %v6306_v5, %v346_v60  ;;  %v6553_v26 = vor.u32 %v7763_v44, %v768_v16  ;;  %v5845_v27 = vld [vmem:[#allocation6 + $0x48] sm:$0xff]  ;;  %1878 = vmatpush.bf16.msrb.mxu1 %v5825_v46 }
  0x46   : > { %899 = vst.msk [vmem:[#allocation2 + $0x4c] sm:$0xf] %vm513_vm5, %v716_v31  ;;  %v7780_v19 = vshrl.u32 %v6533_v61, 16  ;;  %v7781_v20 = vshll.u32 %v6533_v61, 16  ;;  %v468_v32 = vmax.f32 %v436_v15, 0.0  ;;  %v417_v3 = vadd.f32 %v6311_v6, %v381_v4  ;;  %2256 = vmatpush.bf16.msrb.mxu2 %v5845_v27  ;;  %v358_v37 = vld [vmem:[%s6286_s12 + $0x68] sm:$0xff] }
  0x47   : > { %929 = vst.msk [vmem:[#allocation2 + $0x90] sm:$0xf] %vm513_vm5, %v6177_v23  ;;  %v6557_v31 = vrot.slane %v7795_v12, 7  ;;  %v538_v60 = vld [vmem:[#allocation2 + $0x30] sm:$0x1]  ;;  %v6565_v16 = vpack.c.bf16 %v467_v29, %v467_v29  ;;  %v418_v44 = vadd.f32 %v6311_v6, %v382_v30  ;;  %v407_v15 = vmul.f32 %v6306_v5, %v371_v17 }
  0x48   : > { %v5793_v7 = vld [vmem:[#allocation2 + $0x28] sm:$0xff]  ;;  %930 = vst.msk [vmem:[#allocation2 + $0x94] sm:$0xf] %vm513_vm5, %v6177_v23  ;;  %v664_v2 = vrot.slane %v7780_v19, 7  ;;  %v560_v4 = vsel %vm6297_vm2, 0, %v559_v59  ;;  %v6576_v28 = vpack.c.bf16 %v468_v32, %v468_v32  ;;  %v449_v29 = vmax.f32 %v417_v3, 0.0 }
  0x49   : > { %v5788_v25 = vld [vmem:[#allocation2] sm:$0xff]  ;;  %932 = vst.msk [vmem:[#allocation2 + $0x118] sm:$0xf] %vm513_vm5, %v6177_v23  ;;  %v660_v17 = vrot.slane %v6557_v31, 4  ;;  %v6593_v46 = vld [vmem:[#allocation2 + $0x8] sm:$0x1]  ;;  %v408_v13 = vmul.f32 %v6306_v5, %v372_v10  ;;  %v393_v33 = vmul.f32 %v6306_v5, %v357_v24  ;;  %v394_v36 = vmul.f32 %v6306_v5, %v358_v37 }
  0x4a   : > { %933 = vst.msk [vmem:[#allocation2 + $0x11c] sm:$0xf] %vm513_vm5, %v6177_v23  ;;  %5000 = vmatmul.msk.bf16.vlgmr.msra.gmra.mxu0 %vm312_vm8, %v5788_v25  ;;  %v780_v25 = vsel %vm6361_vm6, %v772_v11, %v779_v14  ;;  %v667_v59 = vor.u32 %v7781_v20, %v664_v2  ;;  %v7770_v11 = vshrl.u32 %v6565_v16, 16  ;;  %v450_v14 = vmax.f32 %v418_v44, 0.0 }
  0x4b   : > { %968 = vst.msk [vmem:[#allocation2 + $0x120] sm:$0xf] %vm513_vm5, %v6177_v23  ;;  %v7771_v3 = vshrl.u32 %v6576_v28, 16  ;;  %v7776_v27 = vshll.u32 %v6576_v28, 16  ;;  %v6591_v32 = vpack.c.bf16 %v449_v29, %v449_v29  ;;  %v539_v2 = vsel %vm6297_vm2, 0, %v538_v60 }
  0x4c   : > { %969 = vst.msk [vmem:[#allocation2 + $0x124] sm:$0xf] %vm513_vm5, %v6177_v23  ;;  %5005 = vmatmul.msk.bf16.gmra.mxu1 %vm312_vm8, %v5793_v7  ;;  %v720_v44 = vrot.slane %v7770_v11, 7  ;;  %v6600_v7 = vpack.c.bf16 %v450_v14, %v450_v14  ;;  %v7791_v29 = vshll.u32 %v6527_v45, 16  ;;  %v551_v10 = vsel %vm6297_vm2, 0, %v6578_v18 }
  0x4d   : > { %v5797_v30 = vld [vmem:[#allocation2 + $0x48] sm:$0xff]  ;;  %971 = vst.msk [vmem:[#allocation2 + $0x1a8] sm:$0xf] %vm513_vm5, %v6177_v23  ;;  %v728_v60 = vrot.slane %v7771_v3, 7  ;;  %v444_v3 = vadd.f32 %v6311_v6, %v408_v13  ;;  %v7782_v13 = vshll.u32 %v6565_v16, 16  ;;  %v577_v24 = vshll.u32 %v6591_v32, 16 }
  0x4e   : > { %972 = vst.msk [vmem:[#allocation2 + $0x1ac] sm:$0xf] %vm513_vm5, %v6177_v23  ;;  %v443_v23 = vadd.f32 %v6311_v6, %v407_v15  ;;  %v668_v15 = vsel %vm6361_vm6, %v660_v17, %v667_v59  ;;  %v582_v14 = vshrl.u32 %v6600_v7, 16  ;;  %v585_v11 = vshll.u32 %v6600_v7, 16 }
  0x4f   : > { %561 = vst [vmem:[#allocation2 + $0x68] sm:$0x1] %v560_v4  ;;  %5009 = vmatmul.msk.bf16.gmra.mxu2 %vm312_vm8, %v5797_v30  ;;  %v574_v4 = vshrl.u32 %v6591_v32, 16  ;;  %v724_v30 = vrot.slane %v720_v44, 4  ;;  %v731_v18 = vor.u32 %v7776_v27, %v728_v60  ;;  %v659_v60 = vor.u32 %v7791_v29, %v6557_v31  ;;  %v5886_v27 = vld [vmem:[#allocation6 + $0x90] sm:$0xff] }
  0x50   : > { %915 = vst.msk [vmem:[#allocation2 + $0x6c] sm:$0xf] %vm513_vm5, %v780_v25  ;;  %v524_v25 = vsel %vm6297_vm2, 0, %v6593_v46  ;;  %v475_v34 = vmax.f32 %v443_v23, 0.0  ;;  %v584_v59 = vrot.slane %v582_v14, 7  ;;  %v5865_v23 = vld [vmem:[#allocation6 + $0x68] sm:$0xff]  ;;  %v429_v37 = vadd.f32 %v6311_v6, %v393_v33  ;;  %3011 = vmatpush.bf16.msrb.mxu0 %v5886_v27 }
  0x51   : > { %959 = vst.msk [vmem:[#allocation2 + $0xf8] sm:$0xf] %vm513_vm5, %v6482_v38  ;;  %v6630_v17 = vrot.slane %v574_v4, 7  ;;  %v430_v31 = vadd.f32 %v6311_v6, %v394_v36  ;;  %2634 = vmatpush.bf16.msrb.mxu3 %v5865_v23  ;;  %v401_v19 = vmul.f32 %v6306_v5, %v365_v57  ;;  %vm1025_vm10 = vsmask.f32 3328 }
  0x52   : > { %960 = vst.msk [vmem:[#allocation2 + $0xfc] sm:$0xf] %vm513_vm5, %v6484_v42  ;;  %v6645_v55 = vpack.c.bf16 %v475_v34, %v475_v34  ;;  %v366_v34 = vld [vmem:[%s6286_s12 + $0xa8] sm:$0xff]  ;;  %v587_v20 = vor.u32 %v585_v11, %v584_v59  ;;  %v461_v57 = vmax.f32 %v429_v37, 0.0  ;;  %vm1026_vm12 = vsmask.f32 7440  ;;  %vm6931_vm15 = vmand %vm513_vm5, %vm1025_vm10 }
  0x53   : > { %540 = vst [vmem:[#allocation2 + $0x30] sm:$0x1] %v539_v2  ;;  %v476_v2 = vmax.f32 %v444_v3, 0.0  ;;  %v732_v3 = vsel %vm6361_vm6, %v724_v30, %v731_v18  ;;  %v580_v36 = vrot.slane %v6630_v17, 4  ;;  %v347_v18 = vld [vmem:[%s6286_s12 + $0x10] sm:$0xff]  ;;  %v462_v23 = vmax.f32 %v430_v31, 0.0  ;;  %vm6895_vm14 = vmor %vm1025_vm10, %vm1026_vm12 }
  0x54   : > { %887 = vst.msk [vmem:[#allocation2 + $0x34] sm:$0xf] %vm513_vm5, %v668_v15  ;;  %v7783_v30 = vshrl.u32 %v6645_v55, 16  ;;  %v437_v59 = vadd.f32 %v6311_v6, %v401_v19  ;;  %v6682_v31 = vpack.c.bf16 %v461_v57, %v461_v57 }
  0x55   : > { %945 = vst.msk [vmem:[#allocation2 + $0xc0] sm:$0xf] %vm513_vm5, %v6527_v45  ;;  %v6653_v15 = vpack.c.bf16 %v476_v2, %v476_v2  ;;  %v588_v19 = vsel %vm6361_vm6, %v580_v36, %v587_v20 }
  0x56   : > { %v912_v54 = vld [vmem:[#allocation2 + $0x68] sm:$0xf]  ;;  %946 = vst.msk [vmem:[#allocation2 + $0xc4] sm:$0xf] %vm513_vm5, %v6533_v61 }
  0x57   : > { %v913_v33 = vsel %vm6377_vm7, %v6553_v26, %v912_v54  ;;  %552 = vst [vmem:[#allocation2 + $0x50] sm:$0x1] %v551_v10  ;;  %v7784_v27 = vshrl.u32 %v6653_v15, 16  ;;  %v7785_v2 = vshll.u32 %v6653_v15, 16  ;;  %v723_v54 = vor.u32 %v7782_v13, %v720_v44 }
  0x58   : > { %914 = vst [vmem:[#allocation2 + $0x68] sm:$0xf] %v913_v33  ;;  %v6674_v26 = vrot.slane %v7783_v30, 7  ;;  %v402_v10 = vmul.f32 %v6306_v5, %v366_v34  ;;  %v6684_v44 = vpack.c.bf16 %v462_v23, %v462_v23  ;;  %v383_v13 = vmul.f32 %v6306_v5, %v347_v18 }
  0x59   : > { %903 = vst.msk [vmem:[#allocation2 + $0x54] sm:$0xf] %vm513_vm5, %v732_v3  ;;  %v792_v37 = vrot.slane %v7784_v27, 7  ;;  %v348_v3 = vld [vmem:[%s6286_s12 + $0x18] sm:$0xff]  ;;  %v563_v34 = vsel %vm6297_vm2, 0, %v6655_v56  ;;  %v469_v56 = vmax.f32 %v437_v59, 0.0 }
  0x5a   : > { %v884_v33 = vld [vmem:[#allocation2 + $0x30] sm:$0xf]  ;;  %953 = vst.msk [vmem:[#allocation2 + $0xe0] sm:$0xf] %vm513_vm5, %v6565_v16  ;;  %v438_v57 = vadd.f32 %v6311_v6, %v402_v10  ;;  %v788_v23 = vrot.slane %v6674_v26, 4  ;;  %v7790_v20 = vshll.u32 %v6684_v44, 16  ;;  %v419_v46 = vadd.f32 %v6311_v6, %v383_v13 }
  0x5b   : > { %v885_v30 = vsel %vm6377_vm7, %v659_v60, %v884_v33  ;;  %954 = vst.msk [vmem:[#allocation2 + $0xe4] sm:$0xf] %vm513_vm5, %v6576_v28  ;;  %v795_v18 = vor.u32 %v7785_v2, %v792_v37  ;;  %v7786_v60 = vshrl.u32 %v6682_v31, 16  ;;  %v7788_v33 = vshrl.u32 %v6684_v44, 16  ;;  %v541_v27 = vld [vmem:[#allocation2 + $0x38] sm:$0x1] }
  0x5c   : > { %886 = vst [vmem:[#allocation2 + $0x30] sm:$0xf] %v885_v30  ;;  %v470_v36 = vmax.f32 %v438_v57, 0.0  ;;  %v384_v30 = vmul.f32 %v6306_v5, %v348_v3  ;;  %v6721_v3 = vpack.c.bf16 %v469_v56, %v469_v56  ;;  %v5824_v57 = vld [vmem:[#allocation6 + $0x20] sm:$0xff]  ;;  %v579_v13 = vor.u32 %v577_v24, %v6630_v17 }
  0x5d   : > { %525 = vst [vmem:[#allocation2 + $0x8] sm:$0x1] %v524_v25  ;;  %v6712_v37 = vrot.slane %v7786_v60, 7  ;;  %v680_v2 = vrot.slane %v7788_v33, 7  ;;  %v5844_v60 = vld [vmem:[#allocation6 + $0x40] sm:$0xff]  ;;  %v7792_v33 = vshll.u32 %v6645_v55, 16  ;;  %1879 = vmatpush.bf16.msrb.mxu1 %v5824_v57 }
  0x5e   : > { %v900_v10 = vld [vmem:[#allocation2 + $0x50] sm:$0xf]  ;;  %867 = vst.msk [vmem:[#allocation2 + $0xc] sm:$0xf] %vm513_vm5, %v588_v19  ;;  %v6723_v19 = vpack.c.bf16 %v470_v36, %v470_v36  ;;  %v420_v8 = vadd.f32 %v6311_v6, %v384_v30  ;;  %2257 = vmatpush.bf16.msrb.mxu2 %v5844_v60 }
  0x5f   : > { %v5801_v25 = vld [vmem:[#allocation2 + $0x68] sm:$0xff]  ;;  %v901_v59 = vsel %vm6377_vm7, %v723_v54, %v900_v10  ;;  %935 = vst.msk [vmem:[#allocation2 + $0x98] sm:$0xf] %vm513_vm5, %v6591_v32  ;;  %v796_v54 = vsel %vm6361_vm6, %v788_v23, %v795_v18  ;;  %v451_v10 = vmax.f32 %v419_v46, 0.0  ;;  %v373_v56 = vld [vmem:[%s6286_s12 + $0xe0] sm:$0xff]  ;;  %v676_v36 = vrot.slane %v6712_v37, 4 }
  0x60   : > { %902 = vst [vmem:[#allocation2 + $0x50] sm:$0xf] %v901_v59  ;;  %5013 = vmatmul.msk.bf16.gmra.mxu3 %vm312_vm8, %v5801_v25  ;;  %v683_v30 = vor.u32 %v7790_v20, %v680_v2  ;;  %v7793_v59 = vshrl.u32 %v6721_v3, 16  ;;  %v7794_v17 = vshrl.u32 %v6723_v19, 16  ;;  %v7797_v23 = vshll.u32 %v6723_v19, 16 }
  0x61   : > { %936 = vst.msk [vmem:[#allocation2 + $0x9c] sm:$0xf] %vm513_vm5, %v6600_v7  ;;  %v452_v18 = vmax.f32 %v420_v8, 0.0  ;;  %v6743_v46 = vpack.c.bf16 %v451_v10, %v451_v10  ;;  %v542_v2 = vsel %vm6297_vm2, 0, %v541_v27  ;;  %v409_v57 = vmul.f32 %v6306_v5, %v373_v56  ;;  %v349_v10 = vld [vmem:[%s6286_s12 + $0x20] sm:$0xff] }
  0x62   : > { %564 = vst [vmem:[#allocation2 + $0x70] sm:$0x1] %v563_v34  ;;  %v6750_v20 = vrot.slane %v7793_v59, 7  ;;  %v744_v34 = vrot.slane %v7794_v17, 7  ;;  %v787_v8 = vor.u32 %v7792_v33, %v6674_v26  ;;  %v7800_v26 = vshll.u32 %v6682_v31, 16  ;;  %v350_v17 = vld [vmem:[%s6286_s12 + $0x28] sm:$0xff] }
  0x63   : > { %v5794_v25 = vld [vmem:[#allocation2 + $0x30] sm:$0xff]  ;;  %919 = vst.msk [vmem:[#allocation2 + $0x74] sm:$0xf] %vm513_vm5, %v796_v54  ;;  %v6760_v60 = vpack.c.bf16 %v452_v18, %v452_v18  ;;  %v590_v27 = vshrl.u32 %v6743_v46, 16  ;;  %v410_v54 = vmul.f32 %v6306_v5, %v374_v9  ;;  %v684_v18 = vsel %vm6361_vm6, %v676_v36, %v683_v30  ;;  %v553_v33 = vld [vmem:[#allocation2 + $0x58] sm:$0x1] }
  0x64   : > { %v864_v29 = vld [vmem:[#allocation2 + $0x8] sm:$0xf]  ;;  %961 = vst.msk [vmem:[#allocation2 + $0x100] sm:$0xf] %vm513_vm5, %v6645_v55  ;;  %5006 = vmatmul.msk.bf16.gmra.mxu1 %vm312_vm8, %v5794_v25  ;;  %v740_v59 = vrot.slane %v6750_v20, 4  ;;  %v747_v9 = vor.u32 %v7797_v23, %v744_v34  ;;  %v554_v34 = vsel %vm6297_vm2, 0, %v553_v33  ;;  %v675_v50 = vor.u32 %v7800_v26, %v6712_v37 }
  0x65   : > { %v865_v56 = vsel %vm6377_vm7, %v579_v13, %v864_v29  ;;  %962 = vst.msk [vmem:[#allocation2 + $0x104] sm:$0xf] %vm513_vm5, %v6653_v15  ;;  %v6778_v25 = vrot.slane %v590_v27, 7  ;;  %v598_v29 = vshrl.u32 %v6760_v60, 16  ;;  %v445_v13 = vadd.f32 %v6311_v6, %v409_v57  ;;  %v5864_v57 = vld [vmem:[#allocation6 + $0x60] sm:$0xff] }
  0x66   : > { %866 = vst [vmem:[#allocation2 + $0x8] sm:$0xf] %v865_v56  ;;  %v601_v36 = vshll.u32 %v6760_v60, 16  ;;  %v446_v30 = vadd.f32 %v6311_v6, %v410_v54  ;;  %v385_v56 = vmul.f32 %v6306_v5, %v349_v10  ;;  %v5885_v10 = vld [vmem:[#allocation6 + $0x88] sm:$0xff]  ;;  %2635 = vmatpush.bf16.msrb.mxu3 %v5864_v57  ;;  %v980_v7 = vld [vmem:[#allocation2 + $0x134] sm:$0x8] }
  0x67   : > { %v5798_v12 = vld [vmem:[#allocation2 + $0x50] sm:$0xff]  ;;  %543 = vst [vmem:[#allocation2 + $0x38] sm:$0x1] %v542_v2  ;;  %v600_v23 = vrot.slane %v598_v29, 7  ;;  %v477_v52 = vmax.f32 %v445_v13, 0.0  ;;  %v596_v37 = vrot.slane %v6778_v25, 4  ;;  %3012 = vmatpush.bf16.msrb.mxu0 %v5885_v10 }
  0x68   : > { %891 = vst.msk [vmem:[#allocation2 + $0x3c] sm:$0xf] %vm513_vm5, %v684_v18  ;;  %5010 = vmatmul.msk.bf16.gmra.mxu2 %vm312_vm8, %v5798_v12  ;;  %v478_v54 = vmax.f32 %v446_v30, 0.0  ;;  %v386_v18 = vmul.f32 %v6306_v5, %v350_v17  ;;  %v421_v33 = vadd.f32 %v6311_v6, %v385_v56  ;;  %v748_v12 = vsel %vm6361_vm6, %v740_v59, %v747_v9  ;;  %v5907_v10 = vld [vmem:[#allocation6 + $0xb8] sm:$0xff] }
  0x69   : > { %v916_v2 = vld [vmem:[#allocation2 + $0x70] sm:$0xf]  ;;  %947 = vst.msk [vmem:[#allocation2 + $0xc8] sm:$0xf] %vm513_vm5, %v6682_v31  ;;  %v6806_v26 = vpack.c.bf16 %v477_v52, %v477_v52  ;;  %v603_v5 = vor.u32 %v601_v36, %v600_v23  ;;  %v7804_v56 = vshll.u32 %v6721_v3, 16  ;;  %v527_v59 = vsel %vm6297_vm2, 0, %v526_v53  ;;  %3388 = vmatpush.bf16.msra.mxu1 %v5907_v10 }
  0x6a   : > { %v917_v13 = vsel %vm6377_vm7, %v787_v8, %v916_v2  ;;  %948 = vst.msk [vmem:[#allocation2 + $0xcc] sm:$0xf] %vm513_vm5, %v6684_v44  ;;  %v6810_v17 = vpack.c.bf16 %v478_v54, %v478_v54  ;;  %v422_v8 = vadd.f32 %v6311_v6, %v386_v18  ;;  %v453_v30 = vmax.f32 %v421_v33, 0.0 }
  0x6b   : > { %918 = vst [vmem:[#allocation2 + $0x70] sm:$0xf] %v917_v13  ;;  %v593_v52 = vshll.u32 %v6743_v46, 16  ;;  %v7801_v9 = vshrl.u32 %v6806_v26, 16  ;;  %v604_v33 = vsel %vm6361_vm6, %v596_v37, %v603_v5  ;;  %v529_v5 = vld [vmem:[#allocation2 + $0x18] sm:$0x1] }
  0x6c   : > { %555 = vst [vmem:[#allocation2 + $0x58] sm:$0x1] %v554_v34  ;;  %v7802_v23 = vshrl.u32 %v6810_v17, 16  ;;  %v7803_v2 = vshll.u32 %v6810_v17, 16  ;;  %v454_v54 = vmax.f32 %v422_v8, 0.0  ;;  %v6821_v6 = vpack.c.bf16 %v453_v30, %v453_v30 }
  0x6d   : > { %v5789_v57 = vld [vmem:[#allocation2 + $0x8] sm:$0xff]  ;;  %907 = vst.msk [vmem:[#allocation2 + $0x5c] sm:$0xf] %vm513_vm5, %v748_v12  ;;  %v800_v53 = vrot.slane %v7801_v9, 7  ;;  %v739_v30 = vor.u32 %v7804_v56, %v6750_v20 }
  0x6e   : > { %v888_v34 = vld [vmem:[#allocation2 + $0x38] sm:$0xf]  ;;  %955 = vst.msk [vmem:[#allocation2 + $0xe8] sm:$0xf] %vm513_vm5, %v6721_v3  ;;  %5001 = vmatmul.msk.bf16.gmra.mxu0 %vm312_vm8, %v5789_v57  ;;  %v808_v13 = vrot.slane %v7802_v23, 7  ;;  %v5927_v12 = vld [vmem:[#allocation6 + $0xd8] sm:$0xff]  ;;  %v6836_v8 = vpack.c.bf16 %v454_v54, %v454_v54 }
  0x6f   : > { %v889_v18 = vsel %vm6377_vm7, %v675_v50, %v888_v34  ;;  %956 = vst.msk [vmem:[#allocation2 + $0xec] sm:$0xf] %vm513_vm5, %v6723_v19  ;;  %v565_v57 = vld [vmem:[#allocation2 + $0x78] sm:$0x1]  ;;  %v804_v9 = vrot.slane %v800_v53, 4  ;;  %v606_v50 = vshrl.u32 %v6821_v6, 16  ;;  %3767 = vmatpush.bf16.msra.mxu2 %v5927_v12 }
  0x70   : > { %890 = vst [vmem:[#allocation2 + $0x38] sm:$0xf] %v889_v18  ;;  %v811_v37 = vor.u32 %v7803_v2, %v808_v13  ;;  %v614_v34 = vshrl.u32 %v6836_v8, 16  ;;  %v617_v54 = vshll.u32 %v6836_v8, 16  ;;  %v566_v10 = vsel %vm6297_vm2, 0, %v565_v57 }
  0x71   : > { %528 = vst [vmem:[#allocation2 + $0x10] sm:$0x1] %v527_v59  ;;  %v608_v20 = vrot.slane %v606_v50, 7  ;;  %v595_v59 = vor.u32 %v593_v52, %v6778_v25  ;;  %v530_v12 = vsel %vm6297_vm2, 0, %v529_v5  ;;  %v1028_v57 = vrot.slane %v574_v4, 4  ;;  %v5947_v5 = vld [vmem:[#allocation6 + $0xf8] sm:$0xff] }
  0x72   : > { %v5802_v18 = vld [vmem:[#allocation2 + $0x70] sm:$0xff]  ;;  %871 = vst.msk [vmem:[#allocation2 + $0x14] sm:$0xf] %vm513_vm5, %v604_v33  ;;  %v616_v13 = vrot.slane %v614_v34, 7  ;;  %v812_v25 = vsel %vm6361_vm6, %v804_v9, %v811_v37  ;;  %v801_v2 = vshll.u32 %v6806_v26, 16  ;;  %4146 = vmatpush.bf16.msra.mxu3 %v5947_v5 }
  0x73   : > { %v904_v23 = vld [vmem:[#allocation2 + $0x58] sm:$0xf]  ;;  %937 = vst.msk [vmem:[#allocation2 + $0xa0] sm:$0xf] %vm513_vm5, %v6743_v46  ;;  %5014 = vmatmul.msk.bf16.gmra.mxu3 %vm312_vm8, %v5802_v18  ;;  %v612_v56 = vrot.slane %v608_v20, 4  ;;  %v5884_v37 = vld [vmem:[#allocation6 + $0x80] sm:$0xff] }
  0x74   : > { %v905_v33 = vsel %vm6377_vm7, %v739_v30, %v904_v23  ;;  %938 = vst.msk [vmem:[#allocation2 + $0xa4] sm:$0xf] %vm513_vm5, %v6760_v60  ;;  %v619_v18 = vor.u32 %v617_v54, %v616_v13  ;;  %v1029_v23 = vrot.slane %v577_v24, 5  ;;  %3013 = vmatpush.bf16.msrb.mxu0 %v5884_v37 }
  0x75   : > { %906 = vst [vmem:[#allocation2 + $0x58] sm:$0xf] %v905_v33  ;;  %v977_v33 = vld [vmem:[#allocation2 + $0x12c] sm:$0x8] }
  0x76   : > { %567 = vst [vmem:[#allocation2 + $0x78] sm:$0x1] %v566_v10  ;;  %v1030_v30 = vor.u32 %v1029_v23, %v1028_v57  ;;  %v620_v24 = vsel %vm6361_vm6, %v612_v56, %v619_v18  ;;  %v803_v10 = vor.u32 %v801_v2, %v800_v53  ;;  %v1032_v57 = vrot.slane %v585_v11, 5 }
  0x77   : > { %v5795_v9 = vld [vmem:[#allocation2 + $0x38] sm:$0xff]  ;;  %923 = vst.msk [vmem:[#allocation2 + $0x7c] sm:$0xf] %vm513_vm5, %v812_v25  ;;  %v609_v25 = vshll.u32 %v6821_v6, 16  ;;  %v1034_v18 = vrot.slane %v582_v14, 4 }
  0x78   : > { %v868_v4 = vld [vmem:[#allocation2 + $0x10] sm:$0xf]  ;;  %963 = vst.msk [vmem:[#allocation2 + $0x108] sm:$0xf] %vm513_vm5, %v6806_v26  ;;  %5007 = vmatmul.msk.bf16.gmra.mxu1 %vm312_vm8, %v5795_v9 }
  0x79   : > { %v869_v32 = vsel %vm6377_vm7, %v595_v59, %v868_v4  ;;  %964 = vst.msk [vmem:[#allocation2 + $0x10c] sm:$0xf] %vm513_vm5, %v6810_v17  ;;  %v1031_v59 = vrot.slane %v1030_v30, 4  ;;  %v611_v14 = vor.u32 %v609_v25, %v608_v20  ;;  %v981_v30 = vsel %vm6888_vm13, 0, %v980_v7 }
  0x7a   : > { %870 = vst [vmem:[#allocation2 + $0x10] sm:$0xf] %v869_v32  ;;  %v1035_v4 = vor.u32 %v1034_v18, %v1032_v57  ;;  %v1037_v32 = vrot.slane %v590_v27, 4 }
  0x7b   : > { %531 = vst [vmem:[#allocation2 + $0x18] sm:$0x1] %v530_v12  ;;  %v978_v12 = vsel %vm6888_vm13, 0, %v977_v33  ;;  %v1033_v11 = vsel %vm6895_vm14, %v1031_v59, %v1032_v57  ;;  %v1043_v33 = vrot.slane %v598_v29, 4  ;;  %v5808_v57 = vld [vmem:[#allocation2 + $0x90] sm:$0xff]  ;;  %v5967_v29 = vld [vmem:[#allocation6 + $0x118] sm:$0xff] }
  0x7c   : > { %v5799_v53 = vld [vmem:[#allocation2 + $0x58] sm:$0xff]  ;;  %875 = vst.msk [vmem:[#allocation2 + $0x1c] sm:$0xf] %vm513_vm5, %v620_v24  ;;  %v1038_v24 = vrot.slane %v593_v52, 5  ;;  %v1036_v59 = vrot.slane %v1035_v4, 4  ;;  %4525 = vmatpush.bf16.msra.mxu0 %v5967_v29  ;;  %v5906_v29 = vld [vmem:[#allocation6 + $0xb0] sm:$0xff] }
  0x7d   : > { %v920_v23 = vld [vmem:[#allocation2 + $0x78] sm:$0xf]  ;;  %939 = vst.msk [vmem:[#allocation2 + $0xa8] sm:$0xf] %vm513_vm5, %v6821_v6  ;;  %5011 = vmatmul.msk.bf16.gmra.mxu2 %vm312_vm8, %v5799_v53  ;;  %3389 = vmatpush.bf16.msra.mxu1 %v5906_v29 }
  0x7e   : > { %v921_v9 = vsel %vm6377_vm7, %v803_v10, %v920_v23  ;;  %940 = vst.msk [vmem:[#allocation2 + $0xac] sm:$0xf] %vm513_vm5, %v6836_v8  ;;  %v1041_v10 = vrot.slane %v601_v36, 5  ;;  %v1039_v53 = vor.u32 %v1038_v24, %v1037_v32  ;;  %v1050_v32 = vrot.slane %v617_v54, 5  ;;  %v5868_v54 = vld [vmem:[#allocation2 + $0x98] sm:$0xff] }
  0x7f   : > { %922 = vst [vmem:[#allocation2 + $0x78] sm:$0xf] %v921_v9  ;;  %v1052_v24 = vrot.slane %v614_v34, 4  ;;  %v986_v34 = vld [vmem:[#allocation2 + $0x144] sm:$0x8] }
  0x80   : > { %979 = vst [vmem:[#allocation2 + $0x12c] sm:$0x8] %v978_v12  ;;  %v1044_v27 = vor.u32 %v1043_v33, %v1041_v10  ;;  %v1040_v18 = vrot.slane %v1039_v53, 4 }
  0x81   : > { %v5790_v37 = vld [vmem:[#allocation2 + $0x10] sm:$0xff]  ;;  %1204 = vst.msk [vmem:[#allocation2 + $0x128] sm:$0xf] %vm513_vm5, %v1033_v11  ;;  %v5828_v11 = vld [vmem:[#allocation2 + $0x120] sm:$0xff]  ;;  %v1053_v33 = vor.u32 %v1052_v24, %v1050_v32  ;;  %v7821_v24 = vshrl.u32 %v6340_v40, 16 }
  0x82   : > { %v872_v5 = vld [vmem:[#allocation2 + $0x18] sm:$0xf]  ;;  %982 = vst [vmem:[#allocation2 + $0x134] sm:$0x8] %v981_v30  ;;  %5002 = vmatmul.msk.bf16.gmra.mxu0 %vm312_vm8, %v5790_v37  ;;  %v1045_v12 = vrot.slane %v1044_v27, 4  ;;  %v1042_v36 = vsel %vm6895_vm14, %v1040_v18, %v1041_v10  ;;  %v1046_v37 = vrot.slane %v606_v50, 4 }
  0x83   : > { %v873_v20 = vsel %vm6377_vm7, %v611_v14, %v872_v5  ;;  %1209 = vst.msk [vmem:[#allocation2 + $0x130] sm:$0xf] %vm513_vm5, %v1042_v36  ;;  %v983_v14 = vld [vmem:[#allocation2 + $0x13c] sm:$0x8]  ;;  %v1047_v5 = vrot.slane %v609_v25, 5  ;;  %v987_v25 = vsel %vm6888_vm13, 0, %v986_v34 }
  0x84   : > { %874 = vst [vmem:[#allocation2 + $0x18] sm:$0xf] %v873_v20  ;;  %v984_v4 = vsel %vm6888_vm13, 0, %v983_v14  ;;  %v5848_v20 = vld [vmem:[#allocation2 + $0x8] sm:$0xff]  ;;  %v5810_v18 = vld [vmem:[#allocation2 + $0xa0] sm:$0xff] }
  0x85   : > { %985 = vst [vmem:[#allocation2 + $0x13c] sm:$0x8] %v984_v4  ;;  %v1048_v10 = vor.u32 %v1047_v5, %v1046_v37  ;;  %v5926_v36 = vld [vmem:[#allocation6 + $0xd0] sm:$0xff]  ;;  %v1055_v4 = vrot.slane %v622_v48, 4  ;;  %v1056_v37 = vrot.slane %v625_v49, 5  ;;  %v5870_v48 = vld [vmem:[#allocation2 + $0xa8] sm:$0xff] }
  0x86   : > { %v5803_v52 = vld [vmem:[#allocation2 + $0x78] sm:$0xff]  ;;  %988 = vst [vmem:[#allocation2 + $0x144] sm:$0x8] %v987_v25  ;;  %3768 = vmatpush.bf16.msra.mxu2 %v5926_v36 }
  0x87   : > { %v1206_v23 = vld [vmem:[#allocation2 + $0x12c] sm:$0xf]  ;;  %5015 = vmatmul.msk.bf16.gmra.mxu3 %vm312_vm8, %v5803_v52  ;;  %v1049_v53 = vrot.slane %v1048_v10, 4  ;;  %v5849_v52 = vld [vmem:[#allocation2 + $0x10] sm:$0xff]  ;;  %v1057_v39 = vor.u32 %v1056_v37, %v1055_v4  ;;  %v7824_v4 = vshrl.u32 %v6527_v45, 16 }
  0x88   : > { %v1207_v60 = vsel %vm6931_vm15, %v1036_v59, %v1206_v23  ;;  %5096 = vmatmul.msk.bf16.vlgmr.msrb.gmra.mxu1 %vm312_vm8, %v5808_v57  ;;  %v5809_v59 = vld [vmem:[#allocation2 + $0x98] sm:$0xff]  ;;  %v1054_v57 = vrot.slane %v1053_v33, 4  ;;  %v6178_v23 = vmov 0.0  }
  0x89   : > { %1208 = vst [vmem:[#allocation2 + $0x12c] sm:$0xf] %v1207_v60  ;;  %v1210_v9 = vld [vmem:[#allocation2 + $0x134] sm:$0xf]  ;;  %v1051_v6 = vsel %vm6895_vm14, %v1049_v53, %v1050_v32  ;;  %v5869_v60 = vld [vmem:[#allocation2 + $0xa0] sm:$0xff]  ;;  %v1059_v32 = vrot.slane %v633_v51, 5 }
  0x8a   : > { %v1211_v7 = vsel %vm6931_vm15, %v1045_v12, %v1210_v9  ;;  %1213 = vst.msk [vmem:[#allocation2 + $0x138] sm:$0xf] %vm513_vm5, %v1051_v6  ;;  %v1058_v40 = vrot.slane %v1057_v39, 4  ;;  %v7822_v51 = vshrl.u32 %v6424_v35, 16  ;;  %v1073_v37 = vrot.slane %v7824_v4, 4 }
  0x8b   : > { %1212 = vst [vmem:[#allocation2 + $0x134] sm:$0xf] %v1211_v7  ;;  %v5791_v30 = vld [vmem:[#allocation2 + $0x18] sm:$0xff]  ;;  %v5946_v7 = vld [vmem:[#allocation6 + $0xf0] sm:$0xff] }
  0x8c   : > { %v1214_v27 = vld [vmem:[#allocation2 + $0x13c] sm:$0xf]  ;;  %321 = vst.msk [vmem:[#allocation3 + $0x40] sm:$0xff] %vm312_vm8, %v6178_v23  ;;  %4147 = vmatpush.bf16.msra.mxu3 %v5946_v7  ;;  %v1064_v33 = vrot.slane %v7822_v51, 4  ;;  %v1060_v25 = vsel %vm6895_vm14, %v1058_v40, %v1059_v32  ;;  %v7827_v51 = vshrl.u32 %v6437_v47, 16 }
  0x8d   : > { %5192 = vmatmul.msk.bf16.vlgmr.msrb.gmra.mxu2 %vm312_vm8, %v5828_v11  ;;  %v1215_v50 = vsel %vm6931_vm15, %v1054_v57, %v1214_v27  ;;  %313 = vst.msk [vmem:[#allocation3] sm:$0xff] %vm312_vm8, %v6178_v23  ;;  %v5850_v9 = vld [vmem:[#allocation2 + $0x18] sm:$0xff]  ;;  %v5811_v11 = vld [vmem:[#allocation2 + $0xa8] sm:$0xff] }
  0x8e   : > { %1216 = vst [vmem:[#allocation2 + $0x13c] sm:$0xf] %v1215_v50  ;;  %v5851_v50 = vld [vmem:[#allocation2 + $0x20] sm:$0xff] }
  0x8f   : > { %314 = vst.msk [vmem:[#allocation3 + $0x8] sm:$0xff] %vm312_vm8, %v6178_v23 }
  0x90   : > { %v5829_v8 = vld [vmem:[#allocation2 + $0x128] sm:$0xff]  ;;  %315 = vst.msk [vmem:[#allocation3 + $0x10] sm:$0xff] %vm312_vm8, %v6178_v23 }
  0x91   : > { %316 = vst.msk [vmem:[#allocation3 + $0x18] sm:$0xff] %vm312_vm8, %v6178_v23 }
  0x92   : > { %5003 = vmatmul.msk.bf16.gmra.mxu0 %vm312_vm8, %v5791_v30  ;;  %v5830_v12 = vld [vmem:[#allocation2 + $0x130] sm:$0xff]  ;;  %317 = vst.msk [vmem:[#allocation3 + $0x20] sm:$0xff] %vm312_vm8, %v6178_v23 }
  0x93   : > { %318 = vst.msk [vmem:[#allocation3 + $0x28] sm:$0xff] %vm312_vm8, %v6178_v23  ;;  %v1309_v14 = vld [vmem:[#allocation3 + $0x40] sm:$0xff] }
  0x94   : > { %319 = vst.msk [vmem:[#allocation3 + $0x30] sm:$0xff] %vm312_vm8, %v6178_v23 }
  0x95   : > { %320 = vst.msk [vmem:[#allocation3 + $0x38] sm:$0xff] %vm312_vm8, %v6178_v23  ;;  %v5831_v30 = vld [vmem:[#allocation2 + $0x138] sm:$0xff] }
  0x96   : > { %322 = vst.msk [vmem:[#allocation3 + $0x48] sm:$0xff] %vm312_vm8, %v6178_v23 }
  0x97   : > { %5288 = vmatmul.msk.bf16.vlgmr.msrb.gmra.mxu3 %vm312_vm8, %v5848_v20  ;;  %323 = vst.msk [vmem:[#allocation3 + $0x50] sm:$0xff] %vm312_vm8, %v6178_v23  ;;  %v1061_v20 = vrot.slane %v7821_v24, 4  ;;  %v989_v24 = vld [vmem:[#allocation2 + $0x14c] sm:$0x8] }
  0x98   : > { %5097 = vmatmul.msk.bf16.gmra.mxu1 %vm312_vm8, %v5809_v59  ;;  %324 = vst.msk [vmem:[#allocation3 + $0x58] sm:$0xff] %vm312_vm8, %v6178_v23  ;;  %v7823_v59 = vshll.u32 %v6424_v35, 16 }
  0x99   : > { %325 = vst.msk [vmem:[#allocation3 + $0x60] sm:$0xff] %vm312_vm8, %v6178_v23  ;;  %v1062_v49 = vor.u32 %v1061_v20, %v1059_v32 }
  0x9a   : > { %326 = vst.msk [vmem:[#allocation3 + $0x68] sm:$0xff] %vm312_vm8, %v6178_v23  ;;  %v1065_v53 = vrot.slane %v7823_v59, 5  ;;  %v1301_v59 = vld [vmem:[#allocation3] sm:$0xff] }
  0x9b   : > { %327 = vst.msk [vmem:[#allocation3 + $0x70] sm:$0xff] %vm312_vm8, %v6178_v23  ;;  %v1063_v57 = vrot.slane %v1062_v49, 4  ;;  %v7826_v49 = vshll.u32 %v6437_v47, 16 }
  0x9c   : > { %328 = vst.msk [vmem:[#allocation3 + $0x78] sm:$0xff] %vm312_vm8, %v6178_v23 }
  0x9d   : > { %5193 = vmatmul.msk.bf16.gmra.mxu2 %vm312_vm8, %v5829_v8  ;;  %329 = vst.msk [vmem:[#allocation3 + $0x80] sm:$0xff] %vm312_vm8, %v6178_v23  ;;  %v1218_v8 = vld [vmem:[#allocation2 + $0x144] sm:$0xf]  ;;  %v1310_v35 = vld [vmem:[#allocation3 + $0x48] sm:$0xff]  ;;  %v1068_v40 = vrot.slane %v7826_v49, 5 }
  0x9e   : > { %330 = vst.msk [vmem:[#allocation3 + $0x88] sm:$0xff] %vm312_vm8, %v6178_v23 }
  0x9f   : > { %331 = vst.msk [vmem:[#allocation3 + $0x90] sm:$0xff] %vm312_vm8, %v6178_v23 }
  0xa0   : > { %332 = vst.msk [vmem:[#allocation3 + $0x98] sm:$0xff] %vm312_vm8, %v6178_v23 }
  0xa1   : > { %333 = vst.msk [vmem:[#allocation3 + $0xa0] sm:$0xff] %vm312_vm8, %v6178_v23 }
  0xa2   : > { %5384 = vmatmul.msk.bf16.vlgmr.msrb.gmra.mxu0 %vm312_vm8, %v5868_v54  ;;  %334 = vst.msk [vmem:[#allocation3 + $0xa8] sm:$0xff] %vm312_vm8, %v6178_v23  ;;  %v5812_v54 = vld [vmem:[#allocation2 + $0xb0] sm:$0xff] }
  0xa3   : > { %335 = vst.msk [vmem:[#allocation3 + $0xb0] sm:$0xff] %vm312_vm8, %v6178_v23 }
  0xa4   : > { %336 = vst.msk [vmem:[#allocation3 + $0xb8] sm:$0xff] %vm312_vm8, %v6178_v23  ;;  %v1317_v34 = vld [vmem:[#allocation3 + $0x80] sm:$0xff] }
  0xa5   : > { %337 = vst.msk [vmem:[#allocation3 + $0xc0] sm:$0xff] %vm312_vm8, %v6178_v23 }
  0xa6   : > { %338 = vst.msk [vmem:[#allocation3 + $0xc8] sm:$0xff] %vm312_vm8, %v6178_v23 }
  0xa7   : > { %5289 = vmatmul.msk.bf16.gmra.mxu3 %vm312_vm8, %v5849_v52  ;;  %339 = vst.msk [vmem:[#allocation3 + $0xd0] sm:$0xff] %vm312_vm8, %v6178_v23 }
  0xa8   : > { %5098 = vmatmul.msk.bf16.gmra.mxu1 %vm312_vm8, %v5810_v18  ;;  %340 = vst.msk [vmem:[#allocation3 + $0xd8] sm:$0xff] %vm312_vm8, %v6178_v23  ;;  %v1066_v18 = vor.u32 %v1065_v53, %v1064_v33  ;;  %v1070_v33 = vrot.slane %v7827_v51, 4  ;;  %v990_v53 = vsel %vm6888_vm13, 0, %v989_v24  ;;  %v5852_v24 = vld [vmem:[#allocation2 + $0x28] sm:$0xff] }
  0xa9   : > { %341 = vst.msk [vmem:[#allocation3 + $0xe0] sm:$0xff] %vm312_vm8, %v6178_v23 }
  0xaa   : > { %342 = vst.msk [vmem:[#allocation3 + $0xe8] sm:$0xff] %vm312_vm8, %v6178_v23 }
  0xab   : > { %343 = vst.msk [vmem:[#allocation3 + $0xf0] sm:$0xff] %vm312_vm8, %v6178_v23 }
  0xac   : > { %344 = vst.msk [vmem:[#allocation3 + $0xf8] sm:$0xff] %vm312_vm8, %v6178_v23  ;;  %v1325_v36 = vld [vmem:[#allocation3 + $0xc0] sm:$0xff]  ;;  %v1067_v23 = vrot.slane %v1066_v18, 4 }
  0xad   : > { %5194 = vmatmul.msk.bf16.gmra.mxu2 %vm312_vm8, %v5830_v12  ;;  %v1219_v12 = vsel %vm6931_vm15, %v1063_v57, %v1218_v8  ;;  %1217 = vst.msk [vmem:[#allocation2 + $0x140] sm:$0xf] %vm513_vm5, %v1060_v25  ;;  %v5871_v8 = vld [vmem:[#allocation2 + $0xb0] sm:$0xff]  ;;  %v1319_v25 = vld [vmem:[#allocation3 + $0x90] sm:$0xff] }
  0xae   : > { %1220 = vst [vmem:[#allocation2 + $0x144] sm:$0xf] %v1219_v12 }
  0xaf   : > { %991 = vst [vmem:[#allocation2 + $0x14c] sm:$0x8] %v990_v53 }
  0xb2   : > { %5385 = vmatmul.msk.bf16.gmra.mxu0 %vm312_vm8, %v5869_v60 }
  0xb5   : > { %v5832_v12 = vld [vmem:[#allocation2 + $0x140] sm:$0xff] }
  0xb6   : > { %v1222_v53 = vld [vmem:[#allocation2 + $0x14c] sm:$0xf] }
  0xb7   : > { %5290 = vmatmul.msk.bf16.gmra.mxu3 %vm312_vm8, %v5850_v9  ;;  %v1311_v9 = vld [vmem:[#allocation3 + $0x50] sm:$0xff] }
  0xb8   : > { %5099 = vmatmul.msk.bf16.gmra.mxu1 %vm312_vm8, %v5811_v11 }
  0xb9   : > { %v1523_v5 = vpop.f32.mrf.mxu1 }
  0xba   : > { %v1591_v10 = vadd.f32 %v1523_v5, %v1309_v14  ;;  %v1318_v14 = vld [vmem:[#allocation3 + $0x88] sm:$0xff]  ;;  %v7825_v5 = vshll.u32 %v6527_v45, 16 }
  0xbb   : > { %v1326_v45 = vld [vmem:[#allocation3 + $0xc8] sm:$0xff] }
  0xbc   : > { %1623 = vst.msk [vmem:[#allocation3 + $0x40] sm:$0xff] %vm312_vm8, %v1591_v10  ;;  %v1074_v32 = vrot.slane %v7825_v5, 5 }
  0xbd   : > { %5195 = vmatmul.msk.bf16.gmra.mxu2 %vm312_vm8, %v5831_v30  ;;  %v5966_v30 = vld [vmem:[#allocation6 + $0x110] sm:$0xff] }
  0xbe   : > { %4526 = vmatpush.bf16.msra.mxu0 %v5966_v30  ;;  %v1075_v57 = vor.u32 %v1074_v32, %v1073_v37  ;;  %v7830_v37 = vshrl.u32 %v6682_v31, 16  ;;  %v7831_v32 = vshll.u32 %v6682_v31, 16 }
  0xc0   : > { %v1082_v5 = vrot.slane %v7830_v37, 4 }
  0xc1   : > { %v1525_v6 = vpop.f32.mrf.mxu1 }
  0xc2   : > { %5386 = vmatmul.msk.bf16.gmra.mxu0 %vm312_vm8, %v5870_v48  ;;  %v1543_v27 = vpop.f32.mrf.mxu2  ;;  %v1592_v29 = vadd.f32 %v1525_v6, %v1310_v35  ;;  %v1071_v35 = vor.u32 %v1070_v33, %v1068_v40  ;;  %v7832_v33 = vshll.u32 %v6684_v44, 16 }
  0xc3   : > { %v1599_v60 = vadd.f32 %v1543_v27, %v1317_v34  ;;  %v1069_v27 = vsel %vm6895_vm14, %v1067_v23, %v1068_v40 }
  0xc4   : > { %1624 = vst.msk [vmem:[#allocation3 + $0x48] sm:$0xff] %vm312_vm8, %v1592_v29  ;;  %v1076_v29 = vrot.slane %v1075_v57, 4  ;;  %v1072_v23 = vrot.slane %v1071_v35, 4  ;;  %v1086_v31 = vrot.slane %v7832_v33, 5  ;;  %v1314_v33 = vld [vmem:[#allocation3 + $0x68] sm:$0xff] }
  0xc5   : > { %v1563_v52 = vpop.f32.mrf.mxu3  ;;  %1631 = vst.msk [vmem:[#allocation3 + $0x80] sm:$0xff] %vm312_vm8, %v1599_v60 }
  0xc6   : > { %v1607_v7 = vadd.f32 %v1563_v52, %v1325_v36  ;;  %v1312_v52 = vld [vmem:[#allocation3 + $0x58] sm:$0xff]  ;;  %1221 = vst.msk [vmem:[#allocation2 + $0x148] sm:$0xf] %vm513_vm5, %v1069_v27  ;;  %v7828_v36 = vshll.u32 %v6533_v61, 16 }
  0xc7   : > { %5291 = vmatmul.msk.bf16.gmra.mxu3 %vm312_vm8, %v5851_v50  ;;  %v1503_v11 = vpop.f32.mrf.mxu0  ;;  %v1302_v50 = vld [vmem:[#allocation3 + $0x8] sm:$0xff] }
  0xc8   : > { %5100 = vmatmul.msk.bf16.gmra.mxu1 %vm312_vm8, %v5812_v54  ;;  %1639 = vst.msk [vmem:[#allocation3 + $0xc0] sm:$0xff] %vm312_vm8, %v1607_v7  ;;  %v1583_v34 = vadd.f32 %v1503_v11, %v1301_v59  ;;  %v992_v54 = vld [vmem:[#allocation2 + $0x154] sm:$0x8]  ;;  %v7829_v7 = vshrl.u32 %v6533_v61, 16  ;;  %v1083_v61 = vrot.slane %v7831_v32, 5 }
  0xc9   : > { %v1528_v10 = vpop.f32.mrf.mxu1  ;;  %v993_v11 = vsel %vm6888_vm13, 0, %v992_v54 }
  0xca   : > { %v1545_v20 = vpop.f32.mrf.mxu2  ;;  %v1593_v48 = vadd.f32 %v1528_v10, %v1311_v9  ;;  %v1077_v9 = vrot.slane %v7828_v36, 5  ;;  %1615 = vst.msk [vmem:[#allocation3] sm:$0xff] %vm312_vm8, %v1583_v34  ;;  %v1084_v51 = vor.u32 %v1083_v61, %v1082_v5  ;;  %v7835_v5 = vshrl.u32 %v6342_v41, 16  ;;  %v5853_v61 = vld [vmem:[#allocation2 + $0x30] sm:$0xff] }
  0xcb   : > { %v1600_v39 = vadd.f32 %v1545_v20, %v1318_v14  ;;  %v1079_v14 = vrot.slane %v7829_v7, 4  ;;  %994 = vst [vmem:[#allocation2 + $0x154] sm:$0x8] %v993_v11  ;;  %v7834_v7 = vshrl.u32 %v6346_v43, 16  ;;  %v1327_v11 = vld [vmem:[#allocation3 + $0xd0] sm:$0xff] }
  0xcc   : > { %1625 = vst.msk [vmem:[#allocation3 + $0x50] sm:$0xff] %vm312_vm8, %v1593_v48  ;;  %v5813_v48 = vld [vmem:[#allocation2 + $0xb8] sm:$0xff]  ;;  %v1078_v49 = vsel %vm6895_vm14, %v1076_v29, %v1077_v9  ;;  %v1085_v27 = vrot.slane %v1084_v51, 4  ;;  %v1313_v29 = vld [vmem:[#allocation3 + $0x60] sm:$0xff]  ;;  %v1091_v32 = vrot.slane %v7835_v5, 4 }
  0xcd   : > { %1632 = vst.msk [vmem:[#allocation3 + $0x88] sm:$0xff] %vm312_vm8, %v1600_v39  ;;  %v1565_v6 = vpop.f32.mrf.mxu3  ;;  %5196 = vmatmul.msk.bf16.gmra.mxu2 %vm312_vm8, %v5832_v12  ;;  %v995_v39 = vld [vmem:[#allocation2 + $0x15c] sm:$0x8]  ;;  %v1080_v40 = vor.u32 %v1079_v14, %v1077_v9  ;;  %v998_v12 = vld [vmem:[#allocation2 + $0x164] sm:$0x8]  ;;  %v1097_v14 = vrot.slane %v7834_v7, 4 }
  0xce   : > { %v1608_v47 = vadd.f32 %v1565_v6, %v1326_v45  ;;  %v7833_v45 = vshrl.u32 %v6684_v44, 16  ;;  %v996_v57 = vsel %vm6888_vm13, 0, %v995_v39  ;;  %v1223_v6 = vsel %vm6931_vm15, %v1072_v23, %v1222_v53  ;;  %1225 = vst.msk [vmem:[#allocation2 + $0x150] sm:$0xf] %vm513_vm5, %v1078_v49  ;;  %v5814_v49 = vld [vmem:[#allocation2 + $0xc0] sm:$0xff]  ;;  %v5905_v7 = vld [vmem:[#allocation6 + $0xa8] sm:$0xff] }
  0xcf   : > { %v1505_v18 = vpop.f32.mrf.mxu0  ;;  %1224 = vst [vmem:[#allocation2 + $0x14c] sm:$0xf] %v1223_v6  ;;  %v1081_v44 = vrot.slane %v1080_v40, 4  ;;  %v999_v36 = vsel %vm6888_vm13, 0, %v998_v12  ;;  %v7836_v23 = vshll.u32 %v6342_v41, 16  ;;  %v1328_v41 = vld [vmem:[#allocation3 + $0xd8] sm:$0xff]  ;;  %3390 = vmatpush.bf16.msra.mxu1 %v5905_v7 }
  0xd0   : > { %v1584_v60 = vadd.f32 %v1505_v18, %v1302_v50  ;;  %1640 = vst.msk [vmem:[#allocation3 + $0xc8] sm:$0xff] %vm312_vm8, %v1608_v47  ;;  %v1088_v59 = vrot.slane %v7833_v45, 4  ;;  %v1320_v50 = vld [vmem:[#allocation3 + $0x98] sm:$0xff]  ;;  %v5872_v18 = vld [vmem:[#allocation2 + $0xb8] sm:$0xff]  ;;  %v1303_v53 = vld [vmem:[#allocation3 + $0x10] sm:$0xff] }
  0xd1   : > { %v1530_v4 = vpop.f32.mrf.mxu1  ;;  %997 = vst [vmem:[#allocation2 + $0x15c] sm:$0x8] %v996_v57  ;;  %v1321_v6 = vld [vmem:[#allocation3 + $0xa0] sm:$0xff] }
  0xd2   : > { %5387 = vmatmul.msk.bf16.gmra.mxu0 %vm312_vm8, %v5871_v8  ;;  %v1548_v30 = vpop.f32.mrf.mxu2  ;;  %v1594_v10 = vadd.f32 %v1530_v4, %v1312_v52  ;;  %1616 = vst.msk [vmem:[#allocation3 + $0x8] sm:$0xff] %vm312_vm8, %v1584_v60  ;;  %v1087_v8 = vsel %vm6895_vm14, %v1085_v27, %v1086_v31  ;;  %v1089_v47 = vor.u32 %v1088_v59, %v1086_v31  ;;  %v1226_v35 = vld [vmem:[#allocation2 + $0x154] sm:$0xf] }
  0xd3   : > { %v1601_v20 = vadd.f32 %v1548_v30, %v1319_v25  ;;  %1229 = vst.msk [vmem:[#allocation2 + $0x158] sm:$0xf] %vm513_vm5, %v1087_v8  ;;  %v1227_v25 = vsel %vm6931_vm15, %v1081_v44, %v1226_v35 }
  0xd4   : > { %1626 = vst.msk [vmem:[#allocation3 + $0x58] sm:$0xff] %vm312_vm8, %v1594_v10  ;;  %v1090_v52 = vrot.slane %v1089_v47, 4  ;;  %v7837_v10 = vshll.u32 %v6346_v43, 16 }
  0xd5   : > { %1633 = vst.msk [vmem:[#allocation3 + $0x90] sm:$0xff] %vm312_vm8, %v1601_v20  ;;  %v1092_v20 = vrot.slane %v7836_v23, 5  ;;  %v1329_v23 = vld [vmem:[#allocation3 + $0xe0] sm:$0xff] }
  0xd6   : > { %1228 = vst [vmem:[#allocation2 + $0x154] sm:$0xf] %v1227_v25  ;;  %v5833_v60 = vld [vmem:[#allocation2 + $0x148] sm:$0xff]  ;;  %v1095_v39 = vrot.slane %v7837_v10, 5 }
  0xd7   : > { %5292 = vmatmul.msk.bf16.gmra.mxu3 %vm312_vm8, %v5852_v24  ;;  %1000 = vst [vmem:[#allocation2 + $0x164] sm:$0x8] %v999_v36  ;;  %v1093_v40 = vor.u32 %v1092_v20, %v1091_v32  ;;  %v1304_v36 = vld [vmem:[#allocation3 + $0x18] sm:$0xff]  ;;  %v5854_v32 = vld [vmem:[#allocation2 + $0x38] sm:$0xff] }
  0xd8   : > { %5101 = vmatmul.msk.bf16.gmra.mxu1 %vm312_vm8, %v5813_v48  ;;  %v1230_v9 = vld [vmem:[#allocation2 + $0x15c] sm:$0xf]  ;;  %v1098_v51 = vor.u32 %v1097_v14, %v1095_v39  ;;  %v7839_v14 = vshrl.u32 %v6463_v21, 16 }
  0xd9   : > { %v1231_v4 = vsel %vm6931_vm15, %v1090_v52, %v1230_v9  ;;  %v1094_v31 = vrot.slane %v1093_v40, 4  ;;  %v5873_v52 = vld [vmem:[#allocation2 + $0xc0] sm:$0xff]  ;;  %v1322_v9 = vld [vmem:[#allocation3 + $0xa8] sm:$0xff] }
  0xda   : > { %v1550_v34 = vpop.f32.mrf.mxu2  ;;  %1232 = vst [vmem:[#allocation2 + $0x15c] sm:$0xf] %v1231_v4  ;;  %v1099_v45 = vrot.slane %v1098_v51, 4 }
  0xdb   : > { %v1602_v54 = vadd.f32 %v1550_v34, %v1320_v50  ;;  %v1096_v57 = vsel %vm6895_vm14, %v1094_v31, %v1095_v39  ;;  %v5815_v39 = vld [vmem:[#allocation2 + $0xc8] sm:$0xff] }
  0xdc   : > { %1233 = vst.msk [vmem:[#allocation2 + $0x160] sm:$0xf] %vm513_vm5, %v1096_v57  ;;  %v1316_v57 = vld [vmem:[#allocation3 + $0x78] sm:$0xff] }
  0xdd   : > { %1634 = vst.msk [vmem:[#allocation3 + $0x98] sm:$0xff] %vm312_vm8, %v1602_v54  ;;  %5197 = vmatmul.msk.bf16.gmra.mxu2 %vm312_vm8, %v5833_v60  ;;  %v5834_v25 = vld [vmem:[#allocation2 + $0x150] sm:$0xff]  ;;  %v7838_v60 = vshrl.u32 %v6465_v22, 16 }
  0xde   : > { %v1234_v59 = vld [vmem:[#allocation2 + $0x164] sm:$0xf] }
  0xdf   : > { %v1235_v27 = vsel %vm6931_vm15, %v1099_v45, %v1234_v59 }
  0xe0   : > { %1236 = vst [vmem:[#allocation2 + $0x164] sm:$0xf] %v1235_v27  ;;  %v1330_v27 = vld [vmem:[#allocation3 + $0xe8] sm:$0xff] }
  0xe1   : > { %v1533_v30 = vpop.f32.mrf.mxu1 }
  0xe2   : > { %5388 = vmatmul.msk.bf16.gmra.mxu0 %vm312_vm8, %v5872_v18  ;;  %v1595_v37 = vadd.f32 %v1533_v30, %v1313_v29  ;;  %v1001_v18 = vld [vmem:[#allocation2 + $0x16c] sm:$0x8]  ;;  %v1106_v29 = vrot.slane %v7838_v60, 4  ;;  %v7840_v30 = vshll.u32 %v6463_v21, 16 }
  0xe3   : > { %v1568_v24 = vpop.f32.mrf.mxu3  ;;  %v1002_v12 = vsel %vm6888_vm13, 0, %v1001_v18 }
  0xe4   : > { %v1609_v48 = vadd.f32 %v1568_v24, %v1327_v11  ;;  %1627 = vst.msk [vmem:[#allocation3 + $0x60] sm:$0xff] %vm312_vm8, %v1595_v37  ;;  %v1100_v11 = vrot.slane %v7839_v14, 4  ;;  %v1101_v4 = vrot.slane %v7840_v30, 5  ;;  %v7841_v37 = vshll.u32 %v6465_v22, 16  ;;  %v1315_v24 = vld [vmem:[#allocation3 + $0x70] sm:$0xff] }
  0xe5   : > { %1003 = vst [vmem:[#allocation2 + $0x16c] sm:$0x8] %v1002_v12  ;;  %v7842_v12 = vshrl.u32 %v6576_v28, 16  ;;  %v7843_v14 = vshrl.u32 %v6565_v16, 16  ;;  %v7844_v30 = vshll.u32 %v6565_v16, 16 }
  0xe6   : > { %1641 = vst.msk [vmem:[#allocation3 + $0xd0] sm:$0xff] %vm312_vm8, %v1609_v48  ;;  %v1104_v5 = vrot.slane %v7841_v37, 5  ;;  %v1102_v48 = vor.u32 %v1101_v4, %v1100_v11  ;;  %v7845_v37 = vshll.u32 %v6576_v28, 16 }
  0xe7   : > { %5293 = vmatmul.msk.bf16.gmra.mxu3 %vm312_vm8, %v5853_v61  ;;  %v1115_v60 = vrot.slane %v7842_v12, 4  ;;  %v1109_v11 = vrot.slane %v7843_v14, 4  ;;  %v1110_v4 = vrot.slane %v7844_v30, 5  ;;  %v7848_v14 = vshll.u32 %v6721_v3, 16 }
  0xe8   : > { %5102 = vmatmul.msk.bf16.gmra.mxu1 %vm312_vm8, %v5814_v49  ;;  %v1107_v49 = vor.u32 %v1106_v29, %v1104_v5  ;;  %v1103_v45 = vrot.slane %v1102_v48, 4  ;;  %v1324_v48 = vld [vmem:[#allocation3 + $0xb8] sm:$0xff]  ;;  %v7849_v30 = vshll.u32 %v6723_v19, 16 }
  0xe9   : > { %v1535_v43 = vpop.f32.mrf.mxu1 }
  0xea   : > { %v1596_v50 = vadd.f32 %v1535_v43, %v1314_v33  ;;  %v5925_v33 = vld [vmem:[#allocation6 + $0xc8] sm:$0xff]  ;;  %v1108_v22 = vrot.slane %v1107_v49, 4 }
  0xeb   : > { %v1570_v44 = vpop.f32.mrf.mxu3  ;;  %v1508_v8 = vpop.f32.mrf.mxu0  ;;  %3769 = vmatpush.bf16.msra.mxu2 %v5925_v33 }
  0xec   : > { %v1610_v47 = vadd.f32 %v1570_v44, %v1328_v41  ;;  %v1585_v34 = vadd.f32 %v1508_v8, %v1303_v53  ;;  %v1553_v54 = vpop.f32.mrf.mxu2  ;;  %1628 = vst.msk [vmem:[#allocation3 + $0x68] sm:$0xff] %vm312_vm8, %v1596_v50  ;;  %v1105_v41 = vsel %vm6895_vm14, %v1103_v45, %v1104_v5  ;;  %v1238_v53 = vld [vmem:[#allocation2 + $0x16c] sm:$0xf]  ;;  %v1323_v50 = vld [vmem:[#allocation3 + $0xb0] sm:$0xff]  ;;  %v5945_v8 = vld [vmem:[#allocation6 + $0xe8] sm:$0xff]  ;;  %v1113_v5 = vrot.slane %v7845_v37, 5 }
  0xed   : > { %v1603_v35 = vadd.f32 %v1553_v54, %v1321_v6  ;;  %5198 = vmatmul.msk.bf16.gmra.mxu2 %vm312_vm8, %v5834_v25  ;;  %v1239_v43 = vsel %vm6931_vm15, %v1108_v22, %v1238_v53  ;;  %1237 = vst.msk [vmem:[#allocation2 + $0x168] sm:$0xf] %vm513_vm5, %v1105_v41  ;;  %v1305_v6 = vld [vmem:[#allocation3 + $0x20] sm:$0xff]  ;;  %4148 = vmatpush.bf16.msra.mxu3 %v5945_v8  ;;  %v1007_v8 = vld [vmem:[#allocation2 + $0x17c] sm:$0x8] }
  0xee   : > { %1642 = vst.msk [vmem:[#allocation3 + $0xd8] sm:$0xff] %vm312_vm8, %v1610_v47  ;;  %v5835_v47 = vld [vmem:[#allocation2 + $0x158] sm:$0xff]  ;;  %v1004_v25 = vld [vmem:[#allocation2 + $0x174] sm:$0x8] }
  0xef   : > { %1617 = vst.msk [vmem:[#allocation3 + $0x10] sm:$0xff] %vm312_vm8, %v1585_v34  ;;  %v1005_v7 = vsel %vm6888_vm13, 0, %v1004_v25  ;;  %v7846_v25 = vshrl.u32 %v6723_v19, 16 }
  0xf0   : > { %1635 = vst.msk [vmem:[#allocation3 + $0xa0] sm:$0xff] %vm312_vm8, %v1603_v35  ;;  %v5874_v35 = vld [vmem:[#allocation2 + $0xc8] sm:$0xff] }
  0xf1   : > { %1240 = vst [vmem:[#allocation2 + $0x16c] sm:$0xf] %v1239_v43  ;;  %v1307_v43 = vld [vmem:[#allocation3 + $0x30] sm:$0xff] }
  0xf2   : > { %5389 = vmatmul.msk.bf16.gmra.mxu0 %vm312_vm8, %v5873_v52  ;;  %1006 = vst [vmem:[#allocation2 + $0x174] sm:$0x8] %v1005_v7 }
  0xf3   : > { %v1510_v61 = vpop.f32.mrf.mxu0 }
  0xf4   : > { %v1586_v20 = vadd.f32 %v1510_v61, %v1304_v36  ;;  %v1555_v10 = vpop.f32.mrf.mxu2  ;;  %v5816_v61 = vld [vmem:[#allocation2 + $0xd0] sm:$0xff] }
  0xf5   : > { %v1604_v40 = vadd.f32 %v1555_v10, %v1322_v9  ;;  %v1538_v51 = vpop.f32.mrf.mxu1  ;;  %v1679_v10 = vld [vmem:[#allocation3] sm:$0xff] }
  0xf6   : > { %v1573_v31 = vpop.f32.mrf.mxu3  ;;  %1618 = vst.msk [vmem:[#allocation3 + $0x18] sm:$0xff] %vm312_vm8, %v1586_v20  ;;  %v1597_v21 = vadd.f32 %v1538_v51, %v1315_v24  ;;  %v1111_v24 = vor.u32 %v1110_v4, %v1109_v11  ;;  %v1306_v20 = vld [vmem:[#allocation3 + $0x28] sm:$0xff]  ;;  %v1331_v51 = vld [vmem:[#allocation3 + $0xf0] sm:$0xff]  ;;  %v1119_v11 = vrot.slane %v7848_v14, 5  ;;  %v1122_v4 = vrot.slane %v7849_v30, 5 }
  0xf7   : > { %5294 = vmatmul.msk.bf16.gmra.mxu3 %vm312_vm8, %v5854_v32  ;;  %v1611_v59 = vadd.f32 %v1573_v31, %v1329_v23  ;;  %1636 = vst.msk [vmem:[#allocation3 + $0xa8] sm:$0xff] %vm312_vm8, %v1604_v40  ;;  %v5855_v32 = vld [vmem:[#allocation2 + $0x40] sm:$0xff]  ;;  %v1116_v23 = vor.u32 %v1115_v60, %v1113_v5 }
  0xf8   : > { %1629 = vst.msk [vmem:[#allocation3 + $0x70] sm:$0xff] %vm312_vm8, %v1597_v21  ;;  %5103 = vmatmul.msk.bf16.gmra.mxu1 %vm312_vm8, %v5815_v39  ;;  %v1112_v40 = vrot.slane %v1111_v24, 4 }
  0xf9   : > { %1643 = vst.msk [vmem:[#allocation3 + $0xe0] sm:$0xff] %vm312_vm8, %v1611_v59  ;;  %v1117_v21 = vrot.slane %v1116_v23, 4  ;;  %v1242_v41 = vld [vmem:[#allocation2 + $0x174] sm:$0xf]  ;;  %v1308_v23 = vld [vmem:[#allocation3 + $0x38] sm:$0xff] }
  0xfa   : > { %v1114_v31 = vsel %vm6895_vm14, %v1112_v40, %v1113_v5  ;;  %v5856_v5 = vld [vmem:[#allocation2 + $0x48] sm:$0xff] }
  0xfb   : > { %1241 = vst.msk [vmem:[#allocation2 + $0x170] sm:$0xf] %vm513_vm5, %v1114_v31  ;;  %v1243_v53 = vsel %vm6931_vm15, %v1117_v21, %v1242_v41 }
  0xfc   : > { %1244 = vst [vmem:[#allocation2 + $0x174] sm:$0xf] %v1243_v53  ;;  %v5837_v53 = vld [vmem:[#allocation2 + $0x168] sm:$0xff] }
  0xfd   : > { %v1540_v44 = vpop.f32.mrf.mxu1  ;;  %5199 = vmatmul.msk.bf16.gmra.mxu2 %vm312_vm8, %v5835_v47 }
  0xfe   : > { %v1575_v34 = vpop.f32.mrf.mxu3  ;;  %v1598_v54 = vadd.f32 %v1540_v44, %v1316_v57  ;;  %v1680_v57 = vld [vmem:[#allocation3 + $0x8] sm:$0xff]  ;;  %v5875_v44 = vld [vmem:[#allocation2 + $0xd0] sm:$0xff] }
  0xff   : > { %v1612_v52 = vadd.f32 %v1575_v34, %v1330_v27  ;;  %v1513_v18 = vpop.f32.mrf.mxu0 }
 0x100   : > { %v1587_v29 = vadd.f32 %v1513_v18, %v1305_v6  ;;  %v1558_v36 = vpop.f32.mrf.mxu2  ;;  %1630 = vst.msk [vmem:[#allocation3 + $0x78] sm:$0xff] %vm312_vm8, %v1598_v54  ;;  %v5836_v6 = vld [vmem:[#allocation2 + $0x160] sm:$0xff]  ;;  %v5965_v54 = vld [vmem:[#allocation6 + $0x108] sm:$0xff]  ;;  %v1332_v18 = vld [vmem:[#allocation3 + $0xf8] sm:$0xff] }
 0x101   : > { %1644 = vst.msk [vmem:[#allocation3 + $0xe8] sm:$0xff] %vm312_vm8, %v1612_v52  ;;  %v1605_v9 = vadd.f32 %v1558_v36, %v1323_v50  ;;  %v1124_v52 = vrot.slane %v7846_v25, 4  ;;  %4527 = vmatpush.bf16.msra.mxu0 %v5965_v54 }
 0x102   : > { %1619 = vst.msk [vmem:[#allocation3 + $0x20] sm:$0xff] %vm312_vm8, %v1587_v29  ;;  %5390 = vmatmul.msk.bf16.gmra.mxu0 %vm312_vm8, %v5874_v35  ;;  %v1008_v35 = vsel %vm6888_vm13, 0, %v1007_v8  ;;  %v7850_v8 = vshrl.u32 %v6373_v63, 16 }
 0x103   : > { %1637 = vst.msk [vmem:[#allocation3 + $0xb0] sm:$0xff] %vm312_vm8, %v1605_v9  ;;  %v7847_v9 = vshrl.u32 %v6721_v3, 16  ;;  %v1125_v24 = vor.u32 %v1124_v52, %v1122_v4  ;;  %v7851_v52 = vshrl.u32 %v6371_v62, 16 }
 0x104   : > { %1009 = vst [vmem:[#allocation2 + $0x17c] sm:$0x8] %v1008_v35 }
 0x105   : > { %v1881_v39 = vpop.f32.mrf.mxu1  ;;  %v1118_v7 = vrot.slane %v7847_v9, 4 }
 0x106   : > { %v1961_v49 = vadd.f32 %v1881_v39, %v1679_v10 }
 0x107   : > { %5295 = vmatmul.msk.bf16.gmra.mxu3 %vm312_vm8, %v5855_v32  ;;  %v1515_v16 = vpop.f32.mrf.mxu0  ;;  %v5817_v32 = vld [vmem:[#allocation2 + $0xd8] sm:$0xff] }
 0x108   : > { %v1588_v33 = vadd.f32 %v1515_v16, %v1306_v20  ;;  %v1560_v28 = vpop.f32.mrf.mxu2  ;;  %1993 = vst.msk [vmem:[#allocation3] sm:$0xff] %vm312_vm8, %v1961_v49  ;;  %5104 = vmatmul.msk.bf16.gmra.mxu1 %vm312_vm8, %v5816_v61  ;;  %v1120_v61 = vor.u32 %v1119_v11, %v1118_v7  ;;  %v1681_v20 = vld [vmem:[#allocation3 + $0x10] sm:$0xff]  ;;  %v1126_v49 = vrot.slane %v1125_v24, 4  ;;  %v5857_v7 = vld [vmem:[#allocation2 + $0x50] sm:$0xff] }
 0x109   : > { %v1606_v45 = vadd.f32 %v1560_v28, %v1324_v48  ;;  %v5818_v11 = vld [vmem:[#allocation2 + $0xe0] sm:$0xff] }
 0x10a   : > { %v1578_v22 = vpop.f32.mrf.mxu3  ;;  %1620 = vst.msk [vmem:[#allocation3 + $0x28] sm:$0xff] %vm312_vm8, %v1588_v33  ;;  %v1121_v48 = vrot.slane %v1120_v61, 4 }
 0x10b   : > { %v1613_v59 = vadd.f32 %v1578_v22, %v1331_v51  ;;  %1638 = vst.msk [vmem:[#allocation3 + $0xb8] sm:$0xff] %vm312_vm8, %v1606_v45  ;;  %v1246_v33 = vld [vmem:[#allocation2 + $0x17c] sm:$0xf] }
 0x10c   : > { %v1123_v51 = vsel %vm6895_vm14, %v1121_v48, %v1122_v4  ;;  %v1247_v31 = vsel %vm6931_vm15, %v1126_v49, %v1246_v33 }
 0x10d   : > { %1645 = vst.msk [vmem:[#allocation3 + $0xf0] sm:$0xff] %vm312_vm8, %v1613_v59  ;;  %v1883_v27 = vpop.f32.mrf.mxu1  ;;  %5200 = vmatmul.msk.bf16.gmra.mxu2 %vm312_vm8, %v5836_v6  ;;  %v1682_v59 = vld [vmem:[#allocation3 + $0x18] sm:$0xff] }
 0x10e   : > { %v1962_v50 = vadd.f32 %v1883_v27, %v1680_v57  ;;  %1245 = vst.msk [vmem:[#allocation2 + $0x178] sm:$0xf] %vm513_vm5, %v1123_v51  ;;  %v5876_v57 = vld [vmem:[#allocation2 + $0xd8] sm:$0xff]  ;;  %v1010_v27 = vld [vmem:[#allocation2 + $0x184] sm:$0x8] }
 0x10f   : > { %v1518_v47 = vpop.f32.mrf.mxu0  ;;  %v2057_v34 = vld [vmem:[#allocation3] sm:$0xff]  ;;  %1248 = vst [vmem:[#allocation2 + $0x17c] sm:$0xf] %v1247_v31 }
 0x110   : > { %v1589_v12 = vadd.f32 %v1518_v47, %v1307_v43  ;;  %v2259_v60 = vpop.f32.mrf.mxu2  ;;  %1994 = vst.msk [vmem:[#allocation3 + $0x8] sm:$0xff] %vm312_vm8, %v1962_v50  ;;  %v1133_v47 = vrot.slane %v7850_v8, 4  ;;  %v5838_v31 = vld [vmem:[#allocation2 + $0x170] sm:$0xff] }
 0x111   : > { %v2339_v29 = vadd.f32 %v2259_v60, %v2057_v34  ;;  %v1684_v33 = vld [vmem:[#allocation3 + $0x28] sm:$0xff]  ;;  %v5904_v8 = vld [vmem:[#allocation6 + $0xa0] sm:$0xff] }
 0x112   : > { %v1580_v36 = vpop.f32.mrf.mxu3  ;;  %1621 = vst.msk [vmem:[#allocation3 + $0x30] sm:$0xff] %vm312_vm8, %v1589_v12  ;;  %5391 = vmatmul.msk.bf16.gmra.mxu0 %vm312_vm8, %v5875_v44  ;;  %v1011_v44 = vsel %vm6888_vm13, 0, %v1010_v27  ;;  %v7852_v12 = vshll.u32 %v6371_v62, 16  ;;  %3391 = vmatpush.bf16.msra.mxu1 %v5904_v8 }
 0x113   : > { %v1614_v37 = vadd.f32 %v1580_v36, %v1332_v18  ;;  %2371 = vst.msk [vmem:[#allocation3] sm:$0xff] %vm312_vm8, %v2339_v29  ;;  %v1127_v18 = vrot.slane %v7851_v52, 4  ;;  %v7853_v29 = vshll.u32 %v6373_v63, 16 }
 0x114   : > { %1012 = vst [vmem:[#allocation2 + $0x184] sm:$0x8] %v1011_v44  ;;  %v1128_v60 = vrot.slane %v7852_v12, 5  ;;  %v5858_v12 = vld [vmem:[#allocation2 + $0x58] sm:$0xff] }
 0x115   : > { %1646 = vst.msk [vmem:[#allocation3 + $0xf8] sm:$0xff] %vm312_vm8, %v1614_v37  ;;  %v1886_v10 = vpop.f32.mrf.mxu1  ;;  %v1131_v36 = vrot.slane %v7853_v29, 5  ;;  %v5819_v29 = vld [vmem:[#allocation2 + $0xe8] sm:$0xff] }
 0x116   : > { %v1963_v39 = vadd.f32 %v1886_v10, %v1681_v20  ;;  %v1129_v30 = vor.u32 %v1128_v60, %v1127_v18 }
 0x117   : > { %5296 = vmatmul.msk.bf16.gmra.mxu3 %vm312_vm8, %v5856_v5  ;;  %v1520_v3 = vpop.f32.mrf.mxu0  ;;  %v2058_v19 = vld [vmem:[#allocation3 + $0x8] sm:$0xff]  ;;  %v1134_v4 = vor.u32 %v1133_v47, %v1131_v36  ;;  %v1683_v5 = vld [vmem:[#allocation3 + $0x20] sm:$0xff]  ;;  %v7855_v47 = vshrl.u32 %v6482_v38, 16 }
 0x118   : > { %v1590_v40 = vadd.f32 %v1520_v3, %v1308_v23  ;;  %v2261_v16 = vpop.f32.mrf.mxu2  ;;  %1995 = vst.msk [vmem:[#allocation3 + $0x10] sm:$0xff] %vm312_vm8, %v1963_v39  ;;  %5105 = vmatmul.msk.bf16.gmra.mxu1 %vm312_vm8, %v5817_v32  ;;  %v1130_v24 = vrot.slane %v1129_v30, 4 }
 0x119   : > { %v2340_v28 = vadd.f32 %v2261_v16, %v2058_v19  ;;  %v1135_v62 = vrot.slane %v1134_v4, 4 }
 0x11a   : > { %v2435_v21 = vld [vmem:[#allocation3] sm:$0xff]  ;;  %v2637_v45 = vpop.f32.mrf.mxu3  ;;  %1622 = vst.msk [vmem:[#allocation3 + $0x38] sm:$0xff] %vm312_vm8, %v1590_v40  ;;  %v1132_v10 = vsel %vm6895_vm14, %v1130_v24, %v1131_v36 }
 0x11b   : > { %v2717_v22 = vadd.f32 %v2637_v45, %v2435_v21  ;;  %2372 = vst.msk [vmem:[#allocation3 + $0x8] sm:$0xff] %vm312_vm8, %v2340_v28  ;;  %v1250_v39 = vld [vmem:[#allocation2 + $0x184] sm:$0xf] }
 0x11c   : > { %1249 = vst.msk [vmem:[#allocation2 + $0x180] sm:$0xf] %vm513_vm5, %v1132_v10  ;;  %v1251_v49 = vsel %vm6931_vm15, %v1135_v62, %v1250_v39  ;;  %v5877_v45 = vld [vmem:[#allocation2 + $0xe0] sm:$0xff] }
 0x11d   : > { %2749 = vst.msk [vmem:[#allocation3] sm:$0xff] %vm312_vm8, %v2717_v22  ;;  %v1888_v41 = vpop.f32.mrf.mxu1  ;;  %5201 = vmatmul.msk.bf16.gmra.mxu2 %vm312_vm8, %v5837_v53  ;;  %v1013_v22 = vld [vmem:[#allocation2 + $0x18c] sm:$0x8] }
 0x11e   : > { %v1964_v43 = vadd.f32 %v1888_v41, %v1682_v59  ;;  %1252 = vst [vmem:[#allocation2 + $0x184] sm:$0xf] %v1251_v49  ;;  %v1014_v53 = vsel %vm6888_vm13, 0, %v1013_v22 }
 0x11f   : > { %v2059_v6 = vld [vmem:[#allocation3 + $0x10] sm:$0xff]  ;;  %v3015_v50 = vpop.f32.mrf.mxu0  ;;  %1015 = vst [vmem:[#allocation2 + $0x18c] sm:$0x8] %v1014_v53 }
 0x120   : > { %v2264_v34 = vpop.f32.mrf.mxu2  ;;  %1996 = vst.msk [vmem:[#allocation3 + $0x18] sm:$0xff] %vm312_vm8, %v1964_v43  ;;  %v7854_v43 = vshrl.u32 %v6484_v42, 16 }
 0x121   : > { %v2341_v54 = vadd.f32 %v2264_v34, %v2059_v6  ;;  %v1136_v34 = vrot.slane %v7855_v47, 4  ;;  %v1686_v49 = vld [vmem:[#allocation3 + $0x38] sm:$0xff] }
 0x122   : > { %v2436_v35 = vld [vmem:[#allocation3 + $0x8] sm:$0xff]  ;;  %v2639_v25 = vpop.f32.mrf.mxu3  ;;  %5392 = vmatmul.msk.bf16.gmra.mxu0 %vm312_vm8, %v5876_v57  ;;  %v1142_v57 = vrot.slane %v7854_v43, 4  ;;  %v5944_v43 = vld [vmem:[#allocation6 + $0xe0] sm:$0xff] }
 0x123   : > { %v2718_v9 = vadd.f32 %v2639_v25, %v2436_v35  ;;  %2373 = vst.msk [vmem:[#allocation3 + $0x10] sm:$0xff] %vm312_vm8, %v2341_v54  ;;  %v7856_v54 = vshll.u32 %v6482_v38, 16  ;;  %v7857_v25 = vshll.u32 %v6484_v42, 16  ;;  %4149 = vmatpush.bf16.msra.mxu3 %v5944_v43 }
 0x124   : > { %v2813_v14 = vld [vmem:[#allocation3] sm:$0xff] }
 0x125   : > { %2750 = vst.msk [vmem:[#allocation3 + $0x8] sm:$0xff] %vm312_vm8, %v2718_v9  ;;  %v3095_v37 = vadd.f32 %v3015_v50, %v2813_v14  ;;  %v1891_v32 = vpop.f32.mrf.mxu1  ;;  %v1137_v35 = vrot.slane %v7856_v54, 5  ;;  %v1140_v52 = vrot.slane %v7857_v25, 5  ;;  %v1685_v14 = vld [vmem:[#allocation3 + $0x30] sm:$0xff] }
 0x126   : > { %v1965_v61 = vadd.f32 %v1891_v32, %v1683_v5  ;;  %v5924_v32 = vld [vmem:[#allocation6 + $0xc0] sm:$0xff]  ;;  %v1254_v24 = vld [vmem:[#allocation2 + $0x18c] sm:$0xf] }
 0x127   : > { %3127 = vst.msk [vmem:[#allocation3] sm:$0xff] %vm312_vm8, %v3095_v37  ;;  %5297 = vmatmul.msk.bf16.gmra.mxu3 %vm312_vm8, %v5857_v7  ;;  %v2060_v63 = vld [vmem:[#allocation3 + $0x18] sm:$0xff]  ;;  %v3017_v23 = vpop.f32.mrf.mxu0  ;;  %v1138_v36 = vor.u32 %v1137_v35, %v1136_v34  ;;  %v1143_v9 = vor.u32 %v1142_v57, %v1140_v52  ;;  %3770 = vmatpush.bf16.msra.mxu2 %v5924_v32  ;;  %v7859_v57 = vshrl.u32 %v6645_v55, 16  ;;  %v5859_v34 = vld [vmem:[#allocation2 + $0x60] sm:$0xff]  ;;  %v5820_v35 = vld [vmem:[#allocation2 + $0xf0] sm:$0xff] }
 0x128   : > { %v2266_v20 = vpop.f32.mrf.mxu2  ;;  %1997 = vst.msk [vmem:[#allocation3 + $0x20] sm:$0xff] %vm312_vm8, %v1965_v61  ;;  %5106 = vmatmul.msk.bf16.gmra.mxu1 %vm312_vm8, %v5818_v11 }
 0x129   : > { %v2342_v48 = vadd.f32 %v2266_v20, %v2060_v63  ;;  %v1139_v38 = vrot.slane %v1138_v36, 4  ;;  %v1144_v4 = vrot.slane %v1143_v9, 4 }
 0x12a   : > { %v2437_v3 = vld [vmem:[#allocation3 + $0x10] sm:$0xff]  ;;  %v2642_v19 = vpop.f32.mrf.mxu3 }
 0x12b   : > { %v2719_v40 = vadd.f32 %v2642_v19, %v2437_v3  ;;  %2374 = vst.msk [vmem:[#allocation3 + $0x18] sm:$0xff] %vm312_vm8, %v2342_v48  ;;  %v1141_v61 = vsel %vm6895_vm14, %v1139_v38, %v1140_v52  ;;  %v1255_v63 = vsel %vm6931_vm15, %v1144_v4, %v1254_v24  ;;  %v5839_v19 = vld [vmem:[#allocation2 + $0x178] sm:$0xff] }
 0x12c   : > { %v2814_v16 = vld [vmem:[#allocation3 + $0x8] sm:$0xff]  ;;  %1253 = vst.msk [vmem:[#allocation2 + $0x188] sm:$0xf] %vm513_vm5, %v1141_v61 }
 0x12d   : > { %2751 = vst.msk [vmem:[#allocation3 + $0x10] sm:$0xff] %vm312_vm8, %v2719_v40  ;;  %v3096_v51 = vadd.f32 %v3017_v23, %v2814_v16  ;;  %v1893_v28 = vpop.f32.mrf.mxu1  ;;  %5202 = vmatmul.msk.bf16.gmra.mxu2 %vm312_vm8, %v5838_v31  ;;  %v5878_v16 = vld [vmem:[#allocation2 + $0xe8] sm:$0xff]  ;;  %v1688_v61 = vld [vmem:[#allocation3 + $0x48] sm:$0xff] }
 0x12e   : > { %v1966_v21 = vadd.f32 %v1893_v28, %v1684_v33  ;;  %1256 = vst [vmem:[#allocation2 + $0x18c] sm:$0xf] %v1255_v63 }
 0x12f   : > { %3128 = vst.msk [vmem:[#allocation3 + $0x8] sm:$0xff] %vm312_vm8, %v3096_v51  ;;  %v2061_v59 = vld [vmem:[#allocation3 + $0x20] sm:$0xff]  ;;  %v3020_v41 = vpop.f32.mrf.mxu0 }
 0x130   : > { %v2269_v27 = vpop.f32.mrf.mxu2  ;;  %1998 = vst.msk [vmem:[#allocation3 + $0x28] sm:$0xff] %vm312_vm8, %v1966_v21  ;;  %v1016_v51 = vld [vmem:[#allocation2 + $0x194] sm:$0x8]  ;;  %v7858_v21 = vshrl.u32 %v6653_v15, 16 }
 0x131   : > { %v2343_v6 = vadd.f32 %v2269_v27, %v2061_v59  ;;  %v1017_v31 = vsel %vm6888_vm13, 0, %v1016_v51  ;;  %v1145_v27 = vrot.slane %v7859_v57, 4 }
 0x132   : > { %v2438_v50 = vld [vmem:[#allocation3 + $0x18] sm:$0xff]  ;;  %v2644_v44 = vpop.f32.mrf.mxu3  ;;  %5393 = vmatmul.msk.bf16.gmra.mxu0 %vm312_vm8, %v5877_v45  ;;  %v1151_v45 = vrot.slane %v7858_v21, 4  ;;  %1018 = vst [vmem:[#allocation2 + $0x194] sm:$0x8] %v1017_v31  ;;  %v7863_v31 = vshrl.u32 %v6806_v26, 16 }
 0x133   : > { %v2720_v18 = vadd.f32 %v2644_v44, %v2438_v50  ;;  %2375 = vst.msk [vmem:[#allocation3 + $0x20] sm:$0xff] %vm312_vm8, %v2343_v6  ;;  %v7860_v6 = vshll.u32 %v6645_v55, 16  ;;  %v7861_v44 = vshll.u32 %v6653_v15, 16  ;;  %v568_v26 = vld [vmem:[#allocation2 + $0x80] sm:$0x1] }
 0x134   : > { %v2815_v60 = vld [vmem:[#allocation3 + $0x10] sm:$0xff]  ;;  %v1154_v21 = vrot.slane %v7863_v31, 4 }
 0x135   : > { %2752 = vst.msk [vmem:[#allocation3 + $0x18] sm:$0xff] %vm312_vm8, %v2720_v18  ;;  %v3097_v7 = vadd.f32 %v3020_v41, %v2815_v60  ;;  %v1896_v11 = vpop.f32.mrf.mxu1  ;;  %v1146_v50 = vrot.slane %v7860_v6, 5  ;;  %v1149_v8 = vrot.slane %v7861_v44, 5  ;;  %v5821_v6 = vld [vmem:[#allocation2 + $0xf8] sm:$0xff] }
 0x136   : > { %v1967_v30 = vadd.f32 %v1896_v11, %v1685_v14 }
 0x137   : > { %3129 = vst.msk [vmem:[#allocation3 + $0x10] sm:$0xff] %vm312_vm8, %v3097_v7  ;;  %5298 = vmatmul.msk.bf16.gmra.mxu3 %vm312_vm8, %v5858_v12  ;;  %v2062_v42 = vld [vmem:[#allocation3 + $0x28] sm:$0xff]  ;;  %v3022_v37 = vpop.f32.mrf.mxu0  ;;  %v1147_v25 = vor.u32 %v1146_v50, %v1145_v27  ;;  %v1152_v52 = vor.u32 %v1151_v45, %v1149_v8  ;;  %v1687_v12 = vld [vmem:[#allocation3 + $0x40] sm:$0xff]  ;;  %v1155_v45 = vrot.slane %v801_v2, 5  ;;  %v5860_v27 = vld [vmem:[#allocation2 + $0x68] sm:$0xff] }
 0x138   : > { %v2271_v5 = vpop.f32.mrf.mxu2  ;;  %1999 = vst.msk [vmem:[#allocation3 + $0x30] sm:$0xff] %vm312_vm8, %v1967_v30  ;;  %5107 = vmatmul.msk.bf16.gmra.mxu1 %vm312_vm8, %v5819_v29 }
 0x139   : > { %v2344_v62 = vadd.f32 %v2271_v5, %v2062_v42  ;;  %v1148_v55 = vrot.slane %v1147_v25, 4  ;;  %v1153_v36 = vrot.slane %v1152_v52, 4  ;;  %v1258_v11 = vld [vmem:[#allocation2 + $0x194] sm:$0xf] }
 0x13a   : > { %v2439_v23 = vld [vmem:[#allocation3 + $0x20] sm:$0xff]  ;;  %v2647_v20 = vpop.f32.mrf.mxu3 }
 0x13b   : > { %v2721_v10 = vadd.f32 %v2647_v20, %v2439_v23  ;;  %2376 = vst.msk [vmem:[#allocation3 + $0x28] sm:$0xff] %vm312_vm8, %v2344_v62  ;;  %v1150_v14 = vsel %vm6895_vm14, %v1148_v55, %v1149_v8  ;;  %v1259_v38 = vsel %vm6931_vm15, %v1153_v36, %v1258_v11  ;;  %v5840_v62 = vld [vmem:[#allocation2 + $0x180] sm:$0xff]  ;;  %v5879_v23 = vld [vmem:[#allocation2 + $0xf0] sm:$0xff]  ;;  %v1019_v20 = vld [vmem:[#allocation2 + $0x19c] sm:$0x8] }
 0x13c   : > { %v2816_v39 = vld [vmem:[#allocation3 + $0x18] sm:$0xff]  ;;  %1257 = vst.msk [vmem:[#allocation2 + $0x190] sm:$0xf] %vm513_vm5, %v1150_v14  ;;  %v5964_v8 = vld [vmem:[#allocation6 + $0x100] sm:$0xff] }
 0x13d   : > { %2753 = vst.msk [vmem:[#allocation3 + $0x20] sm:$0xff] %vm312_vm8, %v2721_v10  ;;  %v3098_v48 = vadd.f32 %v3022_v37, %v2816_v39  ;;  %v1898_v3 = vpop.f32.mrf.mxu1  ;;  %5203 = vmatmul.msk.bf16.gmra.mxu2 %vm312_vm8, %v5839_v19  ;;  %v1020_v39 = vsel %vm6888_vm13, 0, %v1019_v20  ;;  %4528 = vmatpush.bf16.msra.mxu0 %v5964_v8 }
 0x13e   : > { %v1968_v40 = vadd.f32 %v1898_v3, %v1686_v49  ;;  %1260 = vst [vmem:[#allocation2 + $0x194] sm:$0xf] %v1259_v38  ;;  %v376_v49 = vld [vmem:[%s6286_s12 + $0xf8] sm:$0xff]  ;;  %v7862_v3 = vshrl.u32 %v6810_v17, 16 }
 0x13f   : > { %3130 = vst.msk [vmem:[#allocation3 + $0x18] sm:$0xff] %vm312_vm8, %v3098_v48  ;;  %v2063_v33 = vld [vmem:[#allocation3 + $0x30] sm:$0xff]  ;;  %v3025_v28 = vpop.f32.mrf.mxu0 }
 0x140   : > { %v2274_v22 = vpop.f32.mrf.mxu2  ;;  %2000 = vst.msk [vmem:[#allocation3 + $0x38] sm:$0xff] %vm312_vm8, %v1968_v40  ;;  %v375_v48 = vld [vmem:[%s6286_s12 + $0xf0] sm:$0xff]  ;;  %v1160_v19 = vrot.slane %v7862_v3, 4  ;;  %v5841_v3 = vld [vmem:[#allocation2 + $0x188] sm:$0xff] }
 0x141   : > { %v2345_v59 = vadd.f32 %v2274_v22, %v2063_v33  ;;  %v6054_v40 = vld [vmem:[%s7757_s1] ss:$0 sm:$0xff]  ;;  %1021 = vst [vmem:[#allocation2 + $0x19c] sm:$0x8] %v1020_v39  ;;  %v7864_v22 = vshll.u32 %v6810_v17, 16 }
 0x142   : > { %v2440_v41 = vld [vmem:[#allocation3 + $0x28] sm:$0xff]  ;;  %v2649_v53 = vpop.f32.mrf.mxu3  ;;  %5394 = vmatmul.msk.bf16.gmra.mxu0 %vm312_vm8, %v5878_v16  ;;  %v411_v16 = vmul.f32 %v6054_v40, %v375_v48  ;;  %v412_v51 = vmul.f32 %v6054_v40, %v376_v49 }
 0x143   : > { %v2722_v47 = vadd.f32 %v2649_v53, %v2440_v41  ;;  %2377 = vst.msk [vmem:[#allocation3 + $0x30] sm:$0xff] %vm312_vm8, %v2345_v59  ;;  %v1158_v59 = vrot.slane %v7864_v22, 5  ;;  %v6055_v41 = vld [vmem:[%s7758_s2] ss:$0 sm:$0xff]  ;;  %v5880_v40 = vld [vmem:[#allocation2 + $0xf8] sm:$0xff]  ;;  %v5861_v22 = vld [vmem:[#allocation2 + $0x70] sm:$0xff] }
 0x144   : > { %v2817_v54 = vld [vmem:[#allocation3 + $0x20] sm:$0xff]  ;;  %v447_v53 = vadd.f32 %v6055_v41, %v411_v16  ;;  %v448_v50 = vadd.f32 %v6055_v41, %v412_v51 }
 0x145   : > { %2754 = vst.msk [vmem:[#allocation3 + $0x28] sm:$0xff] %vm312_vm8, %v2722_v47  ;;  %v3099_v18 = vadd.f32 %v3025_v28, %v2817_v54  ;;  %v1901_v60 = vpop.f32.mrf.mxu1  ;;  %v1156_v47 = vor.u32 %v1155_v45, %v1154_v21  ;;  %v1691_v41 = vld [vmem:[#allocation3 + $0x60] sm:$0xff] }
 0x146   : > { %v1969_v29 = vadd.f32 %v1901_v60, %v1687_v12  ;;  %v479_v54 = vmax.f32 %v447_v53, 0.0  ;;  %v480_v52 = vmax.f32 %v448_v50, 0.0 }
 0x147   : > { %3131 = vst.msk [vmem:[#allocation3 + $0x20] sm:$0xff] %vm312_vm8, %v3099_v18  ;;  %5299 = vmatmul.msk.bf16.gmra.mxu3 %vm312_vm8, %v5859_v34  ;;  %v2064_v15 = vld [vmem:[#allocation3 + $0x38] sm:$0xff]  ;;  %v3027_v9 = vpop.f32.mrf.mxu0  ;;  %v1161_v34 = vor.u32 %v1160_v19, %v1158_v59  ;;  %v569_v18 = vsel %vm6297_vm2, 0, %v568_v26 }
 0x148   : > { %v2276_v7 = vpop.f32.mrf.mxu2  ;;  %2001 = vst.msk [vmem:[#allocation3 + $0x40] sm:$0xff] %vm312_vm8, %v1969_v29  ;;  %5108 = vmatmul.msk.bf16.gmra.mxu1 %vm312_vm8, %v5820_v35  ;;  %v1689_v35 = vld [vmem:[#allocation3 + $0x50] sm:$0xff]  ;;  %v1157_v29 = vrot.slane %v1156_v47, 4 }
 0x149   : > { %v2346_v30 = vadd.f32 %v2276_v7, %v2064_v15  ;;  %v1162_v55 = vrot.slane %v1161_v34, 4  ;;  %570 = vst [vmem:[#allocation2 + $0x80] sm:$0x1] %v569_v18  ;;  %v7322_v15 = vpack.c.bf16 %v479_v54, %v479_v54  ;;  %v1262_v7 = vld [vmem:[#allocation2 + $0x19c] sm:$0xf] }
 0x14a   : > { %v2441_v4 = vld [vmem:[#allocation3 + $0x30] sm:$0xff]  ;;  %v2652_v42 = vpop.f32.mrf.mxu3  ;;  %v1159_v1 = vsel %vm6895_vm14, %v1157_v29, %v1158_v59  ;;  %v1692_v54 = vld [vmem:[#allocation3 + $0x68] sm:$0xff] }
 0x14b   : > { %v2723_v37 = vadd.f32 %v2652_v42, %v2441_v4  ;;  %2378 = vst.msk [vmem:[#allocation3 + $0x38] sm:$0xff] %vm312_vm8, %v2346_v30  ;;  %v1263_v14 = vsel %vm6931_vm15, %v1162_v55, %v1262_v7  ;;  %v814_v11 = vshrl.u32 %v7322_v15, 16  ;;  %v817_v4 = vshll.u32 %v7322_v15, 16  ;;  %v5822_v59 = vld [vmem:[#allocation2 + $0x100] sm:$0xff]  ;;  %v5823_v7 = vld [vmem:[#allocation2 + $0x108] sm:$0xff] }
 0x14c   : > { %v2818_v5 = vld [vmem:[#allocation3 + $0x28] sm:$0xff]  ;;  %1261 = vst.msk [vmem:[#allocation2 + $0x198] sm:$0xf] %vm513_vm5, %v1159_v1 }
 0x14d   : > { %2755 = vst.msk [vmem:[#allocation3 + $0x30] sm:$0xff] %vm312_vm8, %v2723_v37  ;;  %v3100_v32 = vadd.f32 %v3027_v9, %v2818_v5  ;;  %v1903_v24 = vpop.f32.mrf.mxu1  ;;  %5204 = vmatmul.msk.bf16.gmra.mxu2 %vm312_vm8, %v5840_v62  ;;  %v7324_v9 = vpack.c.bf16 %v480_v52, %v480_v52  ;;  %v816_v5 = vrot.slane %v814_v11, 7  ;;  %v5862_v1 = vld [vmem:[#allocation2 + $0x78] sm:$0xff] }
 0x14e   : > { %v1970_v63 = vadd.f32 %v1903_v24, %v1688_v61  ;;  %1264 = vst [vmem:[#allocation2 + $0x19c] sm:$0xf] %v1263_v14 }
 0x14f   : > { %3132 = vst.msk [vmem:[#allocation3 + $0x28] sm:$0xff] %vm312_vm8, %v3100_v32  ;;  %v3030_v10 = vpop.f32.mrf.mxu0  ;;  %v2065_v57 = vld [vmem:[#allocation3 + $0x40] sm:$0xff]  ;;  %v822_v30 = vshrl.u32 %v7324_v9, 16  ;;  %v825_v42 = vshll.u32 %v7324_v9, 16  ;;  %v819_v20 = vor.u32 %v817_v4, %v816_v5 }
 0x150   : > { %2002 = vst.msk [vmem:[#allocation3 + $0x48] sm:$0xff] %vm312_vm8, %v1970_v63  ;;  %v2279_v17 = vpop.f32.mrf.mxu2  ;;  %v1690_v63 = vld [vmem:[#allocation3 + $0x58] sm:$0xff]  ;;  %v924_v48 = vld [vmem:[#allocation2 + $0x80] sm:$0xf] }
 0x151   : > { %v2347_v12 = vadd.f32 %v2279_v17, %v2065_v57  ;;  %v824_v32 = vrot.slane %v822_v30, 7  ;;  %965 = vst.msk [vmem:[#allocation2 + $0x110] sm:$0xf] %vm513_vm5, %v7322_v15  ;;  %v1167_v13 = vrot.slane %v825_v42, 5 }
 0x152   : > { %v2442_v33 = vld [vmem:[#allocation3 + $0x38] sm:$0xff]  ;;  %v2654_v28 = vpop.f32.mrf.mxu3  ;;  %5395 = vmatmul.msk.bf16.gmra.mxu0 %vm312_vm8, %v5879_v23  ;;  %966 = vst.msk [vmem:[#allocation2 + $0x114] sm:$0xf] %vm513_vm5, %v7324_v9 }
 0x153   : > { %v2724_v43 = vadd.f32 %v2654_v28, %v2442_v33  ;;  %2379 = vst.msk [vmem:[#allocation3 + $0x40] sm:$0xff] %vm312_vm8, %v2347_v12  ;;  %v827_v39 = vor.u32 %v825_v42, %v824_v32  ;;  %v925_v28 = vsel %vm6377_vm7, %v819_v20, %v924_v48  ;;  %v1694_v48 = vld [vmem:[#allocation3 + $0x78] sm:$0xff] }
 0x154   : > { %v2819_v44 = vld [vmem:[#allocation3 + $0x30] sm:$0xff]  ;;  %926 = vst [vmem:[#allocation2 + $0x80] sm:$0xf] %v925_v28 }
 0x155   : > { %2756 = vst.msk [vmem:[#allocation3 + $0x38] sm:$0xff] %vm312_vm8, %v2724_v43  ;;  %v3101_v2 = vadd.f32 %v3030_v10, %v2819_v44  ;;  %v1906_v25 = vpop.f32.mrf.mxu1  ;;  %v820_v10 = vrot.slane %v816_v5, 4 }
 0x156   : > { %v1971_v60 = vadd.f32 %v1906_v25, %v1689_v35  ;;  %v5881_v25 = vld [vmem:[#allocation2 + $0x100] sm:$0xff] }
 0x157   : > { %3133 = vst.msk [vmem:[#allocation3 + $0x30] sm:$0xff] %vm312_vm8, %v3101_v2  ;;  %5300 = vmatmul.msk.bf16.gmra.mxu3 %vm312_vm8, %v5860_v27  ;;  %v3032_v36 = vpop.f32.mrf.mxu0  ;;  %v2066_v37 = vld [vmem:[#allocation3 + $0x48] sm:$0xff]  ;;  %v828_v31 = vsel %vm6361_vm6, %v820_v10, %v827_v39  ;;  %v5842_v2 = vld [vmem:[#allocation2 + $0x190] sm:$0xff] }
 0x158   : > { %5109 = vmatmul.msk.bf16.gmra.mxu1 %vm312_vm8, %v5821_v6  ;;  %2003 = vst.msk [vmem:[#allocation3 + $0x50] sm:$0xff] %vm312_vm8, %v1971_v60  ;;  %v2281_v24 = vpop.f32.mrf.mxu2 }
 0x159   : > { %v2348_v49 = vadd.f32 %v2281_v24, %v2066_v37  ;;  %927 = vst.msk [vmem:[#allocation2 + $0x84] sm:$0xf] %vm513_vm5, %v828_v31 }
 0x15a   : > { %v2657_v38 = vpop.f32.mrf.mxu3  ;;  %v2443_v16 = vld [vmem:[#allocation3 + $0x40] sm:$0xff] }
 0x15b   : > { %v2725_v33 = vadd.f32 %v2657_v38, %v2443_v16  ;;  %2380 = vst.msk [vmem:[#allocation3 + $0x48] sm:$0xff] %vm312_vm8, %v2348_v49  ;;  %v1693_v38 = vld [vmem:[#allocation3 + $0x70] sm:$0xff]  ;;  %v5882_v16 = vld [vmem:[#allocation2 + $0x108] sm:$0xff] }
 0x15c   : > { %v2820_v61 = vld [vmem:[#allocation3 + $0x38] sm:$0xff] }
 0x15d   : > { %v3102_v62 = vadd.f32 %v3032_v36, %v2820_v61  ;;  %v1908_v23 = vpop.f32.mrf.mxu1  ;;  %2757 = vst.msk [vmem:[#allocation3 + $0x40] sm:$0xff] %vm312_vm8, %v2725_v33  ;;  %5205 = vmatmul.msk.bf16.gmra.mxu2 %vm312_vm8, %v5841_v3 }
 0x15e   : > { %v1972_v19 = vadd.f32 %v1908_v23, %v1690_v63 }
 0x15f   : > { %3134 = vst.msk [vmem:[#allocation3 + $0x38] sm:$0xff] %vm312_vm8, %v3102_v62  ;;  %v3035_v51 = vpop.f32.mrf.mxu0  ;;  %v2067_v45 = vld [vmem:[#allocation3 + $0x50] sm:$0xff] }
 0x160   : > { %2004 = vst.msk [vmem:[#allocation3 + $0x58] sm:$0xff] %vm312_vm8, %v1972_v19  ;;  %v2284_v0 = vpop.f32.mrf.mxu2  ;;  %v5843_v19 = vld [vmem:[#allocation2 + $0x198] sm:$0xff] }
 0x161   : > { %v2349_v43 = vadd.f32 %v2284_v0, %v2067_v45  ;;  %v5888_v0 = vld [vmem:[#allocation2 + $0x128] sm:$0xff] }
 0x162   : > { %v2659_v21 = vpop.f32.mrf.mxu3  ;;  %5396 = vmatmul.msk.bf16.gmra.mxu0 %vm312_vm8, %v5880_v40  ;;  %v2444_v58 = vld [vmem:[#allocation3 + $0x48] sm:$0xff] }
 0x163   : > { %v2726_v6 = vadd.f32 %v2659_v21, %v2444_v58  ;;  %2381 = vst.msk [vmem:[#allocation3 + $0x50] sm:$0xff] %vm312_vm8, %v2349_v43 }
 0x164   : > { %v2821_v50 = vld [vmem:[#allocation3 + $0x40] sm:$0xff] }
 0x165   : > { %v1911_v53 = vpop.f32.mrf.mxu1  ;;  %2758 = vst.msk [vmem:[#allocation3 + $0x48] sm:$0xff] %vm312_vm8, %v2726_v6  ;;  %v3103_v44 = vadd.f32 %v3035_v51, %v2821_v50 }
 0x166   : > { %v1973_v57 = vadd.f32 %v1911_v53, %v1691_v41  ;;  %v1695_v53 = vld [vmem:[#allocation3 + $0x80] sm:$0xff] }
 0x167   : > { %5301 = vmatmul.msk.bf16.gmra.mxu3 %vm312_vm8, %v5861_v22  ;;  %v3037_v27 = vpop.f32.mrf.mxu0  ;;  %v2068_v47 = vld [vmem:[#allocation3 + $0x58] sm:$0xff]  ;;  %3135 = vst.msk [vmem:[#allocation3 + $0x40] sm:$0xff] %vm312_vm8, %v3103_v44 }
 0x168   : > { %5110 = vmatmul.msk.bf16.gmra.mxu1 %vm312_vm8, %v5822_v59  ;;  %2005 = vst.msk [vmem:[#allocation3 + $0x60] sm:$0xff] %vm312_vm8, %v1973_v57  ;;  %v2286_v34 = vpop.f32.mrf.mxu2  ;;  %v5863_v59 = vld [vmem:[#allocation2 + $0x80] sm:$0xff] }
 0x169   : > { %v2350_v17 = vadd.f32 %v2286_v34, %v2068_v47 }
 0x16a   : > { %v2662_v8 = vpop.f32.mrf.mxu3  ;;  %v2445_v52 = vld [vmem:[#allocation3 + $0x50] sm:$0xff] }
 0x16b   : > { %v2727_v12 = vadd.f32 %v2662_v8, %v2445_v52  ;;  %2382 = vst.msk [vmem:[#allocation3 + $0x58] sm:$0xff] %vm312_vm8, %v2350_v17  ;;  %v5883_v52 = vld [vmem:[#allocation2 + $0x110] sm:$0xff] }
 0x16c   : > { %v2822_v60 = vld [vmem:[#allocation3 + $0x48] sm:$0xff] }
 0x16d   : > { %v1913_v26 = vpop.f32.mrf.mxu1  ;;  %2759 = vst.msk [vmem:[#allocation3 + $0x50] sm:$0xff] %vm312_vm8, %v2727_v12  ;;  %v3104_v29 = vadd.f32 %v3037_v27, %v2822_v60  ;;  %5206 = vmatmul.msk.bf16.gmra.mxu2 %vm312_vm8, %v5842_v2 }
 0x16e   : > { %v1974_v35 = vadd.f32 %v1913_v26, %v1692_v54  ;;  %v1696_v26 = vld [vmem:[#allocation3 + $0x88] sm:$0xff] }
 0x16f   : > { %v3040_v18 = vpop.f32.mrf.mxu0  ;;  %v2069_v36 = vld [vmem:[#allocation3 + $0x60] sm:$0xff]  ;;  %3136 = vst.msk [vmem:[#allocation3 + $0x48] sm:$0xff] %vm312_vm8, %v3104_v29 }
 0x170   : > { %2006 = vst.msk [vmem:[#allocation3 + $0x68] sm:$0xff] %vm312_vm8, %v1974_v35  ;;  %v2289_v14 = vpop.f32.mrf.mxu2  ;;  %v5908_v35 = vld [vmem:[#allocation2 + $0x10] sm:$0xff] }
 0x171   : > { %v2351_v5 = vadd.f32 %v2289_v14, %v2069_v36  ;;  %v5889_v14 = vld [vmem:[#allocation2 + $0x130] sm:$0xff] }
 0x172   : > { %v2664_v55 = vpop.f32.mrf.mxu3  ;;  %5397 = vmatmul.msk.bf16.gmra.mxu0 %vm312_vm8, %v5881_v25  ;;  %v2446_v61 = vld [vmem:[#allocation3 + $0x58] sm:$0xff] }
 0x173   : > { %v2728_v62 = vadd.f32 %v2664_v55, %v2446_v61  ;;  %2383 = vst.msk [vmem:[#allocation3 + $0x60] sm:$0xff] %vm312_vm8, %v2351_v5 }
 0x174   : > { %v2823_v63 = vld [vmem:[#allocation3 + $0x50] sm:$0xff] }
 0x175   : > { %v1916_v37 = vpop.f32.mrf.mxu1  ;;  %2760 = vst.msk [vmem:[#allocation3 + $0x58] sm:$0xff] %vm312_vm8, %v2728_v62  ;;  %v3105_v23 = vadd.f32 %v3040_v18, %v2823_v63 }
 0x176   : > { %v1975_v32 = vadd.f32 %v1916_v37, %v1693_v38  ;;  %v1697_v37 = vld [vmem:[#allocation3 + $0x90] sm:$0xff] }
 0x177   : > { %5302 = vmatmul.msk.bf16.gmra.mxu3 %vm312_vm8, %v5862_v1  ;;  %v3042_v24 = vpop.f32.mrf.mxu0  ;;  %v2070_v10 = vld [vmem:[#allocation3 + $0x68] sm:$0xff]  ;;  %3137 = vst.msk [vmem:[#allocation3 + $0x50] sm:$0xff] %vm312_vm8, %v3105_v23 }
 0x178   : > { %5111 = vmatmul.msk.bf16.gmra.mxu1 %vm312_vm8, %v5823_v7  ;;  %2007 = vst.msk [vmem:[#allocation3 + $0x70] sm:$0xff] %vm312_vm8, %v1975_v32  ;;  %v2291_v39 = vpop.f32.mrf.mxu2  ;;  %v5928_v7 = vld [vmem:[#allocation2 + $0xa0] sm:$0xff] }
 0x179   : > { %v2352_v3 = vadd.f32 %v2291_v39, %v2070_v10 }
 0x17a   : > { %v2667_v20 = vpop.f32.mrf.mxu3  ;;  %v2447_v51 = vld [vmem:[#allocation3 + $0x60] sm:$0xff] }
 0x17b   : > { %v2729_v28 = vadd.f32 %v2667_v20, %v2447_v51  ;;  %2384 = vst.msk [vmem:[#allocation3 + $0x68] sm:$0xff] %vm312_vm8, %v2352_v3  ;;  %v5948_v51 = vld [vmem:[#allocation2 + $0x130] sm:$0xff] }
 0x17c   : > { %v2824_v31 = vld [vmem:[#allocation3 + $0x58] sm:$0xff] }
 0x17d   : > { %v1918_v49 = vpop.f32.mrf.mxu1  ;;  %2761 = vst.msk [vmem:[#allocation3 + $0x60] sm:$0xff] %vm312_vm8, %v2729_v28  ;;  %v3106_v21 = vadd.f32 %v3042_v24, %v2824_v31  ;;  %5207 = vmatmul.msk.bf16.gmra.mxu2 %vm312_vm8, %v5843_v19 }
 0x17e   : > { %v1976_v40 = vadd.f32 %v1918_v49, %v1694_v48  ;;  %v1698_v49 = vld [vmem:[#allocation3 + $0x98] sm:$0xff] }
 0x17f   : > { %v3045_v33 = vpop.f32.mrf.mxu0  ;;  %v2071_v22 = vld [vmem:[#allocation3 + $0x70] sm:$0xff]  ;;  %3138 = vst.msk [vmem:[#allocation3 + $0x58] sm:$0xff] %vm312_vm8, %v3106_v21 }
 0x180   : > { %2008 = vst.msk [vmem:[#allocation3 + $0x78] sm:$0xff] %vm312_vm8, %v1976_v40  ;;  %v2294_v41 = vpop.f32.mrf.mxu2  ;;  %v5909_v40 = vld [vmem:[#allocation2 + $0x18] sm:$0xff] }
 0x181   : > { %v2353_v57 = vadd.f32 %v2294_v41, %v2071_v22  ;;  %v5890_v41 = vld [vmem:[#allocation2 + $0x138] sm:$0xff] }
 0x182   : > { %v2669_v45 = vpop.f32.mrf.mxu3  ;;  %5398 = vmatmul.msk.bf16.gmra.mxu0 %vm312_vm8, %v5882_v16  ;;  %v2448_v27 = vld [vmem:[#allocation3 + $0x68] sm:$0xff] }
 0x183   : > { %v2730_v50 = vadd.f32 %v2669_v45, %v2448_v27  ;;  %2385 = vst.msk [vmem:[#allocation3 + $0x70] sm:$0xff] %vm312_vm8, %v2353_v57 }
 0x184   : > { %v2825_v44 = vld [vmem:[#allocation3 + $0x60] sm:$0xff] }
 0x185   : > { %v1921_v43 = vpop.f32.mrf.mxu1  ;;  %2762 = vst.msk [vmem:[#allocation3 + $0x68] sm:$0xff] %vm312_vm8, %v2730_v50  ;;  %v3107_v8 = vadd.f32 %v3045_v33, %v2825_v44 }
 0x186   : > { %v1977_v58 = vadd.f32 %v1921_v43, %v1695_v53  ;;  %v1699_v43 = vld [vmem:[#allocation3 + $0xa0] sm:$0xff] }
 0x187   : > { %5303 = vmatmul.msk.bf16.gmra.mxu3 %vm312_vm8, %v5863_v59  ;;  %v3047_v6 = vpop.f32.mrf.mxu0  ;;  %v2072_v34 = vld [vmem:[#allocation3 + $0x78] sm:$0xff]  ;;  %3139 = vst.msk [vmem:[#allocation3 + $0x60] sm:$0xff] %vm312_vm8, %v3107_v8 }
 0x188   : > { %5480 = vmatmul.msk.bf16.vlgmr.msra.gmra.mxu1 %vm312_vm8, %v5888_v0  ;;  %2009 = vst.msk [vmem:[#allocation3 + $0x80] sm:$0xff] %vm312_vm8, %v1977_v58  ;;  %v2296_v54 = vpop.f32.mrf.mxu2  ;;  %v5929_v0 = vld [vmem:[#allocation2 + $0xa8] sm:$0xff] }
 0x189   : > { %v2354_v2 = vadd.f32 %v2296_v54, %v2072_v34 }
 0x18a   : > { %v2672_v47 = vpop.f32.mrf.mxu3  ;;  %v2449_v18 = vld [vmem:[#allocation3 + $0x70] sm:$0xff] }
 0x18b   : > { %v2731_v60 = vadd.f32 %v2672_v47, %v2449_v18  ;;  %2386 = vst.msk [vmem:[#allocation3 + $0x78] sm:$0xff] %vm312_vm8, %v2354_v2  ;;  %v5949_v18 = vld [vmem:[#allocation2 + $0x138] sm:$0xff] }
 0x18c   : > { %v2826_v29 = vld [vmem:[#allocation3 + $0x68] sm:$0xff] }
 0x18d   : > { %v1923_v17 = vpop.f32.mrf.mxu1  ;;  %2763 = vst.msk [vmem:[#allocation3 + $0x70] sm:$0xff] %vm312_vm8, %v2731_v60  ;;  %v3108_v55 = vadd.f32 %v3047_v6, %v2826_v29  ;;  %5576 = vmatmul.msk.bf16.vlgmr.msra.gmra.mxu2 %vm312_vm8, %v5908_v35 }
 0x18e   : > { %v1978_v25 = vadd.f32 %v1923_v17, %v1696_v26  ;;  %v1700_v17 = vld [vmem:[#allocation3 + $0xa8] sm:$0xff] }
 0x18f   : > { %v3050_v12 = vpop.f32.mrf.mxu0  ;;  %v2073_v1 = vld [vmem:[#allocation3 + $0x80] sm:$0xff]  ;;  %3140 = vst.msk [vmem:[#allocation3 + $0x68] sm:$0xff] %vm312_vm8, %v3108_v55 }
 0x190   : > { %2010 = vst.msk [vmem:[#allocation3 + $0x88] sm:$0xff] %vm312_vm8, %v1978_v25  ;;  %v2299_v38 = vpop.f32.mrf.mxu2  ;;  %v5910_v25 = vld [vmem:[#allocation2 + $0x20] sm:$0xff] }
 0x191   : > { %v2355_v32 = vadd.f32 %v2299_v38, %v2073_v1  ;;  %v5891_v38 = vld [vmem:[#allocation2 + $0x140] sm:$0xff] }
 0x192   : > { %v2674_v36 = vpop.f32.mrf.mxu3  ;;  %5399 = vmatmul.msk.bf16.gmra.mxu0 %vm312_vm8, %v5883_v52  ;;  %v2450_v24 = vld [vmem:[#allocation3 + $0x78] sm:$0xff] }
 0x193   : > { %v2732_v63 = vadd.f32 %v2674_v36, %v2450_v24  ;;  %2387 = vst.msk [vmem:[#allocation3 + $0x80] sm:$0xff] %vm312_vm8, %v2355_v32 }
 0x194   : > { %v2827_v23 = vld [vmem:[#allocation3 + $0x70] sm:$0xff] }
 0x195   : > { %v1926_v5 = vpop.f32.mrf.mxu1  ;;  %2764 = vst.msk [vmem:[#allocation3 + $0x78] sm:$0xff] %vm312_vm8, %v2732_v63  ;;  %v3109_v20 = vadd.f32 %v3050_v12, %v2827_v23 }
 0x196   : > { %v1979_v61 = vadd.f32 %v1926_v5, %v1697_v37  ;;  %v1701_v5 = vld [vmem:[#allocation3 + $0xb0] sm:$0xff] }
 0x197   : > { %5672 = vmatmul.msk.bf16.vlgmr.msra.gmra.mxu3 %vm312_vm8, %v5928_v7  ;;  %v3052_v62 = vpop.f32.mrf.mxu0  ;;  %v2074_v39 = vld [vmem:[#allocation3 + $0x88] sm:$0xff]  ;;  %3141 = vst.msk [vmem:[#allocation3 + $0x70] sm:$0xff] %vm312_vm8, %v3109_v20 }
 0x198   : > { %5481 = vmatmul.msk.bf16.gmra.mxu1 %vm312_vm8, %v5889_v14  ;;  %2011 = vst.msk [vmem:[#allocation3 + $0x90] sm:$0xff] %vm312_vm8, %v1979_v61  ;;  %v2301_v48 = vpop.f32.mrf.mxu2  ;;  %v5930_v14 = vld [vmem:[#allocation2 + $0xb0] sm:$0xff] }
 0x199   : > { %v2356_v19 = vadd.f32 %v2301_v48, %v2074_v39 }
 0x19a   : > { %v2677_v10 = vpop.f32.mrf.mxu3  ;;  %v2451_v33 = vld [vmem:[#allocation3 + $0x80] sm:$0xff] }
 0x19b   : > { %v2733_v31 = vadd.f32 %v2677_v10, %v2451_v33  ;;  %2388 = vst.msk [vmem:[#allocation3 + $0x88] sm:$0xff] %vm312_vm8, %v2356_v19  ;;  %v5950_v33 = vld [vmem:[#allocation2 + $0x140] sm:$0xff] }
 0x19c   : > { %v2828_v21 = vld [vmem:[#allocation3 + $0x78] sm:$0xff] }
 0x19d   : > { %v1928_v3 = vpop.f32.mrf.mxu1  ;;  %2765 = vst.msk [vmem:[#allocation3 + $0x80] sm:$0xff] %vm312_vm8, %v2733_v31  ;;  %v3110_v45 = vadd.f32 %v3052_v62, %v2828_v21  ;;  %5577 = vmatmul.msk.bf16.gmra.mxu2 %vm312_vm8, %v5909_v40 }
 0x19e   : > { %v1980_v16 = vadd.f32 %v1928_v3, %v1698_v49  ;;  %v1702_v3 = vld [vmem:[#allocation3 + $0xb8] sm:$0xff] }
 0x19f   : > { %v3055_v28 = vpop.f32.mrf.mxu0  ;;  %v2075_v59 = vld [vmem:[#allocation3 + $0x90] sm:$0xff]  ;;  %3142 = vst.msk [vmem:[#allocation3 + $0x78] sm:$0xff] %vm312_vm8, %v3110_v45 }
 0x1a0   : > { %2012 = vst.msk [vmem:[#allocation3 + $0x98] sm:$0xff] %vm312_vm8, %v1980_v16  ;;  %v2304_v53 = vpop.f32.mrf.mxu2  ;;  %v5911_v16 = vld [vmem:[#allocation2 + $0x28] sm:$0xff] }
 0x1a1   : > { %v2357_v58 = vadd.f32 %v2304_v53, %v2075_v59  ;;  %v5892_v53 = vld [vmem:[#allocation2 + $0x148] sm:$0xff] }
 0x1a2   : > { %v2679_v22 = vpop.f32.mrf.mxu3  ;;  %5768 = vmatmul.msk.bf16.vlgmr.msra.gmra.mxu0 %vm312_vm8, %v5948_v51  ;;  %v2452_v6 = vld [vmem:[#allocation3 + $0x88] sm:$0xff] }
 0x1a3   : > { %v2734_v44 = vadd.f32 %v2679_v22, %v2452_v6  ;;  %2389 = vst.msk [vmem:[#allocation3 + $0x90] sm:$0xff] %vm312_vm8, %v2357_v58 }
 0x1a4   : > { %v2829_v8 = vld [vmem:[#allocation3 + $0x80] sm:$0xff] }
 0x1a5   : > { %v1931_v57 = vpop.f32.mrf.mxu1  ;;  %2766 = vst.msk [vmem:[#allocation3 + $0x88] sm:$0xff] %vm312_vm8, %v2734_v44  ;;  %v3111_v47 = vadd.f32 %v3055_v28, %v2829_v8 }
 0x1a6   : > { %v1981_v27 = vadd.f32 %v1931_v57, %v1699_v43  ;;  %v1703_v57 = vld [vmem:[#allocation3 + $0xc0] sm:$0xff] }
 0x1a7   : > { %5673 = vmatmul.msk.bf16.gmra.mxu3 %vm312_vm8, %v5929_v0  ;;  %v3057_v50 = vpop.f32.mrf.mxu0  ;;  %v2076_v54 = vld [vmem:[#allocation3 + $0x98] sm:$0xff]  ;;  %3143 = vst.msk [vmem:[#allocation3 + $0x80] sm:$0xff] %vm312_vm8, %v3111_v47 }
 0x1a8   : > { %5482 = vmatmul.msk.bf16.gmra.mxu1 %vm312_vm8, %v5890_v41  ;;  %2013 = vst.msk [vmem:[#allocation3 + $0xa0] sm:$0xff] %vm312_vm8, %v1981_v27  ;;  %v2306_v26 = vpop.f32.mrf.mxu2  ;;  %v5931_v41 = vld [vmem:[#allocation2 + $0xb8] sm:$0xff] }
 0x1a9   : > { %v2358_v35 = vadd.f32 %v2306_v26, %v2076_v54 }
 0x1aa   : > { %v2682_v34 = vpop.f32.mrf.mxu3  ;;  %v2453_v12 = vld [vmem:[#allocation3 + $0x90] sm:$0xff] }
 0x1ab   : > { %v2735_v29 = vadd.f32 %v2682_v34, %v2453_v12  ;;  %2390 = vst.msk [vmem:[#allocation3 + $0x98] sm:$0xff] %vm312_vm8, %v2358_v35  ;;  %v5951_v12 = vld [vmem:[#allocation2 + $0x148] sm:$0xff] }
 0x1ac   : > { %v2830_v55 = vld [vmem:[#allocation3 + $0x88] sm:$0xff] }
 0x1ad   : > { %v1933_v2 = vpop.f32.mrf.mxu1  ;;  %2767 = vst.msk [vmem:[#allocation3 + $0x90] sm:$0xff] %vm312_vm8, %v2735_v29  ;;  %v3112_v36 = vadd.f32 %v3057_v50, %v2830_v55  ;;  %5578 = vmatmul.msk.bf16.gmra.mxu2 %vm312_vm8, %v5910_v25 }
 0x1ae   : > { %v1982_v52 = vadd.f32 %v1933_v2, %v1700_v17  ;;  %v1704_v2 = vld [vmem:[#allocation3 + $0xc8] sm:$0xff] }
 0x1af   : > { %v3060_v60 = vpop.f32.mrf.mxu0  ;;  %v2077_v7 = vld [vmem:[#allocation3 + $0xa0] sm:$0xff]  ;;  %3144 = vst.msk [vmem:[#allocation3 + $0x88] sm:$0xff] %vm312_vm8, %v3112_v36 }
 0x1b0   : > { %2014 = vst.msk [vmem:[#allocation3 + $0xa8] sm:$0xff] %vm312_vm8, %v1982_v52  ;;  %v2309_v37 = vpop.f32.mrf.mxu2  ;;  %v5912_v52 = vld [vmem:[#allocation2 + $0x30] sm:$0xff] }
 0x1b1   : > { %v2359_v61 = vadd.f32 %v2309_v37, %v2077_v7  ;;  %v5893_v37 = vld [vmem:[#allocation2 + $0x150] sm:$0xff] }
 0x1b2   : > { %v2684_v1 = vpop.f32.mrf.mxu3  ;;  %5769 = vmatmul.msk.bf16.gmra.mxu0 %vm312_vm8, %v5949_v18  ;;  %v2454_v62 = vld [vmem:[#allocation3 + $0x98] sm:$0xff] }
 0x1b3   : > { %v2736_v23 = vadd.f32 %v2684_v1, %v2454_v62  ;;  %2391 = vst.msk [vmem:[#allocation3 + $0xa0] sm:$0xff] %vm312_vm8, %v2359_v61 }
 0x1b4   : > { %v2831_v20 = vld [vmem:[#allocation3 + $0x90] sm:$0xff] }
 0x1b5   : > { %v1936_v32 = vpop.f32.mrf.mxu1  ;;  %2768 = vst.msk [vmem:[#allocation3 + $0x98] sm:$0xff] %vm312_vm8, %v2736_v23  ;;  %v3113_v10 = vadd.f32 %v3060_v60, %v2831_v20 }
 0x1b6   : > { %v1983_v24 = vadd.f32 %v1936_v32, %v1701_v5  ;;  %v1705_v32 = vld [vmem:[#allocation3 + $0xd0] sm:$0xff] }
 0x1b7   : > { %5674 = vmatmul.msk.bf16.gmra.mxu3 %vm312_vm8, %v5930_v14  ;;  %v3062_v63 = vpop.f32.mrf.mxu0  ;;  %v2078_v48 = vld [vmem:[#allocation3 + $0xa8] sm:$0xff]  ;;  %3145 = vst.msk [vmem:[#allocation3 + $0x90] sm:$0xff] %vm312_vm8, %v3113_v10 }
 0x1b8   : > { %5483 = vmatmul.msk.bf16.gmra.mxu1 %vm312_vm8, %v5891_v38  ;;  %2015 = vst.msk [vmem:[#allocation3 + $0xb0] sm:$0xff] %vm312_vm8, %v1983_v24  ;;  %v2311_v49 = vpop.f32.mrf.mxu2  ;;  %v5932_v38 = vld [vmem:[#allocation2 + $0xc0] sm:$0xff] }
 0x1b9   : > { %v2360_v40 = vadd.f32 %v2311_v49, %v2078_v48 }
 0x1ba   : > { %v2687_v39 = vpop.f32.mrf.mxu3  ;;  %v2455_v28 = vld [vmem:[#allocation3 + $0xa0] sm:$0xff] }
 0x1bb   : > { %v2737_v21 = vadd.f32 %v2687_v39, %v2455_v28  ;;  %2392 = vst.msk [vmem:[#allocation3 + $0xa8] sm:$0xff] %vm312_vm8, %v2360_v40  ;;  %v5952_v28 = vld [vmem:[#allocation2 + $0x150] sm:$0xff] }
 0x1bc   : > { %v2832_v45 = vld [vmem:[#allocation3 + $0x98] sm:$0xff] }
 0x1bd   : > { %v1938_v19 = vpop.f32.mrf.mxu1  ;;  %2769 = vst.msk [vmem:[#allocation3 + $0xa0] sm:$0xff] %vm312_vm8, %v2737_v21  ;;  %v3114_v22 = vadd.f32 %v3062_v63, %v2832_v45  ;;  %5579 = vmatmul.msk.bf16.gmra.mxu2 %vm312_vm8, %v5911_v16 }
 0x1be   : > { %v1984_v51 = vadd.f32 %v1938_v19, %v1702_v3  ;;  %v1706_v19 = vld [vmem:[#allocation3 + $0xd8] sm:$0xff] }
 0x1bf   : > { %v3065_v31 = vpop.f32.mrf.mxu0  ;;  %v2079_v0 = vld [vmem:[#allocation3 + $0xb0] sm:$0xff]  ;;  %3146 = vst.msk [vmem:[#allocation3 + $0x98] sm:$0xff] %vm312_vm8, %v3114_v22 }
 0x1c0   : > { %2016 = vst.msk [vmem:[#allocation3 + $0xb8] sm:$0xff] %vm312_vm8, %v1984_v51  ;;  %v2314_v43 = vpop.f32.mrf.mxu2  ;;  %v5913_v51 = vld [vmem:[#allocation2 + $0x38] sm:$0xff] }
 0x1c1   : > { %v2361_v27 = vadd.f32 %v2314_v43, %v2079_v0  ;;  %v5894_v43 = vld [vmem:[#allocation2 + $0x158] sm:$0xff] }
 0x1c2   : > { %v2689_v59 = vpop.f32.mrf.mxu3  ;;  %5770 = vmatmul.msk.bf16.gmra.mxu0 %vm312_vm8, %v5950_v33  ;;  %v2456_v50 = vld [vmem:[#allocation3 + $0xa8] sm:$0xff] }
 0x1c3   : > { %v2738_v8 = vadd.f32 %v2689_v59, %v2456_v50  ;;  %2393 = vst.msk [vmem:[#allocation3 + $0xb0] sm:$0xff] %vm312_vm8, %v2361_v27 }
 0x1c4   : > { %v2833_v47 = vld [vmem:[#allocation3 + $0xa0] sm:$0xff] }
 0x1c5   : > { %v1941_v58 = vpop.f32.mrf.mxu1  ;;  %2770 = vst.msk [vmem:[#allocation3 + $0xa8] sm:$0xff] %vm312_vm8, %v2738_v8  ;;  %v3115_v34 = vadd.f32 %v3065_v31, %v2833_v47 }
 0x1c6   : > { %v1985_v6 = vadd.f32 %v1941_v58, %v1703_v57  ;;  %v1707_v58 = vld [vmem:[#allocation3 + $0xe0] sm:$0xff] }
 0x1c7   : > { %5675 = vmatmul.msk.bf16.gmra.mxu3 %vm312_vm8, %v5931_v41  ;;  %v3067_v44 = vpop.f32.mrf.mxu0  ;;  %v2080_v26 = vld [vmem:[#allocation3 + $0xb8] sm:$0xff]  ;;  %3147 = vst.msk [vmem:[#allocation3 + $0xa0] sm:$0xff] %vm312_vm8, %v3115_v34 }
 0x1c8   : > { %5484 = vmatmul.msk.bf16.gmra.mxu1 %vm312_vm8, %v5892_v53  ;;  %2017 = vst.msk [vmem:[#allocation3 + $0xc0] sm:$0xff] %vm312_vm8, %v1985_v6  ;;  %v2316_v17 = vpop.f32.mrf.mxu2  ;;  %v5933_v53 = vld [vmem:[#allocation2 + $0xc8] sm:$0xff] }
 0x1c9   : > { %v2362_v25 = vadd.f32 %v2316_v17, %v2080_v26 }
 0x1ca   : > { %v2692_v54 = vpop.f32.mrf.mxu3  ;;  %v2457_v60 = vld [vmem:[#allocation3 + $0xb0] sm:$0xff] }
 0x1cb   : > { %v2739_v55 = vadd.f32 %v2692_v54, %v2457_v60  ;;  %2394 = vst.msk [vmem:[#allocation3 + $0xb8] sm:$0xff] %vm312_vm8, %v2362_v25  ;;  %v5953_v60 = vld [vmem:[#allocation2 + $0x158] sm:$0xff] }
 0x1cc   : > { %v2834_v36 = vld [vmem:[#allocation3 + $0xa8] sm:$0xff] }
 0x1cd   : > { %v1943_v35 = vpop.f32.mrf.mxu1  ;;  %2771 = vst.msk [vmem:[#allocation3 + $0xb0] sm:$0xff] %vm312_vm8, %v2739_v55  ;;  %v3116_v1 = vadd.f32 %v3067_v44, %v2834_v36  ;;  %5580 = vmatmul.msk.bf16.gmra.mxu2 %vm312_vm8, %v5912_v52 }
 0x1ce   : > { %v1986_v18 = vadd.f32 %v1943_v35, %v1704_v2  ;;  %v1708_v35 = vld [vmem:[#allocation3 + $0xe8] sm:$0xff] }
 0x1cf   : > { %v3070_v29 = vpop.f32.mrf.mxu0  ;;  %v2081_v14 = vld [vmem:[#allocation3 + $0xc0] sm:$0xff]  ;;  %3148 = vst.msk [vmem:[#allocation3 + $0xa8] sm:$0xff] %vm312_vm8, %v3116_v1 }
 0x1d0   : > { %2018 = vst.msk [vmem:[#allocation3 + $0xc8] sm:$0xff] %vm312_vm8, %v1986_v18  ;;  %v2319_v5 = vpop.f32.mrf.mxu2  ;;  %v5914_v18 = vld [vmem:[#allocation2 + $0x40] sm:$0xff] }
 0x1d1   : > { %v2363_v24 = vadd.f32 %v2319_v5, %v2081_v14  ;;  %v5895_v5 = vld [vmem:[#allocation2 + $0x160] sm:$0xff] }
 0x1d2   : > { %v2694_v7 = vpop.f32.mrf.mxu3  ;;  %5771 = vmatmul.msk.bf16.gmra.mxu0 %vm312_vm8, %v5951_v12  ;;  %v2458_v63 = vld [vmem:[#allocation3 + $0xb8] sm:$0xff] }
 0x1d3   : > { %v2740_v20 = vadd.f32 %v2694_v7, %v2458_v63  ;;  %2395 = vst.msk [vmem:[#allocation3 + $0xc0] sm:$0xff] %vm312_vm8, %v2363_v24 }
 0x1d4   : > { %v2835_v10 = vld [vmem:[#allocation3 + $0xb0] sm:$0xff] }
 0x1d5   : > { %v1946_v61 = vpop.f32.mrf.mxu1  ;;  %2772 = vst.msk [vmem:[#allocation3 + $0xb8] sm:$0xff] %vm312_vm8, %v2740_v20  ;;  %v3117_v39 = vadd.f32 %v3070_v29, %v2835_v10 }
 0x1d6   : > { %v1987_v62 = vadd.f32 %v1946_v61, %v1705_v32  ;;  %v1709_v61 = vld [vmem:[#allocation3 + $0xf0] sm:$0xff] }
 0x1d7   : > { %5676 = vmatmul.msk.bf16.gmra.mxu3 %vm312_vm8, %v5932_v38  ;;  %v3072_v23 = vpop.f32.mrf.mxu0  ;;  %v2082_v49 = vld [vmem:[#allocation3 + $0xc8] sm:$0xff]  ;;  %3149 = vst.msk [vmem:[#allocation3 + $0xb0] sm:$0xff] %vm312_vm8, %v3117_v39 }
 0x1d8   : > { %5485 = vmatmul.msk.bf16.gmra.mxu1 %vm312_vm8, %v5893_v37  ;;  %2019 = vst.msk [vmem:[#allocation3 + $0xd0] sm:$0xff] %vm312_vm8, %v1987_v62  ;;  %v2321_v3 = vpop.f32.mrf.mxu2  ;;  %v5934_v37 = vld [vmem:[#allocation2 + $0xd0] sm:$0xff] }
 0x1d9   : > { %v2364_v16 = vadd.f32 %v2321_v3, %v2082_v49 }
 0x1da   : > { %v2697_v48 = vpop.f32.mrf.mxu3  ;;  %v2459_v31 = vld [vmem:[#allocation3 + $0xc0] sm:$0xff] }
 0x1db   : > { %v2741_v45 = vadd.f32 %v2697_v48, %v2459_v31  ;;  %2396 = vst.msk [vmem:[#allocation3 + $0xc8] sm:$0xff] %vm312_vm8, %v2364_v16  ;;  %v5954_v31 = vld [vmem:[#allocation2 + $0x160] sm:$0xff] }
 0x1dc   : > { %v2836_v22 = vld [vmem:[#allocation3 + $0xb8] sm:$0xff] }
 0x1dd   : > { %v1948_v40 = vpop.f32.mrf.mxu1  ;;  %2773 = vst.msk [vmem:[#allocation3 + $0xc0] sm:$0xff] %vm312_vm8, %v2741_v45  ;;  %v3118_v59 = vadd.f32 %v3072_v23, %v2836_v22  ;;  %5581 = vmatmul.msk.bf16.gmra.mxu2 %vm312_vm8, %v5913_v51 }
 0x1de   : > { %v1988_v33 = vadd.f32 %v1948_v40, %v1706_v19  ;;  %v1710_v40 = vld [vmem:[#allocation3 + $0xf8] sm:$0xff] }
 0x1df   : > { %v3075_v21 = vpop.f32.mrf.mxu0  ;;  %v2083_v41 = vld [vmem:[#allocation3 + $0xd0] sm:$0xff]  ;;  %3150 = vst.msk [vmem:[#allocation3 + $0xb8] sm:$0xff] %vm312_vm8, %v3118_v59 }
 0x1e0   : > { %2020 = vst.msk [vmem:[#allocation3 + $0xd8] sm:$0xff] %vm312_vm8, %v1988_v33  ;;  %v2324_v57 = vpop.f32.mrf.mxu2  ;;  %v5915_v33 = vld [vmem:[#allocation2 + $0x48] sm:$0xff] }
 0x1e1   : > { %v2365_v6 = vadd.f32 %v2324_v57, %v2083_v41  ;;  %v5896_v57 = vld [vmem:[#allocation2 + $0x168] sm:$0xff] }
 0x1e2   : > { %v2699_v0 = vpop.f32.mrf.mxu3  ;;  %5772 = vmatmul.msk.bf16.gmra.mxu0 %vm312_vm8, %v5952_v28  ;;  %v2460_v44 = vld [vmem:[#allocation3 + $0xc8] sm:$0xff] }
 0x1e3   : > { %v2742_v47 = vadd.f32 %v2699_v0, %v2460_v44  ;;  %2397 = vst.msk [vmem:[#allocation3 + $0xd0] sm:$0xff] %vm312_vm8, %v2365_v6 }
 0x1e4   : > { %v2837_v34 = vld [vmem:[#allocation3 + $0xc0] sm:$0xff] }
 0x1e5   : > { %v1951_v27 = vpop.f32.mrf.mxu1  ;;  %2774 = vst.msk [vmem:[#allocation3 + $0xc8] sm:$0xff] %vm312_vm8, %v2742_v47  ;;  %v3119_v54 = vadd.f32 %v3075_v21, %v2837_v34 }
 0x1e6   : > { %v1989_v50 = vadd.f32 %v1951_v27, %v1707_v58  ;;  %v3191_v27 = vld [vmem:[#allocation3] sm:$0xff] }
 0x1e7   : > { %5677 = vmatmul.msk.bf16.gmra.mxu3 %vm312_vm8, %v5933_v53  ;;  %v3077_v8 = vpop.f32.mrf.mxu0  ;;  %v2084_v17 = vld [vmem:[#allocation3 + $0xd8] sm:$0xff]  ;;  %3151 = vst.msk [vmem:[#allocation3 + $0xc0] sm:$0xff] %vm312_vm8, %v3119_v54 }
 0x1e8   : > { %5486 = vmatmul.msk.bf16.gmra.mxu1 %vm312_vm8, %v5894_v43  ;;  %2021 = vst.msk [vmem:[#allocation3 + $0xe0] sm:$0xff] %vm312_vm8, %v1989_v50  ;;  %v2326_v2 = vpop.f32.mrf.mxu2  ;;  %v5935_v43 = vld [vmem:[#allocation2 + $0xd8] sm:$0xff] }
 0x1e9   : > { %v2366_v52 = vadd.f32 %v2326_v2, %v2084_v17 }
 0x1ea   : > { %v2702_v26 = vpop.f32.mrf.mxu3  ;;  %v2461_v29 = vld [vmem:[#allocation3 + $0xd0] sm:$0xff] }
 0x1eb   : > { %v2743_v36 = vadd.f32 %v2702_v26, %v2461_v29  ;;  %2398 = vst.msk [vmem:[#allocation3 + $0xd8] sm:$0xff] %vm312_vm8, %v2366_v52  ;;  %v5955_v29 = vld [vmem:[#allocation2 + $0x168] sm:$0xff] }
 0x1ec   : > { %v2838_v1 = vld [vmem:[#allocation3 + $0xc8] sm:$0xff] }
 0x1ed   : > { %v1953_v25 = vpop.f32.mrf.mxu1  ;;  %2775 = vst.msk [vmem:[#allocation3 + $0xd0] sm:$0xff] %vm312_vm8, %v2743_v36  ;;  %v3120_v7 = vadd.f32 %v3077_v8, %v2838_v1  ;;  %5582 = vmatmul.msk.bf16.gmra.mxu2 %vm312_vm8, %v5914_v18 }
 0x1ee   : > { %v1990_v12 = vadd.f32 %v1953_v25, %v1708_v35  ;;  %v3192_v25 = vld [vmem:[#allocation3 + $0x8] sm:$0xff] }
 0x1ef   : > { %v3080_v55 = vpop.f32.mrf.mxu0  ;;  %v2085_v38 = vld [vmem:[#allocation3 + $0xe0] sm:$0xff]  ;;  %3152 = vst.msk [vmem:[#allocation3 + $0xc8] sm:$0xff] %vm312_vm8, %v3120_v7 }
 0x1f0   : > { %2022 = vst.msk [vmem:[#allocation3 + $0xe8] sm:$0xff] %vm312_vm8, %v1990_v12  ;;  %v2329_v32 = vpop.f32.mrf.mxu2  ;;  %v5916_v12 = vld [vmem:[#allocation2 + $0x50] sm:$0xff] }
 0x1f1   : > { %v2367_v62 = vadd.f32 %v2329_v32, %v2085_v38  ;;  %v5897_v32 = vld [vmem:[#allocation2 + $0x170] sm:$0xff] }
 0x1f2   : > { %v2704_v14 = vpop.f32.mrf.mxu3  ;;  %5773 = vmatmul.msk.bf16.gmra.mxu0 %vm312_vm8, %v5953_v60  ;;  %v2462_v23 = vld [vmem:[#allocation3 + $0xd8] sm:$0xff] }
 0x1f3   : > { %v2744_v10 = vadd.f32 %v2704_v14, %v2462_v23  ;;  %2399 = vst.msk [vmem:[#allocation3 + $0xe0] sm:$0xff] %vm312_vm8, %v2367_v62 }
 0x1f4   : > { %v2839_v39 = vld [vmem:[#allocation3 + $0xd0] sm:$0xff] }
 0x1f5   : > { %v1956_v24 = vpop.f32.mrf.mxu1  ;;  %2776 = vst.msk [vmem:[#allocation3 + $0xd8] sm:$0xff] %vm312_vm8, %v2744_v10  ;;  %v3121_v48 = vadd.f32 %v3080_v55, %v2839_v39 }
 0x1f6   : > { %v1991_v63 = vadd.f32 %v1956_v24, %v1709_v61  ;;  %v3193_v24 = vld [vmem:[#allocation3 + $0x10] sm:$0xff] }
 0x1f7   : > { %5678 = vmatmul.msk.bf16.gmra.mxu3 %vm312_vm8, %v5934_v37  ;;  %v3082_v20 = vpop.f32.mrf.mxu0  ;;  %v2086_v3 = vld [vmem:[#allocation3 + $0xe8] sm:$0xff]  ;;  %3153 = vst.msk [vmem:[#allocation3 + $0xd0] sm:$0xff] %vm312_vm8, %v3121_v48 }
 0x1f8   : > { %5487 = vmatmul.msk.bf16.gmra.mxu1 %vm312_vm8, %v5895_v5  ;;  %2023 = vst.msk [vmem:[#allocation3 + $0xf0] sm:$0xff] %vm312_vm8, %v1991_v63  ;;  %v2331_v19 = vpop.f32.mrf.mxu2  ;;  %v5936_v5 = vld [vmem:[#allocation2 + $0xe0] sm:$0xff] }
 0x1f9   : > { %v2368_v51 = vadd.f32 %v2331_v19, %v2086_v3 }
 0x1fa   : > { %v2707_v49 = vpop.f32.mrf.mxu3  ;;  %v2463_v21 = vld [vmem:[#allocation3 + $0xe0] sm:$0xff] }
 0x1fb   : > { %v2745_v22 = vadd.f32 %v2707_v49, %v2463_v21  ;;  %2400 = vst.msk [vmem:[#allocation3 + $0xe8] sm:$0xff] %vm312_vm8, %v2368_v51  ;;  %v5956_v21 = vld [vmem:[#allocation2 + $0x170] sm:$0xff] }
 0x1fc   : > { %v2840_v59 = vld [vmem:[#allocation3 + $0xd8] sm:$0xff] }
 0x1fd   : > { %v1958_v16 = vpop.f32.mrf.mxu1  ;;  %2777 = vst.msk [vmem:[#allocation3 + $0xe0] sm:$0xff] %vm312_vm8, %v2745_v22  ;;  %v3122_v0 = vadd.f32 %v3082_v20, %v2840_v59  ;;  %5583 = vmatmul.msk.bf16.gmra.mxu2 %vm312_vm8, %v5915_v33 }
 0x1fe   : > { %v1992_v28 = vadd.f32 %v1958_v16, %v1710_v40  ;;  %v3194_v16 = vld [vmem:[#allocation3 + $0x18] sm:$0xff] }
 0x1ff   : > { %v3085_v45 = vpop.f32.mrf.mxu0  ;;  %v2087_v53 = vld [vmem:[#allocation3 + $0xf0] sm:$0xff]  ;;  %3154 = vst.msk [vmem:[#allocation3 + $0xd8] sm:$0xff] %vm312_vm8, %v3122_v0 }
 0x200   : > { %2024 = vst.msk [vmem:[#allocation3 + $0xf8] sm:$0xff] %vm312_vm8, %v1992_v28  ;;  %v2334_v58 = vpop.f32.mrf.mxu2  ;;  %v5917_v28 = vld [vmem:[#allocation2 + $0x58] sm:$0xff] }
 0x201   : > { %v2369_v50 = vadd.f32 %v2334_v58, %v2087_v53  ;;  %v5898_v58 = vld [vmem:[#allocation2 + $0x178] sm:$0xff] }
 0x202   : > { %v2709_v41 = vpop.f32.mrf.mxu3  ;;  %5774 = vmatmul.msk.bf16.gmra.mxu0 %vm312_vm8, %v5954_v31  ;;  %v2464_v8 = vld [vmem:[#allocation3 + $0xe8] sm:$0xff] }
 0x203   : > { %v2746_v34 = vadd.f32 %v2709_v41, %v2464_v8  ;;  %2401 = vst.msk [vmem:[#allocation3 + $0xf0] sm:$0xff] %vm312_vm8, %v2369_v50 }
 0x204   : > { %v2841_v54 = vld [vmem:[#allocation3 + $0xe0] sm:$0xff] }
 0x205   : > { %v3393_v6 = vpop.f32.mrf.mxu1  ;;  %2778 = vst.msk [vmem:[#allocation3 + $0xe8] sm:$0xff] %vm312_vm8, %v2746_v34  ;;  %v3123_v26 = vadd.f32 %v3085_v45, %v2841_v54 }
 0x206   : > { %v3473_v44 = vadd.f32 %v3393_v6, %v3191_v27  ;;  %v3195_v6 = vld [vmem:[#allocation3 + $0x20] sm:$0xff] }
 0x207   : > { %5679 = vmatmul.msk.bf16.gmra.mxu3 %vm312_vm8, %v5935_v43  ;;  %v3087_v47 = vpop.f32.mrf.mxu0  ;;  %v2088_v2 = vld [vmem:[#allocation3 + $0xf8] sm:$0xff]  ;;  %3155 = vst.msk [vmem:[#allocation3 + $0xe0] sm:$0xff] %vm312_vm8, %v3123_v26 }
 0x208   : > { %5488 = vmatmul.msk.bf16.gmra.mxu1 %vm312_vm8, %v5896_v57  ;;  %3505 = vst.msk [vmem:[#allocation3] sm:$0xff] %vm312_vm8, %v3473_v44  ;;  %v2336_v35 = vpop.f32.mrf.mxu2  ;;  %v5937_v57 = vld [vmem:[#allocation2 + $0xe8] sm:$0xff] }
 0x209   : > { %v2370_v18 = vadd.f32 %v2336_v35, %v2088_v2 }
 0x20a   : > { %v2712_v17 = vpop.f32.mrf.mxu3  ;;  %v2465_v55 = vld [vmem:[#allocation3 + $0xf0] sm:$0xff] }
 0x20b   : > { %v2747_v1 = vadd.f32 %v2712_v17, %v2465_v55  ;;  %2402 = vst.msk [vmem:[#allocation3 + $0xf8] sm:$0xff] %vm312_vm8, %v2370_v18  ;;  %v5957_v55 = vld [vmem:[#allocation2 + $0x178] sm:$0xff] }
 0x20c   : > { %v2842_v7 = vld [vmem:[#allocation3 + $0xe8] sm:$0xff] }
 0x20d   : > { %v3395_v52 = vpop.f32.mrf.mxu1  ;;  %2779 = vst.msk [vmem:[#allocation3 + $0xf0] sm:$0xff] %vm312_vm8, %v2747_v1  ;;  %v3124_v14 = vadd.f32 %v3087_v47, %v2842_v7  ;;  %5584 = vmatmul.msk.bf16.gmra.mxu2 %vm312_vm8, %v5916_v12 }
 0x20e   : > { %v3474_v60 = vadd.f32 %v3395_v52, %v3192_v25  ;;  %v3196_v52 = vld [vmem:[#allocation3 + $0x28] sm:$0xff] }
 0x20f   : > { %v3090_v36 = vpop.f32.mrf.mxu0  ;;  %v3570_v37 = vld [vmem:[#allocation3] sm:$0xff]  ;;  %3156 = vst.msk [vmem:[#allocation3 + $0xe8] sm:$0xff] %vm312_vm8, %v3124_v14 }
 0x210   : > { %3506 = vst.msk [vmem:[#allocation3 + $0x8] sm:$0xff] %vm312_vm8, %v3474_v60  ;;  %v3772_v61 = vpop.f32.mrf.mxu2  ;;  %v5918_v60 = vld [vmem:[#allocation2 + $0x60] sm:$0xff] }
 0x211   : > { %v3852_v63 = vadd.f32 %v3772_v61, %v3570_v37  ;;  %v5938_v61 = vld [vmem:[#allocation2 + $0xf0] sm:$0xff] }
 0x212   : > { %v2714_v38 = vpop.f32.mrf.mxu3  ;;  %5775 = vmatmul.msk.bf16.gmra.mxu0 %vm312_vm8, %v5955_v29  ;;  %v2466_v20 = vld [vmem:[#allocation3 + $0xf8] sm:$0xff] }
 0x213   : > { %v2748_v39 = vadd.f32 %v2714_v38, %v2466_v20  ;;  %3884 = vst.msk [vmem:[#allocation3] sm:$0xff] %vm312_vm8, %v3852_v63 }
 0x214   : > { %v2843_v48 = vld [vmem:[#allocation3 + $0xf0] sm:$0xff] }
 0x215   : > { %v3398_v62 = vpop.f32.mrf.mxu1  ;;  %2780 = vst.msk [vmem:[#allocation3 + $0xf8] sm:$0xff] %vm312_vm8, %v2748_v39  ;;  %v3125_v49 = vadd.f32 %v3090_v36, %v2843_v48 }
 0x216   : > { %v3475_v23 = vadd.f32 %v3398_v62, %v3193_v24  ;;  %v5899_v62 = vld [vmem:[#allocation2 + $0x180] sm:$0xff] }
 0x217   : > { %5680 = vmatmul.msk.bf16.gmra.mxu3 %vm312_vm8, %v5936_v5  ;;  %v3092_v10 = vpop.f32.mrf.mxu0  ;;  %v3571_v19 = vld [vmem:[#allocation3 + $0x8] sm:$0xff]  ;;  %3157 = vst.msk [vmem:[#allocation3 + $0xf0] sm:$0xff] %vm312_vm8, %v3125_v49 }
 0x218   : > { %5489 = vmatmul.msk.bf16.gmra.mxu1 %vm312_vm8, %v5897_v32  ;;  %3507 = vst.msk [vmem:[#allocation3 + $0x10] sm:$0xff] %vm312_vm8, %v3475_v23  ;;  %v3774_v40 = vpop.f32.mrf.mxu2  ;;  %v3197_v23 = vld [vmem:[#allocation3 + $0x30] sm:$0xff] }
 0x219   : > { %v3853_v33 = vadd.f32 %v3774_v40, %v3571_v19 }
 0x21a   : > { %v4151_v3 = vpop.f32.mrf.mxu3  ;;  %v3949_v45 = vld [vmem:[#allocation3] sm:$0xff] }
 0x21b   : > { %v4231_v59 = vadd.f32 %v4151_v3, %v3949_v45  ;;  %3885 = vst.msk [vmem:[#allocation3 + $0x8] sm:$0xff] %vm312_vm8, %v3853_v33 }
 0x21c   : > { %v2844_v0 = vld [vmem:[#allocation3 + $0xf8] sm:$0xff] }
 0x21d   : > { %v3400_v51 = vpop.f32.mrf.mxu1  ;;  %4263 = vst.msk [vmem:[#allocation3] sm:$0xff] %vm312_vm8, %v4231_v59  ;;  %v3126_v41 = vadd.f32 %v3092_v10, %v2844_v0  ;;  %5585 = vmatmul.msk.bf16.gmra.mxu2 %vm312_vm8, %v5917_v28  ;;  %v5919_v59 = vld [vmem:[#allocation2 + $0x68] sm:$0xff] }
 0x21e   : > { %v3476_v31 = vadd.f32 %v3400_v51, %v3194_v16 }
 0x21f   : > { %v4530_v22 = vpop.f32.mrf.mxu0  ;;  %v3572_v43 = vld [vmem:[#allocation3 + $0x10] sm:$0xff]  ;;  %3158 = vst.msk [vmem:[#allocation3 + $0xf8] sm:$0xff] %vm312_vm8, %v3126_v41 }
 0x220   : > { %3508 = vst.msk [vmem:[#allocation3 + $0x18] sm:$0xff] %vm312_vm8, %v3476_v31  ;;  %v3777_v27 = vpop.f32.mrf.mxu2  ;;  %v5958_v41 = vld [vmem:[#allocation2 + $0x180] sm:$0xff] }
 0x221   : > { %v3854_v44 = vadd.f32 %v3777_v27, %v3572_v43 }
 0x222   : > { %v4153_v53 = vpop.f32.mrf.mxu3  ;;  %5776 = vmatmul.msk.bf16.gmra.mxu0 %vm312_vm8, %v5956_v21  ;;  %v3950_v47 = vld [vmem:[#allocation3 + $0x8] sm:$0xff]  ;;  %v3198_v21 = vld [vmem:[#allocation3 + $0x38] sm:$0xff] }
 0x223   : > { %v4232_v54 = vadd.f32 %v4153_v53, %v3950_v47  ;;  %3886 = vst.msk [vmem:[#allocation3 + $0x10] sm:$0xff] %vm312_vm8, %v3854_v44 }
 0x224   : > { %v4328_v26 = vld [vmem:[#allocation3] sm:$0xff] }
 0x225   : > { %v3403_v50 = vpop.f32.mrf.mxu1  ;;  %4264 = vst.msk [vmem:[#allocation3 + $0x8] sm:$0xff] %vm312_vm8, %v4232_v54  ;;  %v4610_v17 = vadd.f32 %v4530_v22, %v4328_v26  ;;  %v3199_v26 = vld [vmem:[#allocation3 + $0x40] sm:$0xff] }
 0x226   : > { %v3477_v8 = vadd.f32 %v3403_v50, %v3195_v6 }
 0x227   : > { %5681 = vmatmul.msk.bf16.gmra.mxu3 %vm312_vm8, %v5937_v57  ;;  %v4532_v34 = vpop.f32.mrf.mxu0  ;;  %v3573_v35 = vld [vmem:[#allocation3 + $0x18] sm:$0xff]  ;;  %4642 = vst.msk [vmem:[#allocation3] sm:$0xff] %vm312_vm8, %v4610_v17 }
 0x228   : > { %5490 = vmatmul.msk.bf16.gmra.mxu1 %vm312_vm8, %v5898_v58  ;;  %3509 = vst.msk [vmem:[#allocation3 + $0x20] sm:$0xff] %vm312_vm8, %v3477_v8  ;;  %v3779_v25 = vpop.f32.mrf.mxu2  ;;  %v5939_v8 = vld [vmem:[#allocation2 + $0xf8] sm:$0xff] }
 0x229   : > { %v3855_v12 = vadd.f32 %v3779_v25, %v3573_v35 }
 0x22a   : > { %v4156_v2 = vpop.f32.mrf.mxu3  ;;  %v3951_v36 = vld [vmem:[#allocation3 + $0x10] sm:$0xff] }
 0x22b   : > { %v4233_v7 = vadd.f32 %v4156_v2, %v3951_v36  ;;  %3887 = vst.msk [vmem:[#allocation3 + $0x18] sm:$0xff] %vm312_vm8, %v3855_v12 }
 0x22c   : > { %v4329_v14 = vld [vmem:[#allocation3 + $0x8] sm:$0xff] }
 0x22d   : > { %v3405_v18 = vpop.f32.mrf.mxu1  ;;  %4265 = vst.msk [vmem:[#allocation3 + $0x10] sm:$0xff] %vm312_vm8, %v4233_v7  ;;  %v4611_v38 = vadd.f32 %v4532_v34, %v4329_v14  ;;  %5586 = vmatmul.msk.bf16.gmra.mxu2 %vm312_vm8, %v5918_v60  ;;  %v5900_v34 = vld [vmem:[#allocation2 + $0x188] sm:$0xff]  ;;  %v3200_v14 = vld [vmem:[#allocation3 + $0x48] sm:$0xff] }
 0x22e   : > { %v3478_v29 = vadd.f32 %v3405_v18, %v3196_v52  ;;  %v4677_v5 = vld [vmem:[#allocation3] sm:$0xff] }
 0x22f   : > { %v4535_v1 = vpop.f32.mrf.mxu0  ;;  %v3574_v32 = vld [vmem:[#allocation3 + $0x20] sm:$0xff]  ;;  %v4709_v24 = vpack.c.bf16 %v4677_v5, %v4677_v5  ;;  %4643 = vst.msk [vmem:[#allocation3 + $0x8] sm:$0xff] %vm312_vm8, %v4611_v38 }
 0x230   : > { %3510 = vst.msk [vmem:[#allocation3 + $0x28] sm:$0xff] %vm312_vm8, %v3478_v29  ;;  %v3782_v63 = vpop.f32.mrf.mxu2  ;;  %v5920_v5 = vld [vmem:[#allocation2 + $0x70] sm:$0xff] }
 0x231   : > { %4741 = vst.msk [vmem:[%s7521_s26] sm:$0xf] %vm513_vm5, %v4709_v24  ;;  %v3856_v10 = vadd.f32 %v3782_v63, %v3574_v32  ;;  %v1022_v24 = vld [vmem:[#allocation2 + $0x1a4] sm:$0x8] }
 0x232   : > { %v4158_v37 = vpop.f32.mrf.mxu3  ;;  %5777 = vmatmul.msk.bf16.gmra.mxu0 %vm312_vm8, %v5957_v55  ;;  %v3952_v48 = vld [vmem:[#allocation3 + $0x18] sm:$0xff] }
 0x233   : > { %v4234_v3 = vadd.f32 %v4158_v37, %v3952_v48  ;;  %3888 = vst.msk [vmem:[#allocation3 + $0x20] sm:$0xff] %vm312_vm8, %v3856_v10 }
 0x234   : > { %v4330_v19 = vld [vmem:[#allocation3 + $0x10] sm:$0xff] }
 0x235   : > { %v3408_v20 = vpop.f32.mrf.mxu1  ;;  %4266 = vst.msk [vmem:[#allocation3 + $0x18] sm:$0xff] %vm312_vm8, %v4234_v3  ;;  %v4612_v40 = vadd.f32 %v4535_v1, %v4330_v19  ;;  %v1164_v3 = vrot.slane %v817_v4, 5 }
 0x236   : > { %v3479_v39 = vadd.f32 %v3408_v20, %v3197_v23  ;;  %v4678_v51 = vld [vmem:[#allocation3 + $0x8] sm:$0xff]  ;;  %v1023_v20 = vsel %vm6888_vm13, 0, %v1022_v24 }
 0x237   : > { %5682 = vmatmul.msk.bf16.gmra.mxu3 %vm312_vm8, %v5938_v61  ;;  %v4537_v49 = vpop.f32.mrf.mxu0  ;;  %v3575_v33 = vld [vmem:[#allocation3 + $0x28] sm:$0xff]  ;;  %v4710_v28 = vpack.c.bf16 %v4678_v51, %v4678_v51  ;;  %4644 = vst.msk [vmem:[#allocation3 + $0x10] sm:$0xff] %vm312_vm8, %v4612_v40  ;;  %v5959_v61 = vld [vmem:[#allocation2 + $0x188] sm:$0xff]  ;;  %v1169_v51 = vrot.slane %v822_v30, 4 }
 0x238   : > { %5491 = vmatmul.msk.bf16.gmra.mxu1 %vm312_vm8, %v5899_v62  ;;  %3511 = vst.msk [vmem:[#allocation3 + $0x30] sm:$0xff] %vm312_vm8, %v3479_v39  ;;  %v3784_v31 = vpop.f32.mrf.mxu2 }
 0x239   : > { %4742 = vst.msk [vmem:[%s7521_s26 + $0x4] sm:$0xf] %vm513_vm5, %v4710_v28  ;;  %v3857_v22 = vadd.f32 %v3784_v31, %v3575_v33  ;;  %v5901_v28 = vld [vmem:[#allocation2 + $0x190] sm:$0xff] }
 0x23a   : > { %v4161_v16 = vpop.f32.mrf.mxu3  ;;  %v3953_v53 = vld [vmem:[#allocation3 + $0x20] sm:$0xff]  ;;  %1024 = vst [vmem:[#allocation2 + $0x1a4] sm:$0x8] %v1023_v20 }
 0x23b   : > { %v4235_v57 = vadd.f32 %v4161_v16, %v3953_v53  ;;  %3889 = vst.msk [vmem:[#allocation3 + $0x28] sm:$0xff] %vm312_vm8, %v3857_v22  ;;  %v5940_v16 = vld [vmem:[#allocation2 + $0x100] sm:$0xff] }
 0x23c   : > { %v4331_v58 = vld [vmem:[#allocation3 + $0x18] sm:$0xff] }
 0x23d   : > { %v3410_v45 = vpop.f32.mrf.mxu1  ;;  %4267 = vst.msk [vmem:[#allocation3 + $0x20] sm:$0xff] %vm312_vm8, %v4235_v57  ;;  %v4613_v27 = vadd.f32 %v4537_v49, %v4331_v58  ;;  %5587 = vmatmul.msk.bf16.gmra.mxu2 %vm312_vm8, %v5919_v59  ;;  %v1163_v49 = vrot.slane %v814_v11, 4 }
 0x23e   : > { %v3480_v0 = vadd.f32 %v3410_v45, %v3198_v21  ;;  %v4679_v50 = vld [vmem:[#allocation3 + $0x10] sm:$0xff]  ;;  %v1170_v45 = vor.u32 %v1169_v51, %v1167_v13 }
 0x23f   : > { %v4540_v43 = vpop.f32.mrf.mxu0  ;;  %v3576_v44 = vld [vmem:[#allocation3 + $0x30] sm:$0xff]  ;;  %v4711_v47 = vpack.c.bf16 %v4679_v50, %v4679_v50  ;;  %4645 = vst.msk [vmem:[#allocation3 + $0x18] sm:$0xff] %vm312_vm8, %v4613_v27  ;;  %v1165_v31 = vor.u32 %v1164_v3, %v1163_v49 }
 0x240   : > { %3512 = vst.msk [vmem:[#allocation3 + $0x38] sm:$0xff] %vm312_vm8, %v3480_v0  ;;  %v3787_v54 = vpop.f32.mrf.mxu2  ;;  %v3201_v21 = vld [vmem:[#allocation3 + $0x50] sm:$0xff]  ;;  %v1171_v9 = vrot.slane %v1170_v45, 4  ;;  %v5942_v45 = vld [vmem:[#allocation2 + $0x110] sm:$0xff] }
 0x241   : > { %4743 = vst.msk [vmem:[%s7521_s26 + $0x8] sm:$0xf] %vm513_vm5, %v4711_v47  ;;  %v3858_v2 = vadd.f32 %v3787_v54, %v3576_v44  ;;  %v1166_v22 = vrot.slane %v1165_v31, 4  ;;  %v1266_v58 = vld [vmem:[#allocation2 + $0x1a4] sm:$0xf]  ;;  %v5921_v54 = vld [vmem:[#allocation2 + $0x78] sm:$0xff] }
 0x242   : > { %v4163_v6 = vpop.f32.mrf.mxu3  ;;  %5778 = vmatmul.msk.bf16.gmra.mxu0 %vm312_vm8, %v5958_v41  ;;  %v3954_v25 = vld [vmem:[#allocation3 + $0x28] sm:$0xff]  ;;  %v1267_v50 = vsel %vm6931_vm15, %v1171_v9, %v1266_v58 }
 0x243   : > { %v4236_v18 = vadd.f32 %v4163_v6, %v3954_v25  ;;  %3890 = vst.msk [vmem:[#allocation3 + $0x30] sm:$0xff] %vm312_vm8, %v3858_v2  ;;  %v1168_v41 = vsel %vm6895_vm14, %v1166_v22, %v1167_v13  ;;  %v5922_v13 = vld [vmem:[#allocation2 + $0x80] sm:$0xff] }
 0x244   : > { %v4332_v12 = vld [vmem:[#allocation3 + $0x20] sm:$0xff]  ;;  %1265 = vst.msk [vmem:[#allocation2 + $0x1a0] sm:$0xf] %vm513_vm5, %v1168_v41 }
 0x245   : > { %v3413_v17 = vpop.f32.mrf.mxu1  ;;  %4268 = vst.msk [vmem:[#allocation3 + $0x28] sm:$0xff] %vm312_vm8, %v4236_v18  ;;  %v4614_v60 = vadd.f32 %v4540_v43, %v4332_v12 }
 0x246   : > { %v3481_v35 = vadd.f32 %v3413_v17, %v3199_v26  ;;  %v4680_v55 = vld [vmem:[#allocation3 + $0x18] sm:$0xff]  ;;  %1268 = vst [vmem:[#allocation2 + $0x1a4] sm:$0xf] %v1267_v50  ;;  %v5960_v17 = vld [vmem:[#allocation2 + $0x190] sm:$0xff] }
 0x247   : > { %5683 = vmatmul.msk.bf16.gmra.mxu3 %vm312_vm8, %v5939_v8  ;;  %v4542_v52 = vpop.f32.mrf.mxu0  ;;  %v3577_v36 = vld [vmem:[#allocation3 + $0x38] sm:$0xff]  ;;  %v4712_v1 = vpack.c.bf16 %v4680_v55, %v4680_v55  ;;  %4646 = vst.msk [vmem:[#allocation3 + $0x20] sm:$0xff] %vm312_vm8, %v4614_v60 }
 0x248   : > { %5492 = vmatmul.msk.bf16.gmra.mxu1 %vm312_vm8, %v5900_v34  ;;  %3513 = vst.msk [vmem:[#allocation3 + $0x40] sm:$0xff] %vm312_vm8, %v3481_v35  ;;  %v3789_v7 = vpop.f32.mrf.mxu2  ;;  %v3202_v8 = vld [vmem:[#allocation3 + $0x58] sm:$0xff] }
 0x249   : > { %4744 = vst.msk [vmem:[%s7521_s26 + $0xc] sm:$0xf] %vm513_vm5, %v4712_v1  ;;  %v3859_v37 = vadd.f32 %v3789_v7, %v3577_v36  ;;  %v5902_v36 = vld [vmem:[#allocation2 + $0x198] sm:$0xff]  ;;  %v3203_v7 = vld [vmem:[#allocation3 + $0x60] sm:$0xff] }
 0x24a   : > { %v4166_v29 = vpop.f32.mrf.mxu3  ;;  %v3955_v62 = vld [vmem:[#allocation3 + $0x30] sm:$0xff] }
 0x24b   : > { %v4237_v23 = vadd.f32 %v4166_v29, %v3955_v62  ;;  %3891 = vst.msk [vmem:[#allocation3 + $0x38] sm:$0xff] %vm312_vm8, %v3859_v37  ;;  %v5941_v29 = vld [vmem:[#allocation2 + $0x108] sm:$0xff] }
 0x24c   : > { %v4333_v10 = vld [vmem:[#allocation3 + $0x28] sm:$0xff] }
 0x24d   : > { %v3415_v38 = vpop.f32.mrf.mxu1  ;;  %4269 = vst.msk [vmem:[#allocation3 + $0x30] sm:$0xff] %vm312_vm8, %v4237_v23  ;;  %v4615_v39 = vadd.f32 %v4542_v52, %v4333_v10  ;;  %5588 = vmatmul.msk.bf16.gmra.mxu2 %vm312_vm8, %v5920_v5 }
 0x24e   : > { %v3482_v32 = vadd.f32 %v3415_v38, %v3200_v14  ;;  %v4681_v19 = vld [vmem:[#allocation3 + $0x20] sm:$0xff] }
 0x24f   : > { %v4545_v63 = vpop.f32.mrf.mxu0  ;;  %v3578_v40 = vld [vmem:[#allocation3 + $0x40] sm:$0xff]  ;;  %v4713_v33 = vpack.c.bf16 %v4681_v19, %v4681_v19  ;;  %4647 = vst.msk [vmem:[#allocation3 + $0x28] sm:$0xff] %vm312_vm8, %v4615_v39 }
 0x250   : > { %3514 = vst.msk [vmem:[#allocation3 + $0x48] sm:$0xff] %vm312_vm8, %v3482_v32  ;;  %v3792_v11 = vpop.f32.mrf.mxu2 }
 0x251   : > { %4745 = vst.msk [vmem:[%s7521_s26 + $0x10] sm:$0xf] %vm513_vm5, %v4713_v33  ;;  %v3860_v4 = vadd.f32 %v3792_v11, %v3578_v40  ;;  %v5961_v40 = vld [vmem:[#allocation2 + $0x198] sm:$0xff] }
 0x252   : > { %v4168_v48 = vpop.f32.mrf.mxu3  ;;  %5779 = vmatmul.msk.bf16.gmra.mxu0 %vm312_vm8, %v5959_v61  ;;  %v3956_v59 = vld [vmem:[#allocation3 + $0x38] sm:$0xff] }
 0x253   : > { %v4238_v30 = vadd.f32 %v4168_v48, %v3956_v59  ;;  %3892 = vst.msk [vmem:[#allocation3 + $0x40] sm:$0xff] %vm312_vm8, %v3860_v4  ;;  %v3204_v48 = vld [vmem:[#allocation3 + $0x68] sm:$0xff]  ;;  %v3205_v59 = vld [vmem:[#allocation3 + $0x70] sm:$0xff] }
 0x254   : > { %v4334_v53 = vld [vmem:[#allocation3 + $0x30] sm:$0xff] }
 0x255   : > { %v3418_v15 = vpop.f32.mrf.mxu1  ;;  %4270 = vst.msk [vmem:[#allocation3 + $0x38] sm:$0xff] %vm312_vm8, %v4238_v30  ;;  %v4616_v43 = vadd.f32 %v4545_v63, %v4334_v53 }
 0x256   : > { %v3483_v42 = vadd.f32 %v3418_v15, %v3201_v21  ;;  %v4682_v27 = vld [vmem:[#allocation3 + $0x28] sm:$0xff] }
 0x257   : > { %5684 = vmatmul.msk.bf16.gmra.mxu3 %vm312_vm8, %v5940_v16  ;;  %v4547_v0 = vpop.f32.mrf.mxu0  ;;  %v3579_v6 = vld [vmem:[#allocation3 + $0x48] sm:$0xff]  ;;  %v4714_v44 = vpack.c.bf16 %v4682_v27, %v4682_v27  ;;  %4648 = vst.msk [vmem:[#allocation3 + $0x30] sm:$0xff] %vm312_vm8, %v4616_v43 }
 0x258   : > { %5493 = vmatmul.msk.bf16.gmra.mxu1 %vm312_vm8, %v5901_v28  ;;  %3515 = vst.msk [vmem:[#allocation3 + $0x50] sm:$0xff] %vm312_vm8, %v3483_v42  ;;  %v3794_v56 = vpop.f32.mrf.mxu2  ;;  %v5903_v42 = vld [vmem:[#allocation2 + $0x1a0] sm:$0xff] }
 0x259   : > { %4746 = vst.msk [vmem:[%s7521_s26 + $0x14] sm:$0xf] %vm513_vm5, %v4714_v44  ;;  %v3861_v34 = vadd.f32 %v3794_v56, %v3579_v6 }
 0x25a   : > { %v4171_v57 = vpop.f32.mrf.mxu3  ;;  %v3957_v2 = vld [vmem:[#allocation3 + $0x40] sm:$0xff] }
 0x25b   : > { %v4239_v25 = vadd.f32 %v4171_v57, %v3957_v2  ;;  %3893 = vst.msk [vmem:[#allocation3 + $0x48] sm:$0xff] %vm312_vm8, %v3861_v34 }
 0x25c   : > { %v4335_v46 = vld [vmem:[#allocation3 + $0x38] sm:$0xff] }
 0x25d   : > { %v3420_v47 = vpop.f32.mrf.mxu1  ;;  %4271 = vst.msk [vmem:[#allocation3 + $0x40] sm:$0xff] %vm312_vm8, %v4239_v25  ;;  %v4617_v52 = vadd.f32 %v4547_v0, %v4335_v46  ;;  %5589 = vmatmul.msk.bf16.gmra.mxu2 %vm312_vm8, %v5921_v54  ;;  %v5923_v54 = vld [vmem:[#allocation2 + $0x88] sm:$0xff] }
 0x25e   : > { %v3484_v26 = vadd.f32 %v3420_v47, %v3202_v8  ;;  %v4683_v12 = vld [vmem:[#allocation3 + $0x30] sm:$0xff]  ;;  %v3206_v8 = vld [vmem:[#allocation3 + $0x78] sm:$0xff] }
 0x25f   : > { %v4550_v35 = vpop.f32.mrf.mxu0  ;;  %v3580_v60 = vld [vmem:[#allocation3 + $0x50] sm:$0xff]  ;;  %v4715_v55 = vpack.c.bf16 %v4683_v12, %v4683_v12  ;;  %4649 = vst.msk [vmem:[#allocation3 + $0x38] sm:$0xff] %vm312_vm8, %v4617_v52 }
 0x260   : > { %3516 = vst.msk [vmem:[#allocation3 + $0x58] sm:$0xff] %vm312_vm8, %v3484_v26  ;;  %v3797_v1 = vpop.f32.mrf.mxu2 }
 0x261   : > { %4747 = vst.msk [vmem:[%s7521_s26 + $0x18] sm:$0xf] %vm513_vm5, %v4715_v55  ;;  %v3862_v38 = vadd.f32 %v3797_v1, %v3580_v60  ;;  %v3207_v1 = vld [vmem:[#allocation3 + $0x80] sm:$0xff] }
 0x262   : > { %v4173_v18 = vpop.f32.mrf.mxu3  ;;  %5780 = vmatmul.msk.bf16.gmra.mxu0 %vm312_vm8, %v5960_v17  ;;  %v3958_v5 = vld [vmem:[#allocation3 + $0x48] sm:$0xff]  ;;  %v5962_v17 = vld [vmem:[#allocation2 + $0x1a0] sm:$0xff] }
 0x263   : > { %v4240_v61 = vadd.f32 %v4173_v18, %v3958_v5  ;;  %3894 = vst.msk [vmem:[#allocation3 + $0x50] sm:$0xff] %vm312_vm8, %v3862_v38 }
 0x264   : > { %v4336_v24 = vld [vmem:[#allocation3 + $0x40] sm:$0xff] }
 0x265   : > { %v3423_v14 = vpop.f32.mrf.mxu1  ;;  %4272 = vst.msk [vmem:[#allocation3 + $0x48] sm:$0xff] %vm312_vm8, %v4240_v61  ;;  %v4618_v62 = vadd.f32 %v4550_v35, %v4336_v24 }
 0x266   : > { %v3485_v37 = vadd.f32 %v3423_v14, %v3203_v7  ;;  %v4684_v23 = vld [vmem:[#allocation3 + $0x38] sm:$0xff] }
 0x267   : > { %5685 = vmatmul.msk.bf16.gmra.mxu3 %vm312_vm8, %v5941_v29  ;;  %v4552_v32 = vpop.f32.mrf.mxu0  ;;  %v3581_v20 = vld [vmem:[#allocation3 + $0x58] sm:$0xff]  ;;  %v4716_v10 = vpack.c.bf16 %v4684_v23, %v4684_v23  ;;  %4650 = vst.msk [vmem:[#allocation3 + $0x40] sm:$0xff] %vm312_vm8, %v4618_v62  ;;  %v5943_v29 = vld [vmem:[#allocation2 + $0x118] sm:$0xff] }
 0x268   : > { %5494 = vmatmul.msk.bf16.gmra.mxu1 %vm312_vm8, %v5902_v36  ;;  %3517 = vst.msk [vmem:[#allocation3 + $0x60] sm:$0xff] %vm312_vm8, %v3485_v37  ;;  %v3799_v39 = vpop.f32.mrf.mxu2 }
 0x269   : > { %4748 = vst.msk [vmem:[%s7521_s26 + $0x1c] sm:$0xf] %vm513_vm5, %v4716_v10  ;;  %v3863_v3 = vadd.f32 %v3799_v39, %v3581_v20  ;;  %v3208_v39 = vld [vmem:[#allocation3 + $0x88] sm:$0xff] }
 0x26a   : > { %v4176_v63 = vpop.f32.mrf.mxu3  ;;  %v3959_v16 = vld [vmem:[#allocation3 + $0x50] sm:$0xff] }
 0x26b   : > { %v4241_v33 = vadd.f32 %v4176_v63, %v3959_v16  ;;  %3895 = vst.msk [vmem:[#allocation3 + $0x58] sm:$0xff] %vm312_vm8, %v3863_v3 }
 0x26c   : > { %v4337_v28 = vld [vmem:[#allocation3 + $0x48] sm:$0xff] }
 0x26d   : > { %v3425_v49 = vpop.f32.mrf.mxu1  ;;  %4273 = vst.msk [vmem:[#allocation3 + $0x50] sm:$0xff] %vm312_vm8, %v4241_v33  ;;  %v4619_v31 = vadd.f32 %v4552_v32, %v4337_v28  ;;  %5590 = vmatmul.msk.bf16.gmra.mxu2 %vm312_vm8, %v5922_v13  ;;  %v5963_v13 = vld [vmem:[#allocation2 + $0x1a8] sm:$0xff] }
 0x26e   : > { %v3486_v19 = vadd.f32 %v3425_v49, %v3204_v48  ;;  %v4685_v21 = vld [vmem:[#allocation3 + $0x40] sm:$0xff] }
 0x26f   : > { %v4555_v51 = vpop.f32.mrf.mxu0  ;;  %v3582_v15 = vld [vmem:[#allocation3 + $0x60] sm:$0xff]  ;;  %v4717_v4 = vpack.c.bf16 %v4685_v21, %v4685_v21  ;;  %4651 = vst.msk [vmem:[#allocation3 + $0x48] sm:$0xff] %vm312_vm8, %v4619_v31 }
 0x270   : > { %3518 = vst.msk [vmem:[#allocation3 + $0x68] sm:$0xff] %vm312_vm8, %v3486_v19  ;;  %v3802_v22 = vpop.f32.mrf.mxu2 }
 0x271   : > { %4749 = vst.msk [vmem:[%s7521_s26 + $0x20] sm:$0xf] %vm513_vm5, %v4717_v4  ;;  %v3864_v9 = vadd.f32 %v3802_v22, %v3582_v15 }
 0x272   : > { %v4178_v11 = vpop.f32.mrf.mxu3  ;;  %5781 = vmatmul.msk.bf16.gmra.mxu0 %vm312_vm8, %v5961_v40  ;;  %v3960_v41 = vld [vmem:[#allocation3 + $0x58] sm:$0xff] }
 0x273   : > { %v4242_v43 = vadd.f32 %v4178_v11, %v3960_v41  ;;  %3896 = vst.msk [vmem:[#allocation3 + $0x60] sm:$0xff] %vm312_vm8, %v3864_v9 }
 0x274   : > { %v4338_v57 = vld [vmem:[#allocation3 + $0x50] sm:$0xff] }
 0x275   : > { %v3428_v0 = vpop.f32.mrf.mxu1  ;;  %4274 = vst.msk [vmem:[#allocation3 + $0x58] sm:$0xff] %vm312_vm8, %v4242_v43  ;;  %v4620_v58 = vadd.f32 %v4555_v51, %v4338_v57 }
 0x276   : > { %v3487_v30 = vadd.f32 %v3428_v0, %v3205_v59  ;;  %v4686_v6 = vld [vmem:[#allocation3 + $0x48] sm:$0xff] }
 0x277   : > { %5686 = vmatmul.msk.bf16.gmra.mxu3 %vm312_vm8, %v5942_v45  ;;  %v4557_v53 = vpop.f32.mrf.mxu0  ;;  %v3583_v50 = vld [vmem:[#allocation3 + $0x68] sm:$0xff]  ;;  %v4718_v44 = vpack.c.bf16 %v4686_v6, %v4686_v6  ;;  %4652 = vst.msk [vmem:[#allocation3 + $0x50] sm:$0xff] %vm312_vm8, %v4620_v58  ;;  %v3209_v45 = vld [vmem:[#allocation3 + $0x90] sm:$0xff]  ;;  %v3210_v6 = vld [vmem:[#allocation3 + $0x98] sm:$0xff] }
 0x278   : > { %5495 = vmatmul.msk.bf16.gmra.mxu1 %vm312_vm8, %v5903_v42  ;;  %3519 = vst.msk [vmem:[#allocation3 + $0x70] sm:$0xff] %vm312_vm8, %v3487_v30  ;;  %v3804_v56 = vpop.f32.mrf.mxu2 }
 0x279   : > { %4750 = vst.msk [vmem:[%s7521_s26 + $0x24] sm:$0xf] %vm513_vm5, %v4718_v44  ;;  %v3865_v34 = vadd.f32 %v3804_v56, %v3583_v50 }
 0x27a   : > { %v4181_v27 = vpop.f32.mrf.mxu3  ;;  %v3961_v2 = vld [vmem:[#allocation3 + $0x60] sm:$0xff] }
 0x27b   : > { %v4243_v25 = vadd.f32 %v4181_v27, %v3961_v2  ;;  %3897 = vst.msk [vmem:[#allocation3 + $0x68] sm:$0xff] %vm312_vm8, %v3865_v34 }
 0x27c   : > { %v4339_v46 = vld [vmem:[#allocation3 + $0x58] sm:$0xff] }
 0x27d   : > { %v3430_v47 = vpop.f32.mrf.mxu1  ;;  %4275 = vst.msk [vmem:[#allocation3 + $0x60] sm:$0xff] %vm312_vm8, %v4243_v25  ;;  %v4621_v52 = vadd.f32 %v4557_v53, %v4339_v46  ;;  %5591 = vmatmul.msk.bf16.gmra.mxu2 %vm312_vm8, %v5923_v54 }
 0x27e   : > { %v3488_v26 = vadd.f32 %v3430_v47, %v3206_v8  ;;  %v4687_v12 = vld [vmem:[#allocation3 + $0x50] sm:$0xff] }
 0x27f   : > { %v4560_v35 = vpop.f32.mrf.mxu0  ;;  %v3584_v60 = vld [vmem:[#allocation3 + $0x70] sm:$0xff]  ;;  %v4719_v55 = vpack.c.bf16 %v4687_v12, %v4687_v12  ;;  %4653 = vst.msk [vmem:[#allocation3 + $0x58] sm:$0xff] %vm312_vm8, %v4621_v52  ;;  %v3211_v52 = vld [vmem:[#allocation3 + $0xa0] sm:$0xff] }
 0x280   : > { %3520 = vst.msk [vmem:[#allocation3 + $0x78] sm:$0xff] %vm312_vm8, %v3488_v26  ;;  %v3807_v36 = vpop.f32.mrf.mxu2 }
 0x281   : > { %4751 = vst.msk [vmem:[%s7521_s26 + $0x28] sm:$0xf] %vm513_vm5, %v4719_v55  ;;  %v3866_v14 = vadd.f32 %v3807_v36, %v3584_v60 }
 0x282   : > { %v4183_v18 = vpop.f32.mrf.mxu3  ;;  %5782 = vmatmul.msk.bf16.gmra.mxu0 %vm312_vm8, %v5962_v17  ;;  %v3962_v37 = vld [vmem:[#allocation3 + $0x68] sm:$0xff] }
 0x283   : > { %v4244_v32 = vadd.f32 %v4183_v18, %v3962_v37  ;;  %3898 = vst.msk [vmem:[#allocation3 + $0x70] sm:$0xff] %vm312_vm8, %v3866_v14 }
 0x284   : > { %v4340_v61 = vld [vmem:[#allocation3 + $0x60] sm:$0xff] }
 0x285   : > { %v3433_v7 = vpop.f32.mrf.mxu1  ;;  %4276 = vst.msk [vmem:[#allocation3 + $0x68] sm:$0xff] %vm312_vm8, %v4244_v32  ;;  %v4622_v24 = vadd.f32 %v4560_v35, %v4340_v61  ;;  %v3212_v61 = vld [vmem:[#allocation3 + $0xa8] sm:$0xff] }
 0x286   : > { %v3489_v38 = vadd.f32 %v3433_v7, %v3207_v1  ;;  %v4688_v63 = vld [vmem:[#allocation3 + $0x58] sm:$0xff] }
 0x287   : > { %5687 = vmatmul.msk.bf16.gmra.mxu3 %vm312_vm8, %v5943_v29  ;;  %v4562_v5 = vpop.f32.mrf.mxu0  ;;  %v3585_v23 = vld [vmem:[#allocation3 + $0x78] sm:$0xff]  ;;  %v4720_v20 = vpack.c.bf16 %v4688_v63, %v4688_v63  ;;  %4654 = vst.msk [vmem:[#allocation3 + $0x60] sm:$0xff] %vm312_vm8, %v4622_v24 }
 0x288   : > { %3521 = vst.msk [vmem:[#allocation3 + $0x80] sm:$0xff] %vm312_vm8, %v3489_v38  ;;  %v3809_v10 = vpop.f32.mrf.mxu2 }
 0x289   : > { %4752 = vst.msk [vmem:[%s7521_s26 + $0x2c] sm:$0xf] %vm513_vm5, %v4720_v20  ;;  %v3867_v49 = vadd.f32 %v3809_v10, %v3585_v23 }
 0x28a   : > { %v4186_v62 = vpop.f32.mrf.mxu3  ;;  %v3963_v19 = vld [vmem:[#allocation3 + $0x70] sm:$0xff] }
 0x28b   : > { %v4245_v16 = vadd.f32 %v4186_v62, %v3963_v19  ;;  %3899 = vst.msk [vmem:[#allocation3 + $0x78] sm:$0xff] %vm312_vm8, %v3867_v49 }
 0x28c   : > { %v4341_v51 = vld [vmem:[#allocation3 + $0x68] sm:$0xff] }
 0x28d   : > { %v3435_v48 = vpop.f32.mrf.mxu1  ;;  %4277 = vst.msk [vmem:[#allocation3 + $0x70] sm:$0xff] %vm312_vm8, %v4245_v16  ;;  %v4623_v33 = vadd.f32 %v4562_v5, %v4341_v51  ;;  %v3213_v16 = vld [vmem:[#allocation3 + $0xb0] sm:$0xff] }
 0x28e   : > { %v3490_v3 = vadd.f32 %v3435_v48, %v3208_v39  ;;  %v4689_v31 = vld [vmem:[#allocation3 + $0x60] sm:$0xff] }
 0x28f   : > { %v4565_v40 = vpop.f32.mrf.mxu0  ;;  %v3586_v11 = vld [vmem:[#allocation3 + $0x80] sm:$0xff]  ;;  %v4721_v21 = vpack.c.bf16 %v4689_v31, %v4689_v31  ;;  %4655 = vst.msk [vmem:[#allocation3 + $0x68] sm:$0xff] %vm312_vm8, %v4623_v33 }
 0x290   : > { %3522 = vst.msk [vmem:[#allocation3 + $0x88] sm:$0xff] %vm312_vm8, %v3490_v3  ;;  %v3812_v15 = vpop.f32.mrf.mxu2 }
 0x291   : > { %4753 = vst.msk [vmem:[%s7521_s26 + $0x30] sm:$0xf] %vm513_vm5, %v4721_v21  ;;  %v3868_v42 = vadd.f32 %v3812_v15, %v3586_v11 }
 0x292   : > { %v4188_v28 = vpop.f32.mrf.mxu3  ;;  %5783 = vmatmul.msk.bf16.gmra.mxu0 %vm312_vm8, %v5963_v13  ;;  %v3964_v59 = vld [vmem:[#allocation3 + $0x78] sm:$0xff] }
 0x293   : > { %v4246_v9 = vadd.f32 %v4188_v28, %v3964_v59  ;;  %3900 = vst.msk [vmem:[#allocation3 + $0x80] sm:$0xff] %vm312_vm8, %v3868_v42 }
 0x294   : > { %v4342_v30 = vld [vmem:[#allocation3 + $0x70] sm:$0xff] }
 0x295   : > { %v3438_v4 = vpop.f32.mrf.mxu1  ;;  %4278 = vst.msk [vmem:[#allocation3 + $0x78] sm:$0xff] %vm312_vm8, %v4246_v9  ;;  %v4624_v41 = vadd.f32 %v4565_v40, %v4342_v30  ;;  %v3214_v9 = vld [vmem:[#allocation3 + $0xb8] sm:$0xff] }
 0x296   : > { %v3491_v22 = vadd.f32 %v3438_v4, %v3209_v45  ;;  %v4690_v43 = vld [vmem:[#allocation3 + $0x68] sm:$0xff] }
 0x297   : > { %v4567_v0 = vpop.f32.mrf.mxu0  ;;  %v3587_v57 = vld [vmem:[#allocation3 + $0x88] sm:$0xff]  ;;  %v4722_v58 = vpack.c.bf16 %v4690_v43, %v4690_v43  ;;  %4656 = vst.msk [vmem:[#allocation3 + $0x70] sm:$0xff] %vm312_vm8, %v4624_v41 }
 0x298   : > { %3523 = vst.msk [vmem:[#allocation3 + $0x90] sm:$0xff] %vm312_vm8, %v3491_v22  ;;  %v3814_v27 = vpop.f32.mrf.mxu2 }
 0x299   : > { %4754 = vst.msk [vmem:[%s7521_s26 + $0x34] sm:$0xf] %vm513_vm5, %v4722_v58  ;;  %v3869_v44 = vadd.f32 %v3814_v27, %v3587_v57 }
 0x29a   : > { %v4191_v53 = vpop.f32.mrf.mxu3  ;;  %v3965_v8 = vld [vmem:[#allocation3 + $0x80] sm:$0xff] }
 0x29b   : > { %v4247_v34 = vadd.f32 %v4191_v53, %v3965_v8  ;;  %3901 = vst.msk [vmem:[#allocation3 + $0x88] sm:$0xff] %vm312_vm8, %v3869_v44 }
 0x29c   : > { %v4343_v54 = vld [vmem:[#allocation3 + $0x78] sm:$0xff] }
 0x29d   : > { %v3440_v50 = vpop.f32.mrf.mxu1  ;;  %4279 = vst.msk [vmem:[#allocation3 + $0x80] sm:$0xff] %vm312_vm8, %v4247_v34  ;;  %v4625_v26 = vadd.f32 %v4567_v0, %v4343_v54  ;;  %v3215_v34 = vld [vmem:[#allocation3 + $0xc0] sm:$0xff] }
 0x29e   : > { %v3492_v56 = vadd.f32 %v3440_v50, %v3210_v6  ;;  %v4691_v2 = vld [vmem:[#allocation3 + $0x70] sm:$0xff] }
 0x29f   : > { %v4570_v47 = vpop.f32.mrf.mxu0  ;;  %v3588_v35 = vld [vmem:[#allocation3 + $0x90] sm:$0xff]  ;;  %v4723_v25 = vpack.c.bf16 %v4691_v2, %v4691_v2  ;;  %4657 = vst.msk [vmem:[#allocation3 + $0x78] sm:$0xff] %vm312_vm8, %v4625_v26 }
 0x2a0   : > { %3524 = vst.msk [vmem:[#allocation3 + $0x98] sm:$0xff] %vm312_vm8, %v3492_v56  ;;  %v3817_v46 = vpop.f32.mrf.mxu2 }
 0x2a1   : > { %4755 = vst.msk [vmem:[%s7521_s26 + $0x38] sm:$0xf] %vm513_vm5, %v4723_v25  ;;  %v3870_v12 = vadd.f32 %v3817_v46, %v3588_v35 }
 0x2a2   : > { %v4193_v17 = vpop.f32.mrf.mxu3  ;;  %v3966_v29 = vld [vmem:[#allocation3 + $0x88] sm:$0xff] }
 0x2a3   : > { %v4248_v36 = vadd.f32 %v4193_v17, %v3966_v29  ;;  %3902 = vst.msk [vmem:[#allocation3 + $0x90] sm:$0xff] %vm312_vm8, %v3870_v12 }
 0x2a4   : > { %v4344_v1 = vld [vmem:[#allocation3 + $0x80] sm:$0xff] }
 0x2a5   : > { %v3443_v18 = vpop.f32.mrf.mxu1  ;;  %4280 = vst.msk [vmem:[#allocation3 + $0x88] sm:$0xff] %vm312_vm8, %v4248_v36  ;;  %v4626_v7 = vadd.f32 %v4570_v47, %v4344_v1  ;;  %v3216_v36 = vld [vmem:[#allocation3 + $0xc8] sm:$0xff] }
 0x2a6   : > { %v3493_v60 = vadd.f32 %v3443_v18, %v3211_v52  ;;  %v4692_v38 = vld [vmem:[#allocation3 + $0x78] sm:$0xff] }
 0x2a7   : > { %v4572_v55 = vpop.f32.mrf.mxu0  ;;  %v3589_v37 = vld [vmem:[#allocation3 + $0x98] sm:$0xff]  ;;  %v4724_v5 = vpack.c.bf16 %v4692_v38, %v4692_v38  ;;  %4658 = vst.msk [vmem:[#allocation3 + $0x80] sm:$0xff] %vm312_vm8, %v4626_v7 }
 0x2a8   : > { %3525 = vst.msk [vmem:[#allocation3 + $0xa0] sm:$0xff] %vm312_vm8, %v3493_v60  ;;  %v3819_v32 = vpop.f32.mrf.mxu2 }
 0x2a9   : > { %4756 = vst.msk [vmem:[%s7521_s26 + $0x3c] sm:$0xf] %vm513_vm5, %v4724_v5  ;;  %v3871_v62 = vadd.f32 %v3819_v32, %v3589_v37 }
 0x2aa   : > { %v4196_v14 = vpop.f32.mrf.mxu3  ;;  %v3967_v23 = vld [vmem:[#allocation3 + $0x90] sm:$0xff] }
 0x2ab   : > { %v4249_v10 = vadd.f32 %v4196_v14, %v3967_v23  ;;  %3903 = vst.msk [vmem:[#allocation3 + $0x98] sm:$0xff] %vm312_vm8, %v3871_v62 }
 0x2ac   : > { %v4345_v39 = vld [vmem:[#allocation3 + $0x88] sm:$0xff] }
 0x2ad   : > { %v3445_v24 = vpop.f32.mrf.mxu1  ;;  %4281 = vst.msk [vmem:[#allocation3 + $0x90] sm:$0xff] %vm312_vm8, %v4249_v10  ;;  %v4627_v48 = vadd.f32 %v4572_v55, %v4345_v39  ;;  %v3217_v10 = vld [vmem:[#allocation3 + $0xd0] sm:$0xff] }
 0x2ae   : > { %v3494_v63 = vadd.f32 %v3445_v24, %v3212_v61  ;;  %v4693_v3 = vld [vmem:[#allocation3 + $0x80] sm:$0xff] }
 0x2af   : > { %v4575_v20 = vpop.f32.mrf.mxu0  ;;  %v3590_v13 = vld [vmem:[#allocation3 + $0xa0] sm:$0xff]  ;;  %v4725_v19 = vpack.c.bf16 %v4693_v3, %v4693_v3  ;;  %4659 = vst.msk [vmem:[#allocation3 + $0x88] sm:$0xff] %vm312_vm8, %v4627_v48 }
 0x2b0   : > { %3526 = vst.msk [vmem:[#allocation3 + $0xa8] sm:$0xff] %vm312_vm8, %v3494_v63  ;;  %v3822_v40 = vpop.f32.mrf.mxu2 }
 0x2b1   : > { %4757 = vst.msk [vmem:[%s7521_s26 + $0x40] sm:$0xf] %vm513_vm5, %v4725_v19  ;;  %v3872_v33 = vadd.f32 %v3822_v40, %v3590_v13 }
 0x2b2   : > { %v4198_v49 = vpop.f32.mrf.mxu3  ;;  %v3968_v31 = vld [vmem:[#allocation3 + $0x98] sm:$0xff] }
 0x2b3   : > { %v4250_v21 = vadd.f32 %v4198_v49, %v3968_v31  ;;  %3904 = vst.msk [vmem:[#allocation3 + $0xa0] sm:$0xff] %vm312_vm8, %v3872_v33 }
 0x2b4   : > { %v4346_v15 = vld [vmem:[#allocation3 + $0x90] sm:$0xff] }
 0x2b5   : > { %v3448_v51 = vpop.f32.mrf.mxu1  ;;  %4282 = vst.msk [vmem:[#allocation3 + $0x98] sm:$0xff] %vm312_vm8, %v4250_v21  ;;  %v4628_v45 = vadd.f32 %v4575_v20, %v4346_v15  ;;  %v3218_v21 = vld [vmem:[#allocation3 + $0xd8] sm:$0xff] }
 0x2b6   : > { %v3495_v28 = vadd.f32 %v3448_v51, %v3213_v16  ;;  %v4694_v42 = vld [vmem:[#allocation3 + $0x88] sm:$0xff] }
 0x2b7   : > { %v4577_v11 = vpop.f32.mrf.mxu0  ;;  %v3591_v22 = vld [vmem:[#allocation3 + $0xa8] sm:$0xff]  ;;  %v4726_v59 = vpack.c.bf16 %v4694_v42, %v4694_v42  ;;  %4660 = vst.msk [vmem:[#allocation3 + $0x90] sm:$0xff] %vm312_vm8, %v4628_v45 }
 0x2b8   : > { %3527 = vst.msk [vmem:[#allocation3 + $0xb0] sm:$0xff] %vm312_vm8, %v3495_v28  ;;  %v3824_v0 = vpop.f32.mrf.mxu2 }
 0x2b9   : > { %4758 = vst.msk [vmem:[%s7521_s26 + $0x44] sm:$0xf] %vm513_vm5, %v4726_v59  ;;  %v3873_v41 = vadd.f32 %v3824_v0, %v3591_v22 }
 0x2ba   : > { %v4201_v4 = vpop.f32.mrf.mxu3  ;;  %v3969_v43 = vld [vmem:[#allocation3 + $0xa0] sm:$0xff] }
 0x2bb   : > { %v4251_v58 = vadd.f32 %v4201_v4, %v3969_v43  ;;  %3905 = vst.msk [vmem:[#allocation3 + $0xa8] sm:$0xff] %vm312_vm8, %v3873_v41 }
 0x2bc   : > { %v4347_v27 = vld [vmem:[#allocation3 + $0x98] sm:$0xff] }
 0x2bd   : > { %v3450_v30 = vpop.f32.mrf.mxu1  ;;  %4283 = vst.msk [vmem:[#allocation3 + $0xa0] sm:$0xff] %vm312_vm8, %v4251_v58  ;;  %v4629_v6 = vadd.f32 %v4577_v11, %v4347_v27  ;;  %v3219_v58 = vld [vmem:[#allocation3 + $0xe0] sm:$0xff] }
 0x2be   : > { %v3496_v53 = vadd.f32 %v3450_v30, %v3214_v9  ;;  %v4695_v44 = vld [vmem:[#allocation3 + $0x90] sm:$0xff] }
 0x2bf   : > { %v4580_v57 = vpop.f32.mrf.mxu0  ;;  %v3592_v56 = vld [vmem:[#allocation3 + $0xb0] sm:$0xff]  ;;  %v4727_v8 = vpack.c.bf16 %v4695_v44, %v4695_v44  ;;  %4661 = vst.msk [vmem:[#allocation3 + $0x98] sm:$0xff] %vm312_vm8, %v4629_v6 }
 0x2c0   : > { %3528 = vst.msk [vmem:[#allocation3 + $0xb8] sm:$0xff] %vm312_vm8, %v3496_v53  ;;  %v3827_v47 = vpop.f32.mrf.mxu2 }
 0x2c1   : > { %4759 = vst.msk [vmem:[%s7521_s26 + $0x48] sm:$0xf] %vm513_vm5, %v4727_v8  ;;  %v3874_v26 = vadd.f32 %v3827_v47, %v3592_v56 }
 0x2c2   : > { %v4203_v50 = vpop.f32.mrf.mxu3  ;;  %v3970_v2 = vld [vmem:[#allocation3 + $0xa8] sm:$0xff] }
 0x2c3   : > { %v4252_v25 = vadd.f32 %v4203_v50, %v3970_v2  ;;  %3906 = vst.msk [vmem:[#allocation3 + $0xb0] sm:$0xff] %vm312_vm8, %v3874_v26 }
 0x2c4   : > { %v4348_v46 = vld [vmem:[#allocation3 + $0xa0] sm:$0xff] }
 0x2c5   : > { %v3453_v54 = vpop.f32.mrf.mxu1  ;;  %4284 = vst.msk [vmem:[#allocation3 + $0xa8] sm:$0xff] %vm312_vm8, %v4252_v25  ;;  %v4630_v52 = vadd.f32 %v4580_v57, %v4348_v46  ;;  %v3220_v25 = vld [vmem:[#allocation3 + $0xe8] sm:$0xff] }
 0x2c6   : > { %v3497_v17 = vadd.f32 %v3453_v54, %v3215_v34  ;;  %v4696_v12 = vld [vmem:[#allocation3 + $0x98] sm:$0xff] }
 0x2c7   : > { %v4582_v35 = vpop.f32.mrf.mxu0  ;;  %v3593_v60 = vld [vmem:[#allocation3 + $0xb8] sm:$0xff]  ;;  %v4728_v29 = vpack.c.bf16 %v4696_v12, %v4696_v12  ;;  %4662 = vst.msk [vmem:[#allocation3 + $0xa0] sm:$0xff] %vm312_vm8, %v4630_v52 }
 0x2c8   : > { %3529 = vst.msk [vmem:[#allocation3 + $0xc0] sm:$0xff] %vm312_vm8, %v3497_v17  ;;  %v3829_v55 = vpop.f32.mrf.mxu2 }
 0x2c9   : > { %4760 = vst.msk [vmem:[%s7521_s26 + $0x4c] sm:$0xf] %vm513_vm5, %v4728_v29  ;;  %v3875_v7 = vadd.f32 %v3829_v55, %v3593_v60 }
 0x2ca   : > { %v4206_v18 = vpop.f32.mrf.mxu3  ;;  %v3971_v38 = vld [vmem:[#allocation3 + $0xb0] sm:$0xff] }
 0x2cb   : > { %v4253_v5 = vadd.f32 %v4206_v18, %v3971_v38  ;;  %3907 = vst.msk [vmem:[#allocation3 + $0xb8] sm:$0xff] %vm312_vm8, %v3875_v7 }
 0x2cc   : > { %v4349_v32 = vld [vmem:[#allocation3 + $0xa8] sm:$0xff] }
 0x2cd   : > { %v3455_v1 = vpop.f32.mrf.mxu1  ;;  %4285 = vst.msk [vmem:[#allocation3 + $0xb0] sm:$0xff] %vm312_vm8, %v4253_v5  ;;  %v4631_v61 = vadd.f32 %v4582_v35, %v4349_v32  ;;  %v3221_v5 = vld [vmem:[#allocation3 + $0xf0] sm:$0xff] }
 0x2ce   : > { %v3498_v14 = vadd.f32 %v3455_v1, %v3216_v36  ;;  %v4697_v62 = vld [vmem:[#allocation3 + $0xa0] sm:$0xff] }
 0x2cf   : > { %v4585_v37 = vpop.f32.mrf.mxu0  ;;  %v3594_v63 = vld [vmem:[#allocation3 + $0xc0] sm:$0xff]  ;;  %v4729_v23 = vpack.c.bf16 %v4697_v62, %v4697_v62  ;;  %4663 = vst.msk [vmem:[#allocation3 + $0xa8] sm:$0xff] %vm312_vm8, %v4631_v61 }
 0x2d0   : > { %3530 = vst.msk [vmem:[#allocation3 + $0xc8] sm:$0xff] %vm312_vm8, %v3498_v14  ;;  %v3832_v20 = vpop.f32.mrf.mxu2 }
 0x2d1   : > { %4761 = vst.msk [vmem:[%s7521_s26 + $0x50] sm:$0xf] %vm513_vm5, %v4729_v23  ;;  %v3876_v48 = vadd.f32 %v3832_v20, %v3594_v63 }
 0x2d2   : > { %v4208_v24 = vpop.f32.mrf.mxu3  ;;  %v3972_v3 = vld [vmem:[#allocation3 + $0xb8] sm:$0xff] }
 0x2d3   : > { %v4254_v19 = vadd.f32 %v4208_v24, %v3972_v3  ;;  %3908 = vst.msk [vmem:[#allocation3 + $0xc0] sm:$0xff] %vm312_vm8, %v3876_v48 }
 0x2d4   : > { %v4350_v40 = vld [vmem:[#allocation3 + $0xb0] sm:$0xff] }
 0x2d5   : > { %v3458_v39 = vpop.f32.mrf.mxu1  ;;  %4286 = vst.msk [vmem:[#allocation3 + $0xb8] sm:$0xff] %vm312_vm8, %v4254_v19  ;;  %v4632_v16 = vadd.f32 %v4585_v37, %v4350_v40  ;;  %v3222_v19 = vld [vmem:[#allocation3 + $0xf8] sm:$0xff] }
 0x2d6   : > { %v3499_v49 = vadd.f32 %v3458_v39, %v3217_v10  ;;  %v4698_v33 = vld [vmem:[#allocation3 + $0xa8] sm:$0xff] }
 0x2d7   : > { %v4587_v13 = vpop.f32.mrf.mxu0  ;;  %v3595_v28 = vld [vmem:[#allocation3 + $0xc8] sm:$0xff]  ;;  %v4730_v31 = vpack.c.bf16 %v4698_v33, %v4698_v33  ;;  %4664 = vst.msk [vmem:[#allocation3 + $0xb0] sm:$0xff] %vm312_vm8, %v4632_v16 }
 0x2d8   : > { %3531 = vst.msk [vmem:[#allocation3 + $0xd0] sm:$0xff] %vm312_vm8, %v3499_v49  ;;  %v3834_v11 = vpop.f32.mrf.mxu2 }
 0x2d9   : > { %4762 = vst.msk [vmem:[%s7521_s26 + $0x54] sm:$0xf] %vm513_vm5, %v4730_v31  ;;  %v3877_v45 = vadd.f32 %v3834_v11, %v3595_v28 }
 0x2da   : > { %v4211_v51 = vpop.f32.mrf.mxu3  ;;  %v3973_v42 = vld [vmem:[#allocation3 + $0xc0] sm:$0xff] }
 0x2db   : > { %v4255_v59 = vadd.f32 %v4211_v51, %v3973_v42  ;;  %3909 = vst.msk [vmem:[#allocation3 + $0xc8] sm:$0xff] %vm312_vm8, %v3877_v45 }
 0x2dc   : > { %v4351_v0 = vld [vmem:[#allocation3 + $0xb8] sm:$0xff] }
 0x2dd   : > { %v3460_v15 = vpop.f32.mrf.mxu1  ;;  %4287 = vst.msk [vmem:[#allocation3 + $0xc0] sm:$0xff] %vm312_vm8, %v4255_v59  ;;  %v4633_v9 = vadd.f32 %v4587_v13, %v4351_v0 }
 0x2de   : > { %v3500_v4 = vadd.f32 %v3460_v15, %v3218_v21  ;;  %v4699_v41 = vld [vmem:[#allocation3 + $0xb0] sm:$0xff] }
 0x2df   : > { %v4590_v22 = vpop.f32.mrf.mxu0  ;;  %v3596_v53 = vld [vmem:[#allocation3 + $0xd0] sm:$0xff]  ;;  %v4731_v43 = vpack.c.bf16 %v4699_v41, %v4699_v41  ;;  %4665 = vst.msk [vmem:[#allocation3 + $0xb8] sm:$0xff] %vm312_vm8, %v4633_v9 }
 0x2e0   : > { %3532 = vst.msk [vmem:[#allocation3 + $0xd8] sm:$0xff] %vm312_vm8, %v3500_v4  ;;  %v3837_v57 = vpop.f32.mrf.mxu2 }
 0x2e1   : > { %4763 = vst.msk [vmem:[%s7521_s26 + $0x58] sm:$0xf] %vm513_vm5, %v4731_v43  ;;  %v3878_v6 = vadd.f32 %v3837_v57, %v3596_v53 }
 0x2e2   : > { %v4213_v30 = vpop.f32.mrf.mxu3  ;;  %v3974_v44 = vld [vmem:[#allocation3 + $0xc8] sm:$0xff] }
 0x2e3   : > { %v4256_v8 = vadd.f32 %v4213_v30, %v3974_v44  ;;  %3910 = vst.msk [vmem:[#allocation3 + $0xd0] sm:$0xff] %vm312_vm8, %v3878_v6 }
 0x2e4   : > { %v4352_v47 = vld [vmem:[#allocation3 + $0xc0] sm:$0xff] }
 0x2e5   : > { %v3463_v27 = vpop.f32.mrf.mxu1  ;;  %4288 = vst.msk [vmem:[#allocation3 + $0xc8] sm:$0xff] %vm312_vm8, %v4256_v8  ;;  %v4634_v34 = vadd.f32 %v4590_v22, %v4352_v47 }
 0x2e6   : > { %v3501_v50 = vadd.f32 %v3463_v27, %v3219_v58  ;;  %v4700_v26 = vld [vmem:[#allocation3 + $0xb8] sm:$0xff] }
 0x2e7   : > { %v4592_v56 = vpop.f32.mrf.mxu0  ;;  %v3597_v17 = vld [vmem:[#allocation3 + $0xd8] sm:$0xff]  ;;  %v4732_v2 = vpack.c.bf16 %v4700_v26, %v4700_v26  ;;  %4666 = vst.msk [vmem:[#allocation3 + $0xc0] sm:$0xff] %vm312_vm8, %v4634_v34 }
 0x2e8   : > { %3533 = vst.msk [vmem:[#allocation3 + $0xe0] sm:$0xff] %vm312_vm8, %v3501_v50  ;;  %v3839_v35 = vpop.f32.mrf.mxu2 }
 0x2e9   : > { %4764 = vst.msk [vmem:[%s7521_s26 + $0x5c] sm:$0xf] %vm513_vm5, %v4732_v2  ;;  %v3879_v52 = vadd.f32 %v3839_v35, %v3597_v17 }
 0x2ea   : > { %v4216_v54 = vpop.f32.mrf.mxu3  ;;  %v3975_v12 = vld [vmem:[#allocation3 + $0xd0] sm:$0xff] }
 0x2eb   : > { %v4257_v29 = vadd.f32 %v4216_v54, %v3975_v12  ;;  %3911 = vst.msk [vmem:[#allocation3 + $0xd8] sm:$0xff] %vm312_vm8, %v3879_v52 }
 0x2ec   : > { %v4353_v55 = vld [vmem:[#allocation3 + $0xc8] sm:$0xff] }
 0x2ed   : > { %v3465_v46 = vpop.f32.mrf.mxu1  ;;  %4289 = vst.msk [vmem:[#allocation3 + $0xd0] sm:$0xff] %vm312_vm8, %v4257_v29  ;;  %v4635_v36 = vadd.f32 %v4592_v56, %v4353_v55 }
 0x2ee   : > { %v3502_v18 = vadd.f32 %v3465_v46, %v3220_v25  ;;  %v4701_v7 = vld [vmem:[#allocation3 + $0xc0] sm:$0xff] }
 0x2ef   : > { %v4595_v60 = vpop.f32.mrf.mxu0  ;;  %v3598_v14 = vld [vmem:[#allocation3 + $0xe0] sm:$0xff]  ;;  %v4733_v38 = vpack.c.bf16 %v4701_v7, %v4701_v7  ;;  %4667 = vst.msk [vmem:[#allocation3 + $0xc8] sm:$0xff] %vm312_vm8, %v4635_v36 }
 0x2f0   : > { %3534 = vst.msk [vmem:[#allocation3 + $0xe8] sm:$0xff] %vm312_vm8, %v3502_v18  ;;  %v3842_v37 = vpop.f32.mrf.mxu2 }
 0x2f1   : > { %4765 = vst.msk [vmem:[%s7521_s26 + $0x60] sm:$0xf] %vm513_vm5, %v4733_v38  ;;  %v3880_v61 = vadd.f32 %v3842_v37, %v3598_v14 }
 0x2f2   : > { %v4218_v1 = vpop.f32.mrf.mxu3  ;;  %v3976_v62 = vld [vmem:[#allocation3 + $0xd8] sm:$0xff] }
 0x2f3   : > { %v4258_v63 = vadd.f32 %v4218_v1, %v3976_v62  ;;  %3912 = vst.msk [vmem:[#allocation3 + $0xe0] sm:$0xff] %vm312_vm8, %v3880_v61 }
 0x2f4   : > { %v4354_v20 = vld [vmem:[#allocation3 + $0xd0] sm:$0xff] }
 0x2f5   : > { %v3468_v32 = vpop.f32.mrf.mxu1  ;;  %4290 = vst.msk [vmem:[#allocation3 + $0xd8] sm:$0xff] %vm312_vm8, %v4258_v63  ;;  %v4636_v10 = vadd.f32 %v4595_v60, %v4354_v20 }
 0x2f6   : > { %v3503_v24 = vadd.f32 %v3468_v32, %v3221_v5  ;;  %v4702_v48 = vld [vmem:[#allocation3 + $0xc8] sm:$0xff] }
 0x2f7   : > { %v4597_v23 = vpop.f32.mrf.mxu0  ;;  %v3599_v49 = vld [vmem:[#allocation3 + $0xe8] sm:$0xff]  ;;  %v4734_v3 = vpack.c.bf16 %v4702_v48, %v4702_v48  ;;  %4668 = vst.msk [vmem:[#allocation3 + $0xd0] sm:$0xff] %vm312_vm8, %v4636_v10 }
 0x2f8   : > { %3535 = vst.msk [vmem:[#allocation3 + $0xf0] sm:$0xff] %vm312_vm8, %v3503_v24  ;;  %v3844_v13 = vpop.f32.mrf.mxu2 }
 0x2f9   : > { %4766 = vst.msk [vmem:[%s7521_s26 + $0x64] sm:$0xf] %vm513_vm5, %v4734_v3  ;;  %v3881_v16 = vadd.f32 %v3844_v13, %v3599_v49 }
 0x2fa   : > { %v4221_v39 = vpop.f32.mrf.mxu3  ;;  %v3977_v33 = vld [vmem:[#allocation3 + $0xe0] sm:$0xff] }
 0x2fb   : > { %v4259_v28 = vadd.f32 %v4221_v39, %v3977_v33  ;;  %3913 = vst.msk [vmem:[#allocation3 + $0xe8] sm:$0xff] %vm312_vm8, %v3881_v16 }
 0x2fc   : > { %v4355_v31 = vld [vmem:[#allocation3 + $0xd8] sm:$0xff] }
 0x2fd   : > { %v3470_v40 = vpop.f32.mrf.mxu1  ;;  %4291 = vst.msk [vmem:[#allocation3 + $0xe0] sm:$0xff] %vm312_vm8, %v4259_v28  ;;  %v4637_v11 = vadd.f32 %v4597_v23, %v4355_v31 }
 0x2fe   : > { %v3504_v51 = vadd.f32 %v3470_v40, %v3222_v19  ;;  %v4703_v15 = vld [vmem:[#allocation3 + $0xd0] sm:$0xff] }
 0x2ff   : > { %v4600_v21 = vpop.f32.mrf.mxu0  ;;  %v3600_v4 = vld [vmem:[#allocation3 + $0xf0] sm:$0xff]  ;;  %v4735_v42 = vpack.c.bf16 %v4703_v15, %v4703_v15  ;;  %4669 = vst.msk [vmem:[#allocation3 + $0xd8] sm:$0xff] %vm312_vm8, %v4637_v11 }
 0x300   : > { %3536 = vst.msk [vmem:[#allocation3 + $0xf8] sm:$0xff] %vm312_vm8, %v3504_v51  ;;  %v3847_v22 = vpop.f32.mrf.mxu2 }
 0x301   : > { %4767 = vst.msk [vmem:[%s7521_s26 + $0x68] sm:$0xf] %vm513_vm5, %v4735_v42  ;;  %v3882_v59 = vadd.f32 %v3847_v22, %v3600_v4 }
 0x302   : > { %v4223_v45 = vpop.f32.mrf.mxu3  ;;  %v3978_v0 = vld [vmem:[#allocation3 + $0xe8] sm:$0xff] }
 0x303   : > { %v4260_v9 = vadd.f32 %v4223_v45, %v3978_v0  ;;  %3914 = vst.msk [vmem:[#allocation3 + $0xf0] sm:$0xff] %vm312_vm8, %v3882_v59 }
 0x304   : > { %v4356_v30 = vld [vmem:[#allocation3 + $0xe0] sm:$0xff] }
 0x305   : > { %4292 = vst.msk [vmem:[#allocation3 + $0xe8] sm:$0xff] %vm312_vm8, %v4260_v9  ;;  %v4638_v41 = vadd.f32 %v4600_v21, %v4356_v30 }
 0x306   : > { %v4704_v53 = vld [vmem:[#allocation3 + $0xd8] sm:$0xff] }
 0x307   : > { %v3601_v43 = vld [vmem:[#allocation3 + $0xf8] sm:$0xff]  ;;  %v4736_v57 = vpack.c.bf16 %v4704_v53, %v4704_v53  ;;  %4670 = vst.msk [vmem:[#allocation3 + $0xe0] sm:$0xff] %vm312_vm8, %v4638_v41  ;;  %v4602_v58 = vpop.f32.mrf.mxu0 }
 0x308   : > { %v3849_v6 = vpop.f32.mrf.mxu2 }
 0x309   : > { %4768 = vst.msk [vmem:[%s7521_s26 + $0x6c] sm:$0xf] %vm513_vm5, %v4736_v57  ;;  %v3883_v50 = vadd.f32 %v3849_v6, %v3601_v43 }
 0x30a   : > { %v4226_v27 = vpop.f32.mrf.mxu3  ;;  %v3979_v44 = vld [vmem:[#allocation3 + $0xf0] sm:$0xff] }
 0x30b   : > { %v4261_v56 = vadd.f32 %v4226_v27, %v3979_v44  ;;  %3915 = vst.msk [vmem:[#allocation3 + $0xf8] sm:$0xff] %vm312_vm8, %v3883_v50 }
 0x30c   : > { %v4357_v8 = vld [vmem:[#allocation3 + $0xe8] sm:$0xff] }
 0x30d   : > { %4293 = vst.msk [vmem:[#allocation3 + $0xf0] sm:$0xff] %vm312_vm8, %v4261_v56  ;;  %v4639_v47 = vadd.f32 %v4602_v58, %v4357_v8 }
 0x30e   : > { %v4705_v34 = vld [vmem:[#allocation3 + $0xe0] sm:$0xff] }
 0x30f   : > { %v4737_v54 = vpack.c.bf16 %v4705_v34, %v4705_v34  ;;  %4671 = vst.msk [vmem:[#allocation3 + $0xe8] sm:$0xff] %vm312_vm8, %v4639_v47  ;;  %v4605_v2 = vpop.f32.mrf.mxu0 }
 0x311   : > { %4769 = vst.msk [vmem:[%s7521_s26 + $0x70] sm:$0xf] %vm513_vm5, %v4737_v54 }
 0x312   : > { %v3980_v26 = vld [vmem:[#allocation3 + $0xf8] sm:$0xff]  ;;  %v4228_v17 = vpop.f32.mrf.mxu3 }
 0x313   : > { %v4262_v35 = vadd.f32 %v4228_v17, %v3980_v26 }
 0x314   : > { %v4358_v25 = vld [vmem:[#allocation3 + $0xf0] sm:$0xff] }
 0x315   : > { %4294 = vst.msk [vmem:[#allocation3 + $0xf8] sm:$0xff] %vm312_vm8, %v4262_v35  ;;  %v4640_v46 = vadd.f32 %v4605_v2, %v4358_v25 }
 0x316   : > { %v4706_v52 = vld [vmem:[#allocation3 + $0xe8] sm:$0xff] }
 0x317   : > { %v4738_v18 = vpack.c.bf16 %v4706_v52, %v4706_v52  ;;  %4672 = vst.msk [vmem:[#allocation3 + $0xf0] sm:$0xff] %vm312_vm8, %v4640_v46  ;;  %v4607_v60 = vpop.f32.mrf.mxu0 }
 0x319   : > { %4770 = vst.msk [vmem:[%s7521_s26 + $0x74] sm:$0xf] %vm513_vm5, %v4738_v18 }
 0x31c   : > { %v4359_v12 = vld [vmem:[#allocation3 + $0xf8] sm:$0xff] }
 0x31d   : > { %v4641_v29 = vadd.f32 %v4607_v60, %v4359_v12 }
 0x31e   : > { %v4707_v55 = vld [vmem:[#allocation3 + $0xf0] sm:$0xff] }
 0x31f   : > { %v4739_v36 = vpack.c.bf16 %v4707_v55, %v4707_v55  ;;  %4673 = vst.msk [vmem:[#allocation3 + $0xf8] sm:$0xff] %vm312_vm8, %v4641_v29 }
 0x321   : > { %4771 = vst.msk [vmem:[%s7521_s26 + $0x78] sm:$0xf] %vm513_vm5, %v4739_v36 }
 0x326   : > { %v4708_v1 = vld [vmem:[#allocation3 + $0xf8] sm:$0xff] }
 0x327   : > { %v4740_v7 = vpack.c.bf16 %v4708_v1, %v4708_v1 }
 0x329   : > { %4772 = vst.msk [vmem:[%s7521_s26 + $0x7c] sm:$0xf] %vm513_vm5, %v4740_v7 }
 0x32a PF: > { %s18_s20 = sadd.s32 1, %s6170_s20   ;;  %s7865_s15 = smov %s6154_s16 }
 0x32b   : > { %p15_p2 = scmp.ge.s32.totalorder %s18_s20, 4   ;;  %s7866_s16 = smov %s6158_s17 }
 0x32c   : > { %s7867_s17 = smov %s6274_s13  ;;  %s7868_s18 = smov %s6166_s19 }
 0x32d   : > { %s7869_s19 = smov %s7871_s6  ;;  %17 = sbr.rel (!%p15_p2) target bundleno = 5 (0x5), region = 114 }
 0x332   :  { %4800 = vsyncpa [#allocation5], 1 }
 0x333   :  { %4802 = vsyncpa [#allocation5 + $0x1], 1 }
 0x334   :  { %4803 = vsyncpa [#allocation7], 1 }

// kernel: preact_basic_block_forward.7
= control target key start
LH: loop header
LB: loop body
LE: loop exit
PB: predicated region body
PF: predicated region fallthrough
CT: control target
= control target key end

     0   :  { %s8075_s0 = inlined_call_operand.vmem [shape: bf16[2,16,16,64], index: 0, kind: input, shape index: {}]   ;;  %s8076_s1 = inlined_call_operand.vmem [shape: f32[1,64], index: 1, kind: input, shape index: {}]   ;;  %s8077_s2 = inlined_call_operand.vmem [shape: f32[1,64], index: 2, kind: input, shape index: {}]   ;;  %s8078_s3 = inlined_call_operand.hbm [shape: bf16[9,64,64], index: 3, kind: input, shape index: {}]   ;;  %s8079_s4 = inlined_call_operand.hbm [shape: f32[2,256,64], index: 4, kind: input, shape index: {}]   ;;  %s8080_s5 = inlined_call_operand.hbm [shape: f32[2,256,64], index: 5, kind: output, shape index: {}]  }
   0x1   :  { %8126 = sst [smem:[#allocation15_spill]] %s8078_s3 }
   0x2   :  { %10 = vsyncpa [#allocation5], 0 }
   0x3   :  { %11 = vsyncpa [#allocation8], 0 }
   0x4   :  { %13 = vsyncpa [#allocation8 + $0x1], 0 }
   0x5   :  { %14 = vsyncpa [#allocation6], 0 }
   0x6   :  { %16 = vsyncpa [#allocation6 + $0x1], 0  ;;  %s6481_s18 = smov 0   ;;  %s6483_s19 = smov 0  }
   0x7   :  { %s6485_s20 = smov 0   ;;  %s6487_s21 = smov 0  }
   0x8   :  { %s6489_s22 = smov 0   ;;  %s6491_s23 = smov 0  }
   0x9 LB: > { %8127 = sst [smem:[#allocation13_spill]] %s6440_s23  ;;  %s5050_s24 = sadd.s32 4294967295, %s6440_s23   ;;  %s6440_s23 = sphi %s6491_s23, %s22_s23   ;;  %s6436_s22 = sphi %s6489_s22, %s8197_s22   ;;  %s6432_s21 = sphi %s6487_s21, %s8196_s21   ;;  %s6428_s20 = sphi %s6485_s20, %s8195_s20   ;;  %s6424_s19 = sphi %s6483_s19, %s8194_s19   ;;  %s6420_s18 = sphi %s6481_s18, %s8193_s18  }
   0xa   : > { %s5051_s25 = sadd.s32 4294967294, %s6440_s23   ;;  %p171_p0 = scmp.ne.s32.totalorder %s6424_s19, %s6420_s18 }
   0xb   : > { %p6515_p1 = scmp.eq.s32.totalorder %s5050_s24, 0  ;;  %p6519_p2 = scmp.eq.s32.totalorder %s5050_s24, 1 }
   0xc   : > { %p203_p3 = scmp.eq.s32.totalorder %s5051_s25, 1  ;;  %p5052_p5 = scmp.ge.s32.totalorder %s6440_s23, 1 }
   0xd   : > { %p6525_p4 = por %p6515_p1, %p171_p0  ;;  %p210_p7 = scmp.lt.s32.totalorder %s6440_s23, 3 }
   0xe   : > { %p6530_p6 = por %p203_p3, %p171_p0  ;;  %s8132_s3 = sld [smem:[#allocation15_spill]] }
   0xf   : > { %p6538_p8 = pnand %p5052_p5, %p210_p7  ;;  %s6442_s9 = smov [#allocation4]  }
  0x10   : > { %s239_s10 = sshll.u32 %s6442_s9, 4  ;;  %p5056_p11 = scmp.ge.s32.totalorder %s6440_s23, 2  ;;  %s240_s10 = int_to_ptr.vmem [resolvable:$true] %s239_s10 }
  0x11   : > { %p6217_p9 = pneg %p6538_p8  ;;  %s6443_s11 = smov 64  }
  0x12   : > { %s6444_s12 = smov 4   ;;  %s41_s13 = sadd.s32 1, %s6436_s22 }
  0x13   : > { %p6218_p10 = pnand %p6217_p9, %p6515_p1  ;;  %p43_p12 = scmp.ge.s32.totalorder %s41_s13, 2 }
  0x14   : > { %s237_s7 = sshll.u32 %s8132_s3, 4  ;;  %s158_s14 = sadd.s32 1, %s6428_s20  ;;  %s238_s7 = int_to_ptr.hbm [resolvable:$true] %s237_s7 }
  0x15   : > { %6220 = dma.hbm_to_vmem [thread:$0]  (!%p6218_p10), %s238_s7, 4608, %s240_s10, [#allocation5], %s6443_s11, %s6443_s11, %s6444_s12  }
  0x16   : > { %p165_p13 = scmp.ne.s32.totalorder %s6428_s20, %s6424_s19  ;;  %p166_p0 = scmp.eq.s32.totalorder %s6440_s23, 0 }
  0x17   : > { %s8199_s13 = smov (%p43_p12, %s41_s13), 0  ;;  %p6230_p7 = scmp.lt.s32.totalorder %s6440_s23, 2 }
  0x18   : > { %8134 = sst [smem:[#allocation14_spill]] %s8199_s13  ;;  %p6554_p3 = por %p166_p0, %p165_p13 }
  0x19   : > { %p6560_p5 = por %p6519_p2, %p165_p13  ;;  %s153_s17 = ssub.s32 %s6436_s22, %s8199_s13 }
  0x1a   : > { %p156_p9 = scmp.eq.s32.totalorder %s153_s17, 0  ;;  %s264_s24 = sand.u32 1, %s6428_s20  }
  0x1b   : > { %s5057_s25 = sshll.u32 %s264_s24, 8  ;;  %s5935_s6 = sshll.u32 %s6436_s22, 8 }
  0x1c   : > { %s6569_s30 = scalar_select %p156_p9, %s6428_s20, %s158_s14  }
  0x1d   : > { %s274_s10 = scalar_lea.hbm %s8079_s4, %s5935_s6  ;;  %s268_s11 = scalar_lea.vmem [#allocation7], %s5057_s25 }
  0x1e   : > { %s277_s12 = sshll.u32 %s268_s11, 4  ;;  %s275_s27 = sshll.u32 %s274_s10, 4  ;;  %s278_s12 = int_to_ptr.vmem [resolvable:$true] %s277_s12  ;;  %s276_s27 = int_to_ptr.hbm [resolvable:$true] %s275_s27 }
  0x1f   : > { %p6222_p2 = pnand %p6230_p7, %p6554_p3  ;;  %s265_s3 = scalar_lea.sflag [#allocation8], %s264_s24 }
  0x20   : > { %s6445_s13 = smov 128   ;;  %s6446_s23 = smov 8  }
  0x21   : > { %6224 = dma.hbm_to_vmem [thread:$0]  (!%p6222_p2), %s276_s27, 4096, %s278_s12, %s265_s3, %s6445_s13, %s6445_s13, %s6446_s23  }
  0x22   : > { %289 = sbr.rel (%p6538_p8) target bundleno = 830 (0x33e), region = 40 }
  0x27   : > { %6407 = dma.done.wait (%p6515_p1), [#allocation5], 4608  }
  0x28   : > { %6409 = vsyncadd (%p6515_p1), [#allocation5], 4294962688  ;;  %s6584_s14 = sand.u32 1, %s6424_s19  }
  0x29   : > { %s5062_s15 = sshll.u32 %s6584_s14, 8  ;;  %s297_s17 = scalar_lea.sflag [#allocation8], %s6584_s14 }
  0x2a   : > { %s6590_s3 = scalar_lea.vmem [#allocation7], %s5062_s15 }
  0x2b   : > { %6411 = dma.done.wait (%p6525_p4), %s297_s17, 4096  }
  0x2c   : > { %6413 = vsyncadd (%p6525_p4), %s297_s17, 4294963200  ;;  %p342_p1 = scmp.lt.s32.totalorder %s6432_s21, 1  ;;  %vm602_vm0 = vcmask 516096   ;;  %vm603_vm1 = vsmask.f32 256  ;;  %v5956_v0 = vld [vmem:[#allocation4 + $0x18] sm:$0xff] }
  0x2d   : > { %vm6604_vm2 = vmand %vm602_vm0, %vm603_vm1  ;;  %v5955_v2 = vld [vmem:[#allocation4 + $0x10] sm:$0xff]  ;;  %6197 = vmatpush.bf16.msra.mxu1 %v5956_v0  ;;  %6198 = vmatpush.bf16.msra.mxu2 %v5956_v0  ;;  %vm595_vm3 = vcmask 519168   ;;  %v5954_v21 = vld [vmem:[#allocation4 + $0x8] sm:$0xff]  ;;  %vm653_vm4 = vsmask.f32 4368  ;;  %vm362_vm8 = vcmask 523264  }
  0x2e   : > { %s343_s23 = scalar_select %p342_p1, %s6432_s21, 1  ;;  %v6612_v6 = vld [vmem:[%s8076_s1] ss:$0 sm:$0xff]  ;;  %6199 = vmatpush.bf16.msra.mxu3 %v5956_v0  ;;  %1580 = vmatpush.bf16.msra.mxu0 %v5956_v0  ;;  %v5953_v38 = vld [vmem:[#allocation4] sm:$0xff]  ;;  %vm944_vm5 = vsmask.f32 7938  ;;  %vm6660_vm6 = vmor %vm603_vm1, %vm653_vm4 }
  0x2f   : > { %v6617_v7 = vld [vmem:[%s8077_s2] ss:$0 sm:$0xff]  ;;  %v5976_v44 = vld [vmem:[#allocation4 + $0x38] sm:$0xff]  ;;  %vm6675_vm7 = vmand %vm595_vm3, %vm944_vm5  ;;  %vm1057_vm9 = vsmask.f32 7950  ;;  %vm1056_vm10 = vcmask 519171  }
  0x30   : > { %s5936_s26 = sshll.u32 %s343_s23, 7  ;;  %v614_v8 = vld [vmem:[#allocation2 + $0x20] sm:$0x1]  ;;  %v5996_v51 = vld [vmem:[#allocation4 + $0x58] sm:$0xff]  ;;  %vm1107_vm11 = vsmask.f32 3328  ;;  %vm7157_vm12 = vmand %vm1056_vm10, %vm1057_vm9 }
  0x31   : > { %s6601_s24 = scalar_lea.vmem %s8075_s0, %s5936_s26  ;;  %v626_v10 = vld [vmem:[#allocation2 + $0x40] sm:$0x1]  ;;  %v615_v13 = vsel %vm6604_vm2, 0, %v614_v8  ;;  %6200 = vmatpush.bf16.msra.mxu1 %v5955_v2  ;;  %6201 = vmatpush.bf16.msra.mxu2 %v5955_v2  ;;  %v6016_v52 = vld [vmem:[#allocation4 + $0x78] sm:$0xff]  ;;  %vm1108_vm13 = vsmask.f32 7440  ;;  %vm7201_vm15 = vmand %vm595_vm3, %vm1107_vm11 }
  0x32   : > { %v6184_v3 = vld [vmem:[%s6601_s24 + $0x18] sm:$0xff]   ;;  %616 = vst [vmem:[#allocation2 + $0x20] sm:$0x1] %v615_v13  ;;  %v627_v17 = vsel %vm6604_vm2, 0, %v626_v10  ;;  %v638_v20 = vld [vmem:[#allocation2 + $0x60] sm:$0x1]  ;;  %6202 = vmatpush.bf16.msra.mxu3 %v5955_v2  ;;  %1581 = vmatpush.bf16.msra.mxu0 %v5955_v2  ;;  %vm7163_vm14 = vmor %vm1107_vm11, %vm1108_vm13 }
  0x33   : > { %v6132_v4 = vunpack.c.l.bf16 %v6184_v3  ;;  %v6133_v5 = vunpack.c.h.bf16 %v6184_v3  ;;  %v6188_v9 = vld [vmem:[%s6601_s24 + $0x38] sm:$0xff]   ;;  %628 = vst [vmem:[#allocation2 + $0x40] sm:$0x1] %v627_v17  ;;  %v6185_v25 = vld [vmem:[%s6601_s24 + $0x20] sm:$0xff]   ;;  %v639_v29 = vsel %vm6604_vm2, 0, %v638_v20  ;;  %s7789_s27 = scalar_lea.vmem [#allocation9], %s5062_s15 }
  0x34   : > { %v6148_v14 = vunpack.c.l.bf16 %v6188_v9  ;;  %v6192_v15 = vld [vmem:[%s6601_s24 + $0x58] sm:$0xff]   ;;  %v6149_v16 = vunpack.c.h.bf16 %v6188_v9  ;;  %640 = vst [vmem:[#allocation2 + $0x60] sm:$0x1] %v639_v29  ;;  %v6136_v33 = vunpack.c.l.bf16 %v6185_v25  ;;  %v6137_v37 = vunpack.c.h.bf16 %v6185_v25  ;;  %s6117_s15 = sshll.u32 %s6432_s21, 8  ;;  %s4901_s8 = sshll.u32 %s7789_s27, 4  ;;  %s4902_s8 = int_to_ptr.vmem [resolvable:$true] %s4901_s8 }
  0x35   : > { %v469_v11 = vmul.f32 %v6612_v6, %v6132_v4  ;;  %v470_v12 = vmul.f32 %v6612_v6, %v6133_v5  ;;  %v6164_v18 = vunpack.c.l.bf16 %v6192_v15  ;;  %v6165_v19 = vunpack.c.h.bf16 %v6192_v15  ;;  %6203 = vmatpush.bf16.msra.mxu1 %v5954_v21  ;;  %6204 = vmatpush.bf16.msra.mxu2 %v5954_v21  ;;  %s4900_s26 = scalar_lea.hbm %s8080_s5, %s6117_s15  ;;  %s4888_s21 = scalar_lea.sflag [#allocation6], %s6584_s14 }
  0x36   : > { %v477_v24 = vmul.f32 %v6612_v6, %v6148_v14  ;;  %v478_v26 = vmul.f32 %v6612_v6, %v6149_v16  ;;  %v471_v42 = vmul.f32 %v6612_v6, %v6136_v33  ;;  %6205 = vmatpush.bf16.msra.mxu3 %v5954_v21  ;;  %1582 = vmatpush.bf16.msra.mxu0 %v5954_v21  ;;  %v6189_v16 = vld [vmem:[%s6601_s24 + $0x40] sm:$0xff]   ;;  %s4903_s13 = sshll.u32 %s4900_s26, 4  ;;  %s6374_s7 = scalar_lea.hbm %s8080_s5, 512  ;;  %s4904_s13 = int_to_ptr.hbm [resolvable:$true] %s4903_s13 }
  0x37   : > { %v505_v22 = vadd.f32 %v6617_v7, %v469_v11  ;;  %v506_v23 = vadd.f32 %v6617_v7, %v470_v12  ;;  %v485_v27 = vmul.f32 %v6612_v6, %v6164_v18  ;;  %v486_v28 = vmul.f32 %v6612_v6, %v6165_v19  ;;  %v5975_v21 = vld [vmem:[#allocation4 + $0x30] sm:$0xff] }
  0x38   : > { %v513_v32 = vadd.f32 %v6617_v7, %v477_v24  ;;  %v514_v34 = vadd.f32 %v6617_v7, %v478_v26  ;;  %v472_v56 = vmul.f32 %v6612_v6, %v6137_v37  ;;  %v507_v62 = vadd.f32 %v6617_v7, %v471_v42  ;;  %v6193_v37 = vld [vmem:[%s6601_s24 + $0x60] sm:$0xff]  }
  0x39   : > { %v537_v30 = vmax.f32 %v505_v22, 0.0  ;;  %v538_v31 = vmax.f32 %v506_v23, 0.0  ;;  %v521_v35 = vadd.f32 %v6617_v7, %v485_v27  ;;  %v522_v36 = vadd.f32 %v6617_v7, %v486_v28  ;;  %6206 = vmatpush.bf16.msra.mxu1 %v5953_v38  ;;  %6207 = vmatpush.bf16.msra.mxu2 %v5953_v38  ;;  %v958_v60 = vld [vmem:[#allocation2 + $0x20] sm:$0xf] }
  0x3a   : > { %v545_v41 = vmax.f32 %v513_v32, 0.0  ;;  %v546_v43 = vmax.f32 %v514_v34, 0.0  ;;  %6208 = vmatpush.bf16.msra.mxu3 %v5953_v38  ;;  %v974_v10 = vld [vmem:[#allocation2 + $0x40] sm:$0xf]  ;;  %v508_v15 = vadd.f32 %v6617_v7, %v472_v56  ;;  %1583 = vmatpush.bf16.msra.mxu0 %v5953_v38  ;;  %v539_v34 = vmax.f32 %v507_v62, 0.0 }
  0x3b   : > { %v6640_v39 = vpack.c.bf16 %v537_v30, %v537_v30  ;;  %v6642_v40 = vpack.c.bf16 %v538_v31, %v538_v31  ;;  %v553_v45 = vmax.f32 %v521_v35, 0.0  ;;  %v554_v46 = vmax.f32 %v522_v36, 0.0  ;;  %v5995_v22 = vld [vmem:[#allocation4 + $0x50] sm:$0xff]  ;;  %v617_v31 = vld [vmem:[#allocation2 + $0x28] sm:$0x1] }
  0x3c   : > { %v6651_v53 = vpack.c.bf16 %v545_v41, %v545_v41  ;;  %v6653_v54 = vpack.c.bf16 %v546_v43, %v546_v43  ;;  %v990_v27 = vld [vmem:[#allocation2 + $0x60] sm:$0xf]  ;;  %v540_v35 = vmax.f32 %v508_v15, 0.0  ;;  %v629_v36 = vld [vmem:[#allocation2 + $0x48] sm:$0x1]  ;;  %v6152_v42 = vunpack.c.l.bf16 %v6189_v16 }
  0x3d   : > { %v704_v47 = vshrl.u32 %v6640_v39, 16  ;;  %v707_v48 = vshll.u32 %v6640_v39, 16  ;;  %v8124_v49 = vshrl.u32 %v6642_v40, 16  ;;  %v715_v50 = vshll.u32 %v6642_v40, 16  ;;  %1023 = vst.msk [vmem:[#allocation2 + $0xb0] sm:$0xf] %vm595_vm3, %v6640_v39  ;;  %1958 = vmatpush.bf16.msrb.mxu1 %v5976_v44  ;;  %2336 = vmatpush.bf16.msrb.mxu2 %v5996_v51 }
  0x3e   : > { %v6655_v55 = vpack.c.bf16 %v553_v45, %v553_v45  ;;  %1024 = vst.msk [vmem:[#allocation2 + $0xb4] sm:$0xf] %vm595_vm3, %v6642_v40  ;;  %v6670_v61 = vpack.c.bf16 %v554_v46, %v554_v46  ;;  %v8101_v0 = vshrl.u32 %v6651_v53, 16  ;;  %v8100_v2 = vshll.u32 %v6651_v53, 16  ;;  %2714 = vmatpush.bf16.msrb.mxu3 %v6016_v52 }
  0x3f   : > { %v706_v58 = vrot.slane %v704_v47, 7  ;;  %v714_v59 = vrot.slane %v8124_v49, 7  ;;  %v8104_v3 = vshrl.u32 %v6653_v54, 16  ;;  %v8099_v4 = vshll.u32 %v6653_v54, 16  ;;  %1031 = vst.msk [vmem:[#allocation2 + $0xd0] sm:$0xf] %vm595_vm3, %v6651_v53 }
  0x40   : > { %1032 = vst.msk [vmem:[#allocation2 + $0xd4] sm:$0xf] %vm595_vm3, %v6653_v54  ;;  %v8089_v11 = vshrl.u32 %v6655_v55, 16  ;;  %v770_v12 = vrot.slane %v8101_v0, 7  ;;  %v8088_v14 = vshll.u32 %v6655_v55, 16  ;;  %v8091_v20 = vshrl.u32 %v6670_v61, 16 }
  0x41   : > { %v709_v5 = vor.u32 %v707_v48, %v706_v58  ;;  %v710_v8 = vrot.slane %v706_v58, 4  ;;  %v717_v9 = vor.u32 %v715_v50, %v714_v59  ;;  %v778_v13 = vrot.slane %v8104_v3, 7  ;;  %1039 = vst.msk [vmem:[#allocation2 + $0xf0] sm:$0xf] %vm595_vm3, %v6655_v55  ;;  %1959 = vmatpush.bf16.msrb.mxu1 %v5975_v21  ;;  %2337 = vmatpush.bf16.msrb.mxu2 %v5995_v22  ;;  %v6186_v59 = vld [vmem:[%s6601_s24 + $0x28] sm:$0xff]  }
  0x42   : > { %v834_v19 = vrot.slane %v8089_v11, 7  ;;  %1040 = vst.msk [vmem:[#allocation2 + $0xf4] sm:$0xf] %vm595_vm3, %v6670_v61  ;;  %v773_v23 = vor.u32 %v8100_v2, %v770_v12  ;;  %v774_v24 = vrot.slane %v770_v12, 4  ;;  %v8087_v26 = vshll.u32 %v6670_v61, 16 }
  0x43   : > { %v718_v17 = vsel %vm6660_vm6, %v710_v8, %v717_v9  ;;  %v959_v18 = vsel %vm6675_vm7, %v709_v5, %v958_v60  ;;  %v781_v25 = vor.u32 %v8099_v4, %v778_v13  ;;  %v842_v30 = vrot.slane %v8091_v20, 7  ;;  %v6944_v4 = vld [vmem:[#allocation2 + $0x70] sm:$0x1] }
  0x44   : > { %960 = vst [vmem:[#allocation2 + $0x20] sm:$0xf] %v959_v18  ;;  %v837_v28 = vor.u32 %v8088_v14, %v834_v19  ;;  %v838_v29 = vrot.slane %v834_v19, 4  ;;  %v975_v33 = vsel %vm6675_vm7, %v773_v23, %v974_v10  ;;  %v6730_v43 = vpack.c.bf16 %v539_v34, %v539_v34 }
  0x45   : > { %961 = vst.msk [vmem:[#allocation2 + $0x24] sm:$0xf] %vm595_vm3, %v718_v17  ;;  %v782_v32 = vsel %vm6660_vm6, %v774_v24, %v781_v25  ;;  %v845_v38 = vor.u32 %v8087_v26, %v842_v30  ;;  %v6732_v44 = vpack.c.bf16 %v540_v35, %v540_v35  ;;  %v618_v45 = vsel %vm6604_vm2, 0, %v617_v31  ;;  %v6190_v35 = vld [vmem:[%s6601_s24 + $0x48] sm:$0xff]  }
  0x46   : > { %976 = vst [vmem:[#allocation2 + $0x40] sm:$0xf] %v975_v33  ;;  %v991_v41 = vsel %vm6675_vm7, %v837_v28, %v990_v27  ;;  %v6153_v46 = vunpack.c.h.bf16 %v6189_v16  ;;  %v479_v52 = vmul.f32 %v6612_v6, %v6152_v42  ;;  %v630_v56 = vsel %vm6604_vm2, 0, %v629_v36 }
  0x47   : > { %977 = vst.msk [vmem:[#allocation2 + $0x44] sm:$0xf] %vm595_vm3, %v782_v32  ;;  %v846_v51 = vsel %vm6660_vm6, %v838_v29, %v845_v38  ;;  %v6168_v58 = vunpack.c.l.bf16 %v6193_v37  ;;  %v8123_v60 = vshrl.u32 %v6730_v43, 16  ;;  %v8121_v62 = vshll.u32 %v6730_v43, 16 }
  0x48   : > { %992 = vst [vmem:[#allocation2 + $0x60] sm:$0xf] %v991_v41  ;;  %v8110_v5 = vshrl.u32 %v6732_v44, 16  ;;  %v8111_v8 = vshll.u32 %v6732_v44, 16  ;;  %v480_v9 = vmul.f32 %v6612_v6, %v6153_v46  ;;  %v515_v10 = vadd.f32 %v6617_v7, %v479_v52 }
  0x49   : > { %993 = vst.msk [vmem:[#allocation2 + $0x64] sm:$0xf] %vm595_vm3, %v846_v51  ;;  %v6169_v12 = vunpack.c.h.bf16 %v6193_v37  ;;  %v487_v13 = vmul.f32 %v6612_v6, %v6168_v58  ;;  %v722_v16 = vrot.slane %v8123_v60, 7  ;;  %v6140_v18 = vunpack.c.l.bf16 %v6186_v59 }
  0x4a   : > { %619 = vst [vmem:[#allocation2 + $0x28] sm:$0x1] %v618_v45  ;;  %v730_v17 = vrot.slane %v8110_v5, 7  ;;  %v516_v19 = vadd.f32 %v6617_v7, %v480_v9  ;;  %v547_v21 = vmax.f32 %v515_v10, 0.0  ;;  %v6141_v28 = vunpack.c.h.bf16 %v6186_v59 }
  0x4b   : > { %1025 = vst.msk [vmem:[#allocation2 + $0xb8] sm:$0xf] %vm595_vm3, %v6730_v43  ;;  %v488_v22 = vmul.f32 %v6612_v6, %v6169_v12  ;;  %v523_v23 = vadd.f32 %v6617_v7, %v487_v13  ;;  %v725_v24 = vor.u32 %v8121_v62, %v722_v16  ;;  %v726_v25 = vrot.slane %v722_v16, 4  ;;  %v6076_v62 = vld [vmem:[#allocation4 + $0xd8] sm:$0xff] }
  0x4c   : > { %v5941_v15 = vld [vmem:[#allocation2 + $0x20] sm:$0xff]  ;;  %1026 = vst.msk [vmem:[#allocation2 + $0xbc] sm:$0xf] %vm595_vm3, %v6732_v44  ;;  %v733_v27 = vor.u32 %v8111_v8, %v730_v17  ;;  %v548_v30 = vmax.f32 %v516_v19, 0.0  ;;  %v6766_v31 = vpack.c.bf16 %v547_v21, %v547_v21  ;;  %v6447_v32 = vmov 0   ;;  %v6036_v19 = vld [vmem:[#allocation4 + $0x98] sm:$0xff] }
  0x4d   : > { %5150 = vmatmul.msk.bf16.vlgmr.msra.gmra.mxu1 %vm362_vm8, %v5941_v15  ;;  %631 = vst [vmem:[#allocation2 + $0x48] sm:$0x1] %v630_v56  ;;  %v524_v33 = vadd.f32 %v6617_v7, %v488_v22  ;;  %v555_v34 = vmax.f32 %v523_v23, 0.0  ;;  %v473_v37 = vmul.f32 %v6612_v6, %v6140_v18  ;;  %v474_v38 = vmul.f32 %v6612_v6, %v6141_v28  ;;  %v6015_v18 = vld [vmem:[#allocation4 + $0x70] sm:$0xff] }
  0x4e   : > { %v5945_v29 = vld [vmem:[#allocation2 + $0x40] sm:$0xff]  ;;  %596 = vst.msk [vmem:[#allocation2] sm:$0xf] %vm595_vm3, %v6447_v32  ;;  %v734_v36 = vsel %vm6660_vm6, %v726_v25, %v733_v27  ;;  %v6780_v42 = vpack.c.bf16 %v548_v30, %v548_v30  ;;  %v8097_v45 = vshrl.u32 %v6766_v31, 16  ;;  %v8096_v46 = vshll.u32 %v6766_v31, 16  ;;  %2715 = vmatpush.bf16.msrb.mxu3 %v6015_v18  ;;  %3092 = vmatpush.bf16.msrb.mxu0 %v6036_v19 }
  0x4f   : > { %597 = vst.msk [vmem:[#allocation2 + $0x4] sm:$0xf] %vm595_vm3, %v6447_v32  ;;  %5154 = vmatmul.msk.bf16.vlgmr.msra.gmra.mxu2 %vm362_vm8, %v5945_v29  ;;  %v556_v51 = vmax.f32 %v524_v33, 0.0  ;;  %v6786_v56 = vpack.c.bf16 %v555_v34, %v555_v34  ;;  %v509_v58 = vadd.f32 %v6617_v7, %v473_v37  ;;  %v510_v59 = vadd.f32 %v6617_v7, %v474_v38  ;;  %v6119_v38 = vld [vmem:[%s6601_s24] sm:$0xff]  }
  0x50   : > { %v5949_v41 = vld [vmem:[#allocation2 + $0x60] sm:$0xff]  ;;  %965 = vst.msk [vmem:[#allocation2 + $0x2c] sm:$0xf] %vm595_vm3, %v734_v36  ;;  %v6156_v9 = vunpack.c.l.bf16 %v6190_v35  ;;  %v786_v12 = vrot.slane %v8097_v45, 7  ;;  %v8098_v13 = vshrl.u32 %v6780_v42, 16  ;;  %v8094_v15 = vshll.u32 %v6780_v42, 16 }
  0x51   : > { %v962_v52 = vld [vmem:[#allocation2 + $0x28] sm:$0xf]  ;;  %1033 = vst.msk [vmem:[#allocation2 + $0xd8] sm:$0xf] %vm595_vm3, %v6766_v31  ;;  %5158 = vmatmul.msk.bf16.vlgmr.msra.gmra.mxu3 %vm362_vm8, %v5949_v41  ;;  %v6799_v16 = vpack.c.bf16 %v556_v51, %v556_v51  ;;  %v8085_v17 = vshrl.u32 %v6786_v56, 16  ;;  %v6157_v25 = vunpack.c.h.bf16 %v6190_v35  ;;  %v541_v30 = vmax.f32 %v509_v58, 0.0 }
  0x52   : > { %v963_v10 = vsel %vm6675_vm7, %v725_v24, %v962_v52  ;;  %1034 = vst.msk [vmem:[#allocation2 + $0xdc] sm:$0xf] %vm595_vm3, %v6780_v42  ;;  %v789_v21 = vor.u32 %v8096_v46, %v786_v12  ;;  %v790_v22 = vrot.slane %v786_v12, 4  ;;  %v794_v23 = vrot.slane %v8098_v13, 7  ;;  %v6191_v46 = vld [vmem:[%s6601_s24 + $0x50] sm:$0xff]  }
  0x53   : > { %964 = vst [vmem:[#allocation2 + $0x28] sm:$0xf] %v963_v10  ;;  %v6810_v27 = vrot.slane %v8085_v17, 7  ;;  %v8086_v28 = vshrl.u32 %v6799_v16, 16  ;;  %v8084_v29 = vshll.u32 %v6799_v16, 16  ;;  %v542_v36 = vmax.f32 %v510_v59, 0.0 }
  0x54   : > { %v978_v24 = vld [vmem:[#allocation2 + $0x48] sm:$0xf]  ;;  %599 = vst.msk [vmem:[#allocation2 + $0x88] sm:$0xf] %vm595_vm3, %v6447_v32  ;;  %v797_v33 = vor.u32 %v8094_v15, %v794_v23  ;;  %v481_v37 = vmul.f32 %v6612_v6, %v6156_v9  ;;  %v8090_v52 = vshll.u32 %v6786_v56, 16  ;;  %v6830_v58 = vpack.c.bf16 %v541_v30, %v541_v30 }
  0x55   : > { %v979_v34 = vsel %vm6675_vm7, %v789_v21, %v978_v24  ;;  %600 = vst.msk [vmem:[#allocation2 + $0x8c] sm:$0xf] %vm595_vm3, %v6447_v32  ;;  %v858_v41 = vrot.slane %v8086_v28, 7  ;;  %v6832_v59 = vpack.c.bf16 %v542_v36, %v542_v36  ;;  %v641_v9 = vld [vmem:[#allocation2 + $0x68] sm:$0x1]  ;;  %v854_v10 = vrot.slane %v6810_v27, 4 }
  0x56   : > { %v5937_v35 = vld [vmem:[#allocation2] sm:$0xff]  ;;  %980 = vst [vmem:[#allocation2 + $0x48] sm:$0xf] %v979_v34  ;;  %v798_v51 = vsel %vm6660_vm6, %v790_v22, %v797_v33  ;;  %v482_v12 = vmul.f32 %v6612_v6, %v6157_v25  ;;  %v517_v18 = vadd.f32 %v6617_v7, %v481_v37  ;;  %v6120_v19 = vunpack.c.l.bf16 %v6119_v38  ;;  %v6194_v33 = vld [vmem:[%s6601_s24 + $0x68] sm:$0xff]   ;;  %v5974_v36 = vld [vmem:[#allocation4 + $0x28] sm:$0xff] }
  0x57   : > { %5146 = vmatmul.msk.bf16.vlgmr.msra.gmra.mxu0 %vm362_vm8, %v5937_v35  ;;  %1011 = vst.msk [vmem:[#allocation2 + $0x90] sm:$0xf] %vm595_vm3, %v6447_v32  ;;  %v861_v22 = vor.u32 %v8084_v29, %v858_v41  ;;  %v8117_v23 = vshrl.u32 %v6830_v58, 16  ;;  %v8106_v24 = vshrl.u32 %v6832_v59, 16  ;;  %v6121_v30 = vunpack.c.h.bf16 %v6119_v38  ;;  %v5994_v37 = vld [vmem:[#allocation4 + $0x48] sm:$0xff]  ;;  %1960 = vmatpush.bf16.msrb.mxu1 %v5974_v36 }
  0x58   : > { %981 = vst.msk [vmem:[#allocation2 + $0x4c] sm:$0xf] %vm595_vm3, %v798_v51  ;;  %v8107_v25 = vshll.u32 %v6832_v59, 16  ;;  %v518_v34 = vadd.f32 %v6617_v7, %v482_v12  ;;  %v549_v35 = vmax.f32 %v517_v18, 0.0  ;;  %v463_v51 = vmul.f32 %v6612_v6, %v6120_v19  ;;  %2338 = vmatpush.bf16.msrb.mxu2 %v5994_v37 }
  0x59   : > { %1012 = vst.msk [vmem:[#allocation2 + $0x94] sm:$0xf] %vm595_vm3, %v6447_v32  ;;  %v738_v41 = vrot.slane %v8117_v23, 7  ;;  %v746_v38 = vrot.slane %v8106_v24, 7  ;;  %v464_v29 = vmul.f32 %v6612_v6, %v6121_v30  ;;  %v6172_v17 = vunpack.c.l.bf16 %v6194_v33 }
  0x5a   : > { %v5942_v21 = vld [vmem:[#allocation2 + $0x28] sm:$0xff]  ;;  %1014 = vst.msk [vmem:[#allocation2 + $0x118] sm:$0xf] %vm595_vm3, %v6447_v32  ;;  %v550_v12 = vmax.f32 %v518_v34, 0.0  ;;  %v6860_v18 = vpack.c.bf16 %v549_v35, %v549_v35  ;;  %v642_v28 = vsel %vm6604_vm2, 0, %v641_v9  ;;  %v862_v19 = vsel %vm6660_vm6, %v854_v10, %v861_v22 }
  0x5b   : > { %1015 = vst.msk [vmem:[#allocation2 + $0x11c] sm:$0xf] %vm595_vm3, %v6447_v32  ;;  %v742_v30 = vrot.slane %v738_v41, 4  ;;  %v620_v34 = vld [vmem:[#allocation2 + $0x30] sm:$0x1]  ;;  %v749_v35 = vor.u32 %v8107_v25, %v746_v38  ;;  %v500_v9 = vadd.f32 %v6617_v7, %v464_v29  ;;  %v853_v10 = vor.u32 %v8090_v52, %v6810_v27 }
  0x5c   : > { %1050 = vst.msk [vmem:[#allocation2 + $0x120] sm:$0xf] %vm595_vm3, %v6447_v32  ;;  %v6873_v37 = vpack.c.bf16 %v550_v12, %v550_v12  ;;  %v8092_v26 = vshrl.u32 %v6860_v18, 16  ;;  %v632_v22 = vld [vmem:[#allocation2 + $0x50] sm:$0x1]  ;;  %v489_v38 = vmul.f32 %v6612_v6, %v6172_v17  ;;  %v621_v27 = vsel %vm6604_vm2, 0, %v620_v34 }
  0x5d   : > { %5151 = vmatmul.msk.bf16.gmra.mxu1 %vm362_vm8, %v5942_v21  ;;  %1051 = vst.msk [vmem:[#allocation2 + $0x124] sm:$0xf] %vm595_vm3, %v6447_v32  ;;  %v499_v21 = vadd.f32 %v6617_v7, %v463_v51  ;;  %v6173_v51 = vunpack.c.h.bf16 %v6194_v33  ;;  %v8112_v52 = vshll.u32 %v6830_v58, 16 }
  0x5e   : > { %1053 = vst.msk [vmem:[#allocation2 + $0x1a8] sm:$0xf] %vm595_vm3, %v6447_v32  ;;  %v6885_v12 = vrot.slane %v8092_v26, 7  ;;  %v8093_v29 = vshrl.u32 %v6873_v37, 16  ;;  %v8095_v11 = vshll.u32 %v6873_v37, 16 }
  0x5f   : > { %v5946_v14 = vld [vmem:[#allocation2 + $0x48] sm:$0xff]  ;;  %1054 = vst.msk [vmem:[#allocation2 + $0x1ac] sm:$0xf] %vm595_vm3, %v6447_v32  ;;  %v531_v36 = vmax.f32 %v499_v21, 0.0  ;;  %v532_v32 = vmax.f32 %v500_v9, 0.0  ;;  %v490_v17 = vmul.f32 %v6612_v6, %v6173_v51  ;;  %v6187_v21 = vld [vmem:[%s6601_s24 + $0x30] sm:$0xff]  }
  0x60   : > { %643 = vst [vmem:[#allocation2 + $0x68] sm:$0x1] %v642_v28  ;;  %5155 = vmatmul.msk.bf16.gmra.mxu2 %vm362_vm8, %v5946_v14  ;;  %v525_v28 = vadd.f32 %v6617_v7, %v489_v38  ;;  %v750_v14 = vsel %vm6660_vm6, %v742_v30, %v749_v35  ;;  %v810_v34 = vrot.slane %v8093_v29, 7  ;;  %v806_v9 = vrot.slane %v6885_v12, 4  ;;  %v605_v26 = vld [vmem:[#allocation2 + $0x8] sm:$0x1] }
  0x61   : > { %997 = vst.msk [vmem:[#allocation2 + $0x6c] sm:$0xf] %vm595_vm3, %v862_v19  ;;  %v6893_v33 = vpack.c.bf16 %v531_v36, %v531_v36  ;;  %v633_v19 = vsel %vm6604_vm2, 0, %v632_v22  ;;  %v6910_v36 = vpack.c.bf16 %v532_v32, %v532_v32  ;;  %v526_v38 = vadd.f32 %v6617_v7, %v490_v17 }
  0x62   : > { %1041 = vst.msk [vmem:[#allocation2 + $0xf8] sm:$0xf] %vm595_vm3, %v6786_v56  ;;  %v813_v30 = vor.u32 %v8095_v11, %v810_v34  ;;  %v557_v35 = vmax.f32 %v525_v28, 0.0  ;;  %v6144_v22 = vunpack.c.l.bf16 %v6187_v21  ;;  %v6145_v20 = vunpack.c.h.bf16 %v6187_v21  ;;  %v6014_v21 = vld [vmem:[#allocation4 + $0x68] sm:$0xff] }
  0x63   : > { %1042 = vst.msk [vmem:[#allocation2 + $0xfc] sm:$0xf] %vm595_vm3, %v6799_v16  ;;  %v656_v51 = vshrl.u32 %v6893_v33, 16  ;;  %v664_v32 = vshrl.u32 %v6910_v36, 16  ;;  %v667_v15 = vshll.u32 %v6910_v36, 16  ;;  %v558_v17 = vmax.f32 %v526_v38, 0.0  ;;  %2716 = vmatpush.bf16.msrb.mxu3 %v6014_v21 }
  0x64   : > { %622 = vst [vmem:[#allocation2 + $0x30] sm:$0x1] %v621_v27  ;;  %v741_v27 = vor.u32 %v8112_v52, %v738_v41  ;;  %v6927_v28 = vpack.c.bf16 %v557_v35, %v557_v35  ;;  %v475_v34 = vmul.f32 %v6612_v6, %v6144_v22  ;;  %v476_v11 = vmul.f32 %v6612_v6, %v6145_v20 }
  0x65   : > { %969 = vst.msk [vmem:[#allocation2 + $0x34] sm:$0xf] %vm595_vm3, %v750_v14  ;;  %v6919_v29 = vrot.slane %v656_v51, 7  ;;  %v6035_v14 = vld [vmem:[#allocation4 + $0x90] sm:$0xff]  ;;  %v8103_v38 = vshll.u32 %v6860_v18, 16  ;;  %v814_v41 = vsel %vm6660_vm6, %v806_v9, %v813_v30  ;;  %v666_v35 = vrot.slane %v664_v32, 7 }
  0x66   : > { %1027 = vst.msk [vmem:[#allocation2 + $0xc0] sm:$0xf] %vm595_vm3, %v6830_v58  ;;  %v6939_v13 = vpack.c.bf16 %v558_v17, %v558_v17  ;;  %v8102_v2 = vshrl.u32 %v6927_v28, 16  ;;  %3093 = vmatpush.bf16.msrb.mxu0 %v6035_v14  ;;  %v511_v9 = vadd.f32 %v6617_v7, %v475_v34  ;;  %v6160_v34 = vunpack.c.l.bf16 %v6191_v46 }
  0x67   : > { %v994_v45 = vld [vmem:[#allocation2 + $0x68] sm:$0xf]  ;;  %1028 = vst.msk [vmem:[#allocation2 + $0xc4] sm:$0xf] %vm595_vm3, %v6832_v59  ;;  %v662_v20 = vrot.slane %v6919_v29, 4  ;;  %v669_v30 = vor.u32 %v667_v15, %v666_v35  ;;  %v805_v35 = vor.u32 %v8103_v38, %v6885_v12 }
  0x68   : > { %v995_v22 = vsel %vm6675_vm7, %v853_v10, %v994_v45  ;;  %634 = vst [vmem:[#allocation2 + $0x50] sm:$0x1] %v633_v19  ;;  %v8105_v17 = vshrl.u32 %v6939_v13, 16  ;;  %v8108_v45 = vshll.u32 %v6939_v13, 16  ;;  %v512_v10 = vadd.f32 %v6617_v7, %v476_v11 }
  0x69   : > { %996 = vst [vmem:[#allocation2 + $0x68] sm:$0xf] %v995_v22  ;;  %v606_v19 = vsel %vm6604_vm2, 0, %v605_v26  ;;  %v6958_v21 = vrot.slane %v8102_v2, 7  ;;  %v543_v14 = vmax.f32 %v511_v9, 0.0  ;;  %v6182_v22 = vld [vmem:[%s6601_s24 + $0x8] sm:$0xff]   ;;  %v670_v12 = vsel %vm6660_vm6, %v662_v20, %v669_v30 }
  0x6a   : > { %985 = vst.msk [vmem:[#allocation2 + $0x54] sm:$0xf] %vm595_vm3, %v814_v41  ;;  %v645_v11 = vsel %vm6604_vm2, 0, %v6944_v4  ;;  %v874_v26 = vrot.slane %v8105_v17, 7  ;;  %v6161_v41 = vunpack.c.h.bf16 %v6191_v46  ;;  %v544_v38 = vmax.f32 %v512_v10, 0.0  ;;  %v6195_v30 = vld [vmem:[%s6601_s24 + $0x70] sm:$0xff]  }
  0x6b   : > { %v966_v0 = vld [vmem:[#allocation2 + $0x30] sm:$0xf]  ;;  %1035 = vst.msk [vmem:[#allocation2 + $0xe0] sm:$0xf] %vm595_vm3, %v6860_v18  ;;  %v870_v2 = vrot.slane %v6958_v21, 4  ;;  %v6980_v3 = vpack.c.bf16 %v543_v14, %v543_v14  ;;  %v483_v46 = vmul.f32 %v6612_v6, %v6160_v34  ;;  %v6124_v24 = vunpack.c.l.bf16 %v6182_v22 }
  0x6c   : > { %v967_v9 = vsel %vm6675_vm7, %v741_v27, %v966_v0  ;;  %1036 = vst.msk [vmem:[#allocation2 + $0xe4] sm:$0xf] %vm595_vm3, %v6873_v37  ;;  %v877_v4 = vor.u32 %v8108_v45, %v874_v26  ;;  %v484_v17 = vmul.f32 %v6612_v6, %v6161_v41  ;;  %v659_v0 = vshll.u32 %v6893_v33, 16 }
  0x6d   : > { %968 = vst [vmem:[#allocation2 + $0x30] sm:$0xf] %v967_v9  ;;  %v6985_v27 = vpack.c.bf16 %v544_v38, %v544_v38  ;;  %v6125_v20 = vunpack.c.h.bf16 %v6182_v22  ;;  %v8114_v10 = vshll.u32 %v6927_v28, 16  ;;  %v8109_v34 = vshrl.u32 %v6980_v3, 16 }
  0x6e   : > { %607 = vst [vmem:[#allocation2 + $0x8] sm:$0x1] %v606_v19  ;;  %v878_v14 = vsel %vm6660_vm6, %v870_v2, %v877_v4  ;;  %v519_v26 = vadd.f32 %v6617_v7, %v483_v46  ;;  %v520_v9 = vadd.f32 %v6617_v7, %v484_v17  ;;  %v5993_v46 = vld [vmem:[#allocation4 + $0x40] sm:$0xff]  ;;  %v465_v45 = vmul.f32 %v6612_v6, %v6124_v24  ;;  %v623_v17 = vld [vmem:[#allocation2 + $0x38] sm:$0x1] }
  0x6f   : > { %v982_v25 = vld [vmem:[#allocation2 + $0x50] sm:$0xf]  ;;  %949 = vst.msk [vmem:[#allocation2 + $0xc] sm:$0xf] %vm595_vm3, %v670_v12  ;;  %v8113_v22 = vshrl.u32 %v6985_v27, 16  ;;  %v8116_v41 = vshll.u32 %v6985_v27, 16  ;;  %2339 = vmatpush.bf16.msrb.mxu2 %v5993_v46 }
  0x70   : > { %v5950_v19 = vld [vmem:[#allocation2 + $0x68] sm:$0xff]  ;;  %v983_v38 = vsel %vm6675_vm7, %v805_v35, %v982_v25  ;;  %1017 = vst.msk [vmem:[#allocation2 + $0x98] sm:$0xf] %vm595_vm3, %v6893_v33  ;;  %v5973_v12 = vld [vmem:[#allocation4 + $0x20] sm:$0xff]  ;;  %v754_v2 = vrot.slane %v8109_v34, 7  ;;  %v551_v4 = vmax.f32 %v519_v26, 0.0  ;;  %v466_v25 = vmul.f32 %v6612_v6, %v6125_v20 }
  0x71   : > { %984 = vst [vmem:[#allocation2 + $0x50] sm:$0xf] %v983_v38  ;;  %5159 = vmatmul.msk.bf16.gmra.mxu3 %vm362_vm8, %v5950_v19  ;;  %v661_v35 = vor.u32 %v659_v0, %v6919_v29  ;;  %v762_v38 = vrot.slane %v8113_v22, 7  ;;  %v552_v34 = vmax.f32 %v520_v9, 0.0  ;;  %1961 = vmatpush.bf16.msrb.mxu1 %v5973_v12  ;;  %v6176_v26 = vunpack.c.l.bf16 %v6195_v30  ;;  %v635_v9 = vld [vmem:[#allocation2 + $0x58] sm:$0x1] }
  0x72   : > { %1018 = vst.msk [vmem:[#allocation2 + $0x9c] sm:$0xf] %vm595_vm3, %v6910_v36  ;;  %v8119_v24 = vshll.u32 %v6980_v3, 16  ;;  %v758_v20 = vrot.slane %v754_v2, 4  ;;  %v7014_v5 = vpack.c.bf16 %v551_v4, %v551_v4  ;;  %v501_v19 = vadd.f32 %v6617_v7, %v465_v45 }
  0x73   : > { %646 = vst [vmem:[#allocation2 + $0x70] sm:$0x1] %v645_v11  ;;  %v765_v8 = vor.u32 %v8116_v41, %v762_v38  ;;  %v7020_v52 = vpack.c.bf16 %v552_v34, %v552_v34  ;;  %v502_v11 = vadd.f32 %v6617_v7, %v466_v25  ;;  %v6177_v12 = vunpack.c.h.bf16 %v6195_v30  ;;  %v6034_v41 = vld [vmem:[#allocation4 + $0x88] sm:$0xff]  ;;  %3849 = vmatpush.bf16.msra.mxu2 %v6076_v62 }
  0x74   : > { %v5943_v29 = vld [vmem:[#allocation2 + $0x30] sm:$0xff]  ;;  %1001 = vst.msk [vmem:[#allocation2 + $0x74] sm:$0xf] %vm595_vm3, %v878_v14  ;;  %v869_v4 = vor.u32 %v8114_v10, %v6958_v21  ;;  %v624_v45 = vsel %vm6604_vm2, 0, %v623_v17  ;;  %v8115_v14 = vshrl.u32 %v7014_v5, 16  ;;  %v491_v34 = vmul.f32 %v6612_v6, %v6176_v26  ;;  %3094 = vmatpush.bf16.msrb.mxu0 %v6034_v41 }
  0x75   : > { %v946_v22 = vld [vmem:[#allocation2 + $0x8] sm:$0xf]  ;;  %1043 = vst.msk [vmem:[#allocation2 + $0x100] sm:$0xf] %vm595_vm3, %v6927_v28  ;;  %5152 = vmatmul.msk.bf16.gmra.mxu1 %vm362_vm8, %v5943_v29  ;;  %v766_v21 = vsel %vm6660_vm6, %v758_v20, %v765_v8  ;;  %v8118_v46 = vshrl.u32 %v7020_v52, 16  ;;  %v8120_v25 = vshll.u32 %v7020_v52, 16  ;;  %v492_v10 = vmul.f32 %v6612_v6, %v6177_v12 }
  0x76   : > { %v947_v30 = vsel %vm6675_vm7, %v661_v35, %v946_v22  ;;  %1044 = vst.msk [vmem:[#allocation2 + $0x104] sm:$0xf] %vm595_vm3, %v6939_v13  ;;  %v6183_v17 = vld [vmem:[%s6601_s24 + $0x10] sm:$0xff]   ;;  %v818_v38 = vrot.slane %v8115_v14, 7  ;;  %v533_v26 = vmax.f32 %v501_v19, 0.0  ;;  %v534_v29 = vmax.f32 %v502_v11, 0.0 }
  0x77   : > { %948 = vst [vmem:[#allocation2 + $0x8] sm:$0xf] %v947_v30  ;;  %v757_v35 = vor.u32 %v8119_v24, %v754_v2  ;;  %v636_v8 = vsel %vm6604_vm2, 0, %v635_v9  ;;  %v826_v20 = vrot.slane %v8118_v46, 7  ;;  %v527_v30 = vadd.f32 %v6617_v7, %v491_v34  ;;  %v608_v12 = vld [vmem:[#allocation2 + $0x10] sm:$0x1] }
  0x78   : > { %v5947_v22 = vld [vmem:[#allocation2 + $0x50] sm:$0xff]  ;;  %625 = vst [vmem:[#allocation2 + $0x38] sm:$0x1] %v624_v45  ;;  %v822_v14 = vrot.slane %v818_v38, 4  ;;  %v7053_v19 = vpack.c.bf16 %v533_v26, %v533_v26  ;;  %v7055_v11 = vpack.c.bf16 %v534_v29, %v534_v29  ;;  %v6128_v23 = vunpack.c.l.bf16 %v6183_v17 }
  0x79   : > { %973 = vst.msk [vmem:[#allocation2 + $0x3c] sm:$0xf] %vm595_vm3, %v766_v21  ;;  %v6013_v45 = vld [vmem:[#allocation4 + $0x60] sm:$0xff]  ;;  %5156 = vmatmul.msk.bf16.gmra.mxu2 %vm362_vm8, %v5947_v22  ;;  %v829_v9 = vor.u32 %v8120_v25, %v826_v20  ;;  %v528_v34 = vadd.f32 %v6617_v7, %v492_v10  ;;  %v559_v21 = vmax.f32 %v527_v30, 0.0  ;;  %v6129_v26 = vunpack.c.h.bf16 %v6183_v17 }
  0x7a   : > { %v998_v2 = vld [vmem:[#allocation2 + $0x70] sm:$0xf]  ;;  %1029 = vst.msk [vmem:[#allocation2 + $0xc8] sm:$0xf] %vm595_vm3, %v6980_v3  ;;  %v8125_v46 = vshll.u32 %v7014_v5, 16  ;;  %v672_v22 = vshrl.u32 %v7053_v19, 16  ;;  %2717 = vmatpush.bf16.msrb.mxu3 %v6013_v45  ;;  %v467_v25 = vmul.f32 %v6612_v6, %v6128_v23 }
  0x7b   : > { %v999_v29 = vsel %vm6675_vm7, %v869_v4, %v998_v2  ;;  %1030 = vst.msk [vmem:[#allocation2 + $0xcc] sm:$0xf] %vm595_vm3, %v6985_v27  ;;  %v680_v24 = vshrl.u32 %v7055_v11, 16  ;;  %v830_v10 = vsel %vm6660_vm6, %v822_v14, %v829_v9  ;;  %v683_v17 = vshll.u32 %v7055_v11, 16 }
  0x7c   : > { %1000 = vst [vmem:[#allocation2 + $0x70] sm:$0xf] %v999_v29  ;;  %v560_v20 = vmax.f32 %v528_v34, 0.0  ;;  %v7073_v30 = vpack.c.bf16 %v559_v21, %v559_v21  ;;  %v674_v4 = vrot.slane %v672_v22, 7  ;;  %v468_v41 = vmul.f32 %v6612_v6, %v6129_v26  ;;  %v6056_v29 = vld [vmem:[#allocation4 + $0xb8] sm:$0xff] }
  0x7d   : > { %637 = vst [vmem:[#allocation2 + $0x58] sm:$0x1] %v636_v8  ;;  %v682_v2 = vrot.slane %v680_v24, 7  ;;  %v609_v14 = vsel %vm6604_vm2, 0, %v608_v12  ;;  %v503_v6 = vadd.f32 %v6617_v7, %v467_v25  ;;  %v821_v25 = vor.u32 %v8125_v46, %v818_v38  ;;  %3470 = vmatpush.bf16.msra.mxu1 %v6056_v29 }
  0x7e   : > { %v5938_v45 = vld [vmem:[#allocation2 + $0x8] sm:$0xff]  ;;  %989 = vst.msk [vmem:[#allocation2 + $0x5c] sm:$0xf] %vm595_vm3, %v830_v10  ;;  %v7084_v9 = vpack.c.bf16 %v560_v20, %v560_v20  ;;  %v8122_v8 = vshrl.u32 %v7073_v30, 16  ;;  %v678_v21 = vrot.slane %v674_v4, 4  ;;  %v1110_v62 = vrot.slane %v656_v51, 4 }
  0x7f   : > { %v970_v34 = vld [vmem:[#allocation2 + $0x38] sm:$0xf]  ;;  %1037 = vst.msk [vmem:[#allocation2 + $0xe8] sm:$0xf] %vm595_vm3, %v7014_v5  ;;  %v685_v23 = vor.u32 %v683_v17, %v682_v2  ;;  %5147 = vmatmul.msk.bf16.gmra.mxu0 %vm362_vm8, %v5938_v45  ;;  %v883_v29 = vshll.u32 %v7073_v30, 16 }
  0x80   : > { %v971_v12 = vsel %vm6675_vm7, %v757_v35, %v970_v34  ;;  %1038 = vst.msk [vmem:[#allocation2 + $0xec] sm:$0xf] %vm595_vm3, %v7020_v52  ;;  %v882_v26 = vrot.slane %v8122_v8, 7  ;;  %v888_v10 = vshrl.u32 %v7084_v9, 16  ;;  %v891_v20 = vshll.u32 %v7084_v9, 16 }
  0x81   : > { %972 = vst [vmem:[#allocation2 + $0x38] sm:$0xf] %v971_v12  ;;  %v686_v2 = vsel %vm6660_vm6, %v678_v21, %v685_v23  ;;  %v647_v45 = vld [vmem:[#allocation2 + $0x78] sm:$0x1]  ;;  %v504_v35 = vadd.f32 %v6617_v7, %v468_v41  ;;  %v535_v34 = vmax.f32 %v503_v6, 0.0  ;;  %v675_v8 = vshll.u32 %v7053_v19, 16 }
  0x82   : > { %610 = vst [vmem:[#allocation2 + $0x10] sm:$0x1] %v609_v14  ;;  %v886_v60 = vrot.slane %v882_v26, 4  ;;  %v890_v49 = vrot.slane %v888_v10, 7  ;;  %v611_v21 = vld [vmem:[#allocation2 + $0x18] sm:$0x1] }
  0x83   : > { %v5951_v12 = vld [vmem:[#allocation2 + $0x70] sm:$0xff]  ;;  %953 = vst.msk [vmem:[#allocation2 + $0x14] sm:$0xf] %vm595_vm3, %v686_v2  ;;  %v536_v38 = vmax.f32 %v504_v35, 0.0  ;;  %v7110_v46 = vpack.c.bf16 %v535_v34, %v535_v34  ;;  %v648_v7 = vsel %vm6604_vm2, 0, %v647_v45  ;;  %v612_v45 = vsel %vm6604_vm2, 0, %v611_v21 }
  0x84   : > { %v986_v23 = vld [vmem:[#allocation2 + $0x58] sm:$0xf]  ;;  %1019 = vst.msk [vmem:[#allocation2 + $0xa0] sm:$0xf] %vm595_vm3, %v7053_v19  ;;  %v893_v41 = vor.u32 %v891_v20, %v890_v49  ;;  %5160 = vmatmul.msk.bf16.gmra.mxu3 %vm362_vm8, %v5951_v12  ;;  %v677_v49 = vor.u32 %v675_v8, %v674_v4  ;;  %v4797_v19 = vld [vmem:[%s6590_s3 + $0x30] sm:$0xff] }
  0x85   : > { %v987_v14 = vsel %vm6675_vm7, %v821_v25, %v986_v23  ;;  %1020 = vst.msk [vmem:[#allocation2 + $0xa4] sm:$0xf] %vm595_vm3, %v7055_v11  ;;  %v7126_v6 = vpack.c.bf16 %v536_v38, %v536_v38  ;;  %v688_v2 = vshrl.u32 %v7110_v46, 16  ;;  %v1111_v25 = vrot.slane %v659_v0, 5  ;;  %v6033_v23 = vld [vmem:[#allocation4 + $0x80] sm:$0xff]  ;;  %v6116_v11 = vld [vmem:[#allocation4 + $0x118] sm:$0xff] }
  0x86   : > { %988 = vst [vmem:[#allocation2 + $0x58] sm:$0xf] %v987_v14  ;;  %v894_v51 = vsel %vm6660_vm6, %v886_v60, %v893_v41  ;;  %v1059_v41 = vld [vmem:[#allocation2 + $0x12c] sm:$0x8]  ;;  %3095 = vmatpush.bf16.msrb.mxu0 %v6033_v23  ;;  %v1062_v23 = vld [vmem:[#allocation2 + $0x134] sm:$0x8] }
  0x87   : > { %649 = vst [vmem:[#allocation2 + $0x78] sm:$0x1] %v648_v7  ;;  %v690_v35 = vrot.slane %v688_v2, 7  ;;  %v696_v34 = vshrl.u32 %v7126_v6, 16  ;;  %v699_v12 = vshll.u32 %v7126_v6, 16  ;;  %v1112_v60 = vor.u32 %v1111_v25, %v1110_v62  ;;  %v6096_v7 = vld [vmem:[#allocation4 + $0xf8] sm:$0xff] }
  0x88   : > { %v5944_v38 = vld [vmem:[#allocation2 + $0x38] sm:$0xff]  ;;  %1005 = vst.msk [vmem:[#allocation2 + $0x7c] sm:$0xf] %vm595_vm3, %v894_v51  ;;  %v885_v62 = vor.u32 %v883_v29, %v882_v26  ;;  %v691_v25 = vshll.u32 %v7110_v46, 16  ;;  %4228 = vmatpush.bf16.msra.mxu3 %v6096_v7 }
  0x89   : > { %v950_v4 = vld [vmem:[#allocation2 + $0x10] sm:$0xf]  ;;  %1045 = vst.msk [vmem:[#allocation2 + $0x108] sm:$0xf] %vm595_vm3, %v7073_v30  ;;  %v694_v33 = vrot.slane %v690_v35, 4  ;;  %v698_v0 = vrot.slane %v696_v34, 7  ;;  %5153 = vmatmul.msk.bf16.gmra.mxu1 %vm362_vm8, %v5944_v38 }
  0x8a   : > { %v951_v21 = vsel %vm6675_vm7, %v677_v49, %v950_v4  ;;  %1046 = vst.msk [vmem:[#allocation2 + $0x10c] sm:$0xf] %vm595_vm3, %v7084_v9  ;;  %v1113_v49 = vrot.slane %v1112_v60, 4  ;;  %v1114_v60 = vrot.slane %v667_v15, 5  ;;  %v693_v36 = vor.u32 %v691_v25, %v690_v35  ;;  %4607 = vmatpush.bf16.msra.mxu0 %v6116_v11 }
  0x8b   : > { %952 = vst [vmem:[#allocation2 + $0x10] sm:$0xf] %v951_v21  ;;  %v701_v14 = vor.u32 %v699_v12, %v698_v0  ;;  %v1060_v21 = vsel %vm7157_vm12, 0, %v1059_v41 }
  0x8c   : > { %613 = vst [vmem:[#allocation2 + $0x18] sm:$0x1] %v612_v45  ;;  %v1116_v45 = vrot.slane %v664_v32, 4  ;;  %v1115_v15 = vsel %vm7163_vm14, %v1113_v49, %v1114_v60  ;;  %v1063_v32 = vsel %vm7157_vm12, 0, %v1062_v23  ;;  %v1123_v49 = vrot.slane %v683_v17, 5 }
  0x8d   : > { %v5948_v26 = vld [vmem:[#allocation2 + $0x58] sm:$0xff]  ;;  %v702_v4 = vsel %vm6660_vm6, %v694_v33, %v701_v14  ;;  %1021 = vst.msk [vmem:[#allocation2 + $0xa8] sm:$0xf] %vm595_vm3, %v7110_v46 }
  0x8e   : > { %v1002_v0 = vld [vmem:[#allocation2 + $0x78] sm:$0xf]  ;;  %957 = vst.msk [vmem:[#allocation2 + $0x1c] sm:$0xf] %vm595_vm3, %v702_v4  ;;  %5157 = vmatmul.msk.bf16.gmra.mxu2 %vm362_vm8, %v5948_v26  ;;  %v1117_v7 = vor.u32 %v1116_v45, %v1114_v60  ;;  %v1120_v26 = vrot.slane %v675_v8, 5  ;;  %v1125_v4 = vrot.slane %v680_v24, 4 }
  0x8f   : > { %v1003_v33 = vsel %vm6675_vm7, %v885_v62, %v1002_v0  ;;  %1022 = vst.msk [vmem:[#allocation2 + $0xac] sm:$0xf] %vm595_vm3, %v7126_v6  ;;  %v1119_v62 = vrot.slane %v672_v22, 4  ;;  %v5957_v0 = vld [vmem:[#allocation2 + $0x90] sm:$0xff] }
  0x90   : > { %1004 = vst [vmem:[#allocation2 + $0x78] sm:$0xf] %v1003_v33  ;;  %v1118_v60 = vrot.slane %v1117_v7, 4  ;;  %v1126_v22 = vor.u32 %v1125_v4, %v1123_v49  ;;  %v1065_v7 = vld [vmem:[#allocation2 + $0x13c] sm:$0x8]  ;;  %v5997_v4 = vld [vmem:[#allocation2 + $0x8] sm:$0xff] }
  0x91   : > { %1061 = vst [vmem:[#allocation2 + $0x12c] sm:$0x8] %v1060_v21  ;;  %v1121_v45 = vor.u32 %v1120_v26, %v1119_v62  ;;  %v1128_v62 = vrot.slane %v688_v2, 4  ;;  %v1129_v26 = vrot.slane %v691_v25, 5 }
  0x92   : > { %v5939_v41 = vld [vmem:[#allocation2 + $0x10] sm:$0xff]  ;;  %1286 = vst.msk [vmem:[#allocation2 + $0x128] sm:$0xf] %vm595_vm3, %v1115_v15  ;;  %v1127_v15 = vrot.slane %v1126_v22, 4 }
  0x93   : > { %v954_v14 = vld [vmem:[#allocation2 + $0x18] sm:$0xf]  ;;  %1064 = vst [vmem:[#allocation2 + $0x134] sm:$0x8] %v1063_v32  ;;  %5148 = vmatmul.msk.bf16.gmra.mxu0 %vm362_vm8, %v5939_v41  ;;  %v1122_v21 = vrot.slane %v1121_v45, 4 }
  0x94   : > { %v955_v35 = vsel %vm6675_vm7, %v693_v36, %v954_v14  ;;  %v5977_v36 = vld [vmem:[#allocation2 + $0x120] sm:$0xff]  ;;  %v1066_v14 = vsel %vm7157_vm12, 0, %v1065_v7 }
  0x95   : > { %956 = vst [vmem:[#allocation2 + $0x18] sm:$0xf] %v955_v35  ;;  %v1124_v17 = vsel %vm7163_vm14, %v1122_v21, %v1123_v49  ;;  %v1132_v35 = vrot.slane %v699_v12, 5  ;;  %v1134_v49 = vrot.slane %v696_v34, 4  ;;  %v1068_v34 = vld [vmem:[#allocation2 + $0x144] sm:$0x8] }
  0x96   : > { %1291 = vst.msk [vmem:[#allocation2 + $0x130] sm:$0xf] %vm595_vm3, %v1124_v17  ;;  %v6017_v12 = vld [vmem:[#allocation2 + $0x98] sm:$0xff]  ;;  %v1069_v25 = vsel %vm7157_vm12, 0, %v1068_v34  ;;  %v6018_v17 = vld [vmem:[#allocation2 + $0xa0] sm:$0xff]  ;;  %v5960_v7 = vld [vmem:[#allocation2 + $0xa8] sm:$0xff] }
  0x97   : > { %v5952_v8 = vld [vmem:[#allocation2 + $0x78] sm:$0xff]  ;;  %1067 = vst [vmem:[#allocation2 + $0x13c] sm:$0x8] %v1066_v14  ;;  %v1135_v45 = vor.u32 %v1134_v49, %v1132_v35  ;;  %v1137_v49 = vrot.slane %v704_v47, 4  ;;  %v6019_v47 = vld [vmem:[#allocation2 + $0xa8] sm:$0xff] }
  0x98   : > { %v1288_v33 = vld [vmem:[#allocation2 + $0x12c] sm:$0xf]  ;;  %5161 = vmatmul.msk.bf16.gmra.mxu3 %vm362_vm8, %v5952_v8  ;;  %1070 = vst [vmem:[#allocation2 + $0x144] sm:$0x8] %v1069_v25 }
  0x99   : > { %v1289_v24 = vsel %vm7201_vm15, %v1118_v60, %v1288_v33  ;;  %5242 = vmatmul.msk.bf16.vlgmr.msrb.gmra.mxu1 %vm362_vm8, %v5957_v0  ;;  %v1130_v60 = vor.u32 %v1129_v26, %v1128_v62  ;;  %v5958_v0 = vld [vmem:[#allocation2 + $0x98] sm:$0xff]  ;;  %v1136_v8 = vrot.slane %v1135_v45, 4  ;;  %v5998_v33 = vld [vmem:[#allocation2 + $0x10] sm:$0xff]  ;;  %v6095_v62 = vld [vmem:[#allocation4 + $0xf0] sm:$0xff]  ;;  %v8149_v45 = vshrl.u32 %v6642_v40, 16 }
  0x9a   : > { %1290 = vst [vmem:[#allocation2 + $0x12c] sm:$0xf] %v1289_v24  ;;  %v1292_v23 = vld [vmem:[#allocation2 + $0x134] sm:$0xf]  ;;  %v6448_v24 = vmov 0.0   ;;  %4229 = vmatpush.bf16.msra.mxu3 %v6095_v62 }
  0x9b   : > { %v1293_v32 = vsel %vm7201_vm15, %v1127_v15, %v1292_v23  ;;  %v1131_v22 = vrot.slane %v1130_v60, 4  ;;  %v5959_v15 = vld [vmem:[#allocation2 + $0xa0] sm:$0xff]  ;;  %371 = vst.msk [vmem:[#allocation3 + $0x40] sm:$0xff] %vm362_vm8, %v6448_v24  ;;  %v1141_v60 = vrot.slane %v715_v50, 5 }
  0x9c   : > { %1294 = vst [vmem:[#allocation2 + $0x134] sm:$0xf] %v1293_v32  ;;  %v5940_v41 = vld [vmem:[#allocation2 + $0x18] sm:$0xff]  ;;  %v6055_v23 = vld [vmem:[#allocation4 + $0xb0] sm:$0xff] }
  0x9d   : > { %v1133_v46 = vsel %vm7163_vm14, %v1131_v22, %v1132_v35  ;;  %363 = vst.msk [vmem:[#allocation3] sm:$0xff] %vm362_vm8, %v6448_v24  ;;  %v5999_v32 = vld [vmem:[#allocation2 + $0x18] sm:$0xff]  ;;  %3471 = vmatpush.bf16.msra.mxu1 %v6055_v23 }
  0x9e   : > { %5338 = vmatmul.msk.bf16.vlgmr.msrb.gmra.mxu2 %vm362_vm8, %v5977_v36  ;;  %v1296_v21 = vld [vmem:[#allocation2 + $0x13c] sm:$0xf]  ;;  %1295 = vst.msk [vmem:[#allocation2 + $0x138] sm:$0xf] %vm595_vm3, %v1133_v46  ;;  %v6075_v36 = vld [vmem:[#allocation4 + $0xd0] sm:$0xff]  ;;  %v8151_v46 = vshll.u32 %v6730_v43, 16 }
  0x9f   : > { %v1297_v2 = vsel %vm7201_vm15, %v1136_v8, %v1296_v21  ;;  %364 = vst.msk [vmem:[#allocation3 + $0x8] sm:$0xff] %vm362_vm8, %v6448_v24  ;;  %3850 = vmatpush.bf16.msra.mxu2 %v6075_v36  ;;  %v8150_v8 = vshrl.u32 %v6730_v43, 16  ;;  %v1300_v25 = vld [vmem:[#allocation2 + $0x144] sm:$0xf] }
  0xa0   : > { %1298 = vst [vmem:[#allocation2 + $0x13c] sm:$0xf] %v1297_v2  ;;  %v1147_v2 = vrot.slane %v8151_v46, 5  ;;  %v8155_v46 = vshrl.u32 %v6732_v44, 16 }
  0xa1   : > { %v5978_v6 = vld [vmem:[#allocation2 + $0x128] sm:$0xff]  ;;  %365 = vst.msk [vmem:[#allocation3 + $0x10] sm:$0xff] %vm362_vm8, %v6448_v24  ;;  %v1146_v21 = vrot.slane %v8150_v8, 4  ;;  %v8154_v8 = vshll.u32 %v6732_v44, 16 }
  0xa2   : > { %366 = vst.msk [vmem:[#allocation3 + $0x18] sm:$0xff] %vm362_vm8, %v6448_v24 }
  0xa3   : > { %5149 = vmatmul.msk.bf16.gmra.mxu0 %vm362_vm8, %v5940_v41  ;;  %v5979_v11 = vld [vmem:[#allocation2 + $0x130] sm:$0xff]  ;;  %367 = vst.msk [vmem:[#allocation3 + $0x20] sm:$0xff] %vm362_vm8, %v6448_v24  ;;  %v1148_v23 = vor.u32 %v1147_v2, %v1146_v21  ;;  %v1150_v21 = vrot.slane %v8154_v8, 5  ;;  %v1152_v2 = vrot.slane %v8155_v46, 4  ;;  %v5962_v8 = vld [vmem:[#allocation2 + $0xb8] sm:$0xff] }
  0xa4   : > { %368 = vst.msk [vmem:[#allocation3 + $0x28] sm:$0xff] %vm362_vm8, %v6448_v24  ;;  %v1391_v41 = vld [vmem:[#allocation3 + $0x40] sm:$0xff] }
  0xa5   : > { %369 = vst.msk [vmem:[#allocation3 + $0x30] sm:$0xff] %vm362_vm8, %v6448_v24 }
  0xa6   : > { %370 = vst.msk [vmem:[#allocation3 + $0x38] sm:$0xff] %vm362_vm8, %v6448_v24 }
  0xa7   : > { %372 = vst.msk [vmem:[#allocation3 + $0x48] sm:$0xff] %vm362_vm8, %v6448_v24  ;;  %v5980_v35 = vld [vmem:[#allocation2 + $0x138] sm:$0xff] }
  0xa8   : > { %5434 = vmatmul.msk.bf16.vlgmr.msrb.gmra.mxu3 %vm362_vm8, %v5997_v4  ;;  %373 = vst.msk [vmem:[#allocation3 + $0x50] sm:$0xff] %vm362_vm8, %v6448_v24  ;;  %v1138_v4 = vrot.slane %v707_v48, 5 }
  0xa9   : > { %5243 = vmatmul.msk.bf16.gmra.mxu1 %vm362_vm8, %v5958_v0  ;;  %374 = vst.msk [vmem:[#allocation3 + $0x58] sm:$0xff] %vm362_vm8, %v6448_v24  ;;  %v1143_v0 = vrot.slane %v8149_v45, 4 }
  0xaa   : > { %375 = vst.msk [vmem:[#allocation3 + $0x60] sm:$0xff] %vm362_vm8, %v6448_v24  ;;  %v1139_v39 = vor.u32 %v1138_v4, %v1137_v49  ;;  %v6115_v4 = vld [vmem:[#allocation4 + $0x110] sm:$0xff] }
  0xab   : > { %376 = vst.msk [vmem:[#allocation3 + $0x68] sm:$0xff] %vm362_vm8, %v6448_v24  ;;  %v1144_v48 = vor.u32 %v1143_v0, %v1141_v60  ;;  %v8153_v0 = vshll.u32 %v6830_v58, 16  ;;  %4608 = vmatpush.bf16.msra.mxu0 %v6115_v4  ;;  %v8157_v4 = vshrl.u32 %v6832_v59, 16 }
  0xac   : > { %377 = vst.msk [vmem:[#allocation3 + $0x70] sm:$0xff] %vm362_vm8, %v6448_v24  ;;  %v1140_v22 = vrot.slane %v1139_v39, 4 }
  0xad   : > { %378 = vst.msk [vmem:[#allocation3 + $0x78] sm:$0xff] %vm362_vm8, %v6448_v24  ;;  %v1156_v39 = vrot.slane %v8153_v0, 5 }
  0xae   : > { %5339 = vmatmul.msk.bf16.gmra.mxu2 %vm362_vm8, %v5978_v6  ;;  %379 = vst.msk [vmem:[#allocation3 + $0x80] sm:$0xff] %vm362_vm8, %v6448_v24  ;;  %v1145_v6 = vrot.slane %v1144_v48, 4  ;;  %v1392_v43 = vld [vmem:[#allocation3 + $0x48] sm:$0xff]  ;;  %v1149_v48 = vrot.slane %v1148_v23, 4  ;;  %v1153_v23 = vor.u32 %v1152_v2, %v1150_v21  ;;  %v8161_v2 = vshrl.u32 %v6985_v27, 16 }
  0xaf   : > { %380 = vst.msk [vmem:[#allocation3 + $0x88] sm:$0xff] %vm362_vm8, %v6448_v24  ;;  %v1393_v62 = vld [vmem:[#allocation3 + $0x50] sm:$0xff] }
  0xb0   : > { %381 = vst.msk [vmem:[#allocation3 + $0x90] sm:$0xff] %vm362_vm8, %v6448_v24  ;;  %v1301_v36 = vsel %vm7201_vm15, %v1145_v6, %v1300_v25 }
  0xb1   : > { %382 = vst.msk [vmem:[#allocation3 + $0x98] sm:$0xff] %vm362_vm8, %v6448_v24 }
  0xb2   : > { %383 = vst.msk [vmem:[#allocation3 + $0xa0] sm:$0xff] %vm362_vm8, %v6448_v24 }
  0xb3   : > { %5530 = vmatmul.msk.bf16.vlgmr.msrb.gmra.mxu0 %vm362_vm8, %v6017_v12  ;;  %384 = vst.msk [vmem:[#allocation3 + $0xa8] sm:$0xff] %vm362_vm8, %v6448_v24  ;;  %v6000_v12 = vld [vmem:[#allocation2 + $0x20] sm:$0xff] }
  0xb4   : > { %385 = vst.msk [vmem:[#allocation3 + $0xb0] sm:$0xff] %vm362_vm8, %v6448_v24 }
  0xb5   : > { %386 = vst.msk [vmem:[#allocation3 + $0xb8] sm:$0xff] %vm362_vm8, %v6448_v24 }
  0xb6   : > { %387 = vst.msk [vmem:[#allocation3 + $0xc0] sm:$0xff] %vm362_vm8, %v6448_v24 }
  0xb7   : > { %388 = vst.msk [vmem:[#allocation3 + $0xc8] sm:$0xff] %vm362_vm8, %v6448_v24 }
  0xb8   : > { %5435 = vmatmul.msk.bf16.gmra.mxu3 %vm362_vm8, %v5998_v33  ;;  %389 = vst.msk [vmem:[#allocation3 + $0xd0] sm:$0xff] %vm362_vm8, %v6448_v24  ;;  %v1399_v33 = vld [vmem:[#allocation3 + $0x80] sm:$0xff] }
  0xb9   : > { %5244 = vmatmul.msk.bf16.gmra.mxu1 %vm362_vm8, %v5959_v15  ;;  %390 = vst.msk [vmem:[#allocation3 + $0xd8] sm:$0xff] %vm362_vm8, %v6448_v24 }
  0xba   : > { %391 = vst.msk [vmem:[#allocation3 + $0xe0] sm:$0xff] %vm362_vm8, %v6448_v24 }
  0xbb   : > { %392 = vst.msk [vmem:[#allocation3 + $0xe8] sm:$0xff] %vm362_vm8, %v6448_v24 }
  0xbc   : > { %393 = vst.msk [vmem:[#allocation3 + $0xf0] sm:$0xff] %vm362_vm8, %v6448_v24 }
  0xbd   : > { %394 = vst.msk [vmem:[#allocation3 + $0xf8] sm:$0xff] %vm362_vm8, %v6448_v24  ;;  %v1071_v24 = vld [vmem:[#allocation2 + $0x14c] sm:$0x8] }
  0xbe   : > { %5340 = vmatmul.msk.bf16.gmra.mxu2 %vm362_vm8, %v5979_v11  ;;  %v5961_v11 = vld [vmem:[#allocation2 + $0xb0] sm:$0xff]  ;;  %1302 = vst [vmem:[#allocation2 + $0x144] sm:$0xf] %v1301_v36  ;;  %v1072_v6 = vsel %vm7157_vm12, 0, %v1071_v24  ;;  %v6001_v24 = vld [vmem:[#allocation2 + $0x28] sm:$0xff] }
  0xbf   : > { %1073 = vst [vmem:[#allocation2 + $0x14c] sm:$0x8] %v1072_v6 }
  0xc3   : > { %5531 = vmatmul.msk.bf16.gmra.mxu0 %vm362_vm8, %v6018_v17  ;;  %v1142_v17 = vsel %vm7163_vm14, %v1140_v22, %v1141_v60  ;;  %v8152_v60 = vshrl.u32 %v6830_v58, 16  ;;  %v1383_v58 = vld [vmem:[#allocation3] sm:$0xff] }
  0xc4   : > { %1299 = vst.msk [vmem:[#allocation2 + $0x140] sm:$0xf] %vm595_vm3, %v1142_v17  ;;  %v6020_v17 = vld [vmem:[#allocation2 + $0xb0] sm:$0xff] }
  0xc5   : > { %v1155_v45 = vrot.slane %v8152_v60, 4  ;;  %v1161_v60 = vrot.slane %v8157_v4, 4 }
  0xc6   : > { %v1304_v6 = vld [vmem:[#allocation2 + $0x14c] sm:$0xf] }
  0xc8   : > { %5436 = vmatmul.msk.bf16.gmra.mxu3 %vm362_vm8, %v5999_v32 }
  0xc9   : > { %5245 = vmatmul.msk.bf16.gmra.mxu1 %vm362_vm8, %v5960_v7  ;;  %v1400_v7 = vld [vmem:[#allocation3 + $0x88] sm:$0xff] }
  0xca   : > { %v1605_v14 = vpop.f32.mrf.mxu1 }
  0xcb   : > { %v1673_v26 = vadd.f32 %v1605_v14, %v1391_v41  ;;  %v1407_v14 = vld [vmem:[#allocation3 + $0xc0] sm:$0xff] }
  0xcd   : > { %1705 = vst.msk [vmem:[#allocation3 + $0x40] sm:$0xff] %vm362_vm8, %v1673_v26 }
  0xce   : > { %5341 = vmatmul.msk.bf16.gmra.mxu2 %vm362_vm8, %v5980_v35 }
  0xd2   : > { %v1607_v40 = vpop.f32.mrf.mxu1  ;;  %v1625_v50 = vpop.f32.mrf.mxu2 }
  0xd3   : > { %5532 = vmatmul.msk.bf16.gmra.mxu0 %vm362_vm8, %v6019_v47  ;;  %v1681_v32 = vadd.f32 %v1625_v50, %v1399_v33  ;;  %v1674_v41 = vadd.f32 %v1607_v40, %v1392_v43  ;;  %v1408_v50 = vld [vmem:[#allocation3 + $0xc8] sm:$0xff]  ;;  %v1394_v33 = vld [vmem:[#allocation3 + $0x58] sm:$0xff] }
  0xd4   : > { %v1645_v34 = vpop.f32.mrf.mxu3  ;;  %v1585_v15 = vpop.f32.mrf.mxu0 }
  0xd5   : > { %v1689_v35 = vadd.f32 %v1645_v34, %v1407_v14  ;;  %1713 = vst.msk [vmem:[#allocation3 + $0x80] sm:$0xff] %vm362_vm8, %v1681_v32  ;;  %v1157_v34 = vor.u32 %v1156_v39, %v1155_v45  ;;  %v1665_v44 = vadd.f32 %v1585_v15, %v1383_v58  ;;  %v1074_v32 = vld [vmem:[#allocation2 + $0x154] sm:$0x8]  ;;  %v8158_v45 = vshrl.u32 %v6980_v3, 16 }
  0xd6   : > { %1706 = vst.msk [vmem:[#allocation3 + $0x48] sm:$0xff] %vm362_vm8, %v1674_v41  ;;  %v1401_v41 = vld [vmem:[#allocation3 + $0x90] sm:$0xff]  ;;  %v8159_v39 = vshll.u32 %v6980_v3, 16  ;;  %v8160_v3 = vshll.u32 %v6985_v27, 16  ;;  %v1170_v58 = vrot.slane %v8161_v2, 4 }
  0xd7   : > { %1721 = vst.msk [vmem:[#allocation3 + $0xc0] sm:$0xff] %vm362_vm8, %v1689_v35  ;;  %v8156_v35 = vshll.u32 %v6832_v59, 16  ;;  %v1164_v0 = vrot.slane %v8158_v45, 4 }
  0xd8   : > { %5437 = vmatmul.msk.bf16.gmra.mxu3 %vm362_vm8, %v6000_v12  ;;  %v1151_v12 = vsel %vm7163_vm14, %v1149_v48, %v1150_v21  ;;  %1697 = vst.msk [vmem:[#allocation3] sm:$0xff] %vm362_vm8, %v1665_v44  ;;  %v1154_v48 = vrot.slane %v1153_v23, 4  ;;  %v1168_v46 = vrot.slane %v8160_v3, 5  ;;  %v5963_v3 = vld [vmem:[#allocation2 + $0xc0] sm:$0xff] }
  0xd9   : > { %5246 = vmatmul.msk.bf16.gmra.mxu1 %vm362_vm8, %v5961_v11  ;;  %v1384_v11 = vld [vmem:[#allocation3 + $0x8] sm:$0xff]  ;;  %1303 = vst.msk [vmem:[#allocation2 + $0x148] sm:$0xf] %vm595_vm3, %v1151_v12 }
  0xda   : > { %v1610_v26 = vpop.f32.mrf.mxu1  ;;  %v1627_v49 = vpop.f32.mrf.mxu2 }
  0xdb   : > { %v1682_v47 = vadd.f32 %v1627_v49, %v1400_v7  ;;  %v1675_v40 = vadd.f32 %v1610_v26, %v1393_v62  ;;  %v5981_v7 = vld [vmem:[#allocation2 + $0x140] sm:$0xff]  ;;  %v1158_v26 = vrot.slane %v1157_v34, 4  ;;  %v1159_v49 = vrot.slane %v8156_v35, 5 }
  0xdc   : > { %v1647_v22 = vpop.f32.mrf.mxu3  ;;  %v1587_v43 = vpop.f32.mrf.mxu0 }
  0xdd   : > { %1714 = vst.msk [vmem:[#allocation3 + $0x88] sm:$0xff] %vm362_vm8, %v1682_v47  ;;  %v1690_v25 = vadd.f32 %v1647_v22, %v1408_v50  ;;  %v1666_v62 = vadd.f32 %v1587_v43, %v1384_v11  ;;  %v1165_v47 = vrot.slane %v8159_v39, 5  ;;  %v1075_v50 = vsel %vm7157_vm12, 0, %v1074_v32  ;;  %v1077_v22 = vld [vmem:[#allocation2 + $0x15c] sm:$0x8]  ;;  %v1402_v11 = vld [vmem:[#allocation3 + $0x98] sm:$0xff] }
  0xde   : > { %1707 = vst.msk [vmem:[#allocation3 + $0x50] sm:$0xff] %vm362_vm8, %v1675_v40  ;;  %5342 = vmatmul.msk.bf16.gmra.mxu2 %vm362_vm8, %v5981_v7  ;;  %v1160_v59 = vsel %vm7163_vm14, %v1158_v26, %v1159_v49  ;;  %v1162_v34 = vor.u32 %v1161_v60, %v1159_v49  ;;  %v1078_v12 = vsel %vm7157_vm12, 0, %v1077_v22  ;;  %v1171_v43 = vor.u32 %v1170_v58, %v1168_v46  ;;  %v6021_v7 = vld [vmem:[#allocation2 + $0xb8] sm:$0xff]  ;;  %v1395_v26 = vld [vmem:[#allocation3 + $0x60] sm:$0xff]  ;;  %v1409_v60 = vld [vmem:[#allocation3 + $0xd0] sm:$0xff] }
  0xdf   : > { %1722 = vst.msk [vmem:[#allocation3 + $0xc8] sm:$0xff] %vm362_vm8, %v1690_v25  ;;  %v1166_v21 = vor.u32 %v1165_v47, %v1164_v0  ;;  %v8162_v49 = vshrl.u32 %v6653_v54, 16  ;;  %v8163_v47 = vshrl.u32 %v6651_v53, 16  ;;  %v1396_v58 = vld [vmem:[#allocation3 + $0x68] sm:$0xff] }
  0xe0   : > { %1698 = vst.msk [vmem:[#allocation3 + $0x8] sm:$0xff] %vm362_vm8, %v1666_v62  ;;  %v1163_v44 = vrot.slane %v1162_v34, 4  ;;  %v1172_v32 = vrot.slane %v1171_v43, 4 }
  0xe1   : > { %1076 = vst [vmem:[#allocation2 + $0x154] sm:$0x8] %v1075_v50  ;;  %v1167_v25 = vrot.slane %v1166_v21, 4  ;;  %v1179_v4 = vrot.slane %v8162_v49, 4  ;;  %v8164_v50 = vshll.u32 %v6651_v53, 16  ;;  %v1410_v53 = vld [vmem:[#allocation3 + $0xd8] sm:$0xff] }
  0xe2   : > { %v1612_v36 = vpop.f32.mrf.mxu1  ;;  %1307 = vst.msk [vmem:[#allocation2 + $0x150] sm:$0xf] %vm595_vm3, %v1160_v59  ;;  %v1386_v49 = vld [vmem:[#allocation3 + $0x18] sm:$0xff] }
  0xe3   : > { %v1676_v14 = vadd.f32 %v1612_v36, %v1394_v33  ;;  %5533 = vmatmul.msk.bf16.gmra.mxu0 %vm362_vm8, %v6020_v17  ;;  %v1630_v15 = vpop.f32.mrf.mxu2  ;;  %v1305_v33 = vsel %vm7201_vm15, %v1154_v48, %v1304_v6  ;;  %v1169_v27 = vsel %vm7163_vm14, %v1167_v25, %v1168_v46  ;;  %1079 = vst [vmem:[#allocation2 + $0x15c] sm:$0x8] %v1078_v12  ;;  %v6002_v48 = vld [vmem:[#allocation2 + $0x30] sm:$0xff]  ;;  %v1174_v22 = vrot.slane %v8164_v50, 5  ;;  %v1385_v25 = vld [vmem:[#allocation3 + $0x10] sm:$0xff] }
  0xe4   : > { %v1683_v40 = vadd.f32 %v1630_v15, %v1401_v41  ;;  %1306 = vst [vmem:[#allocation2 + $0x14c] sm:$0xf] %v1305_v33 }
  0xe5   : > { %1708 = vst.msk [vmem:[#allocation3 + $0x58] sm:$0xff] %vm362_vm8, %v1676_v14  ;;  %v1080_v14 = vld [vmem:[#allocation2 + $0x164] sm:$0x8] }
  0xe6   : > { %1715 = vst.msk [vmem:[#allocation3 + $0x90] sm:$0xff] %vm362_vm8, %v1683_v40  ;;  %v1081_v15 = vsel %vm7157_vm12, 0, %v1080_v14  ;;  %v6022_v14 = vld [vmem:[#allocation2 + $0xc0] sm:$0xff] }
  0xe7   : > { %1311 = vst.msk [vmem:[#allocation2 + $0x158] sm:$0xf] %vm595_vm3, %v1169_v27  ;;  %v1403_v27 = vld [vmem:[#allocation3 + $0xa0] sm:$0xff] }
  0xe8   : > { %5438 = vmatmul.msk.bf16.gmra.mxu3 %vm362_vm8, %v6001_v24  ;;  %v1308_v36 = vld [vmem:[#allocation2 + $0x154] sm:$0xf]  ;;  %1082 = vst [vmem:[#allocation2 + $0x164] sm:$0x8] %v1081_v15  ;;  %v1173_v24 = vrot.slane %v8163_v47, 4  ;;  %v8166_v15 = vshrl.u32 %v6780_v42, 16 }
  0xe9   : > { %5247 = vmatmul.msk.bf16.gmra.mxu1 %vm362_vm8, %v5962_v8  ;;  %v1309_v41 = vsel %vm7201_vm15, %v1163_v44, %v1308_v36  ;;  %v8165_v8 = vshll.u32 %v6653_v54, 16 }
  0xea   : > { %1310 = vst [vmem:[#allocation2 + $0x154] sm:$0xf] %v1309_v41  ;;  %v1312_v35 = vld [vmem:[#allocation2 + $0x15c] sm:$0xf]  ;;  %v1175_v46 = vor.u32 %v1174_v22, %v1173_v24  ;;  %v8169_v24 = vshll.u32 %v6780_v42, 16  ;;  %v1397_v22 = vld [vmem:[#allocation3 + $0x70] sm:$0xff] }
  0xeb   : > { %v1632_v17 = vpop.f32.mrf.mxu2  ;;  %v5982_v62 = vld [vmem:[#allocation2 + $0x148] sm:$0xff]  ;;  %v1313_v0 = vsel %vm7201_vm15, %v1172_v32, %v1312_v35  ;;  %v1177_v59 = vrot.slane %v8165_v8, 5  ;;  %v1188_v35 = vrot.slane %v8166_v15, 4  ;;  %v1411_v8 = vld [vmem:[#allocation3 + $0xe0] sm:$0xff] }
  0xec   : > { %v1684_v23 = vadd.f32 %v1632_v17, %v1402_v11  ;;  %1314 = vst [vmem:[#allocation2 + $0x15c] sm:$0xf] %v1313_v0  ;;  %v1176_v6 = vrot.slane %v1175_v46, 4 }
  0xed   : > { %v1180_v2 = vor.u32 %v1179_v4, %v1177_v59  ;;  %v1404_v4 = vld [vmem:[#allocation3 + $0xa8] sm:$0xff] }
  0xee   : > { %1716 = vst.msk [vmem:[#allocation3 + $0x98] sm:$0xff] %vm362_vm8, %v1684_v23  ;;  %5343 = vmatmul.msk.bf16.gmra.mxu2 %vm362_vm8, %v5982_v62  ;;  %v1178_v33 = vsel %vm7163_vm14, %v1176_v6, %v1177_v59  ;;  %v1083_v62 = vld [vmem:[#allocation2 + $0x16c] sm:$0x8] }
  0xef   : > { %v1181_v34 = vrot.slane %v1180_v2, 4  ;;  %v1316_v12 = vld [vmem:[#allocation2 + $0x164] sm:$0xf]  ;;  %1315 = vst.msk [vmem:[#allocation2 + $0x160] sm:$0xf] %vm595_vm3, %v1178_v33 }
  0xf1   : > { %v1317_v11 = vsel %vm7201_vm15, %v1181_v34, %v1316_v12  ;;  %v5983_v41 = vld [vmem:[#allocation2 + $0x150] sm:$0xff]  ;;  %v6074_v34 = vld [vmem:[#allocation4 + $0xc8] sm:$0xff] }
  0xf2   : > { %v1615_v45 = vpop.f32.mrf.mxu1  ;;  %1318 = vst [vmem:[#allocation2 + $0x164] sm:$0xf] %v1317_v11  ;;  %3851 = vmatpush.bf16.msra.mxu2 %v6074_v34 }
  0xf3   : > { %5534 = vmatmul.msk.bf16.gmra.mxu0 %vm362_vm8, %v6021_v7  ;;  %v1677_v39 = vadd.f32 %v1615_v45, %v1395_v26  ;;  %v1084_v26 = vsel %vm7157_vm12, 0, %v1083_v62  ;;  %v8167_v45 = vshrl.u32 %v6766_v31, 16  ;;  %v1086_v62 = vld [vmem:[#allocation2 + $0x174] sm:$0x8] }
  0xf4   : > { %v1650_v40 = vpop.f32.mrf.mxu3  ;;  %1085 = vst [vmem:[#allocation2 + $0x16c] sm:$0x8] %v1084_v26 }
  0xf5   : > { %v1691_v21 = vadd.f32 %v1650_v40, %v1409_v60  ;;  %1709 = vst.msk [vmem:[#allocation3 + $0x60] sm:$0xff] %vm362_vm8, %v1677_v39  ;;  %v6054_v60 = vld [vmem:[#allocation4 + $0xa8] sm:$0xff]  ;;  %v1182_v0 = vrot.slane %v8167_v45, 4  ;;  %v8168_v39 = vshll.u32 %v6766_v31, 16 }
  0xf6   : > { %v6003_v40 = vld [vmem:[#allocation2 + $0x38] sm:$0xff]  ;;  %3472 = vmatpush.bf16.msra.mxu1 %v6054_v60 }
  0xf7   : > { %1723 = vst.msk [vmem:[#allocation3 + $0xd0] sm:$0xff] %vm362_vm8, %v1691_v21  ;;  %v1183_v47 = vrot.slane %v8168_v39, 5  ;;  %v8171_v39 = vshrl.u32 %v6860_v18, 16 }
  0xf8   : > { %5439 = vmatmul.msk.bf16.gmra.mxu3 %vm362_vm8, %v6002_v48  ;;  %v1186_v48 = vrot.slane %v8169_v24, 5  ;;  %v8172_v24 = vshll.u32 %v6860_v18, 16 }
  0xf9   : > { %5248 = vmatmul.msk.bf16.gmra.mxu1 %vm362_vm8, %v5963_v3  ;;  %v5964_v3 = vld [vmem:[#allocation2 + $0xc8] sm:$0xff]  ;;  %v1184_v46 = vor.u32 %v1183_v47, %v1182_v0  ;;  %v1087_v0 = vsel %vm7157_vm12, 0, %v1086_v62  ;;  %v1191_v47 = vrot.slane %v8171_v39, 4  ;;  %v6114_v62 = vld [vmem:[#allocation4 + $0x108] sm:$0xff]  ;;  %v8175_v39 = vshrl.u32 %v7014_v5, 16 }
  0xfa   : > { %v1617_v54 = vpop.f32.mrf.mxu1  ;;  %v1189_v2 = vor.u32 %v1188_v35, %v1186_v48  ;;  %v8170_v35 = vshrl.u32 %v6873_v37, 16  ;;  %1088 = vst [vmem:[#allocation2 + $0x174] sm:$0x8] %v1087_v0  ;;  %4609 = vmatpush.bf16.msra.mxu0 %v6114_v62 }
  0xfb   : > { %v1678_v43 = vadd.f32 %v1617_v54, %v1396_v58  ;;  %v1320_v33 = vld [vmem:[#allocation2 + $0x16c] sm:$0xf] }
  0xfc   : > { %v1652_v17 = vpop.f32.mrf.mxu3  ;;  %v1590_v44 = vpop.f32.mrf.mxu0  ;;  %v1190_v42 = vrot.slane %v1189_v2, 4 }
  0xfd   : > { %v1692_v23 = vadd.f32 %v1652_v17, %v1410_v53  ;;  %v1667_v36 = vadd.f32 %v1590_v44, %v1385_v25  ;;  %v1635_v32 = vpop.f32.mrf.mxu2  ;;  %1710 = vst.msk [vmem:[#allocation3 + $0x68] sm:$0xff] %vm362_vm8, %v1678_v43  ;;  %v1185_v53 = vrot.slane %v1184_v46, 4  ;;  %v1412_v43 = vld [vmem:[#allocation3 + $0xe8] sm:$0xff]  ;;  %v1387_v17 = vld [vmem:[#allocation3 + $0x20] sm:$0xff]  ;;  %v1405_v44 = vld [vmem:[#allocation3 + $0xb0] sm:$0xff] }
  0xfe   : > { %v1685_v7 = vadd.f32 %v1635_v32, %v1403_v27  ;;  %5344 = vmatmul.msk.bf16.gmra.mxu2 %vm362_vm8, %v5983_v41  ;;  %v1321_v11 = vsel %vm7201_vm15, %v1190_v42, %v1320_v33  ;;  %v1398_v27 = vld [vmem:[#allocation3 + $0x78] sm:$0xff]  ;;  %v5984_v32 = vld [vmem:[#allocation2 + $0x158] sm:$0xff]  ;;  %v1761_v46 = vld [vmem:[#allocation3] sm:$0xff] }
  0xff   : > { %1724 = vst.msk [vmem:[#allocation3 + $0xd8] sm:$0xff] %vm362_vm8, %v1692_v23  ;;  %v1187_v54 = vsel %vm7163_vm14, %v1185_v53, %v1186_v48  ;;  %v1192_v48 = vrot.slane %v8172_v24, 5  ;;  %v8176_v24 = vshll.u32 %v7014_v5, 16 }
 0x100   : > { %1699 = vst.msk [vmem:[#allocation3 + $0x10] sm:$0xff] %vm362_vm8, %v1667_v36  ;;  %v6094_v36 = vld [vmem:[#allocation4 + $0xe8] sm:$0xff] }
 0x101   : > { %1717 = vst.msk [vmem:[#allocation3 + $0xa0] sm:$0xff] %vm362_vm8, %v1685_v7  ;;  %4230 = vmatpush.bf16.msra.mxu3 %v6094_v36 }
 0x102   : > { %1319 = vst.msk [vmem:[#allocation2 + $0x168] sm:$0xf] %vm595_vm3, %v1187_v54 }
 0x103   : > { %5535 = vmatmul.msk.bf16.gmra.mxu0 %vm362_vm8, %v6022_v14  ;;  %1322 = vst [vmem:[#allocation2 + $0x16c] sm:$0xf] %v1321_v11  ;;  %v6023_v14 = vld [vmem:[#allocation2 + $0xc8] sm:$0xff]  ;;  %v1324_v11 = vld [vmem:[#allocation2 + $0x174] sm:$0xf] }
 0x104   : > { %v1592_v50 = vpop.f32.mrf.mxu0 }
 0x105   : > { %v1668_v59 = vadd.f32 %v1592_v50, %v1386_v49  ;;  %v1637_v21 = vpop.f32.mrf.mxu2  ;;  %v1197_v49 = vrot.slane %v8170_v35, 4 }
 0x106   : > { %v1686_v58 = vadd.f32 %v1637_v21, %v1404_v4  ;;  %v1620_v6 = vpop.f32.mrf.mxu1 }
 0x107   : > { %v1655_v12 = vpop.f32.mrf.mxu3  ;;  %1700 = vst.msk [vmem:[#allocation3 + $0x18] sm:$0xff] %vm362_vm8, %v1668_v59  ;;  %v1679_v31 = vadd.f32 %v1620_v6, %v1397_v22  ;;  %v6004_v22 = vld [vmem:[#allocation2 + $0x40] sm:$0xff]  ;;  %v1193_v59 = vor.u32 %v1192_v48, %v1191_v47  ;;  %v1200_v47 = vrot.slane %v8175_v39, 4  ;;  %v1201_v48 = vrot.slane %v8176_v24, 5 }
 0x108   : > { %5440 = vmatmul.msk.bf16.gmra.mxu3 %vm362_vm8, %v6003_v40  ;;  %v1693_v25 = vadd.f32 %v1655_v12, %v1411_v8  ;;  %1718 = vst.msk [vmem:[#allocation3 + $0xa8] sm:$0xff] %vm362_vm8, %v1686_v58  ;;  %v8173_v40 = vshll.u32 %v6873_v37, 16  ;;  %v5965_v8 = vld [vmem:[#allocation2 + $0xd0] sm:$0xff]  ;;  %v1406_v58 = vld [vmem:[#allocation3 + $0xb8] sm:$0xff]  ;;  %v1413_v12 = vld [vmem:[#allocation3 + $0xf0] sm:$0xff]  ;;  %v8181_v39 = vshll.u32 %v6670_v61, 16 }
 0x109   : > { %1711 = vst.msk [vmem:[#allocation3 + $0x70] sm:$0xff] %vm362_vm8, %v1679_v31  ;;  %5249 = vmatmul.msk.bf16.gmra.mxu1 %vm362_vm8, %v5964_v3  ;;  %v1388_v3 = vld [vmem:[#allocation3 + $0x28] sm:$0xff]  ;;  %v1194_v34 = vrot.slane %v1193_v59, 4 }
 0x10a   : > { %1725 = vst.msk [vmem:[#allocation3 + $0xe0] sm:$0xff] %vm362_vm8, %v1693_v25  ;;  %v1195_v50 = vrot.slane %v8173_v40, 5  ;;  %v8177_v40 = vshll.u32 %v7020_v52, 16  ;;  %v5966_v59 = vld [vmem:[#allocation2 + $0xd8] sm:$0xff] }
 0x10c   : > { %v1198_v21 = vor.u32 %v1197_v49, %v1195_v50  ;;  %v1196_v53 = vsel %vm7163_vm14, %v1194_v34, %v1195_v50  ;;  %v1414_v49 = vld [vmem:[#allocation3 + $0xf8] sm:$0xff]  ;;  %v1204_v50 = vrot.slane %v8177_v40, 5 }
 0x10d   : > { %1323 = vst.msk [vmem:[#allocation2 + $0x170] sm:$0xf] %vm595_vm3, %v1196_v53 }
 0x10e   : > { %v1622_v23 = vpop.f32.mrf.mxu1  ;;  %5345 = vmatmul.msk.bf16.gmra.mxu2 %vm362_vm8, %v5984_v32  ;;  %v1199_v42 = vrot.slane %v1198_v21, 4  ;;  %v6024_v32 = vld [vmem:[#allocation2 + $0xd0] sm:$0xff]  ;;  %v1202_v21 = vor.u32 %v1201_v48, %v1200_v47  ;;  %v1213_v47 = vrot.slane %v8181_v39, 5  ;;  %v6007_v39 = vld [vmem:[#allocation2 + $0x58] sm:$0xff] }
 0x10f   : > { %v1657_v7 = vpop.f32.mrf.mxu3  ;;  %v1680_v41 = vadd.f32 %v1622_v23, %v1398_v27  ;;  %v5985_v23 = vld [vmem:[#allocation2 + $0x160] sm:$0xff]  ;;  %v6006_v48 = vld [vmem:[#allocation2 + $0x50] sm:$0xff] }
 0x110   : > { %v1694_v26 = vadd.f32 %v1657_v7, %v1412_v43  ;;  %v1595_v15 = vpop.f32.mrf.mxu0  ;;  %v1325_v27 = vsel %vm7201_vm15, %v1199_v42, %v1324_v11  ;;  %v1389_v43 = vld [vmem:[#allocation3 + $0x30] sm:$0xff]  ;;  %v1089_v7 = vld [vmem:[#allocation2 + $0x17c] sm:$0x8]  ;;  %v1203_v34 = vrot.slane %v1202_v21, 4 }
 0x111   : > { %v1669_v4 = vadd.f32 %v1595_v15, %v1387_v17  ;;  %v1640_v60 = vpop.f32.mrf.mxu2  ;;  %1712 = vst.msk [vmem:[#allocation3 + $0x78] sm:$0xff] %vm362_vm8, %v1680_v41  ;;  %v1762_v17 = vld [vmem:[#allocation3 + $0x8] sm:$0xff]  ;;  %v8174_v15 = vshrl.u32 %v7020_v52, 16 }
 0x112   : > { %1726 = vst.msk [vmem:[#allocation3 + $0xe8] sm:$0xff] %vm362_vm8, %v1694_v26  ;;  %v1687_v45 = vadd.f32 %v1640_v60, %v1405_v44  ;;  %v1090_v26 = vsel %vm7157_vm12, 0, %v1089_v7 }
 0x113   : > { %1701 = vst.msk [vmem:[#allocation3 + $0x20] sm:$0xff] %vm362_vm8, %v1669_v4  ;;  %5536 = vmatmul.msk.bf16.gmra.mxu0 %vm362_vm8, %v6023_v14  ;;  %v1206_v35 = vrot.slane %v8174_v15, 4 }
 0x114   : > { %1719 = vst.msk [vmem:[#allocation3 + $0xb0] sm:$0xff] %vm362_vm8, %v1687_v45 }
 0x115   : > { %1326 = vst [vmem:[#allocation2 + $0x174] sm:$0xf] %v1325_v27  ;;  %v1764_v27 = vld [vmem:[#allocation3 + $0x18] sm:$0xff] }
 0x116   : > { %v1963_v2 = vpop.f32.mrf.mxu1  ;;  %1091 = vst [vmem:[#allocation2 + $0x17c] sm:$0x8] %v1090_v26 }
 0x117   : > { %v2043_v6 = vadd.f32 %v1963_v2, %v1761_v46  ;;  %v1390_v46 = vld [vmem:[#allocation3 + $0x38] sm:$0xff]  ;;  %v1763_v2 = vld [vmem:[#allocation3 + $0x10] sm:$0xff] }
 0x118   : > { %5441 = vmatmul.msk.bf16.gmra.mxu3 %vm362_vm8, %v6004_v22  ;;  %v1597_v18 = vpop.f32.mrf.mxu0 }
 0x119   : > { %v1670_v31 = vadd.f32 %v1597_v18, %v1388_v3  ;;  %v1642_v37 = vpop.f32.mrf.mxu2  ;;  %2075 = vst.msk [vmem:[#allocation3] sm:$0xff] %vm362_vm8, %v2043_v6  ;;  %5250 = vmatmul.msk.bf16.gmra.mxu1 %vm362_vm8, %v5965_v8  ;;  %v6005_v8 = vld [vmem:[#allocation2 + $0x48] sm:$0xff]  ;;  %v1207_v3 = vor.u32 %v1206_v35, %v1204_v50 }
 0x11a   : > { %v1688_v25 = vadd.f32 %v1642_v37, %v1406_v58  ;;  %v1205_v37 = vsel %vm7163_vm14, %v1203_v34, %v1204_v50  ;;  %v5967_v50 = vld [vmem:[#allocation2 + $0xe0] sm:$0xff]  ;;  %v1765_v21 = vld [vmem:[#allocation3 + $0x20] sm:$0xff] }
 0x11b   : > { %v1660_v54 = vpop.f32.mrf.mxu3  ;;  %1702 = vst.msk [vmem:[#allocation3 + $0x28] sm:$0xff] %vm362_vm8, %v1670_v31  ;;  %v1208_v18 = vrot.slane %v1207_v3, 4 }
 0x11c   : > { %v1695_v33 = vadd.f32 %v1660_v54, %v1413_v12  ;;  %1720 = vst.msk [vmem:[#allocation3 + $0xb8] sm:$0xff] %vm362_vm8, %v1688_v25 }
 0x11d   : > { %v1328_v53 = vld [vmem:[#allocation2 + $0x17c] sm:$0xf]  ;;  %1327 = vst.msk [vmem:[#allocation2 + $0x178] sm:$0xf] %vm595_vm3, %v1205_v37 }
 0x11e   : > { %1727 = vst.msk [vmem:[#allocation3 + $0xf0] sm:$0xff] %vm362_vm8, %v1695_v33  ;;  %v1965_v44 = vpop.f32.mrf.mxu1  ;;  %5346 = vmatmul.msk.bf16.gmra.mxu2 %vm362_vm8, %v5985_v23  ;;  %v1329_v25 = vsel %vm7201_vm15, %v1208_v18, %v1328_v53  ;;  %v6025_v23 = vld [vmem:[#allocation2 + $0xd8] sm:$0xff] }
 0x11f   : > { %v2044_v36 = vadd.f32 %v1965_v44, %v1762_v17  ;;  %1330 = vst [vmem:[#allocation2 + $0x17c] sm:$0xf] %v1329_v25  ;;  %v5986_v17 = vld [vmem:[#allocation2 + $0x168] sm:$0xff] }
 0x120   : > { %v1600_v41 = vpop.f32.mrf.mxu0  ;;  %v2139_v14 = vld [vmem:[#allocation3] sm:$0xff] }
 0x121   : > { %v1671_v4 = vadd.f32 %v1600_v41, %v1389_v43  ;;  %v2341_v60 = vpop.f32.mrf.mxu2  ;;  %2076 = vst.msk [vmem:[#allocation3 + $0x8] sm:$0xff] %vm362_vm8, %v2044_v36  ;;  %v1092_v36 = vld [vmem:[#allocation2 + $0x184] sm:$0x8] }
 0x122   : > { %v2421_v45 = vadd.f32 %v2341_v60, %v2139_v14  ;;  %v1093_v41 = vsel %vm7157_vm12, 0, %v1092_v36  ;;  %v8178_v14 = vshrl.u32 %v6670_v61, 16  ;;  %v1766_v25 = vld [vmem:[#allocation3 + $0x28] sm:$0xff]  ;;  %v8182_v36 = vshrl.u32 %v6799_v16, 16 }
 0x123   : > { %v1662_v0 = vpop.f32.mrf.mxu3  ;;  %1703 = vst.msk [vmem:[#allocation3 + $0x30] sm:$0xff] %vm362_vm8, %v1671_v4  ;;  %5537 = vmatmul.msk.bf16.gmra.mxu0 %vm362_vm8, %v6024_v32  ;;  %v8179_v4 = vshrl.u32 %v6655_v55, 16 }
 0x124   : > { %v1696_v22 = vadd.f32 %v1662_v0, %v1414_v49  ;;  %2453 = vst.msk [vmem:[#allocation3] sm:$0xff] %vm362_vm8, %v2421_v45  ;;  %v1215_v62 = vrot.slane %v8178_v14, 4  ;;  %v8180_v45 = vshll.u32 %v6655_v55, 16 }
 0x125   : > { %1094 = vst [vmem:[#allocation2 + $0x184] sm:$0x8] %v1093_v41  ;;  %v1209_v60 = vrot.slane %v8179_v4, 4 }
 0x126   : > { %1728 = vst.msk [vmem:[#allocation3 + $0xf8] sm:$0xff] %vm362_vm8, %v1696_v22  ;;  %v1968_v58 = vpop.f32.mrf.mxu1  ;;  %v1210_v0 = vrot.slane %v8180_v45, 5 }
 0x127   : > { %v2045_v6 = vadd.f32 %v1968_v58, %v1763_v2 }
 0x128   : > { %5442 = vmatmul.msk.bf16.gmra.mxu3 %vm362_vm8, %v6005_v8  ;;  %v1602_v5 = vpop.f32.mrf.mxu0  ;;  %v2140_v52 = vld [vmem:[#allocation3 + $0x8] sm:$0xff]  ;;  %v1211_v22 = vor.u32 %v1210_v0, %v1209_v60  ;;  %v1216_v8 = vor.u32 %v1215_v62, %v1213_v47  ;;  %v8185_v60 = vshll.u32 %v6799_v16, 16 }
 0x129   : > { %v1672_v12 = vadd.f32 %v1602_v5, %v1390_v46  ;;  %v2343_v31 = vpop.f32.mrf.mxu2  ;;  %2077 = vst.msk [vmem:[#allocation3 + $0x10] sm:$0xff] %vm362_vm8, %v2045_v6  ;;  %5251 = vmatmul.msk.bf16.gmra.mxu1 %vm362_vm8, %v5966_v59 }
 0x12a   : > { %v2422_v42 = vadd.f32 %v2343_v31, %v2140_v52  ;;  %v1212_v2 = vrot.slane %v1211_v22, 4  ;;  %v1217_v55 = vrot.slane %v1216_v8, 4  ;;  %v1222_v45 = vrot.slane %v8185_v60, 5  ;;  %v1767_v22 = vld [vmem:[#allocation3 + $0x30] sm:$0xff] }
 0x12b   : > { %v2517_v54 = vld [vmem:[#allocation3] sm:$0xff]  ;;  %v2719_v33 = vpop.f32.mrf.mxu3  ;;  %1704 = vst.msk [vmem:[#allocation3 + $0x38] sm:$0xff] %vm362_vm8, %v1672_v12 }
 0x12c   : > { %v2799_v11 = vadd.f32 %v2719_v33, %v2517_v54  ;;  %2454 = vst.msk [vmem:[#allocation3 + $0x8] sm:$0xff] %vm362_vm8, %v2422_v42  ;;  %v1214_v34 = vsel %vm7163_vm14, %v1212_v2, %v1213_v47  ;;  %v1332_v18 = vld [vmem:[#allocation2 + $0x184] sm:$0xf]  ;;  %v5987_v33 = vld [vmem:[#allocation2 + $0x170] sm:$0xff] }
 0x12d   : > { %1331 = vst.msk [vmem:[#allocation2 + $0x180] sm:$0xf] %vm595_vm3, %v1214_v34  ;;  %v1333_v52 = vsel %vm7201_vm15, %v1217_v55, %v1332_v18  ;;  %v6073_v2 = vld [vmem:[#allocation4 + $0xc0] sm:$0xff] }
 0x12e   : > { %2831 = vst.msk [vmem:[#allocation3] sm:$0xff] %vm362_vm8, %v2799_v11  ;;  %v1970_v43 = vpop.f32.mrf.mxu1  ;;  %5347 = vmatmul.msk.bf16.gmra.mxu2 %vm362_vm8, %v5986_v17 }
 0x12f   : > { %v2046_v44 = vadd.f32 %v1970_v43, %v1764_v27  ;;  %1334 = vst [vmem:[#allocation2 + $0x184] sm:$0xf] %v1333_v52  ;;  %v6026_v27 = vld [vmem:[#allocation2 + $0xe0] sm:$0xff]  ;;  %v1095_v43 = vld [vmem:[#allocation2 + $0x18c] sm:$0x8]  ;;  %3852 = vmatpush.bf16.msra.mxu2 %v6073_v2 }
 0x130   : > { %v2141_v32 = vld [vmem:[#allocation3 + $0x10] sm:$0xff]  ;;  %v3097_v7 = vpop.f32.mrf.mxu0 }
 0x131   : > { %v2346_v26 = vpop.f32.mrf.mxu2  ;;  %2078 = vst.msk [vmem:[#allocation3 + $0x18] sm:$0xff] %vm362_vm8, %v2046_v44 }
 0x132   : > { %v2423_v15 = vadd.f32 %v2346_v26, %v2141_v32  ;;  %v1224_v32 = vrot.slane %v8182_v36, 4  ;;  %v6053_v26 = vld [vmem:[#allocation4 + $0xa0] sm:$0xff] }
 0x133   : > { %v2518_v35 = vld [vmem:[#allocation3 + $0x8] sm:$0xff]  ;;  %v2721_v49 = vpop.f32.mrf.mxu3  ;;  %5538 = vmatmul.msk.bf16.gmra.mxu0 %vm362_vm8, %v6025_v23  ;;  %v1096_v23 = vsel %vm7157_vm12, 0, %v1095_v43  ;;  %3473 = vmatpush.bf16.msra.mxu1 %v6053_v26  ;;  %v8186_v43 = vshrl.u32 %v6939_v13, 16 }
 0x134   : > { %v2800_v24 = vadd.f32 %v2721_v49, %v2518_v35  ;;  %2455 = vst.msk [vmem:[#allocation3 + $0x10] sm:$0xff] %vm362_vm8, %v2423_v15  ;;  %v8183_v15 = vshrl.u32 %v6786_v56, 16  ;;  %v8184_v49 = vshll.u32 %v6786_v56, 16 }
 0x135   : > { %v2895_v40 = vld [vmem:[#allocation3] sm:$0xff]  ;;  %1097 = vst [vmem:[#allocation2 + $0x18c] sm:$0x8] %v1096_v23 }
 0x136   : > { %2832 = vst.msk [vmem:[#allocation3 + $0x8] sm:$0xff] %vm362_vm8, %v2800_v24  ;;  %v3177_v59 = vadd.f32 %v3097_v7, %v2895_v40  ;;  %v1973_v3 = vpop.f32.mrf.mxu1  ;;  %v1218_v35 = vrot.slane %v8183_v15, 4  ;;  %v1219_v4 = vrot.slane %v8184_v49, 5  ;;  %v5968_v24 = vld [vmem:[#allocation2 + $0xe8] sm:$0xff]  ;;  %v1225_v40 = vor.u32 %v1224_v32, %v1222_v45 }
 0x137   : > { %v2047_v46 = vadd.f32 %v1973_v3, %v1765_v21  ;;  %v8189_v15 = vshll.u32 %v6939_v13, 16 }
 0x138   : > { %3209 = vst.msk [vmem:[#allocation3] sm:$0xff] %vm362_vm8, %v3177_v59  ;;  %5443 = vmatmul.msk.bf16.gmra.mxu3 %vm362_vm8, %v6006_v48  ;;  %v2142_v61 = vld [vmem:[#allocation3 + $0x18] sm:$0xff]  ;;  %v3099_v58 = vpop.f32.mrf.mxu0  ;;  %v1220_v48 = vor.u32 %v1219_v4, %v1218_v35  ;;  %v1226_v21 = vrot.slane %v1225_v40, 4  ;;  %v6008_v4 = vld [vmem:[#allocation2 + $0x60] sm:$0xff] }
 0x139   : > { %v2348_v6 = vpop.f32.mrf.mxu2  ;;  %2079 = vst.msk [vmem:[#allocation3 + $0x20] sm:$0xff] %vm362_vm8, %v2047_v46  ;;  %5252 = vmatmul.msk.bf16.gmra.mxu1 %vm362_vm8, %v5967_v50  ;;  %v1231_v35 = vrot.slane %v8189_v15, 5 }
 0x13a   : > { %v2424_v5 = vadd.f32 %v2348_v6, %v2142_v61  ;;  %v1221_v56 = vrot.slane %v1220_v48, 4 }
 0x13b   : > { %v2519_v12 = vld [vmem:[#allocation3 + $0x10] sm:$0xff]  ;;  %v2724_v31 = vpop.f32.mrf.mxu3 }
 0x13c   : > { %v2801_v37 = vadd.f32 %v2724_v31, %v2519_v12  ;;  %2456 = vst.msk [vmem:[#allocation3 + $0x18] sm:$0xff] %vm362_vm8, %v2424_v5  ;;  %v1223_v55 = vsel %vm7163_vm14, %v1221_v56, %v1222_v45  ;;  %v1336_v61 = vld [vmem:[#allocation2 + $0x18c] sm:$0xf]  ;;  %v5969_v45 = vld [vmem:[#allocation2 + $0xf0] sm:$0xff] }
 0x13d   : > { %v2896_v53 = vld [vmem:[#allocation3 + $0x8] sm:$0xff]  ;;  %1335 = vst.msk [vmem:[#allocation2 + $0x188] sm:$0xf] %vm595_vm3, %v1223_v55  ;;  %v1337_v6 = vsel %vm7201_vm15, %v1226_v21, %v1336_v61  ;;  %v1768_v31 = vld [vmem:[#allocation3 + $0x38] sm:$0xff] }
 0x13e   : > { %2833 = vst.msk [vmem:[#allocation3 + $0x10] sm:$0xff] %vm362_vm8, %v2801_v37  ;;  %v3178_v42 = vadd.f32 %v3099_v58, %v2896_v53  ;;  %v1975_v54 = vpop.f32.mrf.mxu1  ;;  %5348 = vmatmul.msk.bf16.gmra.mxu2 %vm362_vm8, %v5987_v33  ;;  %v5988_v53 = vld [vmem:[#allocation2 + $0x178] sm:$0xff] }
 0x13f   : > { %v2048_v11 = vadd.f32 %v1975_v54, %v1766_v25  ;;  %1338 = vst [vmem:[#allocation2 + $0x18c] sm:$0xf] %v1337_v6  ;;  %v6027_v25 = vld [vmem:[#allocation2 + $0xe8] sm:$0xff]  ;;  %v1098_v54 = vld [vmem:[#allocation2 + $0x194] sm:$0x8] }
 0x140   : > { %3210 = vst.msk [vmem:[#allocation3 + $0x8] sm:$0xff] %vm362_vm8, %v3178_v42  ;;  %v2143_v17 = vld [vmem:[#allocation3 + $0x20] sm:$0xff]  ;;  %v3102_v44 = vpop.f32.mrf.mxu0 }
 0x141   : > { %v2351_v7 = vpop.f32.mrf.mxu2  ;;  %2080 = vst.msk [vmem:[#allocation3 + $0x28] sm:$0xff] %vm362_vm8, %v2048_v11 }
 0x142   : > { %v2425_v41 = vadd.f32 %v2351_v7, %v2143_v17  ;;  %v1233_v17 = vrot.slane %v8186_v43, 4  ;;  %v6093_v7 = vld [vmem:[#allocation4 + $0xe0] sm:$0xff] }
 0x143   : > { %v2520_v14 = vld [vmem:[#allocation3 + $0x18] sm:$0xff]  ;;  %v2726_v62 = vpop.f32.mrf.mxu3  ;;  %5539 = vmatmul.msk.bf16.gmra.mxu0 %vm362_vm8, %v6026_v27  ;;  %v1099_v27 = vsel %vm7157_vm12, 0, %v1098_v54  ;;  %4231 = vmatpush.bf16.msra.mxu3 %v6093_v7  ;;  %v6292_v54 = vld [vmem:[%s8076_s1] ss:$0 sm:$0xff] }
 0x144   : > { %v2802_v0 = vadd.f32 %v2726_v62, %v2520_v14  ;;  %2457 = vst.msk [vmem:[#allocation3 + $0x20] sm:$0xff] %vm362_vm8, %v2425_v41  ;;  %v8187_v41 = vshrl.u32 %v6927_v28, 16  ;;  %v8188_v62 = vshll.u32 %v6927_v28, 16 }
 0x145   : > { %v2897_v47 = vld [vmem:[#allocation3 + $0x10] sm:$0xff]  ;;  %1100 = vst [vmem:[#allocation2 + $0x194] sm:$0x8] %v1099_v27 }
 0x146   : > { %2834 = vst.msk [vmem:[#allocation3 + $0x18] sm:$0xff] %vm362_vm8, %v2802_v0  ;;  %v3179_v50 = vadd.f32 %v3102_v44, %v2897_v47  ;;  %v1978_v8 = vpop.f32.mrf.mxu1  ;;  %v1227_v14 = vrot.slane %v8187_v41, 4  ;;  %v1228_v26 = vrot.slane %v8188_v62, 5  ;;  %v5970_v62 = vld [vmem:[#allocation2 + $0xf8] sm:$0xff] }
 0x147   : > { %v2049_v59 = vadd.f32 %v1978_v8, %v1767_v22 }
 0x148   : > { %3211 = vst.msk [vmem:[#allocation3 + $0x10] sm:$0xff] %vm362_vm8, %v3179_v50  ;;  %5444 = vmatmul.msk.bf16.gmra.mxu3 %vm362_vm8, %v6007_v39  ;;  %v2144_v16 = vld [vmem:[#allocation3 + $0x28] sm:$0xff]  ;;  %v3104_v3 = vpop.f32.mrf.mxu0  ;;  %v1229_v0 = vor.u32 %v1228_v26, %v1227_v14  ;;  %v1234_v39 = vor.u32 %v1233_v17, %v1231_v35  ;;  %v8190_v17 = vshrl.u32 %v7073_v30, 16  ;;  %v6009_v14 = vld [vmem:[#allocation2 + $0x68] sm:$0xff]  ;;  %v650_v30 = vld [vmem:[#allocation2 + $0x80] sm:$0x1] }
 0x149   : > { %v2353_v46 = vpop.f32.mrf.mxu2  ;;  %2081 = vst.msk [vmem:[#allocation3 + $0x30] sm:$0xff] %vm362_vm8, %v2049_v59  ;;  %5253 = vmatmul.msk.bf16.gmra.mxu1 %vm362_vm8, %v5968_v24  ;;  %v1769_v24 = vld [vmem:[#allocation3 + $0x40] sm:$0xff] }
 0x14a   : > { %v2426_v58 = vadd.f32 %v2353_v46, %v2144_v16  ;;  %v1230_v28 = vrot.slane %v1229_v0, 4  ;;  %v1235_v50 = vrot.slane %v1234_v39, 4  ;;  %v651_v39 = vsel %vm6604_vm2, 0, %v650_v30 }
 0x14b   : > { %v2521_v34 = vld [vmem:[#allocation3 + $0x20] sm:$0xff]  ;;  %v2729_v18 = vpop.f32.mrf.mxu3  ;;  %652 = vst [vmem:[#allocation2 + $0x80] sm:$0x1] %v651_v39 }
 0x14c   : > { %v2803_v5 = vadd.f32 %v2729_v18, %v2521_v34  ;;  %2458 = vst.msk [vmem:[#allocation3 + $0x28] sm:$0xff] %vm362_vm8, %v2426_v58  ;;  %v1232_v59 = vsel %vm7163_vm14, %v1230_v28, %v1231_v35  ;;  %v1340_v56 = vld [vmem:[#allocation2 + $0x194] sm:$0xf]  ;;  %v1770_v58 = vld [vmem:[#allocation3 + $0x48] sm:$0xff]  ;;  %v5989_v18 = vld [vmem:[#allocation2 + $0x180] sm:$0xff] }
 0x14d   : > { %v2898_v52 = vld [vmem:[#allocation3 + $0x18] sm:$0xff]  ;;  %1339 = vst.msk [vmem:[#allocation2 + $0x190] sm:$0xf] %vm595_vm3, %v1232_v59  ;;  %v1341_v16 = vsel %vm7201_vm15, %v1235_v50, %v1340_v56  ;;  %v6196_v34 = vld [vmem:[%s6601_s24 + $0x78] sm:$0xff]   ;;  %v6113_v35 = vld [vmem:[#allocation4 + $0x100] sm:$0xff]  ;;  %s6368_s24 = sshra.s32 %s4904_s13, 4  ;;  %s6369_s24 = int_to_ptr.hbm [resolvable:$true] %s6368_s24 }
 0x14e   : > { %2835 = vst.msk [vmem:[#allocation3 + $0x20] sm:$0xff] %vm362_vm8, %v2803_v5  ;;  %v3180_v12 = vadd.f32 %v3104_v3, %v2898_v52  ;;  %v1980_v37 = vpop.f32.mrf.mxu1  ;;  %5349 = vmatmul.msk.bf16.gmra.mxu2 %vm362_vm8, %v5988_v53  ;;  %v6028_v52 = vld [vmem:[#allocation2 + $0xf0] sm:$0xff]  ;;  %4610 = vmatpush.bf16.msra.mxu0 %v6113_v35  ;;  %s6370_s28 = scalar_lea.hbm %s6369_s24, 256  ;;  %p6375_p12 = scmp.lt.s32.totalorder %s6369_s24, %s8080_s5 }
 0x14f   : > { %v2050_v42 = vadd.f32 %v1980_v37, %v1768_v31  ;;  %1342 = vst [vmem:[#allocation2 + $0x194] sm:$0xf] %v1341_v16  ;;  %v6180_v31 = vunpack.c.l.bf16 %v6196_v34  ;;  %v6181_v37 = vunpack.c.h.bf16 %v6196_v34  ;;  %v1772_v34 = vld [vmem:[#allocation3 + $0x58] sm:$0xff]  ;;  %p6371_p4 = scmp.ne.s32.totalorder %s6369_s24, %s6370_s28  ;;  %p6376_p13 = scmp.lt.s32.totalorder %s6374_s7, %s6370_s28 }
 0x150   : > { %3212 = vst.msk [vmem:[#allocation3 + $0x18] sm:$0xff] %vm362_vm8, %v3180_v12  ;;  %v2145_v33 = vld [vmem:[#allocation3 + $0x30] sm:$0xff]  ;;  %v3107_v11 = vpop.f32.mrf.mxu0  ;;  %v1101_v12 = vld [vmem:[#allocation2 + $0x19c] sm:$0x8] }
 0x151   : > { %v2356_v44 = vpop.f32.mrf.mxu2  ;;  %2082 = vst.msk [vmem:[#allocation3 + $0x38] sm:$0xff] %vm362_vm8, %v2050_v42  ;;  %v1102_v42 = vsel %vm7157_vm12, 0, %v1101_v12  ;;  %p6372_p8 = pnand %p6371_p4, %p6560_p5  ;;  %p6377_p0 = por %p6376_p13, %p6375_p12 }
 0x152   : > { %v2427_v23 = vadd.f32 %v2356_v44, %v2145_v33  ;;  %v493_v33 = vmul.f32 %v6292_v54, %v6180_v31  ;;  %1103 = vst [vmem:[#allocation2 + $0x19c] sm:$0x8] %v1102_v42  ;;  %v1236_v44 = vrot.slane %v8190_v17, 4  ;;  %v1006_v31 = vld [vmem:[#allocation2 + $0x80] sm:$0xf] }
 0x153   : > { %v2522_v36 = vld [vmem:[#allocation3 + $0x28] sm:$0xff]  ;;  %v2731_v32 = vpop.f32.mrf.mxu3  ;;  %5540 = vmatmul.msk.bf16.gmra.mxu0 %vm362_vm8, %v6027_v25  ;;  %v1242_v25 = vrot.slane %v888_v10, 4  ;;  %v1237_v10 = vrot.slane %v883_v29, 5  ;;  %v1771_v29 = vld [vmem:[#allocation3 + $0x50] sm:$0xff]  ;;  %p6373_p10 = pneg %p6372_p8 }
 0x154   : > { %v2804_v49 = vadd.f32 %v2731_v32, %v2522_v36  ;;  %2459 = vst.msk [vmem:[#allocation3 + $0x30] sm:$0xff] %vm362_vm8, %v2427_v23  ;;  %v1240_v23 = vrot.slane %v891_v20, 5  ;;  %v6293_v36 = vld [vmem:[%s8077_s2] ss:$0 sm:$0xff] }
 0x155   : > { %v2899_v60 = vld [vmem:[#allocation3 + $0x20] sm:$0xff]  ;;  %v529_v32 = vadd.f32 %v6293_v36, %v493_v33  ;;  %p6378_p3 = pnand %p6377_p0, %p6373_p10 }
 0x156   : > { %2836 = vst.msk [vmem:[#allocation3 + $0x28] sm:$0xff] %vm362_vm8, %v2804_v49  ;;  %v3181_v47 = vadd.f32 %v3107_v11, %v2899_v60  ;;  %v1983_v48 = vpop.f32.mrf.mxu1  ;;  %v494_v11 = vmul.f32 %v6292_v54, %v6181_v37  ;;  %v1238_v49 = vor.u32 %v1237_v10, %v1236_v44  ;;  %v6010_v10 = vld [vmem:[#allocation2 + $0x70] sm:$0xff] }
 0x157   : > { %v2051_v40 = vadd.f32 %v1983_v48, %v1769_v24  ;;  %v561_v60 = vmax.f32 %v529_v32, 0.0 }
 0x158   : > { %3213 = vst.msk [vmem:[#allocation3 + $0x20] sm:$0xff] %vm362_vm8, %v3181_v47  ;;  %5445 = vmatmul.msk.bf16.gmra.mxu3 %vm362_vm8, %v6008_v4  ;;  %v2146_v13 = vld [vmem:[#allocation3 + $0x38] sm:$0xff]  ;;  %v3109_v22 = vpop.f32.mrf.mxu0  ;;  %v530_v26 = vadd.f32 %v6293_v36, %v494_v11  ;;  %v1243_v4 = vor.u32 %v1242_v25, %v1240_v23  ;;  %v1239_v48 = vrot.slane %v1238_v49, 4  ;;  %v6029_v25 = vld [vmem:[#allocation2 + $0xf8] sm:$0xff]  ;;  %v1773_v36 = vld [vmem:[#allocation3 + $0x60] sm:$0xff] }
 0x159   : > { %v2358_v8 = vpop.f32.mrf.mxu2  ;;  %2083 = vst.msk [vmem:[#allocation3 + $0x40] sm:$0xff] %vm362_vm8, %v2051_v40  ;;  %5254 = vmatmul.msk.bf16.gmra.mxu1 %vm362_vm8, %v5969_v45  ;;  %v7591_v50 = vpack.c.bf16 %v561_v60, %v561_v60  ;;  %v1774_v60 = vld [vmem:[#allocation3 + $0x68] sm:$0xff] }
 0x15a   : > { %v2428_v21 = vadd.f32 %v2358_v8, %v2146_v13  ;;  %v562_v0 = vmax.f32 %v530_v26, 0.0  ;;  %v1244_v40 = vrot.slane %v1243_v4, 4  ;;  %v1241_v1 = vsel %vm7163_vm14, %v1239_v48, %v1240_v23  ;;  %v5971_v23 = vld [vmem:[#allocation2 + $0x100] sm:$0xff] }
 0x15b   : > { %v2523_v3 = vld [vmem:[#allocation3 + $0x30] sm:$0xff]  ;;  %v2734_v46 = vpop.f32.mrf.mxu3  ;;  %v896_v59 = vshrl.u32 %v7591_v50, 16  ;;  %1343 = vst.msk [vmem:[#allocation2 + $0x198] sm:$0xf] %vm595_vm3, %v1241_v1  ;;  %v899_v16 = vshll.u32 %v7591_v50, 16  ;;  %v6011_v1 = vld [vmem:[#allocation2 + $0x78] sm:$0xff] }
 0x15c   : > { %v2805_v2 = vadd.f32 %v2734_v46, %v2523_v3  ;;  %2460 = vst.msk [vmem:[#allocation3 + $0x38] sm:$0xff] %vm362_vm8, %v2428_v21  ;;  %v7593_v13 = vpack.c.bf16 %v562_v0, %v562_v0 }
 0x15d   : > { %v2900_v55 = vld [vmem:[#allocation3 + $0x28] sm:$0xff]  ;;  %1047 = vst.msk [vmem:[#allocation2 + $0x110] sm:$0xf] %vm595_vm3, %v7591_v50  ;;  %v1246_v51 = vrot.slane %v899_v16, 5 }
 0x15e   : > { %2837 = vst.msk [vmem:[#allocation3 + $0x30] sm:$0xff] %vm362_vm8, %v2805_v2  ;;  %v3182_v61 = vadd.f32 %v3109_v22, %v2900_v55  ;;  %v1985_v6 = vpop.f32.mrf.mxu1  ;;  %5350 = vmatmul.msk.bf16.gmra.mxu2 %vm362_vm8, %v5989_v18  ;;  %v1344_v22 = vld [vmem:[#allocation2 + $0x19c] sm:$0xf]  ;;  %v904_v56 = vshrl.u32 %v7593_v13, 16  ;;  %v907_v3 = vshll.u32 %v7593_v13, 16  ;;  %v898_v2 = vrot.slane %v896_v59, 7 }
 0x15f   : > { %v2052_v5 = vadd.f32 %v1985_v6, %v1770_v58  ;;  %v1345_v8 = vsel %vm7201_vm15, %v1244_v40, %v1344_v22  ;;  %1048 = vst.msk [vmem:[#allocation2 + $0x114] sm:$0xf] %vm595_vm3, %v7593_v13  ;;  %v5972_v22 = vld [vmem:[#allocation2 + $0x108] sm:$0xff] }
 0x160   : > { %3214 = vst.msk [vmem:[#allocation3 + $0x28] sm:$0xff] %vm362_vm8, %v3182_v61  ;;  %v3112_v53 = vpop.f32.mrf.mxu0  ;;  %v2147_v41 = vld [vmem:[#allocation3 + $0x40] sm:$0xff]  ;;  %v906_v55 = vrot.slane %v904_v56, 7 }
 0x161   : > { %2084 = vst.msk [vmem:[#allocation3 + $0x48] sm:$0xff] %vm362_vm8, %v2052_v5  ;;  %v2361_v9 = vpop.f32.mrf.mxu2  ;;  %v901_v5 = vor.u32 %v899_v16, %v898_v2 }
 0x162   : > { %v2429_v47 = vadd.f32 %v2361_v9, %v2147_v41  ;;  %1346 = vst [vmem:[#allocation2 + $0x19c] sm:$0xf] %v1345_v8  ;;  %v909_v12 = vor.u32 %v907_v3, %v906_v55 }
 0x163   : > { %v2524_v27 = vld [vmem:[#allocation3 + $0x38] sm:$0xff]  ;;  %v2736_v43 = vpop.f32.mrf.mxu3  ;;  %5541 = vmatmul.msk.bf16.gmra.mxu0 %vm362_vm8, %v6028_v52  ;;  %v902_v52 = vrot.slane %v898_v2, 4 }
 0x164   : > { %v2806_v7 = vadd.f32 %v2736_v43, %v2524_v27  ;;  %2461 = vst.msk [vmem:[#allocation3 + $0x40] sm:$0xff] %vm362_vm8, %v2429_v47  ;;  %v1007_v27 = vsel %vm6675_vm7, %v901_v5, %v1006_v31  ;;  %v1776_v31 = vld [vmem:[#allocation3 + $0x78] sm:$0xff] }
 0x165   : > { %v2901_v15 = vld [vmem:[#allocation3 + $0x30] sm:$0xff]  ;;  %v910_v43 = vsel %vm6660_vm6, %v902_v52, %v909_v12  ;;  %1008 = vst [vmem:[#allocation2 + $0x80] sm:$0xf] %v1007_v27 }
 0x166   : > { %2838 = vst.msk [vmem:[#allocation3 + $0x38] sm:$0xff] %vm362_vm8, %v2806_v7  ;;  %v3183_v20 = vadd.f32 %v3112_v53, %v2901_v15  ;;  %v1988_v45 = vpop.f32.mrf.mxu1  ;;  %v5990_v53 = vld [vmem:[#allocation2 + $0x188] sm:$0xff] }
 0x167   : > { %v2053_v24 = vadd.f32 %v1988_v45, %v1771_v29  ;;  %1009 = vst.msk [vmem:[#allocation2 + $0x84] sm:$0xf] %vm595_vm3, %v910_v43  ;;  %v6030_v45 = vld [vmem:[#allocation2 + $0x100] sm:$0xff] }
 0x168   : > { %3215 = vst.msk [vmem:[#allocation3 + $0x30] sm:$0xff] %vm362_vm8, %v3183_v20  ;;  %5446 = vmatmul.msk.bf16.gmra.mxu3 %vm362_vm8, %v6009_v14  ;;  %v3114_v28 = vpop.f32.mrf.mxu0  ;;  %v2148_v46 = vld [vmem:[#allocation3 + $0x48] sm:$0xff]  ;;  %v5991_v20 = vld [vmem:[#allocation2 + $0x190] sm:$0xff] }
 0x169   : > { %5255 = vmatmul.msk.bf16.gmra.mxu1 %vm362_vm8, %v5970_v62  ;;  %2085 = vst.msk [vmem:[#allocation3 + $0x50] sm:$0xff] %vm362_vm8, %v2053_v24  ;;  %v2363_v58 = vpop.f32.mrf.mxu2 }
 0x16a   : > { %v2430_v37 = vadd.f32 %v2363_v58, %v2148_v46 }
 0x16b   : > { %v2739_v21 = vpop.f32.mrf.mxu3  ;;  %v2525_v54 = vld [vmem:[#allocation3 + $0x40] sm:$0xff] }
 0x16c   : > { %v2807_v11 = vadd.f32 %v2739_v21, %v2525_v54  ;;  %2462 = vst.msk [vmem:[#allocation3 + $0x48] sm:$0xff] %vm362_vm8, %v2430_v37  ;;  %v1775_v21 = vld [vmem:[#allocation3 + $0x70] sm:$0xff]  ;;  %v6031_v54 = vld [vmem:[#allocation2 + $0x108] sm:$0xff] }
 0x16d   : > { %v2902_v61 = vld [vmem:[#allocation3 + $0x38] sm:$0xff] }
 0x16e   : > { %v3184_v6 = vadd.f32 %v3114_v28, %v2902_v61  ;;  %v1990_v18 = vpop.f32.mrf.mxu1  ;;  %2839 = vst.msk [vmem:[#allocation3 + $0x40] sm:$0xff] %vm362_vm8, %v2807_v11  ;;  %5351 = vmatmul.msk.bf16.gmra.mxu2 %vm362_vm8, %v5990_v53 }
 0x16f   : > { %v2054_v42 = vadd.f32 %v1990_v18, %v1772_v34 }
 0x170   : > { %3216 = vst.msk [vmem:[#allocation3 + $0x38] sm:$0xff] %vm362_vm8, %v3184_v6  ;;  %v3117_v33 = vpop.f32.mrf.mxu0  ;;  %v2149_v44 = vld [vmem:[#allocation3 + $0x50] sm:$0xff] }
 0x171   : > { %2086 = vst.msk [vmem:[#allocation3 + $0x58] sm:$0xff] %vm362_vm8, %v2054_v42  ;;  %v2366_v63 = vpop.f32.mrf.mxu2  ;;  %v5992_v42 = vld [vmem:[#allocation2 + $0x198] sm:$0xff] }
 0x172   : > { %v2431_v7 = vadd.f32 %v2366_v63, %v2149_v44  ;;  %v6037_v63 = vld [vmem:[#allocation2 + $0x128] sm:$0xff] }
 0x173   : > { %v2741_v17 = vpop.f32.mrf.mxu3  ;;  %5542 = vmatmul.msk.bf16.gmra.mxu0 %vm362_vm8, %v6029_v25  ;;  %v2526_v57 = vld [vmem:[#allocation3 + $0x48] sm:$0xff] }
 0x174   : > { %v2808_v62 = vadd.f32 %v2741_v17, %v2526_v57  ;;  %2463 = vst.msk [vmem:[#allocation3 + $0x50] sm:$0xff] %vm362_vm8, %v2431_v7 }
 0x175   : > { %v2903_v26 = vld [vmem:[#allocation3 + $0x40] sm:$0xff] }
 0x176   : > { %v1993_v32 = vpop.f32.mrf.mxu1  ;;  %2840 = vst.msk [vmem:[#allocation3 + $0x48] sm:$0xff] %vm362_vm8, %v2808_v62  ;;  %v3185_v15 = vadd.f32 %v3117_v33, %v2903_v26 }
 0x177   : > { %v2055_v41 = vadd.f32 %v1993_v32, %v1773_v36  ;;  %v1777_v32 = vld [vmem:[#allocation3 + $0x80] sm:$0xff] }
 0x178   : > { %5447 = vmatmul.msk.bf16.gmra.mxu3 %vm362_vm8, %v6010_v10  ;;  %v3119_v14 = vpop.f32.mrf.mxu0  ;;  %v2150_v49 = vld [vmem:[#allocation3 + $0x58] sm:$0xff]  ;;  %3217 = vst.msk [vmem:[#allocation3 + $0x40] sm:$0xff] %vm362_vm8, %v3185_v15 }
 0x179   : > { %5256 = vmatmul.msk.bf16.gmra.mxu1 %vm362_vm8, %v5971_v23  ;;  %2087 = vst.msk [vmem:[#allocation3 + $0x60] sm:$0xff] %vm362_vm8, %v2055_v41  ;;  %v2368_v4 = vpop.f32.mrf.mxu2  ;;  %v6012_v23 = vld [vmem:[#allocation2 + $0x80] sm:$0xff] }
 0x17a   : > { %v2432_v9 = vadd.f32 %v2368_v4, %v2150_v49 }
 0x17b   : > { %v2744_v35 = vpop.f32.mrf.mxu3  ;;  %v2527_v0 = vld [vmem:[#allocation3 + $0x50] sm:$0xff] }
 0x17c   : > { %v2809_v47 = vadd.f32 %v2744_v35, %v2527_v0  ;;  %2464 = vst.msk [vmem:[#allocation3 + $0x58] sm:$0xff] %vm362_vm8, %v2432_v9  ;;  %v6032_v0 = vld [vmem:[#allocation2 + $0x110] sm:$0xff] }
 0x17d   : > { %v2904_v24 = vld [vmem:[#allocation3 + $0x48] sm:$0xff] }
 0x17e   : > { %v1995_v30 = vpop.f32.mrf.mxu1  ;;  %2841 = vst.msk [vmem:[#allocation3 + $0x50] sm:$0xff] %vm362_vm8, %v2809_v47  ;;  %v3186_v48 = vadd.f32 %v3119_v14, %v2904_v24  ;;  %5352 = vmatmul.msk.bf16.gmra.mxu2 %vm362_vm8, %v5991_v20 }
 0x17f   : > { %v2056_v29 = vadd.f32 %v1995_v30, %v1774_v60  ;;  %v1778_v30 = vld [vmem:[#allocation3 + $0x88] sm:$0xff] }
 0x180   : > { %v3122_v39 = vpop.f32.mrf.mxu0  ;;  %v2151_v28 = vld [vmem:[#allocation3 + $0x60] sm:$0xff]  ;;  %3218 = vst.msk [vmem:[#allocation3 + $0x48] sm:$0xff] %vm362_vm8, %v3186_v48 }
 0x181   : > { %2088 = vst.msk [vmem:[#allocation3 + $0x68] sm:$0xff] %vm362_vm8, %v2056_v29  ;;  %v2371_v8 = vpop.f32.mrf.mxu2  ;;  %v6057_v29 = vld [vmem:[#allocation2 + $0x10] sm:$0xff] }
 0x182   : > { %v2433_v2 = vadd.f32 %v2371_v8, %v2151_v28  ;;  %v6038_v8 = vld [vmem:[#allocation2 + $0x130] sm:$0xff] }
 0x183   : > { %v2746_v40 = vpop.f32.mrf.mxu3  ;;  %5543 = vmatmul.msk.bf16.gmra.mxu0 %vm362_vm8, %v6030_v45  ;;  %v2528_v61 = vld [vmem:[#allocation3 + $0x58] sm:$0xff] }
 0x184   : > { %v2810_v6 = vadd.f32 %v2746_v40, %v2528_v61  ;;  %2465 = vst.msk [vmem:[#allocation3 + $0x60] sm:$0xff] %vm362_vm8, %v2433_v2 }
 0x185   : > { %v2905_v34 = vld [vmem:[#allocation3 + $0x50] sm:$0xff] }
 0x186   : > { %v1998_v46 = vpop.f32.mrf.mxu1  ;;  %2842 = vst.msk [vmem:[#allocation3 + $0x58] sm:$0xff] %vm362_vm8, %v2810_v6  ;;  %v3187_v18 = vadd.f32 %v3122_v39, %v2905_v34 }
 0x187   : > { %v2057_v55 = vadd.f32 %v1998_v46, %v1775_v21  ;;  %v1779_v46 = vld [vmem:[#allocation3 + $0x90] sm:$0xff] }
 0x188   : > { %5448 = vmatmul.msk.bf16.gmra.mxu3 %vm362_vm8, %v6011_v1  ;;  %v3124_v58 = vpop.f32.mrf.mxu0  ;;  %v2152_v52 = vld [vmem:[#allocation3 + $0x68] sm:$0xff]  ;;  %3219 = vst.msk [vmem:[#allocation3 + $0x50] sm:$0xff] %vm362_vm8, %v3187_v18 }
 0x189   : > { %5257 = vmatmul.msk.bf16.gmra.mxu1 %vm362_vm8, %v5972_v22  ;;  %2089 = vst.msk [vmem:[#allocation3 + $0x70] sm:$0xff] %vm362_vm8, %v2057_v55  ;;  %v2373_v12 = vpop.f32.mrf.mxu2  ;;  %v6077_v22 = vld [vmem:[#allocation2 + $0xa0] sm:$0xff] }
 0x18a   : > { %v2434_v53 = vadd.f32 %v2373_v12, %v2152_v52 }
 0x18b   : > { %v2749_v5 = vpop.f32.mrf.mxu3  ;;  %v2529_v33 = vld [vmem:[#allocation3 + $0x60] sm:$0xff] }
 0x18c   : > { %v2811_v27 = vadd.f32 %v2749_v5, %v2529_v33  ;;  %2466 = vst.msk [vmem:[#allocation3 + $0x68] sm:$0xff] %vm362_vm8, %v2434_v53  ;;  %v6097_v33 = vld [vmem:[#allocation2 + $0x130] sm:$0xff] }
 0x18d   : > { %v2906_v43 = vld [vmem:[#allocation3 + $0x58] sm:$0xff] }
 0x18e   : > { %v2000_v37 = vpop.f32.mrf.mxu1  ;;  %2843 = vst.msk [vmem:[#allocation3 + $0x60] sm:$0xff] %vm362_vm8, %v2811_v27  ;;  %v3188_v17 = vadd.f32 %v3124_v58, %v2906_v43  ;;  %5353 = vmatmul.msk.bf16.gmra.mxu2 %vm362_vm8, %v5992_v42 }
 0x18f   : > { %v2058_v25 = vadd.f32 %v2000_v37, %v1776_v31  ;;  %v1780_v37 = vld [vmem:[#allocation3 + $0x98] sm:$0xff]  ;;  %v3283_v50 = vld [vmem:[#allocation3 + $0x50] sm:$0xff] }
 0x190   : > { %v3127_v11 = vpop.f32.mrf.mxu0  ;;  %v2153_v10 = vld [vmem:[#allocation3 + $0x70] sm:$0xff]  ;;  %3220 = vst.msk [vmem:[#allocation3 + $0x58] sm:$0xff] %vm362_vm8, %v3188_v17 }
 0x191   : > { %2090 = vst.msk [vmem:[#allocation3 + $0x78] sm:$0xff] %vm362_vm8, %v2058_v25  ;;  %v2376_v36 = vpop.f32.mrf.mxu2  ;;  %v6058_v25 = vld [vmem:[#allocation2 + $0x18] sm:$0xff] }
 0x192   : > { %v2435_v41 = vadd.f32 %v2376_v36, %v2153_v10  ;;  %v6039_v36 = vld [vmem:[#allocation2 + $0x138] sm:$0xff] }
 0x193   : > { %v2751_v44 = vpop.f32.mrf.mxu3  ;;  %5544 = vmatmul.msk.bf16.gmra.mxu0 %vm362_vm8, %v6031_v54  ;;  %v2530_v14 = vld [vmem:[#allocation3 + $0x68] sm:$0xff] }
 0x194   : > { %v2812_v26 = vadd.f32 %v2751_v44, %v2530_v14  ;;  %2467 = vst.msk [vmem:[#allocation3 + $0x70] sm:$0xff] %vm362_vm8, %v2435_v41 }
 0x195   : > { %v2907_v15 = vld [vmem:[#allocation3 + $0x60] sm:$0xff] }
 0x196   : > { %v2003_v7 = vpop.f32.mrf.mxu1  ;;  %2844 = vst.msk [vmem:[#allocation3 + $0x68] sm:$0xff] %vm362_vm8, %v2812_v26  ;;  %v3189_v35 = vadd.f32 %v3127_v11, %v2907_v15 }
 0x197   : > { %v2059_v57 = vadd.f32 %v2003_v7, %v1777_v32  ;;  %v1781_v7 = vld [vmem:[#allocation3 + $0xa0] sm:$0xff] }
 0x198   : > { %5449 = vmatmul.msk.bf16.gmra.mxu3 %vm362_vm8, %v6012_v23  ;;  %v3129_v62 = vpop.f32.mrf.mxu0  ;;  %v2154_v4 = vld [vmem:[#allocation3 + $0x78] sm:$0xff]  ;;  %3221 = vst.msk [vmem:[#allocation3 + $0x60] sm:$0xff] %vm362_vm8, %v3189_v35 }
 0x199   : > { %5626 = vmatmul.msk.bf16.vlgmr.msra.gmra.mxu1 %vm362_vm8, %v6037_v63  ;;  %2091 = vst.msk [vmem:[#allocation3 + $0x80] sm:$0xff] %vm362_vm8, %v2059_v57  ;;  %v2378_v60 = vpop.f32.mrf.mxu2  ;;  %v6078_v63 = vld [vmem:[#allocation2 + $0xa8] sm:$0xff] }
 0x19a   : > { %v2436_v20 = vadd.f32 %v2378_v60, %v2154_v4 }
 0x19b   : > { %v2754_v49 = vpop.f32.mrf.mxu3  ;;  %v2531_v39 = vld [vmem:[#allocation3 + $0x70] sm:$0xff] }
 0x19c   : > { %v2813_v24 = vadd.f32 %v2754_v49, %v2531_v39  ;;  %2468 = vst.msk [vmem:[#allocation3 + $0x78] sm:$0xff] %vm362_vm8, %v2436_v20  ;;  %v6098_v39 = vld [vmem:[#allocation2 + $0x138] sm:$0xff] }
 0x19d   : > { %v2908_v48 = vld [vmem:[#allocation3 + $0x68] sm:$0xff] }
 0x19e   : > { %v2005_v9 = vpop.f32.mrf.mxu1  ;;  %2845 = vst.msk [vmem:[#allocation3 + $0x70] sm:$0xff] %vm362_vm8, %v2813_v24  ;;  %v3190_v40 = vadd.f32 %v3129_v62, %v2908_v48  ;;  %5722 = vmatmul.msk.bf16.vlgmr.msra.gmra.mxu2 %vm362_vm8, %v6057_v29 }
 0x19f   : > { %v2060_v45 = vadd.f32 %v2005_v9, %v1778_v30  ;;  %v1782_v9 = vld [vmem:[#allocation3 + $0xa8] sm:$0xff] }
 0x1a0   : > { %v3132_v47 = vpop.f32.mrf.mxu0  ;;  %v2155_v1 = vld [vmem:[#allocation3 + $0x80] sm:$0xff]  ;;  %3222 = vst.msk [vmem:[#allocation3 + $0x68] sm:$0xff] %vm362_vm8, %v3190_v40 }
 0x1a1   : > { %2092 = vst.msk [vmem:[#allocation3 + $0x88] sm:$0xff] %vm362_vm8, %v2060_v45  ;;  %v2381_v21 = vpop.f32.mrf.mxu2  ;;  %v6059_v45 = vld [vmem:[#allocation2 + $0x20] sm:$0xff] }
 0x1a2   : > { %v2437_v55 = vadd.f32 %v2381_v21, %v2155_v1  ;;  %v6040_v21 = vld [vmem:[#allocation2 + $0x140] sm:$0xff] }
 0x1a3   : > { %v2756_v28 = vpop.f32.mrf.mxu3  ;;  %5545 = vmatmul.msk.bf16.gmra.mxu0 %vm362_vm8, %v6032_v0  ;;  %v2532_v58 = vld [vmem:[#allocation3 + $0x78] sm:$0xff] }
 0x1a4   : > { %v2814_v34 = vadd.f32 %v2756_v28, %v2532_v58  ;;  %2469 = vst.msk [vmem:[#allocation3 + $0x80] sm:$0xff] %vm362_vm8, %v2437_v55 }
 0x1a5   : > { %v2909_v18 = vld [vmem:[#allocation3 + $0x70] sm:$0xff] }
 0x1a6   : > { %v2008_v2 = vpop.f32.mrf.mxu1  ;;  %2846 = vst.msk [vmem:[#allocation3 + $0x78] sm:$0xff] %vm362_vm8, %v2814_v34  ;;  %v3191_v5 = vadd.f32 %v3132_v47, %v2909_v18 }
 0x1a7   : > { %v2061_v61 = vadd.f32 %v2008_v2, %v1779_v46  ;;  %v1783_v2 = vld [vmem:[#allocation3 + $0xb0] sm:$0xff] }
 0x1a8   : > { %5818 = vmatmul.msk.bf16.vlgmr.msra.gmra.mxu3 %vm362_vm8, %v6077_v22  ;;  %v3134_v6 = vpop.f32.mrf.mxu0  ;;  %v2156_v12 = vld [vmem:[#allocation3 + $0x88] sm:$0xff]  ;;  %3223 = vst.msk [vmem:[#allocation3 + $0x70] sm:$0xff] %vm362_vm8, %v3191_v5 }
 0x1a9   : > { %5627 = vmatmul.msk.bf16.gmra.mxu1 %vm362_vm8, %v6038_v8  ;;  %2093 = vst.msk [vmem:[#allocation3 + $0x90] sm:$0xff] %vm362_vm8, %v2061_v61  ;;  %v2383_v31 = vpop.f32.mrf.mxu2  ;;  %v6079_v8 = vld [vmem:[#allocation2 + $0xb0] sm:$0xff] }
 0x1aa   : > { %v2438_v42 = vadd.f32 %v2383_v31, %v2156_v12 }
 0x1ab   : > { %v2759_v52 = vpop.f32.mrf.mxu3  ;;  %v2533_v11 = vld [vmem:[#allocation3 + $0x80] sm:$0xff] }
 0x1ac   : > { %v2815_v43 = vadd.f32 %v2759_v52, %v2533_v11  ;;  %2470 = vst.msk [vmem:[#allocation3 + $0x88] sm:$0xff] %vm362_vm8, %v2438_v42  ;;  %v6099_v11 = vld [vmem:[#allocation2 + $0x140] sm:$0xff] }
 0x1ad   : > { %v2910_v17 = vld [vmem:[#allocation3 + $0x78] sm:$0xff] }
 0x1ae   : > { %v2010_v53 = vpop.f32.mrf.mxu1  ;;  %2847 = vst.msk [vmem:[#allocation3 + $0x80] sm:$0xff] %vm362_vm8, %v2815_v43  ;;  %v3192_v44 = vadd.f32 %v3134_v6, %v2910_v17  ;;  %5723 = vmatmul.msk.bf16.gmra.mxu2 %vm362_vm8, %v6058_v25 }
 0x1af   : > { %v2062_v54 = vadd.f32 %v2010_v53, %v1780_v37  ;;  %v1784_v53 = vld [vmem:[#allocation3 + $0xb8] sm:$0xff] }
 0x1b0   : > { %v3137_v27 = vpop.f32.mrf.mxu0  ;;  %v2157_v23 = vld [vmem:[#allocation3 + $0x90] sm:$0xff]  ;;  %3224 = vst.msk [vmem:[#allocation3 + $0x78] sm:$0xff] %vm362_vm8, %v3192_v44 }
 0x1b1   : > { %2094 = vst.msk [vmem:[#allocation3 + $0x98] sm:$0xff] %vm362_vm8, %v2062_v54  ;;  %v2386_v32 = vpop.f32.mrf.mxu2  ;;  %v6060_v54 = vld [vmem:[#allocation2 + $0x28] sm:$0xff] }
 0x1b2   : > { %v2439_v57 = vadd.f32 %v2386_v32, %v2157_v23  ;;  %v6041_v32 = vld [vmem:[#allocation2 + $0x148] sm:$0xff] }
 0x1b3   : > { %v2761_v10 = vpop.f32.mrf.mxu3  ;;  %5914 = vmatmul.msk.bf16.vlgmr.msra.gmra.mxu0 %vm362_vm8, %v6097_v33  ;;  %v2534_v62 = vld [vmem:[#allocation3 + $0x88] sm:$0xff] }
 0x1b4   : > { %v2816_v15 = vadd.f32 %v2761_v10, %v2534_v62  ;;  %2471 = vst.msk [vmem:[#allocation3 + $0x90] sm:$0xff] %vm362_vm8, %v2439_v57 }
 0x1b5   : > { %v2911_v35 = vld [vmem:[#allocation3 + $0x80] sm:$0xff] }
 0x1b6   : > { %v2013_v41 = vpop.f32.mrf.mxu1  ;;  %2848 = vst.msk [vmem:[#allocation3 + $0x88] sm:$0xff] %vm362_vm8, %v2816_v15  ;;  %v3193_v49 = vadd.f32 %v3137_v27, %v2911_v35 }
 0x1b7   : > { %v2063_v14 = vadd.f32 %v2013_v41, %v1781_v7  ;;  %v1785_v41 = vld [vmem:[#allocation3 + $0xc0] sm:$0xff] }
 0x1b8   : > { %5819 = vmatmul.msk.bf16.gmra.mxu3 %vm362_vm8, %v6078_v63  ;;  %v3139_v26 = vpop.f32.mrf.mxu0  ;;  %v2158_v60 = vld [vmem:[#allocation3 + $0x98] sm:$0xff]  ;;  %3225 = vst.msk [vmem:[#allocation3 + $0x80] sm:$0xff] %vm362_vm8, %v3193_v49 }
 0x1b9   : > { %5628 = vmatmul.msk.bf16.gmra.mxu1 %vm362_vm8, %v6039_v36  ;;  %2095 = vst.msk [vmem:[#allocation3 + $0xa0] sm:$0xff] %vm362_vm8, %v2063_v14  ;;  %v2388_v30 = vpop.f32.mrf.mxu2  ;;  %v6080_v36 = vld [vmem:[#allocation2 + $0xb8] sm:$0xff] }
 0x1ba   : > { %v2440_v29 = vadd.f32 %v2388_v30, %v2158_v60 }
 0x1bb   : > { %v2764_v4 = vpop.f32.mrf.mxu3  ;;  %v2535_v47 = vld [vmem:[#allocation3 + $0x90] sm:$0xff] }
 0x1bc   : > { %v2817_v48 = vadd.f32 %v2764_v4, %v2535_v47  ;;  %2472 = vst.msk [vmem:[#allocation3 + $0x98] sm:$0xff] %vm362_vm8, %v2440_v29  ;;  %v6100_v47 = vld [vmem:[#allocation2 + $0x148] sm:$0xff] }
 0x1bd   : > { %v2912_v40 = vld [vmem:[#allocation3 + $0x88] sm:$0xff] }
 0x1be   : > { %v2015_v20 = vpop.f32.mrf.mxu1  ;;  %2849 = vst.msk [vmem:[#allocation3 + $0x90] sm:$0xff] %vm362_vm8, %v2817_v48  ;;  %v3194_v28 = vadd.f32 %v3139_v26, %v2912_v40  ;;  %5724 = vmatmul.msk.bf16.gmra.mxu2 %vm362_vm8, %v6059_v45 }
 0x1bf   : > { %v2064_v0 = vadd.f32 %v2015_v20, %v1782_v9  ;;  %v1786_v20 = vld [vmem:[#allocation3 + $0xc8] sm:$0xff] }
 0x1c0   : > { %v3142_v24 = vpop.f32.mrf.mxu0  ;;  %v2159_v22 = vld [vmem:[#allocation3 + $0xa0] sm:$0xff]  ;;  %3226 = vst.msk [vmem:[#allocation3 + $0x88] sm:$0xff] %vm362_vm8, %v3194_v28 }
 0x1c1   : > { %2096 = vst.msk [vmem:[#allocation3 + $0xa8] sm:$0xff] %vm362_vm8, %v2064_v0  ;;  %v2391_v46 = vpop.f32.mrf.mxu2  ;;  %v6061_v0 = vld [vmem:[#allocation2 + $0x30] sm:$0xff] }
 0x1c2   : > { %v2441_v61 = vadd.f32 %v2391_v46, %v2159_v22  ;;  %v6042_v46 = vld [vmem:[#allocation2 + $0x150] sm:$0xff] }
 0x1c3   : > { %v2766_v1 = vpop.f32.mrf.mxu3  ;;  %5915 = vmatmul.msk.bf16.gmra.mxu0 %vm362_vm8, %v6098_v39  ;;  %v2536_v6 = vld [vmem:[#allocation3 + $0x98] sm:$0xff] }
 0x1c4   : > { %v2818_v18 = vadd.f32 %v2766_v1, %v2536_v6  ;;  %2473 = vst.msk [vmem:[#allocation3 + $0xa0] sm:$0xff] %vm362_vm8, %v2441_v61 }
 0x1c5   : > { %v2913_v5 = vld [vmem:[#allocation3 + $0x90] sm:$0xff] }
 0x1c6   : > { %v2018_v55 = vpop.f32.mrf.mxu1  ;;  %2850 = vst.msk [vmem:[#allocation3 + $0x98] sm:$0xff] %vm362_vm8, %v2818_v18  ;;  %v3195_v52 = vadd.f32 %v3142_v24, %v2913_v5 }
 0x1c7   : > { %v2065_v58 = vadd.f32 %v2018_v55, %v1783_v2  ;;  %v1787_v55 = vld [vmem:[#allocation3 + $0xd0] sm:$0xff] }
 0x1c8   : > { %5820 = vmatmul.msk.bf16.gmra.mxu3 %vm362_vm8, %v6079_v8  ;;  %v3144_v34 = vpop.f32.mrf.mxu0  ;;  %v2160_v31 = vld [vmem:[#allocation3 + $0xa8] sm:$0xff]  ;;  %3227 = vst.msk [vmem:[#allocation3 + $0x90] sm:$0xff] %vm362_vm8, %v3195_v52 }
 0x1c9   : > { %5629 = vmatmul.msk.bf16.gmra.mxu1 %vm362_vm8, %v6040_v21  ;;  %2097 = vst.msk [vmem:[#allocation3 + $0xb0] sm:$0xff] %vm362_vm8, %v2065_v58  ;;  %v2393_v37 = vpop.f32.mrf.mxu2  ;;  %v6081_v21 = vld [vmem:[#allocation2 + $0xc0] sm:$0xff] }
 0x1ca   : > { %v2442_v25 = vadd.f32 %v2393_v37, %v2160_v31 }
 0x1cb   : > { %v2769_v12 = vpop.f32.mrf.mxu3  ;;  %v2537_v27 = vld [vmem:[#allocation3 + $0xa0] sm:$0xff] }
 0x1cc   : > { %v2819_v17 = vadd.f32 %v2769_v12, %v2537_v27  ;;  %2474 = vst.msk [vmem:[#allocation3 + $0xa8] sm:$0xff] %vm362_vm8, %v2442_v25  ;;  %v6101_v27 = vld [vmem:[#allocation2 + $0x150] sm:$0xff] }
 0x1cd   : > { %v2914_v44 = vld [vmem:[#allocation3 + $0x98] sm:$0xff] }
 0x1ce   : > { %v2020_v42 = vpop.f32.mrf.mxu1  ;;  %2851 = vst.msk [vmem:[#allocation3 + $0xa0] sm:$0xff] %vm362_vm8, %v2819_v17  ;;  %v3196_v10 = vadd.f32 %v3144_v34, %v2914_v44  ;;  %5725 = vmatmul.msk.bf16.gmra.mxu2 %vm362_vm8, %v6060_v54 }
 0x1cf   : > { %v2066_v33 = vadd.f32 %v2020_v42, %v1784_v53  ;;  %v1788_v42 = vld [vmem:[#allocation3 + $0xd8] sm:$0xff] }
 0x1d0   : > { %v3147_v43 = vpop.f32.mrf.mxu0  ;;  %v2161_v63 = vld [vmem:[#allocation3 + $0xb0] sm:$0xff]  ;;  %3228 = vst.msk [vmem:[#allocation3 + $0x98] sm:$0xff] %vm362_vm8, %v3196_v10 }
 0x1d1   : > { %2098 = vst.msk [vmem:[#allocation3 + $0xb8] sm:$0xff] %vm362_vm8, %v2066_v33  ;;  %v2396_v7 = vpop.f32.mrf.mxu2  ;;  %v6062_v33 = vld [vmem:[#allocation2 + $0x38] sm:$0xff] }
 0x1d2   : > { %v2443_v14 = vadd.f32 %v2396_v7, %v2161_v63  ;;  %v6043_v7 = vld [vmem:[#allocation2 + $0x158] sm:$0xff] }
 0x1d3   : > { %v2771_v23 = vpop.f32.mrf.mxu3  ;;  %5916 = vmatmul.msk.bf16.gmra.mxu0 %vm362_vm8, %v6099_v11  ;;  %v2538_v26 = vld [vmem:[#allocation3 + $0xa8] sm:$0xff] }
 0x1d4   : > { %v2820_v35 = vadd.f32 %v2771_v23, %v2538_v26  ;;  %2475 = vst.msk [vmem:[#allocation3 + $0xb0] sm:$0xff] %vm362_vm8, %v2443_v14 }
 0x1d5   : > { %v2915_v49 = vld [vmem:[#allocation3 + $0xa0] sm:$0xff] }
 0x1d6   : > { %v2023_v57 = vpop.f32.mrf.mxu1  ;;  %2852 = vst.msk [vmem:[#allocation3 + $0xa8] sm:$0xff] %vm362_vm8, %v2820_v35  ;;  %v3197_v4 = vadd.f32 %v3147_v43, %v2915_v49 }
 0x1d7   : > { %v2067_v62 = vadd.f32 %v2023_v57, %v1785_v41  ;;  %v1789_v57 = vld [vmem:[#allocation3 + $0xe0] sm:$0xff] }
 0x1d8   : > { %5821 = vmatmul.msk.bf16.gmra.mxu3 %vm362_vm8, %v6080_v36  ;;  %v3149_v15 = vpop.f32.mrf.mxu0  ;;  %v2162_v30 = vld [vmem:[#allocation3 + $0xb8] sm:$0xff]  ;;  %3229 = vst.msk [vmem:[#allocation3 + $0xa0] sm:$0xff] %vm362_vm8, %v3197_v4 }
 0x1d9   : > { %5630 = vmatmul.msk.bf16.gmra.mxu1 %vm362_vm8, %v6041_v32  ;;  %2099 = vst.msk [vmem:[#allocation3 + $0xc0] sm:$0xff] %vm362_vm8, %v2067_v62  ;;  %v2398_v9 = vpop.f32.mrf.mxu2  ;;  %v6082_v32 = vld [vmem:[#allocation2 + $0xc8] sm:$0xff] }
 0x1da   : > { %v2444_v45 = vadd.f32 %v2398_v9, %v2162_v30 }
 0x1db   : > { %v2774_v60 = vpop.f32.mrf.mxu3  ;;  %v2539_v24 = vld [vmem:[#allocation3 + $0xb0] sm:$0xff] }
 0x1dc   : > { %v2821_v40 = vadd.f32 %v2774_v60, %v2539_v24  ;;  %2476 = vst.msk [vmem:[#allocation3 + $0xb8] sm:$0xff] %vm362_vm8, %v2444_v45  ;;  %v6102_v24 = vld [vmem:[#allocation2 + $0x158] sm:$0xff] }
 0x1dd   : > { %v2916_v28 = vld [vmem:[#allocation3 + $0xa8] sm:$0xff] }
 0x1de   : > { %v2025_v29 = vpop.f32.mrf.mxu1  ;;  %2853 = vst.msk [vmem:[#allocation3 + $0xb0] sm:$0xff] %vm362_vm8, %v2821_v40  ;;  %v3198_v1 = vadd.f32 %v3149_v15, %v2916_v28  ;;  %5726 = vmatmul.msk.bf16.gmra.mxu2 %vm362_vm8, %v6061_v0 }
 0x1df   : > { %v2068_v39 = vadd.f32 %v2025_v29, %v1786_v20  ;;  %v1790_v29 = vld [vmem:[#allocation3 + $0xe8] sm:$0xff] }
 0x1e0   : > { %v3152_v48 = vpop.f32.mrf.mxu0  ;;  %v2163_v8 = vld [vmem:[#allocation3 + $0xc0] sm:$0xff]  ;;  %3230 = vst.msk [vmem:[#allocation3 + $0xa8] sm:$0xff] %vm362_vm8, %v3198_v1 }
 0x1e1   : > { %2100 = vst.msk [vmem:[#allocation3 + $0xc8] sm:$0xff] %vm362_vm8, %v2068_v39  ;;  %v2401_v2 = vpop.f32.mrf.mxu2  ;;  %v6063_v39 = vld [vmem:[#allocation2 + $0x40] sm:$0xff] }
 0x1e2   : > { %v2445_v58 = vadd.f32 %v2401_v2, %v2163_v8  ;;  %v6044_v2 = vld [vmem:[#allocation2 + $0x160] sm:$0xff] }
 0x1e3   : > { %v2776_v22 = vpop.f32.mrf.mxu3  ;;  %5917 = vmatmul.msk.bf16.gmra.mxu0 %vm362_vm8, %v6100_v47  ;;  %v2540_v34 = vld [vmem:[#allocation3 + $0xb8] sm:$0xff] }
 0x1e4   : > { %v2822_v5 = vadd.f32 %v2776_v22, %v2540_v34  ;;  %2477 = vst.msk [vmem:[#allocation3 + $0xc0] sm:$0xff] %vm362_vm8, %v2445_v58 }
 0x1e5   : > { %v2917_v52 = vld [vmem:[#allocation3 + $0xb0] sm:$0xff] }
 0x1e6   : > { %v2028_v61 = vpop.f32.mrf.mxu1  ;;  %2854 = vst.msk [vmem:[#allocation3 + $0xb8] sm:$0xff] %vm362_vm8, %v2822_v5  ;;  %v3199_v12 = vadd.f32 %v3152_v48, %v2917_v52 }
 0x1e7   : > { %v2069_v6 = vadd.f32 %v2028_v61, %v1787_v55  ;;  %v1791_v61 = vld [vmem:[#allocation3 + $0xf0] sm:$0xff] }
 0x1e8   : > { %5822 = vmatmul.msk.bf16.gmra.mxu3 %vm362_vm8, %v6081_v21  ;;  %v3154_v18 = vpop.f32.mrf.mxu0  ;;  %v2164_v37 = vld [vmem:[#allocation3 + $0xc8] sm:$0xff]  ;;  %3231 = vst.msk [vmem:[#allocation3 + $0xb0] sm:$0xff] %vm362_vm8, %v3199_v12 }
 0x1e9   : > { %5631 = vmatmul.msk.bf16.gmra.mxu1 %vm362_vm8, %v6042_v46  ;;  %2101 = vst.msk [vmem:[#allocation3 + $0xd0] sm:$0xff] %vm362_vm8, %v2069_v6  ;;  %v2403_v53 = vpop.f32.mrf.mxu2  ;;  %v6083_v46 = vld [vmem:[#allocation2 + $0xd0] sm:$0xff] }
 0x1ea   : > { %v2446_v54 = vadd.f32 %v2403_v53, %v2164_v37 }
 0x1eb   : > { %v2779_v31 = vpop.f32.mrf.mxu3  ;;  %v2541_v43 = vld [vmem:[#allocation3 + $0xc0] sm:$0xff] }
 0x1ec   : > { %v2823_v44 = vadd.f32 %v2779_v31, %v2541_v43  ;;  %2478 = vst.msk [vmem:[#allocation3 + $0xc8] sm:$0xff] %vm362_vm8, %v2446_v54  ;;  %v6103_v43 = vld [vmem:[#allocation2 + $0x160] sm:$0xff] }
 0x1ed   : > { %v2918_v10 = vld [vmem:[#allocation3 + $0xb8] sm:$0xff] }
 0x1ee   : > { %v2030_v25 = vpop.f32.mrf.mxu1  ;;  %2855 = vst.msk [vmem:[#allocation3 + $0xc0] sm:$0xff] %vm362_vm8, %v2823_v44  ;;  %v3200_v23 = vadd.f32 %v3154_v18, %v2918_v10  ;;  %5727 = vmatmul.msk.bf16.gmra.mxu2 %vm362_vm8, %v6062_v33 }
 0x1ef   : > { %v2070_v11 = vadd.f32 %v2030_v25, %v1788_v42  ;;  %v1792_v25 = vld [vmem:[#allocation3 + $0xf8] sm:$0xff] }
 0x1f0   : > { %v3157_v17 = vpop.f32.mrf.mxu0  ;;  %v2165_v36 = vld [vmem:[#allocation3 + $0xd0] sm:$0xff]  ;;  %3232 = vst.msk [vmem:[#allocation3 + $0xb8] sm:$0xff] %vm362_vm8, %v3200_v23 }
 0x1f1   : > { %2102 = vst.msk [vmem:[#allocation3 + $0xd8] sm:$0xff] %vm362_vm8, %v2070_v11  ;;  %v2406_v41 = vpop.f32.mrf.mxu2  ;;  %v6064_v11 = vld [vmem:[#allocation2 + $0x48] sm:$0xff] }
 0x1f2   : > { %v2447_v62 = vadd.f32 %v2406_v41, %v2165_v36  ;;  %v6045_v41 = vld [vmem:[#allocation2 + $0x168] sm:$0xff] }
 0x1f3   : > { %v2781_v63 = vpop.f32.mrf.mxu3  ;;  %5918 = vmatmul.msk.bf16.gmra.mxu0 %vm362_vm8, %v6101_v27  ;;  %v2542_v15 = vld [vmem:[#allocation3 + $0xc8] sm:$0xff] }
 0x1f4   : > { %v2824_v49 = vadd.f32 %v2781_v63, %v2542_v15  ;;  %2479 = vst.msk [vmem:[#allocation3 + $0xd0] sm:$0xff] %vm362_vm8, %v2447_v62 }
 0x1f5   : > { %v2919_v4 = vld [vmem:[#allocation3 + $0xc0] sm:$0xff] }
 0x1f6   : > { %v2033_v14 = vpop.f32.mrf.mxu1  ;;  %2856 = vst.msk [vmem:[#allocation3 + $0xc8] sm:$0xff] %vm362_vm8, %v2824_v49  ;;  %v3201_v60 = vadd.f32 %v3157_v17, %v2919_v4 }
 0x1f7   : > { %v2071_v26 = vadd.f32 %v2033_v14, %v1789_v57  ;;  %v3273_v14 = vld [vmem:[#allocation3] sm:$0xff] }
 0x1f8   : > { %5823 = vmatmul.msk.bf16.gmra.mxu3 %vm362_vm8, %v6082_v32  ;;  %v3159_v35 = vpop.f32.mrf.mxu0  ;;  %v2166_v9 = vld [vmem:[#allocation3 + $0xd8] sm:$0xff]  ;;  %3233 = vst.msk [vmem:[#allocation3 + $0xc0] sm:$0xff] %vm362_vm8, %v3201_v60 }
 0x1f9   : > { %5632 = vmatmul.msk.bf16.gmra.mxu1 %vm362_vm8, %v6043_v7  ;;  %2103 = vst.msk [vmem:[#allocation3 + $0xe0] sm:$0xff] %vm362_vm8, %v2071_v26  ;;  %v2408_v20 = vpop.f32.mrf.mxu2  ;;  %v6084_v7 = vld [vmem:[#allocation2 + $0xd8] sm:$0xff] }
 0x1fa   : > { %v2448_v0 = vadd.f32 %v2408_v20, %v2166_v9 }
 0x1fb   : > { %v2784_v30 = vpop.f32.mrf.mxu3  ;;  %v2543_v48 = vld [vmem:[#allocation3 + $0xd0] sm:$0xff] }
 0x1fc   : > { %v2825_v28 = vadd.f32 %v2784_v30, %v2543_v48  ;;  %2480 = vst.msk [vmem:[#allocation3 + $0xd8] sm:$0xff] %vm362_vm8, %v2448_v0  ;;  %v6104_v48 = vld [vmem:[#allocation2 + $0x168] sm:$0xff] }
 0x1fd   : > { %v2920_v1 = vld [vmem:[#allocation3 + $0xc8] sm:$0xff] }
 0x1fe   : > { %v2035_v45 = vpop.f32.mrf.mxu1  ;;  %2857 = vst.msk [vmem:[#allocation3 + $0xd0] sm:$0xff] %vm362_vm8, %v2825_v28  ;;  %v3202_v22 = vadd.f32 %v3159_v35, %v2920_v1  ;;  %5728 = vmatmul.msk.bf16.gmra.mxu2 %vm362_vm8, %v6063_v39 }
 0x1ff   : > { %v2072_v47 = vadd.f32 %v2035_v45, %v1790_v29  ;;  %v3274_v45 = vld [vmem:[#allocation3 + $0x8] sm:$0xff] }
 0x200   : > { %v3162_v40 = vpop.f32.mrf.mxu0  ;;  %v2167_v21 = vld [vmem:[#allocation3 + $0xe0] sm:$0xff]  ;;  %3234 = vst.msk [vmem:[#allocation3 + $0xc8] sm:$0xff] %vm362_vm8, %v3202_v22 }
 0x201   : > { %2104 = vst.msk [vmem:[#allocation3 + $0xe8] sm:$0xff] %vm362_vm8, %v2072_v47  ;;  %v2411_v55 = vpop.f32.mrf.mxu2  ;;  %v6065_v47 = vld [vmem:[#allocation2 + $0x50] sm:$0xff] }
 0x202   : > { %v2449_v6 = vadd.f32 %v2411_v55, %v2167_v21  ;;  %v6046_v55 = vld [vmem:[#allocation2 + $0x170] sm:$0xff] }
 0x203   : > { %v2786_v8 = vpop.f32.mrf.mxu3  ;;  %5919 = vmatmul.msk.bf16.gmra.mxu0 %vm362_vm8, %v6102_v24  ;;  %v2544_v18 = vld [vmem:[#allocation3 + $0xd8] sm:$0xff] }
 0x204   : > { %v2826_v52 = vadd.f32 %v2786_v8, %v2544_v18  ;;  %2481 = vst.msk [vmem:[#allocation3 + $0xe0] sm:$0xff] %vm362_vm8, %v2449_v6 }
 0x205   : > { %v2921_v12 = vld [vmem:[#allocation3 + $0xd0] sm:$0xff] }
 0x206   : > { %v2038_v58 = vpop.f32.mrf.mxu1  ;;  %2858 = vst.msk [vmem:[#allocation3 + $0xd8] sm:$0xff] %vm362_vm8, %v2826_v52  ;;  %v3203_v31 = vadd.f32 %v3162_v40, %v2921_v12 }
 0x207   : > { %v2073_v34 = vadd.f32 %v2038_v58, %v1791_v61  ;;  %v3275_v58 = vld [vmem:[#allocation3 + $0x10] sm:$0xff] }
 0x208   : > { %5824 = vmatmul.msk.bf16.gmra.mxu3 %vm362_vm8, %v6083_v46  ;;  %v3164_v5 = vpop.f32.mrf.mxu0  ;;  %v2168_v53 = vld [vmem:[#allocation3 + $0xe8] sm:$0xff]  ;;  %3235 = vst.msk [vmem:[#allocation3 + $0xd0] sm:$0xff] %vm362_vm8, %v3203_v31 }
 0x209   : > { %5633 = vmatmul.msk.bf16.gmra.mxu1 %vm362_vm8, %v6044_v2  ;;  %2105 = vst.msk [vmem:[#allocation3 + $0xf0] sm:$0xff] %vm362_vm8, %v2073_v34  ;;  %v2413_v42 = vpop.f32.mrf.mxu2  ;;  %v6085_v2 = vld [vmem:[#allocation2 + $0xe0] sm:$0xff] }
 0x20a   : > { %v2450_v33 = vadd.f32 %v2413_v42, %v2168_v53 }
 0x20b   : > { %v2789_v37 = vpop.f32.mrf.mxu3  ;;  %v2545_v17 = vld [vmem:[#allocation3 + $0xe0] sm:$0xff] }
 0x20c   : > { %v2827_v10 = vadd.f32 %v2789_v37, %v2545_v17  ;;  %2482 = vst.msk [vmem:[#allocation3 + $0xe8] sm:$0xff] %vm362_vm8, %v2450_v33  ;;  %v6105_v17 = vld [vmem:[#allocation2 + $0x170] sm:$0xff] }
 0x20d   : > { %v2922_v23 = vld [vmem:[#allocation3 + $0xd8] sm:$0xff] }
 0x20e   : > { %v2040_v54 = vpop.f32.mrf.mxu1  ;;  %2859 = vst.msk [vmem:[#allocation3 + $0xe0] sm:$0xff] %vm362_vm8, %v2827_v10  ;;  %v3204_v63 = vadd.f32 %v3164_v5, %v2922_v23  ;;  %5729 = vmatmul.msk.bf16.gmra.mxu2 %vm362_vm8, %v6064_v11 }
 0x20f   : > { %v2074_v27 = vadd.f32 %v2040_v54, %v1792_v25  ;;  %v3276_v54 = vld [vmem:[#allocation3 + $0x18] sm:$0xff] }
 0x210   : > { %v3167_v44 = vpop.f32.mrf.mxu0  ;;  %v2169_v32 = vld [vmem:[#allocation3 + $0xf0] sm:$0xff]  ;;  %3236 = vst.msk [vmem:[#allocation3 + $0xd8] sm:$0xff] %vm362_vm8, %v3204_v63 }
 0x211   : > { %2106 = vst.msk [vmem:[#allocation3 + $0xf8] sm:$0xff] %vm362_vm8, %v2074_v27  ;;  %v2416_v57 = vpop.f32.mrf.mxu2  ;;  %v6066_v27 = vld [vmem:[#allocation2 + $0x58] sm:$0xff] }
 0x212   : > { %v2451_v26 = vadd.f32 %v2416_v57, %v2169_v32  ;;  %v6047_v57 = vld [vmem:[#allocation2 + $0x178] sm:$0xff] }
 0x213   : > { %v2791_v36 = vpop.f32.mrf.mxu3  ;;  %5920 = vmatmul.msk.bf16.gmra.mxu0 %vm362_vm8, %v6103_v43  ;;  %v2546_v35 = vld [vmem:[#allocation3 + $0xe8] sm:$0xff] }
 0x214   : > { %v2828_v4 = vadd.f32 %v2791_v36, %v2546_v35  ;;  %2483 = vst.msk [vmem:[#allocation3 + $0xf0] sm:$0xff] %vm362_vm8, %v2451_v26 }
 0x215   : > { %v2923_v60 = vld [vmem:[#allocation3 + $0xe0] sm:$0xff] }
 0x216   : > { %v3475_v62 = vpop.f32.mrf.mxu1  ;;  %2860 = vst.msk [vmem:[#allocation3 + $0xe8] sm:$0xff] %vm362_vm8, %v2828_v4  ;;  %v3205_v30 = vadd.f32 %v3167_v44, %v2923_v60 }
 0x217   : > { %v3555_v15 = vadd.f32 %v3475_v62, %v3273_v14  ;;  %v3277_v62 = vld [vmem:[#allocation3 + $0x20] sm:$0xff] }
 0x218   : > { %5825 = vmatmul.msk.bf16.gmra.mxu3 %vm362_vm8, %v6084_v7  ;;  %v3169_v49 = vpop.f32.mrf.mxu0  ;;  %v2170_v20 = vld [vmem:[#allocation3 + $0xf8] sm:$0xff]  ;;  %3237 = vst.msk [vmem:[#allocation3 + $0xe0] sm:$0xff] %vm362_vm8, %v3205_v30 }
 0x219   : > { %5634 = vmatmul.msk.bf16.gmra.mxu1 %vm362_vm8, %v6045_v41  ;;  %3587 = vst.msk [vmem:[#allocation3] sm:$0xff] %vm362_vm8, %v3555_v15  ;;  %v2418_v29 = vpop.f32.mrf.mxu2  ;;  %v6086_v41 = vld [vmem:[#allocation2 + $0xe8] sm:$0xff] }
 0x21a   : > { %v2452_v39 = vadd.f32 %v2418_v29, %v2170_v20 }
 0x21b   : > { %v2794_v9 = vpop.f32.mrf.mxu3  ;;  %v2547_v40 = vld [vmem:[#allocation3 + $0xf0] sm:$0xff] }
 0x21c   : > { %v2829_v1 = vadd.f32 %v2794_v9, %v2547_v40  ;;  %2484 = vst.msk [vmem:[#allocation3 + $0xf8] sm:$0xff] %vm362_vm8, %v2452_v39  ;;  %v6106_v40 = vld [vmem:[#allocation2 + $0x178] sm:$0xff] }
 0x21d   : > { %v2924_v22 = vld [vmem:[#allocation3 + $0xe8] sm:$0xff] }
 0x21e   : > { %v3477_v0 = vpop.f32.mrf.mxu1  ;;  %2861 = vst.msk [vmem:[#allocation3 + $0xf0] sm:$0xff] %vm362_vm8, %v2829_v1  ;;  %v3206_v8 = vadd.f32 %v3169_v49, %v2924_v22  ;;  %5730 = vmatmul.msk.bf16.gmra.mxu2 %vm362_vm8, %v6065_v47 }
 0x21f   : > { %v3556_v24 = vadd.f32 %v3477_v0, %v3274_v45  ;;  %v3278_v0 = vld [vmem:[#allocation3 + $0x28] sm:$0xff] }
 0x220   : > { %v3172_v28 = vpop.f32.mrf.mxu0  ;;  %v3652_v46 = vld [vmem:[#allocation3] sm:$0xff]  ;;  %3238 = vst.msk [vmem:[#allocation3 + $0xe8] sm:$0xff] %vm362_vm8, %v3206_v8 }
 0x221   : > { %3588 = vst.msk [vmem:[#allocation3 + $0x8] sm:$0xff] %vm362_vm8, %v3556_v24  ;;  %v3854_v61 = vpop.f32.mrf.mxu2  ;;  %v6067_v24 = vld [vmem:[#allocation2 + $0x60] sm:$0xff]  ;;  %v4791_v8 = vld [vmem:[%s6590_s3] sm:$0xff] }
 0x222   : > { %v3934_v34 = vadd.f32 %v3854_v61, %v3652_v46 }
 0x223   : > { %v2796_v21 = vpop.f32.mrf.mxu3  ;;  %5921 = vmatmul.msk.bf16.gmra.mxu0 %vm362_vm8, %v6104_v48  ;;  %v2548_v5 = vld [vmem:[#allocation3 + $0xf8] sm:$0xff] }
 0x224   : > { %v2830_v12 = vadd.f32 %v2796_v21, %v2548_v5  ;;  %3966 = vst.msk [vmem:[#allocation3] sm:$0xff] %vm362_vm8, %v3934_v34  ;;  %v6048_v34 = vld [vmem:[#allocation2 + $0x180] sm:$0xff] }
 0x225   : > { %v2925_v31 = vld [vmem:[#allocation3 + $0xf0] sm:$0xff] }
 0x226   : > { %v3480_v6 = vpop.f32.mrf.mxu1  ;;  %2862 = vst.msk [vmem:[#allocation3 + $0xf8] sm:$0xff] %vm362_vm8, %v2830_v12  ;;  %v3207_v37 = vadd.f32 %v3172_v28, %v2925_v31  ;;  %v3279_v5 = vld [vmem:[#allocation3 + $0x30] sm:$0xff] }
 0x227   : > { %v3557_v18 = vadd.f32 %v3480_v6, %v3275_v58  ;;  %v6087_v58 = vld [vmem:[#allocation2 + $0xf0] sm:$0xff] }
 0x228   : > { %5826 = vmatmul.msk.bf16.gmra.mxu3 %vm362_vm8, %v6085_v2  ;;  %v3174_v52 = vpop.f32.mrf.mxu0  ;;  %v3653_v42 = vld [vmem:[#allocation3 + $0x8] sm:$0xff]  ;;  %3239 = vst.msk [vmem:[#allocation3 + $0xf0] sm:$0xff] %vm362_vm8, %v3207_v37 }
 0x229   : > { %5635 = vmatmul.msk.bf16.gmra.mxu1 %vm362_vm8, %v6046_v55  ;;  %3589 = vst.msk [vmem:[#allocation3 + $0x10] sm:$0xff] %vm362_vm8, %v3557_v18  ;;  %v3856_v25 = vpop.f32.mrf.mxu2 }
 0x22a   : > { %v3935_v11 = vadd.f32 %v3856_v25, %v3653_v42  ;;  %v4792_v25 = vld [vmem:[%s6590_s3 + $0x8] sm:$0xff] }
 0x22b   : > { %v4233_v53 = vpop.f32.mrf.mxu3  ;;  %v4031_v44 = vld [vmem:[#allocation3] sm:$0xff] }
 0x22c   : > { %v4313_v23 = vadd.f32 %v4233_v53, %v4031_v44  ;;  %3967 = vst.msk [vmem:[#allocation3 + $0x8] sm:$0xff] %vm362_vm8, %v3935_v11 }
 0x22d   : > { %v2926_v63 = vld [vmem:[#allocation3 + $0xf8] sm:$0xff] }
 0x22e   : > { %v3482_v33 = vpop.f32.mrf.mxu1  ;;  %4345 = vst.msk [vmem:[#allocation3] sm:$0xff] %vm362_vm8, %v4313_v23  ;;  %v3208_v36 = vadd.f32 %v3174_v52, %v2926_v63  ;;  %5731 = vmatmul.msk.bf16.gmra.mxu2 %vm362_vm8, %v6066_v27 }
 0x22f   : > { %v3558_v43 = vadd.f32 %v3482_v33, %v3276_v54 }
 0x230   : > { %v4612_v10 = vpop.f32.mrf.mxu0  ;;  %v3654_v7 = vld [vmem:[#allocation3 + $0x10] sm:$0xff]  ;;  %3240 = vst.msk [vmem:[#allocation3 + $0xf8] sm:$0xff] %vm362_vm8, %v3208_v36  ;;  %v6068_v36 = vld [vmem:[#allocation2 + $0x68] sm:$0xff] }
 0x231   : > { %3590 = vst.msk [vmem:[#allocation3 + $0x18] sm:$0xff] %vm362_vm8, %v3558_v43  ;;  %v3859_v14 = vpop.f32.mrf.mxu2 }
 0x232   : > { %v3936_v15 = vadd.f32 %v3859_v14, %v3654_v7  ;;  %v6107_v7 = vld [vmem:[#allocation2 + $0x180] sm:$0xff] }
 0x233   : > { %v4235_v32 = vpop.f32.mrf.mxu3  ;;  %5922 = vmatmul.msk.bf16.gmra.mxu0 %vm362_vm8, %v6105_v17  ;;  %v4032_v49 = vld [vmem:[#allocation3 + $0x8] sm:$0xff] }
 0x234   : > { %v4314_v60 = vadd.f32 %v4235_v32, %v4032_v49  ;;  %3968 = vst.msk [vmem:[#allocation3 + $0x10] sm:$0xff] %vm362_vm8, %v3936_v15 }
 0x235   : > { %v4410_v30 = vld [vmem:[#allocation3] sm:$0xff] }
 0x236   : > { %v3485_v26 = vpop.f32.mrf.mxu1  ;;  %4346 = vst.msk [vmem:[#allocation3 + $0x8] sm:$0xff] %vm362_vm8, %v4314_v60  ;;  %v4692_v9 = vadd.f32 %v4612_v10, %v4410_v30  ;;  %v3280_v10 = vld [vmem:[#allocation3 + $0x38] sm:$0xff]  ;;  %v6088_v60 = vld [vmem:[#allocation2 + $0xf8] sm:$0xff] }
 0x237   : > { %v3559_v35 = vadd.f32 %v3485_v26, %v3277_v62  ;;  %v4793_v62 = vld [vmem:[%s6590_s3 + $0x10] sm:$0xff] }
 0x238   : > { %5827 = vmatmul.msk.bf16.gmra.mxu3 %vm362_vm8, %v6086_v41  ;;  %v4614_v4 = vpop.f32.mrf.mxu0  ;;  %v3655_v29 = vld [vmem:[#allocation3 + $0x18] sm:$0xff]  ;;  %4724 = vst.msk [vmem:[#allocation3] sm:$0xff] %vm362_vm8, %v4692_v9 }
 0x239   : > { %5636 = vmatmul.msk.bf16.gmra.mxu1 %vm362_vm8, %v6047_v57  ;;  %3591 = vst.msk [vmem:[#allocation3 + $0x20] sm:$0xff] %vm362_vm8, %v3559_v35  ;;  %v3861_v45 = vpop.f32.mrf.mxu2  ;;  %v6049_v9 = vld [vmem:[#allocation2 + $0x188] sm:$0xff] }
 0x23a   : > { %v3937_v47 = vadd.f32 %v3861_v45, %v3655_v29  ;;  %v3281_v29 = vld [vmem:[#allocation3 + $0x40] sm:$0xff] }
 0x23b   : > { %v4238_v20 = vpop.f32.mrf.mxu3  ;;  %v4033_v28 = vld [vmem:[#allocation3 + $0x10] sm:$0xff] }
 0x23c   : > { %v4315_v22 = vadd.f32 %v4238_v20, %v4033_v28  ;;  %3969 = vst.msk [vmem:[#allocation3 + $0x18] sm:$0xff] %vm362_vm8, %v3937_v47 }
 0x23d   : > { %v4411_v21 = vld [vmem:[#allocation3 + $0x8] sm:$0xff] }
 0x23e   : > { %v3487_v39 = vpop.f32.mrf.mxu1  ;;  %4347 = vst.msk [vmem:[#allocation3 + $0x10] sm:$0xff] %vm362_vm8, %v4315_v22  ;;  %v4693_v46 = vadd.f32 %v4614_v4, %v4411_v21  ;;  %5732 = vmatmul.msk.bf16.gmra.mxu2 %vm362_vm8, %v6067_v24 }
 0x23f   : > { %v3560_v48 = vadd.f32 %v3487_v39, %v3278_v0  ;;  %v4759_v55 = vld [vmem:[#allocation3] sm:$0xff] }
 0x240   : > { %v4617_v1 = vpop.f32.mrf.mxu0  ;;  %v3656_v61 = vld [vmem:[#allocation3 + $0x20] sm:$0xff]  ;;  %v4823_v6 = vadd.f32 %v4791_v8, %v4759_v55  ;;  %4725 = vst.msk [vmem:[#allocation3 + $0x8] sm:$0xff] %vm362_vm8, %v4693_v46  ;;  %v3282_v55 = vld [vmem:[#allocation3 + $0x48] sm:$0xff] }
 0x241   : > { %3592 = vst.msk [vmem:[#allocation3 + $0x28] sm:$0xff] %vm362_vm8, %v3560_v48  ;;  %v3864_v18 = vpop.f32.mrf.mxu2 }
 0x242   : > { %4855 = vst.msk [vmem:[%s7789_s27] sm:$0xff] %vm362_vm8, %v4823_v6  ;;  %v3938_v12 = vadd.f32 %v3864_v18, %v3656_v61  ;;  %v6069_v6 = vld [vmem:[#allocation2 + $0x70] sm:$0xff]  ;;  %v6108_v18 = vld [vmem:[#allocation2 + $0x188] sm:$0xff] }
 0x243   : > { %v4240_v2 = vpop.f32.mrf.mxu3  ;;  %5923 = vmatmul.msk.bf16.gmra.mxu0 %vm362_vm8, %v6106_v40  ;;  %v4034_v37 = vld [vmem:[#allocation3 + $0x18] sm:$0xff] }
 0x244   : > { %v4316_v42 = vadd.f32 %v4240_v2, %v4034_v37  ;;  %3970 = vst.msk [vmem:[#allocation3 + $0x20] sm:$0xff] %vm362_vm8, %v3938_v12  ;;  %v4794_v40 = vld [vmem:[%s6590_s3 + $0x18] sm:$0xff] }
 0x245   : > { %v4412_v54 = vld [vmem:[#allocation3 + $0x10] sm:$0xff] }
 0x246   : > { %v3490_v52 = vpop.f32.mrf.mxu1  ;;  %4348 = vst.msk [vmem:[#allocation3 + $0x18] sm:$0xff] %vm362_vm8, %v4316_v42  ;;  %v4694_v33 = vadd.f32 %v4617_v1, %v4412_v54 }
 0x247   : > { %v3561_v31 = vadd.f32 %v3490_v52, %v3279_v5  ;;  %v4760_v27 = vld [vmem:[#allocation3 + $0x8] sm:$0xff]  ;;  %v1104_v5 = vld [vmem:[#allocation2 + $0x1a4] sm:$0x8] }
 0x248   : > { %5828 = vmatmul.msk.bf16.gmra.mxu3 %vm362_vm8, %v6087_v58  ;;  %v4619_v53 = vpop.f32.mrf.mxu0  ;;  %v3657_v43 = vld [vmem:[#allocation3 + $0x28] sm:$0xff]  ;;  %v4824_v17 = vadd.f32 %v4792_v25, %v4760_v27  ;;  %4726 = vst.msk [vmem:[#allocation3 + $0x10] sm:$0xff] %vm362_vm8, %v4694_v33  ;;  %v1105_v37 = vsel %vm7157_vm12, 0, %v1104_v5  ;;  %v1245_v33 = vrot.slane %v896_v59, 4 }
 0x249   : > { %5637 = vmatmul.msk.bf16.gmra.mxu1 %vm362_vm8, %v6048_v34  ;;  %3593 = vst.msk [vmem:[#allocation3 + $0x30] sm:$0xff] %vm362_vm8, %v3561_v31  ;;  %v3866_v44 = vpop.f32.mrf.mxu2 }
 0x24a   : > { %4856 = vst.msk [vmem:[%s7789_s27 + $0x8] sm:$0xff] %vm362_vm8, %v4824_v17  ;;  %v3939_v63 = vadd.f32 %v3866_v44, %v3657_v43  ;;  %v6089_v17 = vld [vmem:[#allocation2 + $0x100] sm:$0xff]  ;;  %v1251_v44 = vrot.slane %v904_v56, 4 }
 0x24b   : > { %v4243_v11 = vpop.f32.mrf.mxu3  ;;  %v4035_v41 = vld [vmem:[#allocation3 + $0x20] sm:$0xff]  ;;  %1106 = vst [vmem:[#allocation2 + $0x1a4] sm:$0x8] %v1105_v37 }
 0x24c   : > { %v4317_v14 = vadd.f32 %v4243_v11, %v4035_v41  ;;  %3971 = vst.msk [vmem:[#allocation3 + $0x28] sm:$0xff] %vm362_vm8, %v3939_v63  ;;  %v1249_v11 = vrot.slane %v907_v3, 5  ;;  %v1247_v63 = vor.u32 %v1246_v51, %v1245_v33 }
 0x24d   : > { %v4413_v26 = vld [vmem:[#allocation3 + $0x18] sm:$0xff] }
 0x24e   : > { %v3492_v23 = vpop.f32.mrf.mxu1  ;;  %4349 = vst.msk [vmem:[#allocation3 + $0x20] sm:$0xff] %vm362_vm8, %v4317_v14  ;;  %v4695_v15 = vadd.f32 %v4619_v53, %v4413_v26  ;;  %5733 = vmatmul.msk.bf16.gmra.mxu2 %vm362_vm8, %v6068_v36  ;;  %v4795_v53 = vld [vmem:[%s6590_s3 + $0x20] sm:$0xff]  ;;  %v1252_v16 = vor.u32 %v1251_v44, %v1249_v11 }
 0x24f   : > { %v3562_v32 = vadd.f32 %v3492_v23, %v3280_v10  ;;  %v4761_v49 = vld [vmem:[#allocation3 + $0x10] sm:$0xff]  ;;  %v6050_v23 = vld [vmem:[#allocation2 + $0x190] sm:$0xff] }
 0x250   : > { %v4622_v57 = vpop.f32.mrf.mxu0  ;;  %v3658_v4 = vld [vmem:[#allocation3 + $0x30] sm:$0xff]  ;;  %v4825_v30 = vadd.f32 %v4793_v62, %v4761_v49  ;;  %4727 = vst.msk [vmem:[#allocation3 + $0x18] sm:$0xff] %vm362_vm8, %v4695_v15  ;;  %v1253_v56 = vrot.slane %v1252_v16, 4  ;;  %v4796_v62 = vld [vmem:[%s6590_s3 + $0x28] sm:$0xff] }
 0x251   : > { %3594 = vst.msk [vmem:[#allocation3 + $0x38] sm:$0xff] %vm362_vm8, %v3562_v32  ;;  %v3869_v20 = vpop.f32.mrf.mxu2 }
 0x252   : > { %4857 = vst.msk [vmem:[%s7789_s27 + $0x10] sm:$0xff] %vm362_vm8, %v4825_v30  ;;  %v3940_v0 = vadd.f32 %v3869_v20, %v3658_v4  ;;  %v1348_v49 = vld [vmem:[#allocation2 + $0x1a4] sm:$0xf]  ;;  %v3284_v20 = vld [vmem:[#allocation3 + $0x58] sm:$0xff] }
 0x253   : > { %v4245_v35 = vpop.f32.mrf.mxu3  ;;  %5924 = vmatmul.msk.bf16.gmra.mxu0 %vm362_vm8, %v6107_v7  ;;  %v4036_v47 = vld [vmem:[#allocation3 + $0x28] sm:$0xff]  ;;  %v1248_v7 = vrot.slane %v1247_v63, 4  ;;  %v1349_v30 = vsel %vm7201_vm15, %v1253_v56, %v1348_v49 }
 0x254   : > { %v4318_v48 = vadd.f32 %v4245_v35, %v4036_v47  ;;  %3972 = vst.msk [vmem:[#allocation3 + $0x30] sm:$0xff] %vm362_vm8, %v3940_v0  ;;  %v6070_v0 = vld [vmem:[#allocation2 + $0x78] sm:$0xff]  ;;  %v6109_v47 = vld [vmem:[#allocation2 + $0x190] sm:$0xff] }
 0x255   : > { %v4414_v28 = vld [vmem:[#allocation3 + $0x20] sm:$0xff]  ;;  %v1250_v14 = vsel %vm7163_vm14, %v1248_v7, %v1249_v11  ;;  %1350 = vst [vmem:[#allocation2 + $0x1a4] sm:$0xf] %v1349_v30  ;;  %v3286_v11 = vld [vmem:[#allocation3 + $0x68] sm:$0xff] }
 0x256   : > { %v3495_v45 = vpop.f32.mrf.mxu1  ;;  %4350 = vst.msk [vmem:[#allocation3 + $0x28] sm:$0xff] %vm362_vm8, %v4318_v48  ;;  %v4696_v1 = vadd.f32 %v4622_v57, %v4414_v28 }
 0x257   : > { %v3563_v39 = vadd.f32 %v3495_v45, %v3281_v29  ;;  %v4762_v8 = vld [vmem:[#allocation3 + $0x18] sm:$0xff]  ;;  %1347 = vst.msk [vmem:[#allocation2 + $0x1a0] sm:$0xf] %vm595_vm3, %v1250_v14  ;;  %v3287_v14 = vld [vmem:[#allocation3 + $0x70] sm:$0xff] }
 0x258   : > { %5829 = vmatmul.msk.bf16.gmra.mxu3 %vm362_vm8, %v6088_v60  ;;  %v4624_v24 = vpop.f32.mrf.mxu0  ;;  %v3659_v21 = vld [vmem:[#allocation3 + $0x38] sm:$0xff]  ;;  %v4826_v46 = vadd.f32 %v4794_v40, %v4762_v8  ;;  %4728 = vst.msk [vmem:[#allocation3 + $0x20] sm:$0xff] %vm362_vm8, %v4696_v1 }
 0x259   : > { %5638 = vmatmul.msk.bf16.gmra.mxu1 %vm362_vm8, %v6049_v9  ;;  %3595 = vst.msk [vmem:[#allocation3 + $0x40] sm:$0xff] %vm362_vm8, %v3563_v39  ;;  %v3871_v2 = vpop.f32.mrf.mxu2 }
 0x25a   : > { %4858 = vst.msk [vmem:[%s7789_s27 + $0x18] sm:$0xff] %vm362_vm8, %v4826_v46  ;;  %v3941_v58 = vadd.f32 %v3871_v2, %v3659_v21  ;;  %v6090_v46 = vld [vmem:[#allocation2 + $0x108] sm:$0xff] }
 0x25b   : > { %v4248_v22 = vpop.f32.mrf.mxu3  ;;  %v4037_v52 = vld [vmem:[#allocation3 + $0x30] sm:$0xff] }
 0x25c   : > { %v4319_v31 = vadd.f32 %v4248_v22, %v4037_v52  ;;  %3973 = vst.msk [vmem:[#allocation3 + $0x38] sm:$0xff] %vm362_vm8, %v3941_v58  ;;  %v3285_v58 = vld [vmem:[#allocation3 + $0x60] sm:$0xff] }
 0x25d   : > { %v4415_v42 = vld [vmem:[#allocation3 + $0x28] sm:$0xff] }
 0x25e   : > { %v3497_v61 = vpop.f32.mrf.mxu1  ;;  %4351 = vst.msk [vmem:[#allocation3 + $0x30] sm:$0xff] %vm362_vm8, %v4319_v31  ;;  %v4697_v25 = vadd.f32 %v4624_v24, %v4415_v42  ;;  %5734 = vmatmul.msk.bf16.gmra.mxu2 %vm362_vm8, %v6069_v6  ;;  %v4798_v31 = vld [vmem:[%s6590_s3 + $0x38] sm:$0xff]  ;;  %v6052_v56 = vld [vmem:[#allocation2 + $0x1a0] sm:$0xff] }
 0x25f   : > { %v3564_v34 = vadd.f32 %v3497_v61, %v3282_v55  ;;  %v4763_v27 = vld [vmem:[#allocation3 + $0x20] sm:$0xff]  ;;  %v6051_v55 = vld [vmem:[#allocation2 + $0x198] sm:$0xff] }
 0x260   : > { %v4627_v12 = vpop.f32.mrf.mxu0  ;;  %v3660_v43 = vld [vmem:[#allocation3 + $0x40] sm:$0xff]  ;;  %v4827_v10 = vadd.f32 %v4795_v53, %v4763_v27  ;;  %4729 = vst.msk [vmem:[#allocation3 + $0x28] sm:$0xff] %vm362_vm8, %v4697_v25 }
 0x261   : > { %3596 = vst.msk [vmem:[#allocation3 + $0x48] sm:$0xff] %vm362_vm8, %v3564_v34  ;;  %v3874_v59 = vpop.f32.mrf.mxu2 }
 0x262   : > { %4859 = vst.msk [vmem:[%s7789_s27 + $0x20] sm:$0xff] %vm362_vm8, %v4827_v10  ;;  %v3942_v3 = vadd.f32 %v3874_v59, %v3660_v43  ;;  %v6110_v10 = vld [vmem:[#allocation2 + $0x198] sm:$0xff] }
 0x263   : > { %v4250_v54 = vpop.f32.mrf.mxu3  ;;  %5925 = vmatmul.msk.bf16.gmra.mxu0 %vm362_vm8, %v6108_v18  ;;  %v4038_v41 = vld [vmem:[#allocation3 + $0x38] sm:$0xff] }
 0x264   : > { %v4320_v57 = vadd.f32 %v4250_v54, %v4038_v41  ;;  %3974 = vst.msk [vmem:[#allocation3 + $0x40] sm:$0xff] %vm362_vm8, %v3942_v3  ;;  %v6091_v41 = vld [vmem:[#allocation2 + $0x110] sm:$0xff] }
 0x265   : > { %v4416_v26 = vld [vmem:[#allocation3 + $0x30] sm:$0xff] }
 0x266   : > { %v3500_v36 = vpop.f32.mrf.mxu1  ;;  %4352 = vst.msk [vmem:[#allocation3 + $0x38] sm:$0xff] %vm362_vm8, %v4320_v57  ;;  %v4698_v15 = vadd.f32 %v4627_v12, %v4416_v26 }
 0x267   : > { %v3565_v32 = vadd.f32 %v3500_v36, %v3283_v50  ;;  %v4764_v4 = vld [vmem:[#allocation3 + $0x28] sm:$0xff]  ;;  %v4799_v50 = vld [vmem:[%s6590_s3 + $0x40] sm:$0xff] }
 0x268   : > { %5830 = vmatmul.msk.bf16.gmra.mxu3 %vm362_vm8, %v6089_v17  ;;  %v4629_v13 = vpop.f32.mrf.mxu0  ;;  %v3661_v60 = vld [vmem:[#allocation3 + $0x48] sm:$0xff]  ;;  %v4828_v38 = vadd.f32 %v4796_v62, %v4764_v4  ;;  %4730 = vst.msk [vmem:[#allocation3 + $0x30] sm:$0xff] %vm362_vm8, %v4698_v15  ;;  %v6071_v17 = vld [vmem:[#allocation2 + $0x80] sm:$0xff] }
 0x269   : > { %5639 = vmatmul.msk.bf16.gmra.mxu1 %vm362_vm8, %v6050_v23  ;;  %3597 = vst.msk [vmem:[#allocation3 + $0x50] sm:$0xff] %vm362_vm8, %v3565_v32  ;;  %v3876_v9 = vpop.f32.mrf.mxu2 }
 0x26a   : > { %4860 = vst.msk [vmem:[%s7789_s27 + $0x28] sm:$0xff] %vm362_vm8, %v4828_v38  ;;  %v3943_v45 = vadd.f32 %v3876_v9, %v3661_v60  ;;  %v4800_v60 = vld [vmem:[%s6590_s3 + $0x48] sm:$0xff] }
 0x26b   : > { %v4253_v35 = vpop.f32.mrf.mxu3  ;;  %v4039_v24 = vld [vmem:[#allocation3 + $0x40] sm:$0xff] }
 0x26c   : > { %v4321_v40 = vadd.f32 %v4253_v35, %v4039_v24  ;;  %3975 = vst.msk [vmem:[#allocation3 + $0x48] sm:$0xff] %vm362_vm8, %v3943_v45 }
 0x26d   : > { %v4417_v28 = vld [vmem:[#allocation3 + $0x38] sm:$0xff] }
 0x26e   : > { %v3502_v29 = vpop.f32.mrf.mxu1  ;;  %4353 = vst.msk [vmem:[#allocation3 + $0x40] sm:$0xff] %vm362_vm8, %v4321_v40  ;;  %v4699_v1 = vadd.f32 %v4629_v13, %v4417_v28  ;;  %5735 = vmatmul.msk.bf16.gmra.mxu2 %vm362_vm8, %v6070_v0 }
 0x26f   : > { %v3566_v39 = vadd.f32 %v3502_v29, %v3284_v20  ;;  %v4765_v8 = vld [vmem:[#allocation3 + $0x30] sm:$0xff] }
 0x270   : > { %v4632_v48 = vpop.f32.mrf.mxu0  ;;  %v3662_v21 = vld [vmem:[#allocation3 + $0x50] sm:$0xff]  ;;  %v4829_v2 = vadd.f32 %v4797_v19, %v4765_v8  ;;  %4731 = vst.msk [vmem:[#allocation3 + $0x38] sm:$0xff] %vm362_vm8, %v4699_v1 }
 0x271   : > { %3598 = vst.msk [vmem:[#allocation3 + $0x58] sm:$0xff] %vm362_vm8, %v3566_v39  ;;  %v3879_v61 = vpop.f32.mrf.mxu2  ;;  %v3288_v39 = vld [vmem:[#allocation3 + $0x78] sm:$0xff]  ;;  %v6111_v19 = vld [vmem:[#allocation2 + $0x1a0] sm:$0xff] }
 0x272   : > { %4861 = vst.msk [vmem:[%s7789_s27 + $0x30] sm:$0xff] %vm362_vm8, %v4829_v2  ;;  %v3944_v34 = vadd.f32 %v3879_v61, %v3662_v21  ;;  %v4801_v8 = vld [vmem:[%s6590_s3 + $0x50] sm:$0xff] }
 0x273   : > { %v4255_v22 = vpop.f32.mrf.mxu3  ;;  %5926 = vmatmul.msk.bf16.gmra.mxu0 %vm362_vm8, %v6109_v47  ;;  %v4040_v5 = vld [vmem:[#allocation3 + $0x48] sm:$0xff] }
 0x274   : > { %v4322_v12 = vadd.f32 %v4255_v22, %v4040_v5  ;;  %3976 = vst.msk [vmem:[#allocation3 + $0x50] sm:$0xff] %vm362_vm8, %v3944_v34 }
 0x275   : > { %v4418_v37 = vld [vmem:[#allocation3 + $0x40] sm:$0xff] }
 0x276   : > { %v3505_v6 = vpop.f32.mrf.mxu1  ;;  %4354 = vst.msk [vmem:[#allocation3 + $0x48] sm:$0xff] %vm362_vm8, %v4322_v12  ;;  %v4700_v53 = vadd.f32 %v4632_v48, %v4418_v37  ;;  %v6072_v48 = vld [vmem:[#allocation2 + $0x88] sm:$0xff] }
 0x277   : > { %v3567_v18 = vadd.f32 %v3505_v6, %v3285_v58  ;;  %v4766_v25 = vld [vmem:[#allocation3 + $0x38] sm:$0xff]  ;;  %v6092_v58 = vld [vmem:[#allocation2 + $0x118] sm:$0xff] }
 0x278   : > { %5831 = vmatmul.msk.bf16.gmra.mxu3 %vm362_vm8, %v6090_v46  ;;  %v4634_v52 = vpop.f32.mrf.mxu0  ;;  %v3663_v54 = vld [vmem:[#allocation3 + $0x58] sm:$0xff]  ;;  %v4830_v33 = vadd.f32 %v4798_v31, %v4766_v25  ;;  %4732 = vst.msk [vmem:[#allocation3 + $0x40] sm:$0xff] %vm362_vm8, %v4700_v53 }
 0x279   : > { %5640 = vmatmul.msk.bf16.gmra.mxu1 %vm362_vm8, %v6051_v55  ;;  %3599 = vst.msk [vmem:[#allocation3 + $0x60] sm:$0xff] %vm362_vm8, %v3567_v18  ;;  %v3881_v51 = vpop.f32.mrf.mxu2  ;;  %v3289_v18 = vld [vmem:[#allocation3 + $0x80] sm:$0xff] }
 0x27a   : > { %4862 = vst.msk [vmem:[%s7789_s27 + $0x38] sm:$0xff] %vm362_vm8, %v4830_v33  ;;  %v3945_v43 = vadd.f32 %v3881_v51, %v3663_v54 }
 0x27b   : > { %v4258_v42 = vpop.f32.mrf.mxu3  ;;  %v4041_v23 = vld [vmem:[#allocation3 + $0x50] sm:$0xff] }
 0x27c   : > { %v4323_v59 = vadd.f32 %v4258_v42, %v4041_v23  ;;  %3977 = vst.msk [vmem:[#allocation3 + $0x58] sm:$0xff] %vm362_vm8, %v3945_v43  ;;  %v4802_v42 = vld [vmem:[%s6590_s3 + $0x58] sm:$0xff] }
 0x27d   : > { %v4419_v36 = vld [vmem:[#allocation3 + $0x48] sm:$0xff] }
 0x27e   : > { %v3507_v27 = vpop.f32.mrf.mxu1  ;;  %4355 = vst.msk [vmem:[#allocation3 + $0x50] sm:$0xff] %vm362_vm8, %v4323_v59  ;;  %v4701_v16 = vadd.f32 %v4634_v52, %v4419_v36  ;;  %5736 = vmatmul.msk.bf16.gmra.mxu2 %vm362_vm8, %v6071_v17  ;;  %v3290_v17 = vld [vmem:[#allocation3 + $0x88] sm:$0xff] }
 0x27f   : > { %v3568_v44 = vadd.f32 %v3507_v27, %v3286_v11  ;;  %v4767_v32 = vld [vmem:[#allocation3 + $0x40] sm:$0xff] }
 0x280   : > { %v4637_v63 = vpop.f32.mrf.mxu0  ;;  %v3664_v7 = vld [vmem:[#allocation3 + $0x60] sm:$0xff]  ;;  %v4831_v13 = vadd.f32 %v4799_v50, %v4767_v32  ;;  %4733 = vst.msk [vmem:[#allocation3 + $0x48] sm:$0xff] %vm362_vm8, %v4701_v16 }
 0x281   : > { %3600 = vst.msk [vmem:[#allocation3 + $0x68] sm:$0xff] %vm362_vm8, %v3568_v44  ;;  %v3884_v57 = vpop.f32.mrf.mxu2  ;;  %v4803_v16 = vld [vmem:[%s6590_s3 + $0x60] sm:$0xff] }
 0x282   : > { %4863 = vst.msk [vmem:[%s7789_s27 + $0x40] sm:$0xff] %vm362_vm8, %v4831_v13  ;;  %v3946_v26 = vadd.f32 %v3884_v57, %v3664_v7 }
 0x283   : > { %v4260_v3 = vpop.f32.mrf.mxu3  ;;  %5927 = vmatmul.msk.bf16.gmra.mxu0 %vm362_vm8, %v6110_v10  ;;  %v4042_v35 = vld [vmem:[#allocation3 + $0x58] sm:$0xff] }
 0x284   : > { %v4324_v4 = vadd.f32 %v4260_v3, %v4042_v35  ;;  %3978 = vst.msk [vmem:[#allocation3 + $0x60] sm:$0xff] %vm362_vm8, %v3946_v26 }
 0x285   : > { %v4420_v30 = vld [vmem:[#allocation3 + $0x50] sm:$0xff] }
 0x286   : > { %v3510_v62 = vpop.f32.mrf.mxu1  ;;  %4356 = vst.msk [vmem:[#allocation3 + $0x58] sm:$0xff] %vm362_vm8, %v4324_v4  ;;  %v4702_v38 = vadd.f32 %v4637_v63, %v4420_v30  ;;  %v6112_v63 = vld [vmem:[#allocation2 + $0x1a8] sm:$0xff] }
 0x287   : > { %v3569_v15 = vadd.f32 %v3510_v62, %v3287_v14  ;;  %v4768_v20 = vld [vmem:[#allocation3 + $0x48] sm:$0xff]  ;;  %v3291_v14 = vld [vmem:[#allocation3 + $0x90] sm:$0xff] }
 0x288   : > { %5832 = vmatmul.msk.bf16.gmra.mxu3 %vm362_vm8, %v6091_v41  ;;  %v4639_v49 = vpop.f32.mrf.mxu0  ;;  %v3665_v29 = vld [vmem:[#allocation3 + $0x68] sm:$0xff]  ;;  %v4832_v45 = vadd.f32 %v4800_v60, %v4768_v20  ;;  %4734 = vst.msk [vmem:[#allocation3 + $0x50] sm:$0xff] %vm362_vm8, %v4702_v38 }
 0x289   : > { %5641 = vmatmul.msk.bf16.gmra.mxu1 %vm362_vm8, %v6052_v56  ;;  %3601 = vst.msk [vmem:[#allocation3 + $0x70] sm:$0xff] %vm362_vm8, %v3569_v15  ;;  %v3886_v0 = vpop.f32.mrf.mxu2  ;;  %v4804_v60 = vld [vmem:[%s6590_s3 + $0x68] sm:$0xff] }
 0x28a   : > { %4864 = vst.msk [vmem:[%s7789_s27 + $0x48] sm:$0xff] %vm362_vm8, %v4832_v45  ;;  %v3947_v24 = vadd.f32 %v3886_v0, %v3665_v29 }
 0x28b   : > { %v4263_v9 = vpop.f32.mrf.mxu3  ;;  %v4043_v28 = vld [vmem:[#allocation3 + $0x60] sm:$0xff] }
 0x28c   : > { %v4325_v22 = vadd.f32 %v4263_v9, %v4043_v28  ;;  %3979 = vst.msk [vmem:[#allocation3 + $0x68] sm:$0xff] %vm362_vm8, %v3947_v24 }
 0x28d   : > { %v4421_v21 = vld [vmem:[#allocation3 + $0x58] sm:$0xff] }
 0x28e   : > { %v3512_v47 = vpop.f32.mrf.mxu1  ;;  %4357 = vst.msk [vmem:[#allocation3 + $0x60] sm:$0xff] %vm362_vm8, %v4325_v22  ;;  %v4703_v46 = vadd.f32 %v4639_v49, %v4421_v21  ;;  %5737 = vmatmul.msk.bf16.gmra.mxu2 %vm362_vm8, %v6072_v48 }
 0x28f   : > { %v3570_v40 = vadd.f32 %v3512_v47, %v3288_v39  ;;  %v4769_v55 = vld [vmem:[#allocation3 + $0x50] sm:$0xff]  ;;  %v3292_v39 = vld [vmem:[#allocation3 + $0x98] sm:$0xff] }
 0x290   : > { %v4642_v1 = vpop.f32.mrf.mxu0  ;;  %v3666_v61 = vld [vmem:[#allocation3 + $0x70] sm:$0xff]  ;;  %v4833_v6 = vadd.f32 %v4801_v8, %v4769_v55  ;;  %4735 = vst.msk [vmem:[#allocation3 + $0x58] sm:$0xff] %vm362_vm8, %v4703_v46 }
 0x291   : > { %3602 = vst.msk [vmem:[#allocation3 + $0x78] sm:$0xff] %vm362_vm8, %v3570_v40  ;;  %v3889_v34 = vpop.f32.mrf.mxu2 }
 0x292   : > { %4865 = vst.msk [vmem:[%s7789_s27 + $0x50] sm:$0xff] %vm362_vm8, %v4833_v6  ;;  %v3948_v52 = vadd.f32 %v3889_v34, %v3666_v61 }
 0x293   : > { %v4265_v2 = vpop.f32.mrf.mxu3  ;;  %5928 = vmatmul.msk.bf16.gmra.mxu0 %vm362_vm8, %v6111_v19  ;;  %v4044_v31 = vld [vmem:[#allocation3 + $0x68] sm:$0xff] }
 0x294   : > { %v4326_v53 = vadd.f32 %v4265_v2, %v4044_v31  ;;  %3980 = vst.msk [vmem:[#allocation3 + $0x70] sm:$0xff] %vm362_vm8, %v3948_v52  ;;  %v4806_v31 = vld [vmem:[%s6590_s3 + $0x78] sm:$0xff] }
 0x295   : > { %v4422_v25 = vld [vmem:[#allocation3 + $0x60] sm:$0xff] }
 0x296   : > { %v3515_v5 = vpop.f32.mrf.mxu1  ;;  %4358 = vst.msk [vmem:[#allocation3 + $0x68] sm:$0xff] %vm362_vm8, %v4326_v53  ;;  %v4704_v54 = vadd.f32 %v4642_v1, %v4422_v25  ;;  %v4805_v1 = vld [vmem:[%s6590_s3 + $0x70] sm:$0xff] }
 0x297   : > { %v3571_v12 = vadd.f32 %v3515_v5, %v3289_v18  ;;  %v4770_v51 = vld [vmem:[#allocation3 + $0x58] sm:$0xff] }
 0x298   : > { %5833 = vmatmul.msk.bf16.gmra.mxu3 %vm362_vm8, %v6092_v58  ;;  %v4644_v37 = vpop.f32.mrf.mxu0  ;;  %v3667_v11 = vld [vmem:[#allocation3 + $0x78] sm:$0xff]  ;;  %v4834_v27 = vadd.f32 %v4802_v42, %v4770_v51  ;;  %4736 = vst.msk [vmem:[#allocation3 + $0x60] sm:$0xff] %vm362_vm8, %v4704_v54  ;;  %v3293_v58 = vld [vmem:[#allocation3 + $0xa0] sm:$0xff] }
 0x299   : > { %3603 = vst.msk [vmem:[#allocation3 + $0x80] sm:$0xff] %vm362_vm8, %v3571_v12  ;;  %v3891_v43 = vpop.f32.mrf.mxu2 }
 0x29a   : > { %4866 = vst.msk [vmem:[%s7789_s27 + $0x58] sm:$0xff] %vm362_vm8, %v4834_v27  ;;  %v3949_v10 = vadd.f32 %v3891_v43, %v3667_v11  ;;  %v3294_v11 = vld [vmem:[#allocation3 + $0xa8] sm:$0xff] }
 0x29b   : > { %v4268_v33 = vpop.f32.mrf.mxu3  ;;  %v4045_v59 = vld [vmem:[#allocation3 + $0x70] sm:$0xff] }
 0x29c   : > { %v4327_v36 = vadd.f32 %v4268_v33, %v4045_v59  ;;  %3981 = vst.msk [vmem:[#allocation3 + $0x78] sm:$0xff] %vm362_vm8, %v3949_v10 }
 0x29d   : > { %v4423_v3 = vld [vmem:[#allocation3 + $0x68] sm:$0xff] }
 0x29e   : > { %v3517_v44 = vpop.f32.mrf.mxu1  ;;  %4359 = vst.msk [vmem:[#allocation3 + $0x70] sm:$0xff] %vm362_vm8, %v4327_v36  ;;  %v4705_v32 = vadd.f32 %v4644_v37, %v4423_v3 }
 0x29f   : > { %v3572_v23 = vadd.f32 %v3517_v44, %v3290_v17  ;;  %v4771_v41 = vld [vmem:[#allocation3 + $0x60] sm:$0xff] }
 0x2a0   : > { %v4647_v50 = vpop.f32.mrf.mxu0  ;;  %v3668_v13 = vld [vmem:[#allocation3 + $0x80] sm:$0xff]  ;;  %v4835_v56 = vadd.f32 %v4803_v16, %v4771_v41  ;;  %4737 = vst.msk [vmem:[#allocation3 + $0x68] sm:$0xff] %vm362_vm8, %v4705_v32  ;;  %v3295_v41 = vld [vmem:[#allocation3 + $0xb0] sm:$0xff] }
 0x2a1   : > { %3604 = vst.msk [vmem:[#allocation3 + $0x88] sm:$0xff] %vm362_vm8, %v3572_v23  ;;  %v3894_v57 = vpop.f32.mrf.mxu2 }
 0x2a2   : > { %4867 = vst.msk [vmem:[%s7789_s27 + $0x60] sm:$0xff] %vm362_vm8, %v4835_v56  ;;  %v3950_v26 = vadd.f32 %v3894_v57, %v3668_v13 }
 0x2a3   : > { %v4270_v7 = vpop.f32.mrf.mxu3  ;;  %5929 = vmatmul.msk.bf16.gmra.mxu0 %vm362_vm8, %v6112_v63  ;;  %v4046_v35 = vld [vmem:[#allocation3 + $0x78] sm:$0xff]  ;;  %v4807_v63 = vld [vmem:[%s6590_s3 + $0x80] sm:$0xff] }
 0x2a4   : > { %v4328_v4 = vadd.f32 %v4270_v7, %v4046_v35  ;;  %3982 = vst.msk [vmem:[#allocation3 + $0x80] sm:$0xff] %vm362_vm8, %v3950_v26 }
 0x2a5   : > { %v4424_v30 = vld [vmem:[#allocation3 + $0x70] sm:$0xff] }
 0x2a6   : > { %v3520_v62 = vpop.f32.mrf.mxu1  ;;  %4360 = vst.msk [vmem:[#allocation3 + $0x78] sm:$0xff] %vm362_vm8, %v4328_v4  ;;  %v4706_v38 = vadd.f32 %v4647_v50, %v4424_v30 }
 0x2a7   : > { %v3573_v15 = vadd.f32 %v3520_v62, %v3291_v14  ;;  %v4772_v20 = vld [vmem:[#allocation3 + $0x68] sm:$0xff] }
 0x2a8   : > { %v4649_v49 = vpop.f32.mrf.mxu0  ;;  %v3669_v29 = vld [vmem:[#allocation3 + $0x88] sm:$0xff]  ;;  %v4836_v45 = vadd.f32 %v4804_v60, %v4772_v20  ;;  %4738 = vst.msk [vmem:[#allocation3 + $0x70] sm:$0xff] %vm362_vm8, %v4706_v38  ;;  %v3296_v20 = vld [vmem:[#allocation3 + $0xb8] sm:$0xff] }
 0x2a9   : > { %3605 = vst.msk [vmem:[#allocation3 + $0x90] sm:$0xff] %vm362_vm8, %v3573_v15  ;;  %v3896_v0 = vpop.f32.mrf.mxu2  ;;  %v4808_v15 = vld [vmem:[%s6590_s3 + $0x88] sm:$0xff] }
 0x2aa   : > { %4868 = vst.msk [vmem:[%s7789_s27 + $0x68] sm:$0xff] %vm362_vm8, %v4836_v45  ;;  %v3951_v24 = vadd.f32 %v3896_v0, %v3669_v29 }
 0x2ab   : > { %v4273_v9 = vpop.f32.mrf.mxu3  ;;  %v4047_v40 = vld [vmem:[#allocation3 + $0x80] sm:$0xff] }
 0x2ac   : > { %v4329_v28 = vadd.f32 %v4273_v9, %v4047_v40  ;;  %3983 = vst.msk [vmem:[#allocation3 + $0x88] sm:$0xff] %vm362_vm8, %v3951_v24 }
 0x2ad   : > { %v4425_v22 = vld [vmem:[#allocation3 + $0x78] sm:$0xff] }
 0x2ae   : > { %v3522_v47 = vpop.f32.mrf.mxu1  ;;  %4361 = vst.msk [vmem:[#allocation3 + $0x80] sm:$0xff] %vm362_vm8, %v4329_v28  ;;  %v4707_v8 = vadd.f32 %v4649_v49, %v4425_v22 }
 0x2af   : > { %v3574_v48 = vadd.f32 %v3522_v47, %v3292_v39  ;;  %v4773_v46 = vld [vmem:[#allocation3 + $0x70] sm:$0xff] }
 0x2b0   : > { %v4652_v19 = vpop.f32.mrf.mxu0  ;;  %v3670_v2 = vld [vmem:[#allocation3 + $0x90] sm:$0xff]  ;;  %v4837_v55 = vadd.f32 %v4805_v1, %v4773_v46  ;;  %4739 = vst.msk [vmem:[#allocation3 + $0x78] sm:$0xff] %vm362_vm8, %v4707_v8  ;;  %v3297_v46 = vld [vmem:[#allocation3 + $0xc0] sm:$0xff] }
 0x2b1   : > { %3606 = vst.msk [vmem:[#allocation3 + $0x98] sm:$0xff] %vm362_vm8, %v3574_v48  ;;  %v3899_v61 = vpop.f32.mrf.mxu2  ;;  %v4809_v48 = vld [vmem:[%s6590_s3 + $0x90] sm:$0xff] }
 0x2b2   : > { %4869 = vst.msk [vmem:[%s7789_s27 + $0x70] sm:$0xff] %vm362_vm8, %v4837_v55  ;;  %v3952_v34 = vadd.f32 %v3899_v61, %v3670_v2 }
 0x2b3   : > { %v4275_v21 = vpop.f32.mrf.mxu3  ;;  %v4048_v5 = vld [vmem:[#allocation3 + $0x88] sm:$0xff] }
 0x2b4   : > { %v4330_v12 = vadd.f32 %v4275_v21, %v4048_v5  ;;  %3984 = vst.msk [vmem:[#allocation3 + $0x90] sm:$0xff] %vm362_vm8, %v3952_v34 }
 0x2b5   : > { %v4426_v37 = vld [vmem:[#allocation3 + $0x80] sm:$0xff] }
 0x2b6   : > { %v3525_v6 = vpop.f32.mrf.mxu1  ;;  %4362 = vst.msk [vmem:[#allocation3 + $0x88] sm:$0xff] %vm362_vm8, %v4330_v12  ;;  %v4708_v53 = vadd.f32 %v4652_v19, %v4426_v37 }
 0x2b7   : > { %v3575_v18 = vadd.f32 %v3525_v6, %v3293_v58  ;;  %v4774_v25 = vld [vmem:[#allocation3 + $0x78] sm:$0xff] }
 0x2b8   : > { %v4654_v52 = vpop.f32.mrf.mxu0  ;;  %v3671_v54 = vld [vmem:[#allocation3 + $0x98] sm:$0xff]  ;;  %v4838_v33 = vadd.f32 %v4806_v31, %v4774_v25  ;;  %4740 = vst.msk [vmem:[#allocation3 + $0x80] sm:$0xff] %vm362_vm8, %v4708_v53  ;;  %v3298_v25 = vld [vmem:[#allocation3 + $0xc8] sm:$0xff] }
 0x2b9   : > { %3607 = vst.msk [vmem:[#allocation3 + $0xa0] sm:$0xff] %vm362_vm8, %v3575_v18  ;;  %v3901_v51 = vpop.f32.mrf.mxu2  ;;  %v4810_v18 = vld [vmem:[%s6590_s3 + $0x98] sm:$0xff] }
 0x2ba   : > { %4870 = vst.msk [vmem:[%s7789_s27 + $0x78] sm:$0xff] %vm362_vm8, %v4838_v33  ;;  %v3953_v43 = vadd.f32 %v3901_v51, %v3671_v54 }
 0x2bb   : > { %v4278_v42 = vpop.f32.mrf.mxu3  ;;  %v4049_v44 = vld [vmem:[#allocation3 + $0x90] sm:$0xff] }
 0x2bc   : > { %v4331_v23 = vadd.f32 %v4278_v42, %v4049_v44  ;;  %3985 = vst.msk [vmem:[#allocation3 + $0x98] sm:$0xff] %vm362_vm8, %v3953_v43 }
 0x2bd   : > { %v4427_v59 = vld [vmem:[#allocation3 + $0x88] sm:$0xff] }
 0x2be   : > { %v3527_v27 = vpop.f32.mrf.mxu1  ;;  %4363 = vst.msk [vmem:[#allocation3 + $0x90] sm:$0xff] %vm362_vm8, %v4331_v23  ;;  %v4709_v50 = vadd.f32 %v4654_v52, %v4427_v59 }
 0x2bf   : > { %v3576_v17 = vadd.f32 %v3527_v27, %v3294_v11  ;;  %v4775_v16 = vld [vmem:[#allocation3 + $0x80] sm:$0xff] }
 0x2c0   : > { %v4657_v10 = vpop.f32.mrf.mxu0  ;;  %v3672_v3 = vld [vmem:[#allocation3 + $0xa0] sm:$0xff]  ;;  %v4839_v32 = vadd.f32 %v4807_v63, %v4775_v16  ;;  %4741 = vst.msk [vmem:[#allocation3 + $0x88] sm:$0xff] %vm362_vm8, %v4709_v50  ;;  %v3299_v16 = vld [vmem:[#allocation3 + $0xd0] sm:$0xff] }
 0x2c1   : > { %3608 = vst.msk [vmem:[#allocation3 + $0xa8] sm:$0xff] %vm362_vm8, %v3576_v17  ;;  %v3904_v7 = vpop.f32.mrf.mxu2  ;;  %v4811_v17 = vld [vmem:[%s6590_s3 + $0xa0] sm:$0xff] }
 0x2c2   : > { %4871 = vst.msk [vmem:[%s7789_s27 + $0x80] sm:$0xff] %vm362_vm8, %v4839_v32  ;;  %v3954_v56 = vadd.f32 %v3904_v7, %v3672_v3 }
 0x2c3   : > { %v4280_v36 = vpop.f32.mrf.mxu3  ;;  %v4050_v14 = vld [vmem:[#allocation3 + $0x98] sm:$0xff] }
 0x2c4   : > { %v4332_v26 = vadd.f32 %v4280_v36, %v4050_v14  ;;  %3986 = vst.msk [vmem:[#allocation3 + $0xa0] sm:$0xff] %vm362_vm8, %v3954_v56 }
 0x2c5   : > { %v4428_v35 = vld [vmem:[#allocation3 + $0x90] sm:$0xff] }
 0x2c6   : > { %v3530_v13 = vpop.f32.mrf.mxu1  ;;  %4364 = vst.msk [vmem:[#allocation3 + $0x98] sm:$0xff] %vm362_vm8, %v4332_v26  ;;  %v4710_v49 = vadd.f32 %v4657_v10, %v4428_v35 }
 0x2c7   : > { %v3577_v57 = vadd.f32 %v3530_v13, %v3295_v41  ;;  %v4776_v60 = vld [vmem:[#allocation3 + $0x88] sm:$0xff] }
 0x2c8   : > { %v4659_v62 = vpop.f32.mrf.mxu0  ;;  %v3673_v30 = vld [vmem:[#allocation3 + $0xa8] sm:$0xff]  ;;  %v4840_v38 = vadd.f32 %v4808_v15, %v4776_v60  ;;  %4742 = vst.msk [vmem:[#allocation3 + $0x90] sm:$0xff] %vm362_vm8, %v4710_v49  ;;  %v3300_v60 = vld [vmem:[#allocation3 + $0xd8] sm:$0xff] }
 0x2c9   : > { %3609 = vst.msk [vmem:[#allocation3 + $0xb0] sm:$0xff] %vm362_vm8, %v3577_v57  ;;  %v3906_v9 = vpop.f32.mrf.mxu2  ;;  %v4812_v57 = vld [vmem:[%s6590_s3 + $0xa8] sm:$0xff] }
 0x2ca   : > { %4872 = vst.msk [vmem:[%s7789_s27 + $0x88] sm:$0xff] %vm362_vm8, %v4840_v38  ;;  %v3955_v45 = vadd.f32 %v3906_v9, %v3673_v30 }
 0x2cb   : > { %v4283_v4 = vpop.f32.mrf.mxu3  ;;  %v4051_v39 = vld [vmem:[#allocation3 + $0xa0] sm:$0xff] }
 0x2cc   : > { %v4333_v24 = vadd.f32 %v4283_v4, %v4051_v39  ;;  %3987 = vst.msk [vmem:[#allocation3 + $0xa8] sm:$0xff] %vm362_vm8, %v3955_v45 }
 0x2cd   : > { %v4429_v40 = vld [vmem:[#allocation3 + $0x98] sm:$0xff] }
 0x2ce   : > { %v3532_v29 = vpop.f32.mrf.mxu1  ;;  %4365 = vst.msk [vmem:[#allocation3 + $0xa0] sm:$0xff] %vm362_vm8, %v4333_v24  ;;  %v4711_v19 = vadd.f32 %v4659_v62, %v4429_v40 }
 0x2cf   : > { %v3578_v0 = vadd.f32 %v3532_v29, %v3296_v20  ;;  %v4777_v1 = vld [vmem:[#allocation3 + $0x90] sm:$0xff] }
 0x2d0   : > { %v4662_v47 = vpop.f32.mrf.mxu0  ;;  %v3674_v22 = vld [vmem:[#allocation3 + $0xb0] sm:$0xff]  ;;  %v4841_v8 = vadd.f32 %v4809_v48, %v4777_v1  ;;  %4743 = vst.msk [vmem:[#allocation3 + $0x98] sm:$0xff] %vm362_vm8, %v4711_v19  ;;  %v3301_v1 = vld [vmem:[#allocation3 + $0xe0] sm:$0xff] }
 0x2d1   : > { %3610 = vst.msk [vmem:[#allocation3 + $0xb8] sm:$0xff] %vm362_vm8, %v3578_v0  ;;  %v3909_v21 = vpop.f32.mrf.mxu2  ;;  %v4813_v0 = vld [vmem:[%s6590_s3 + $0xb0] sm:$0xff] }
 0x2d2   : > { %4873 = vst.msk [vmem:[%s7789_s27 + $0x90] sm:$0xff] %vm362_vm8, %v4841_v8  ;;  %v3956_v55 = vadd.f32 %v3909_v21, %v3674_v22 }
 0x2d3   : > { %v4285_v28 = vpop.f32.mrf.mxu3  ;;  %v4052_v58 = vld [vmem:[#allocation3 + $0xa8] sm:$0xff] }
 0x2d4   : > { %v4334_v34 = vadd.f32 %v4285_v28, %v4052_v58  ;;  %3988 = vst.msk [vmem:[#allocation3 + $0xb0] sm:$0xff] %vm362_vm8, %v3956_v55 }
 0x2d5   : > { %v4430_v5 = vld [vmem:[#allocation3 + $0xa0] sm:$0xff] }
 0x2d6   : > { %v3535_v2 = vpop.f32.mrf.mxu1  ;;  %4366 = vst.msk [vmem:[#allocation3 + $0xa8] sm:$0xff] %vm362_vm8, %v4334_v34  ;;  %v4712_v52 = vadd.f32 %v4662_v47, %v4430_v5 }
 0x2d7   : > { %v3579_v61 = vadd.f32 %v3535_v2, %v3297_v46  ;;  %v4778_v31 = vld [vmem:[#allocation3 + $0x98] sm:$0xff] }
 0x2d8   : > { %v4664_v6 = vpop.f32.mrf.mxu0  ;;  %v3675_v37 = vld [vmem:[#allocation3 + $0xb8] sm:$0xff]  ;;  %v4842_v53 = vadd.f32 %v4810_v18, %v4778_v31  ;;  %4744 = vst.msk [vmem:[#allocation3 + $0xa0] sm:$0xff] %vm362_vm8, %v4712_v52  ;;  %v3302_v31 = vld [vmem:[#allocation3 + $0xe8] sm:$0xff] }
 0x2d9   : > { %3611 = vst.msk [vmem:[#allocation3 + $0xc0] sm:$0xff] %vm362_vm8, %v3579_v61  ;;  %v3911_v42 = vpop.f32.mrf.mxu2  ;;  %v4814_v61 = vld [vmem:[%s6590_s3 + $0xb8] sm:$0xff] }
 0x2da   : > { %4874 = vst.msk [vmem:[%s7789_s27 + $0x98] sm:$0xff] %vm362_vm8, %v4842_v53  ;;  %v3957_v33 = vadd.f32 %v3911_v42, %v3675_v37 }
 0x2db   : > { %v4288_v12 = vpop.f32.mrf.mxu3  ;;  %v4053_v11 = vld [vmem:[#allocation3 + $0xb0] sm:$0xff] }
 0x2dc   : > { %v4335_v43 = vadd.f32 %v4288_v12, %v4053_v11  ;;  %3989 = vst.msk [vmem:[#allocation3 + $0xb8] sm:$0xff] %vm362_vm8, %v3957_v33 }
 0x2dd   : > { %v4431_v44 = vld [vmem:[#allocation3 + $0xa8] sm:$0xff] }
 0x2de   : > { %v3537_v54 = vpop.f32.mrf.mxu1  ;;  %4367 = vst.msk [vmem:[#allocation3 + $0xb0] sm:$0xff] %vm362_vm8, %v4335_v43  ;;  %v4713_v10 = vadd.f32 %v4664_v6, %v4431_v44 }
 0x2df   : > { %v3580_v51 = vadd.f32 %v3537_v54, %v3298_v25  ;;  %v4779_v63 = vld [vmem:[#allocation3 + $0xa0] sm:$0xff] }
 0x2e0   : > { %v4667_v27 = vpop.f32.mrf.mxu0  ;;  %v3676_v59 = vld [vmem:[#allocation3 + $0xc0] sm:$0xff]  ;;  %v4843_v50 = vadd.f32 %v4811_v17, %v4779_v63  ;;  %4745 = vst.msk [vmem:[#allocation3 + $0xa8] sm:$0xff] %vm362_vm8, %v4713_v10  ;;  %v3303_v63 = vld [vmem:[#allocation3 + $0xf0] sm:$0xff] }
 0x2e1   : > { %3612 = vst.msk [vmem:[#allocation3 + $0xc8] sm:$0xff] %vm362_vm8, %v3580_v51  ;;  %v3914_v36 = vpop.f32.mrf.mxu2  ;;  %v4815_v51 = vld [vmem:[%s6590_s3 + $0xc0] sm:$0xff] }
 0x2e2   : > { %4875 = vst.msk [vmem:[%s7789_s27 + $0xa0] sm:$0xff] %vm362_vm8, %v4843_v50  ;;  %v3958_v32 = vadd.f32 %v3914_v36, %v3676_v59 }
 0x2e3   : > { %v4290_v23 = vpop.f32.mrf.mxu3  ;;  %v4054_v41 = vld [vmem:[#allocation3 + $0xb8] sm:$0xff] }
 0x2e4   : > { %v4336_v56 = vadd.f32 %v4290_v23, %v4054_v41  ;;  %3990 = vst.msk [vmem:[#allocation3 + $0xc0] sm:$0xff] %vm362_vm8, %v3958_v32 }
 0x2e5   : > { %v4432_v14 = vld [vmem:[#allocation3 + $0xb0] sm:$0xff] }
 0x2e6   : > { %v3540_v3 = vpop.f32.mrf.mxu1  ;;  %4368 = vst.msk [vmem:[#allocation3 + $0xb8] sm:$0xff] %vm362_vm8, %v4336_v56  ;;  %v4714_v62 = vadd.f32 %v4667_v27, %v4432_v14 }
 0x2e7   : > { %v3581_v7 = vadd.f32 %v3540_v3, %v3299_v16  ;;  %v4780_v15 = vld [vmem:[#allocation3 + $0xa8] sm:$0xff] }
 0x2e8   : > { %v4669_v13 = vpop.f32.mrf.mxu0  ;;  %v3677_v35 = vld [vmem:[#allocation3 + $0xc8] sm:$0xff]  ;;  %v4844_v49 = vadd.f32 %v4812_v57, %v4780_v15  ;;  %4746 = vst.msk [vmem:[#allocation3 + $0xb0] sm:$0xff] %vm362_vm8, %v4714_v62  ;;  %v3304_v15 = vld [vmem:[#allocation3 + $0xf8] sm:$0xff] }
 0x2e9   : > { %3613 = vst.msk [vmem:[#allocation3 + $0xd0] sm:$0xff] %vm362_vm8, %v3581_v7  ;;  %v3916_v4 = vpop.f32.mrf.mxu2  ;;  %v4816_v7 = vld [vmem:[%s6590_s3 + $0xc8] sm:$0xff] }
 0x2ea   : > { %4876 = vst.msk [vmem:[%s7789_s27 + $0xa8] sm:$0xff] %vm362_vm8, %v4844_v49  ;;  %v3959_v38 = vadd.f32 %v3916_v4, %v3677_v35 }
 0x2eb   : > { %v4293_v26 = vpop.f32.mrf.mxu3  ;;  %v4055_v20 = vld [vmem:[#allocation3 + $0xc0] sm:$0xff] }
 0x2ec   : > { %v4337_v45 = vadd.f32 %v4293_v26, %v4055_v20  ;;  %3991 = vst.msk [vmem:[#allocation3 + $0xc8] sm:$0xff] %vm362_vm8, %v3959_v38  ;;  %v4817_v38 = vld [vmem:[%s6590_s3 + $0xd0] sm:$0xff] }
 0x2ed   : > { %v4433_v39 = vld [vmem:[#allocation3 + $0xb8] sm:$0xff] }
 0x2ee   : > { %v3542_v30 = vpop.f32.mrf.mxu1  ;;  %4369 = vst.msk [vmem:[#allocation3 + $0xc0] sm:$0xff] %vm362_vm8, %v4337_v45  ;;  %v4715_v47 = vadd.f32 %v4669_v13, %v4433_v39 }
 0x2ef   : > { %v3582_v9 = vadd.f32 %v3542_v30, %v3300_v60  ;;  %v4781_v48 = vld [vmem:[#allocation3 + $0xb0] sm:$0xff] }
 0x2f0   : > { %v4672_v29 = vpop.f32.mrf.mxu0  ;;  %v3678_v40 = vld [vmem:[#allocation3 + $0xd0] sm:$0xff]  ;;  %v4845_v19 = vadd.f32 %v4813_v0, %v4781_v48  ;;  %4747 = vst.msk [vmem:[#allocation3 + $0xb8] sm:$0xff] %vm362_vm8, %v4715_v47 }
 0x2f1   : > { %3614 = vst.msk [vmem:[#allocation3 + $0xd8] sm:$0xff] %vm362_vm8, %v3582_v9  ;;  %v3919_v28 = vpop.f32.mrf.mxu2 }
 0x2f2   : > { %4877 = vst.msk [vmem:[%s7789_s27 + $0xb0] sm:$0xff] %vm362_vm8, %v4845_v19  ;;  %v3960_v8 = vadd.f32 %v3919_v28, %v3678_v40  ;;  %v4818_v28 = vld [vmem:[%s6590_s3 + $0xd8] sm:$0xff] }
 0x2f3   : > { %v4295_v24 = vpop.f32.mrf.mxu3  ;;  %v4056_v46 = vld [vmem:[#allocation3 + $0xc8] sm:$0xff] }
 0x2f4   : > { %v4338_v55 = vadd.f32 %v4295_v24, %v4056_v46  ;;  %3992 = vst.msk [vmem:[#allocation3 + $0xd0] sm:$0xff] %vm362_vm8, %v3960_v8 }
 0x2f5   : > { %v4434_v58 = vld [vmem:[#allocation3 + $0xc0] sm:$0xff] }
 0x2f6   : > { %v3545_v22 = vpop.f32.mrf.mxu1  ;;  %4370 = vst.msk [vmem:[#allocation3 + $0xc8] sm:$0xff] %vm362_vm8, %v4338_v55  ;;  %v4716_v6 = vadd.f32 %v4672_v29, %v4434_v58 }
 0x2f7   : > { %v3583_v21 = vadd.f32 %v3545_v22, %v3301_v1  ;;  %v4782_v18 = vld [vmem:[#allocation3 + $0xb8] sm:$0xff] }
 0x2f8   : > { %v4674_v2 = vpop.f32.mrf.mxu0  ;;  %v3679_v5 = vld [vmem:[#allocation3 + $0xd8] sm:$0xff]  ;;  %v4846_v52 = vadd.f32 %v4814_v61, %v4782_v18  ;;  %4748 = vst.msk [vmem:[#allocation3 + $0xc0] sm:$0xff] %vm362_vm8, %v4716_v6  ;;  %v4819_v18 = vld [vmem:[%s6590_s3 + $0xe0] sm:$0xff] }
 0x2f9   : > { %3615 = vst.msk [vmem:[#allocation3 + $0xe0] sm:$0xff] %vm362_vm8, %v3583_v21  ;;  %v3921_v12 = vpop.f32.mrf.mxu2 }
 0x2fa   : > { %4878 = vst.msk [vmem:[%s7789_s27 + $0xb8] sm:$0xff] %vm362_vm8, %v4846_v52  ;;  %v3961_v53 = vadd.f32 %v3921_v12, %v3679_v5 }
 0x2fb   : > { %v4298_v34 = vpop.f32.mrf.mxu3  ;;  %v4057_v25 = vld [vmem:[#allocation3 + $0xd0] sm:$0xff] }
 0x2fc   : > { %v4339_v33 = vadd.f32 %v4298_v34, %v4057_v25  ;;  %3993 = vst.msk [vmem:[#allocation3 + $0xd8] sm:$0xff] %vm362_vm8, %v3961_v53 }
 0x2fd   : > { %v4435_v11 = vld [vmem:[#allocation3 + $0xc8] sm:$0xff] }
 0x2fe   : > { %v3547_v37 = vpop.f32.mrf.mxu1  ;;  %4371 = vst.msk [vmem:[#allocation3 + $0xd0] sm:$0xff] %vm362_vm8, %v4339_v33  ;;  %v4717_v27 = vadd.f32 %v4674_v2, %v4435_v11 }
 0x2ff   : > { %v3584_v42 = vadd.f32 %v3547_v37, %v3302_v31  ;;  %v4783_v17 = vld [vmem:[#allocation3 + $0xc0] sm:$0xff] }
 0x300   : > { %v4677_v54 = vpop.f32.mrf.mxu0  ;;  %v3680_v44 = vld [vmem:[#allocation3 + $0xe0] sm:$0xff]  ;;  %v4847_v10 = vadd.f32 %v4815_v51, %v4783_v17  ;;  %4749 = vst.msk [vmem:[#allocation3 + $0xc8] sm:$0xff] %vm362_vm8, %v4717_v27 }
 0x301   : > { %3616 = vst.msk [vmem:[#allocation3 + $0xe8] sm:$0xff] %vm362_vm8, %v3584_v42  ;;  %v3924_v23 = vpop.f32.mrf.mxu2 }
 0x302   : > { %4879 = vst.msk [vmem:[%s7789_s27 + $0xc0] sm:$0xff] %vm362_vm8, %v4847_v10  ;;  %v3962_v50 = vadd.f32 %v3924_v23, %v3680_v44 }
 0x303   : > { %v4300_v43 = vpop.f32.mrf.mxu3  ;;  %v4058_v16 = vld [vmem:[#allocation3 + $0xd8] sm:$0xff] }
 0x304   : > { %v4340_v3 = vadd.f32 %v4300_v43, %v4058_v16  ;;  %3994 = vst.msk [vmem:[#allocation3 + $0xe0] sm:$0xff] %vm362_vm8, %v3962_v50  ;;  %v4821_v43 = vld [vmem:[%s6590_s3 + $0xf0] sm:$0xff] }
 0x305   : > { %v4436_v41 = vld [vmem:[#allocation3 + $0xd0] sm:$0xff] }
 0x306   : > { %v3550_v59 = vpop.f32.mrf.mxu1  ;;  %4372 = vst.msk [vmem:[#allocation3 + $0xd8] sm:$0xff] %vm362_vm8, %v4340_v3  ;;  %v4718_v13 = vadd.f32 %v4677_v54, %v4436_v41  ;;  %v4820_v54 = vld [vmem:[%s6590_s3 + $0xe8] sm:$0xff] }
 0x307   : > { %v3585_v36 = vadd.f32 %v3550_v59, %v3303_v63  ;;  %v4784_v57 = vld [vmem:[#allocation3 + $0xc8] sm:$0xff]  ;;  %v4822_v59 = vld [vmem:[%s6590_s3 + $0xf8] sm:$0xff] }
 0x308   : > { %v4679_v32 = vpop.f32.mrf.mxu0  ;;  %v3681_v14 = vld [vmem:[#allocation3 + $0xe8] sm:$0xff]  ;;  %v4848_v62 = vadd.f32 %v4816_v7, %v4784_v57  ;;  %4750 = vst.msk [vmem:[#allocation3 + $0xd0] sm:$0xff] %vm362_vm8, %v4718_v13 }
 0x309   : > { %3617 = vst.msk [vmem:[#allocation3 + $0xf0] sm:$0xff] %vm362_vm8, %v3585_v36  ;;  %v3926_v26 = vpop.f32.mrf.mxu2 }
 0x30a   : > { %4880 = vst.msk [vmem:[%s7789_s27 + $0xc8] sm:$0xff] %vm362_vm8, %v4848_v62  ;;  %v3963_v49 = vadd.f32 %v3926_v26, %v3681_v14 }
 0x30b   : > { %v4303_v56 = vpop.f32.mrf.mxu3  ;;  %v4059_v60 = vld [vmem:[#allocation3 + $0xe0] sm:$0xff] }
 0x30c   : > { %v4341_v30 = vadd.f32 %v4303_v56, %v4059_v60  ;;  %3995 = vst.msk [vmem:[#allocation3 + $0xe8] sm:$0xff] %vm362_vm8, %v3963_v49 }
 0x30d   : > { %v4437_v9 = vld [vmem:[#allocation3 + $0xd8] sm:$0xff] }
 0x30e   : > { %v3552_v35 = vpop.f32.mrf.mxu1  ;;  %4373 = vst.msk [vmem:[#allocation3 + $0xe0] sm:$0xff] %vm362_vm8, %v4341_v30  ;;  %v4719_v20 = vadd.f32 %v4679_v32, %v4437_v9 }
 0x30f   : > { %v3586_v4 = vadd.f32 %v3552_v35, %v3304_v15  ;;  %v4785_v45 = vld [vmem:[#allocation3 + $0xd0] sm:$0xff] }
 0x310   : > { %v4682_v29 = vpop.f32.mrf.mxu0  ;;  %v3682_v39 = vld [vmem:[#allocation3 + $0xf0] sm:$0xff]  ;;  %v4849_v47 = vadd.f32 %v4817_v38, %v4785_v45  ;;  %4751 = vst.msk [vmem:[#allocation3 + $0xd8] sm:$0xff] %vm362_vm8, %v4719_v20 }
 0x311   : > { %3618 = vst.msk [vmem:[#allocation3 + $0xf8] sm:$0xff] %vm362_vm8, %v3586_v4  ;;  %v3929_v24 = vpop.f32.mrf.mxu2 }
 0x312   : > { %4881 = vst.msk [vmem:[%s7789_s27 + $0xd0] sm:$0xff] %vm362_vm8, %v4849_v47  ;;  %v3964_v48 = vadd.f32 %v3929_v24, %v3682_v39 }
 0x313   : > { %v4305_v0 = vpop.f32.mrf.mxu3  ;;  %v4060_v40 = vld [vmem:[#allocation3 + $0xe8] sm:$0xff] }
 0x314   : > { %v4342_v19 = vadd.f32 %v4305_v0, %v4060_v40  ;;  %3996 = vst.msk [vmem:[#allocation3 + $0xf0] sm:$0xff] %vm362_vm8, %v3964_v48 }
 0x315   : > { %v4438_v1 = vld [vmem:[#allocation3 + $0xe0] sm:$0xff] }
 0x316   : > { %4374 = vst.msk [vmem:[#allocation3 + $0xe8] sm:$0xff] %vm362_vm8, %v4342_v19  ;;  %v4720_v22 = vadd.f32 %v4682_v29, %v4438_v1 }
 0x317   : > { %v4786_v8 = vld [vmem:[#allocation3 + $0xd8] sm:$0xff] }
 0x318   : > { %v3683_v21 = vld [vmem:[#allocation3 + $0xf8] sm:$0xff]  ;;  %v4850_v46 = vadd.f32 %v4818_v28, %v4786_v8  ;;  %4752 = vst.msk [vmem:[#allocation3 + $0xe0] sm:$0xff] %vm362_vm8, %v4720_v22  ;;  %v4684_v2 = vpop.f32.mrf.mxu0 }
 0x319   : > { %v3931_v61 = vpop.f32.mrf.mxu2 }
 0x31a   : > { %4882 = vst.msk [vmem:[%s7789_s27 + $0xd8] sm:$0xff] %vm362_vm8, %v4850_v46  ;;  %v3965_v58 = vadd.f32 %v3931_v61, %v3683_v21 }
 0x31b   : > { %v4308_v55 = vpop.f32.mrf.mxu3  ;;  %v4061_v6 = vld [vmem:[#allocation3 + $0xf0] sm:$0xff] }
 0x31c   : > { %v4343_v34 = vadd.f32 %v4308_v55, %v4061_v6  ;;  %3997 = vst.msk [vmem:[#allocation3 + $0xf8] sm:$0xff] %vm362_vm8, %v3965_v58 }
 0x31d   : > { %v4439_v5 = vld [vmem:[#allocation3 + $0xe8] sm:$0xff] }
 0x31e   : > { %4375 = vst.msk [vmem:[#allocation3 + $0xf0] sm:$0xff] %vm362_vm8, %v4343_v34  ;;  %v4721_v52 = vadd.f32 %v4684_v2, %v4439_v5 }
 0x31f   : > { %v4787_v12 = vld [vmem:[#allocation3 + $0xe0] sm:$0xff] }
 0x320   : > { %v4851_v31 = vadd.f32 %v4819_v18, %v4787_v12  ;;  %4753 = vst.msk [vmem:[#allocation3 + $0xe8] sm:$0xff] %vm362_vm8, %v4721_v52  ;;  %v4687_v42 = vpop.f32.mrf.mxu0 }
 0x322   : > { %4883 = vst.msk [vmem:[%s7789_s27 + $0xe0] sm:$0xff] %vm362_vm8, %v4851_v31 }
 0x323   : > { %v4062_v37 = vld [vmem:[#allocation3 + $0xf8] sm:$0xff]  ;;  %v4310_v53 = vpop.f32.mrf.mxu3 }
 0x324   : > { %v4344_v25 = vadd.f32 %v4310_v53, %v4062_v37 }
 0x325   : > { %v4440_v33 = vld [vmem:[#allocation3 + $0xf0] sm:$0xff] }
 0x326   : > { %4376 = vst.msk [vmem:[#allocation3 + $0xf8] sm:$0xff] %vm362_vm8, %v4344_v25  ;;  %v4722_v51 = vadd.f32 %v4687_v42, %v4440_v33 }
 0x327   : > { %v4788_v11 = vld [vmem:[#allocation3 + $0xe8] sm:$0xff] }
 0x328   : > { %v4852_v27 = vadd.f32 %v4820_v54, %v4788_v11  ;;  %4754 = vst.msk [vmem:[#allocation3 + $0xf0] sm:$0xff] %vm362_vm8, %v4722_v51  ;;  %v4689_v44 = vpop.f32.mrf.mxu0 }
 0x32a   : > { %4884 = vst.msk [vmem:[%s7789_s27 + $0xe8] sm:$0xff] %vm362_vm8, %v4852_v27 }
 0x32d   : > { %v4441_v17 = vld [vmem:[#allocation3 + $0xf8] sm:$0xff] }
 0x32e   : > { %v4723_v10 = vadd.f32 %v4689_v44, %v4441_v17 }
 0x32f   : > { %v4789_v23 = vld [vmem:[#allocation3 + $0xf0] sm:$0xff] }
 0x330   : > { %v4853_v63 = vadd.f32 %v4821_v43, %v4789_v23  ;;  %4755 = vst.msk [vmem:[#allocation3 + $0xf8] sm:$0xff] %vm362_vm8, %v4723_v10 }
 0x332   : > { %4885 = vst.msk [vmem:[%s7789_s27 + $0xf0] sm:$0xff] %vm362_vm8, %v4853_v63 }
 0x337   : > { %v4790_v50 = vld [vmem:[#allocation3 + $0xf8] sm:$0xff] }
 0x338   : > { %v4854_v36 = vadd.f32 %v4822_v59, %v4790_v50 }
 0x33a   : > { %4886 = vst.msk [vmem:[%s7789_s27 + $0xf8] sm:$0xff] %vm362_vm8, %v4854_v36 }
 0x33b   : > { %6381 = shalt.err (!%p6378_p3)
}
 0x33c   : > { %s6449_s14 = smov 128   ;;  %s6450_s10 = smov 8  }
 0x33d   : > { %6215 = dma.vmem_to_hbm [thread:$0]  (%p6560_p5), %s4902_s8, 4096, %s4904_s13, %s4888_s21, %s6449_s14, %s6449_s14, %s6450_s10  }
 0x33e PF: > { %s8191_s11 = sld [smem:[#allocation13_spill]]  ;;  %s4918_s12 = sand.u32 1, %s6420_s18  }
 0x33f   : > { %p6226_p7 = pnand %p5056_p11, %p6530_p6  ;;  %s4919_s27 = scalar_lea.sflag [#allocation6], %s4918_s12 }
 0x341   : > { %p6227_p9 = pneg %p6226_p7 }
 0x343   : > { %6415 = dma.done.wait (%p6227_p9), %s4919_s27, 4096  }
 0x344   : > { %6417 = vsyncadd (%p6227_p9), %s4919_s27, 4294963200  ;;  %s22_s23 = sadd.s32 1, %s8191_s11   ;;  %s8192_s16 = sld [smem:[#allocation14_spill]] }
 0x345   : > { %p19_p2 = scmp.ge.s32.totalorder %s22_s23, 4   ;;  %s8193_s18 = smov %s6424_s19 }
 0x346   : > { %s8194_s19 = smov %s6428_s20  ;;  %s8195_s20 = smov %s6569_s30 }
 0x347   : > { %s8196_s21 = smov %s6436_s22  ;;  %21 = sbr.rel (!%p19_p2) target bundleno = 9 (0x9), region = 127 }
 0x34a   : > { %s8197_s22 = smov %s8192_s16 }
 0x34c   :  { %4925 = vsyncpa [#allocation5], 1 }
 0x34d   :  { %4927 = vsyncpa [#allocation5 + $0x1], 1 }
 0x34e   :  { %4928 = vsyncpa [#allocation8], 1 }
 0x34f   :  { %4930 = vsyncpa [#allocation8 + $0x1], 1 }
 0x350   :  { %4931 = vsyncpa [#allocation6], 1 }
 0x351   :  { %4933 = vsyncpa [#allocation6 + $0x1], 1 }

</bundles_post_ra>
